<compile_context>
chip_gen: v6e
topology: v6e:2x2x1
jax: 0.10.0
libtpu: 0.0.40
codegen_flags: <defaults>
</compile_context>

<pallas_src>
import jax
import jax.numpy as jnp
from jax.experimental import pallas as pl
from jax.experimental.pallas import tpu as pltpu

IMAGE_SIZE = 64
NUM_CLASSES = 3
IN_DIM = 3 * IMAGE_SIZE * IMAGE_SIZE   # 12288
H1 = 512
H2 = 128
N_SPLIT = 2                            # H1 column split (2 steps / 2 TCs on v7x)
H1_BLK = H1 // N_SPLIT                 # 256


# --------------------------------------------------------------------------- #
# Kernels
# --------------------------------------------------------------------------- #
def fused_kernel(x_ref, w1_ref, b1_ref, w2_ref, b2_ref, w3_ref, b3_ref,
                 out_ref, h1_scratch):
    """Whole network in one kernel (single-TensorCore path).

    grid=(N_SPLIT,), "arbitrary".  Step n computes one H1 column block of
    h1 = relu(x @ W1 + b1) into a persistent VMEM scratch; the last step runs
    the tiny layer-2/3 tail on the full h1 and writes the logits.
    """
    n = pl.program_id(0)
    acc = jnp.dot(x_ref[...], w1_ref[...], preferred_element_type=jnp.float32)
    col0 = pl.multiple_of(n * H1_BLK, H1_BLK)
    h1_scratch[:, pl.ds(col0, H1_BLK)] = jnp.maximum(acc + b1_ref[...], 0.0)

    @pl.when(n == pl.num_programs(0) - 1)
    def _():
        h1 = h1_scratch[...]
        h2 = jnp.dot(h1, w2_ref[...],
                     preferred_element_type=jnp.float32) + b2_ref[...]
        h2 = jnp.maximum(h2, 0.0)
        out = jnp.dot(h2, w3_ref[...],
                      preferred_element_type=jnp.float32) + b3_ref[...]
        out_ref[...] = out.astype(out_ref.dtype)


def layer1_kernel(x_ref, w1_ref, b1_ref, h1_ref):
    """One H1 column block: h1 = relu(x @ W1[:, blk] + b1[blk]).

    v7x path: the 2 blocks are 'parallel', so each TensorCore streams half of W1.
    """
    acc = jnp.dot(x_ref[...], w1_ref[...], preferred_element_type=jnp.float32)
    h1_ref[...] = jnp.maximum(acc + b1_ref[...], 0.0).astype(h1_ref.dtype)


def tail_kernel(h1_ref, w2_ref, b2_ref, w3_ref, b3_ref, out_ref):
    """Layers 2 and 3 (0.13 MFLOP), fully VMEM-resident, f32."""
    h2 = jnp.dot(h1_ref[...], w2_ref[...],
                 preferred_element_type=jnp.float32) + b2_ref[...]
    h2 = jnp.maximum(h2, 0.0)
    out = jnp.dot(h2, w3_ref[...],
                  preferred_element_type=jnp.float32) + b3_ref[...]
    out_ref[...] = out.astype(out_ref.dtype)


# --------------------------------------------------------------------------- #
# Wrapper
# --------------------------------------------------------------------------- #
def prepare_params(params):
    """One-time weight prep (call OUTSIDE the per-call forward).

    W1 -> bf16 here so the per-call HBM traffic is only the 12 MiB bf16 stream;
    biases reshaped to (1, N) row vectors for in-kernel broadcasting.
    """
    w1, b1, w2, b2, w3, b3 = params
    return (w1.astype(jnp.bfloat16),
            b1.reshape(1, H1).astype(jnp.float32),
            w2.astype(jnp.float32),
            b2.reshape(1, H2).astype(jnp.float32),
            w3.astype(jnp.float32),
            b3.reshape(1, NUM_CLASSES).astype(jnp.float32))


def _layer1_cost(b_pad):
    flops = 2 * b_pad * IN_DIM * H1 + 2 * b_pad * H1 * H2 + 2 * b_pad * H2 * NUM_CLASSES
    bytes_accessed = (IN_DIM * H1 * 2        # W1 bf16 stream (dominant)
                      + b_pad * IN_DIM * 2   # x bf16
                      + b_pad * H1 * 4)      # h1 / logits f32
    return pl.CostEstimate(flops=flops, transcendentals=0,
                           bytes_accessed=bytes_accessed)


def posenet_forward(x_nchw, prepped, split_tail=False):
    """x_nchw: (B, 3, 64, 64) f32 -> logits (B, NUM_CLASSES) f32.

    split_tail=False: fused single kernel (best on single-TC v5e/v6e).
    split_tail=True : 'parallel' layer-1 split + tiny tail call (best on v7x).
    """
    w1_bf, b1r, w2, b2r, w3, b3r = prepped
    B = x_nchw.shape[0]
    x = x_nchw.reshape(B, IN_DIM)                    # nn.Flatten (row-major)

    # Pad batch to a multiple of 16 (bf16 sublane packing); sliced off at the end.
    B_pad = ((B + 15) // 16) * 16
    if B_pad != B:
        x = jnp.pad(x, ((0, B_pad - B), (0, 0)))
    x_bf = x.astype(jnp.bfloat16)                    # tiny at small B

    # Scalability guard: x is fully VMEM-resident.  Add a batch grid axis (with
    # a ~256-row tile) before letting B grow past a few hundred rows, otherwise
    # VMEM scales silently with B (v7x scoped limit is 32 MiB).
    assert B_pad * IN_DIM * 2 <= 8 * 1024 * 1024, "add batch tiling for large B"

    cost = _layer1_cost(B_pad)
    cparams = pltpu.CompilerParams(
        dimension_semantics=("parallel",) if split_tail else ("arbitrary",),
        vmem_limit_bytes=32 * 1024 * 1024,
    )

    if not split_tail:
        # ---- single fused kernel: layer 1 streamed, tail under pl.when ----
        logits = pl.pallas_call(
            fused_kernel,
            out_shape=jax.ShapeDtypeStruct((B_pad, NUM_CLASSES), jnp.float32),
            grid_spec=pltpu.PrefetchScalarGridSpec(
                num_scalar_prefetch=0,
                grid=(N_SPLIT,),
                in_specs=[
                    pl.BlockSpec((B_pad, IN_DIM), lambda n: (0, 0)),    # x (resident)
                    pl.BlockSpec((IN_DIM, H1_BLK), lambda n: (0, n)),   # W1 half (stream)
                    pl.BlockSpec((1, H1_BLK), lambda n: (0, n)),        # b1 half
                    pl.BlockSpec((H1, H2), lambda n: (0, 0)),           # w2 (resident)
                    pl.BlockSpec((1, H2), lambda n: (0, 0)),            # b2
                    pl.BlockSpec((H2, NUM_CLASSES), lambda n: (0, 0)),  # w3
                    pl.BlockSpec((1, NUM_CLASSES), lambda n: (0, 0)),   # b3
                ],
                out_specs=pl.BlockSpec((B_pad, NUM_CLASSES), lambda n: (0, 0)),
                scratch_shapes=[pltpu.VMEM((B_pad, H1), jnp.float32)],  # persistent h1
            ),
            compiler_params=cparams,
            cost_estimate=cost,
        )(x_bf, w1_bf, b1r, w2, b2r, w3, b3r)
        return logits[:B]

    # ---- v7x path: megacore-split layer 1, then the tiny tail kernel ----
    h1 = pl.pallas_call(
        layer1_kernel,
        out_shape=jax.ShapeDtypeStruct((B_pad, H1), jnp.float32),
        grid_spec=pltpu.PrefetchScalarGridSpec(
            num_scalar_prefetch=0,
            grid=(N_SPLIT,),
            in_specs=[
                pl.BlockSpec((B_pad, IN_DIM), lambda n: (0, 0)),
                pl.BlockSpec((IN_DIM, H1_BLK), lambda n: (0, n)),
                pl.BlockSpec((1, H1_BLK), lambda n: (0, n)),
            ],
            out_specs=pl.BlockSpec((B_pad, H1_BLK), lambda n: (0, n)),
        ),
        compiler_params=cparams,
        cost_estimate=cost,
    )(x_bf, w1_bf, b1r)

    vmem = pltpu.MemorySpace.VMEM
    logits = pl.pallas_call(
        tail_kernel,
        out_shape=jax.ShapeDtypeStruct((B_pad, NUM_CLASSES), jnp.float32),
        in_specs=[pl.BlockSpec(memory_space=vmem)] * 5,
        out_specs=pl.BlockSpec(memory_space=vmem),
    )(h1, w2, b2r, w3, b3r)
    return logits[:B]


def _has_two_tensorcores():
    """v7x has 2 TensorCores per chip -> prefer the 'parallel' split path."""
    try:
        kind = jax.devices()[0].device_kind.lower()
    except Exception:
        return False
    return "v7" in kind or "7x" in kind


# --------------------------------------------------------------------------- #
# Params & references
# --------------------------------------------------------------------------- #
def init_params(key):
    """Deterministic synthetic weights with nn.Linear-like uniform init (f32)."""
    def linear_init(k, fan_in, fan_out):
        bound = 1.0 / jnp.sqrt(fan_in)
        kw, kb = jax.random.split(k)
        w = jax.random.uniform(kw, (fan_in, fan_out), jnp.float32,
                               minval=-bound, maxval=bound)
        b = jax.random.uniform(kb, (fan_out,), jnp.float32,
                               minval=-bound, maxval=bound)
        return w, b

    k1, k2, k3 = jax.random.split(key, 3)
    w1, b1 = linear_init(k1, IN_DIM, H1)
    w2, b2 = linear_init(k2, H1, H2)
    w3, b3 = linear_init(k3, H2, NUM_CLASSES)
    return (w1, b1, w2, b2, w3, b3)


def reference_forward_f32(x_nchw, params):
    """Exact f32 reference of the PyTorch module."""
    w1, b1, w2, b2, w3, b3 = params
    x = x_nchw.reshape(x_nchw.shape[0], IN_DIM)
    h1 = jnp.maximum(x @ w1 + b1, 0.0)
    h2 = jnp.maximum(h1 @ w2 + b2, 0.0)
    return h2 @ w3 + b3


def reference_forward_bf16(x_nchw, params):
    """Reference with the same bf16-input / f32-accumulate layer 1 as the kernel."""
    w1, b1, w2, b2, w3, b3 = params
    x = x_nchw.reshape(x_nchw.shape[0], IN_DIM).astype(jnp.bfloat16)
    h1 = jnp.dot(x, w1.astype(jnp.bfloat16),
                 preferred_element_type=jnp.float32) + b1
    h1 = jnp.maximum(h1, 0.0)
    h2 = jnp.maximum(h1 @ w2 + b2, 0.0)
    return h2 @ w3 + b3


# --------------------------------------------------------------------------- #
# Main
# --------------------------------------------------------------------------- #
if __name__ == "__main__":
    key = jax.random.PRNGKey(0)
    kx, kp = jax.random.split(key)

    B = 2
    x = jax.random.normal(kx, (B, 3, IMAGE_SIZE, IMAGE_SIZE), jnp.float32)
    params = init_params(kp)
    prepped = prepare_params(params)          # one-time weight prep (outside jit)

    split_tail = _has_two_tensorcores()       # v7x -> parallel split + tail call
    fwd = jax.jit(posenet_forward, static_argnums=(2,))

    out = jax.block_until_ready(fwd(x, prepped, split_tail))
    assert out.shape == (B, NUM_CLASSES)

    # Authoritative correctness check: numerically-matched bf16-layer-1 reference.
    ref_q = reference_forward_bf16(x, params)
    assert jnp.allclose(out, ref_q, atol=1e-2, rtol=1e-2), "mismatch vs bf16 ref"

    # Exercise the other code path too (both must compile, run and agree).
    out_alt = jax.block_until_ready(fwd(x, prepped, not split_tail))
    assert jnp.allclose(out_alt, ref_q, atol=1e-2, rtol=1e-2), "alt-path mismatch"

    # Fidelity vs exact f32 forward (bf16 quantization error only, report-only).
    ref_f32 = reference_forward_f32(x, params)
    _max_err = float(jnp.max(jnp.abs(out - ref_f32)))

    print("KERNEL_OK")
</pallas_src>

<mosaic_0001>
module attributes {stable_mosaic.version = 11 : i64} {
  func.func @fused_kernel(%arg0: i32, %arg1: memref<16x12288xbf16, #tpu.memory_space<vmem>>, %arg2: memref<12288x256xbf16, #tpu.memory_space<vmem>>, %arg3: memref<1x256xf32, #tpu.memory_space<vmem>>, %arg4: memref<512x128xf32, #tpu.memory_space<vmem>>, %arg5: memref<1x128xf32, #tpu.memory_space<vmem>>, %arg6: memref<128x3xf32, #tpu.memory_space<vmem>>, %arg7: memref<1x3xf32, #tpu.memory_space<vmem>>, %arg8: memref<16x3xf32, #tpu.memory_space<vmem>>, %arg9: memref<16x512xf32, #tpu.memory_space<vmem>>) attributes {dimension_semantics = [#tpu.dimension_semantics<arbitrary>], iteration_bounds = array<i64: 2>, scalar_prefetch = 0 : i64, scratch_operands = 1 : i64, tpu.core_type = #tpu.core_type<tc>, window_params = [{pipeline_mode = #tpu.pipeline_mode<synchronous>, transform_indices = @transform_0, window_bounds = array<i64: 16, 12288>}, {transform_indices = @transform_1, window_bounds = array<i64: 12288, 256>}, {transform_indices = @transform_2, window_bounds = array<i64: 1, 256>}, {pipeline_mode = #tpu.pipeline_mode<synchronous>, transform_indices = @transform_3, window_bounds = array<i64: 512, 128>}, {pipeline_mode = #tpu.pipeline_mode<synchronous>, transform_indices = @transform_4, window_bounds = array<i64: 1, 128>}, {pipeline_mode = #tpu.pipeline_mode<synchronous>, transform_indices = @transform_5, window_bounds = array<i64: 128, 3>}, {pipeline_mode = #tpu.pipeline_mode<synchronous>, transform_indices = @transform_6, window_bounds = array<i64: 1, 3>}, {pipeline_mode = #tpu.pipeline_mode<synchronous>, transform_indices = @transform_7, window_bounds = array<i64: 16, 3>}]} {
    %c0 = arith.constant 0 : index
    %c0_0 = arith.constant 0 : index
    %0 = vector.load %arg1[%c0, %c0_0] : memref<16x12288xbf16, #tpu.memory_space<vmem>>, vector<16x12288xbf16>
    %c0_1 = arith.constant 0 : index
    %c0_2 = arith.constant 0 : index
    %1 = vector.load %arg2[%c0_1, %c0_2] : memref<12288x256xbf16, #tpu.memory_space<vmem>>, vector<12288x256xbf16>
    %cst = arith.constant dense<0.000000e+00> : vector<16x256xf32>
    %2 = tpu.matmul %0, %1, %cst {dimension_numbers = #tpu.dot_dimension_numbers<[1], [0], [0], [1], [0, 0, 1, 1], [], []>} : vector<16x12288xbf16>, vector<12288x256xbf16>, vector<16x256xf32> -> vector<16x256xf32>
    %c256_i32 = arith.constant 256 : i32
    %3 = arith.muli %arg0, %c256_i32 : i32
    %4 = tpu.assume_multiple %3, 256 : i32
    %c0_3 = arith.constant 0 : index
    %c0_4 = arith.constant 0 : index
    %5 = vector.load %arg3[%c0_3, %c0_4] : memref<1x256xf32, #tpu.memory_space<vmem>>, vector<1x256xf32>
    %6 = vector.broadcast %5 : vector<1x256xf32> to vector<16x256xf32>
    %7 = arith.addf %2, %6 : vector<16x256xf32>
    %cst_5 = arith.constant 0.000000e+00 : f32
    %8 = vector.broadcast %cst_5 : f32 to vector<16x256xf32>
    %9 = arith.maximumf %7, %8 : vector<16x256xf32>
    %c0_6 = arith.constant 0 : index
    %10 = arith.index_cast %4 : i32 to index
    %11 = vector.load %arg9[%c0_6, %10] : memref<16x512xf32, #tpu.memory_space<vmem>>, vector<16x256xf32>
    tpu.vector_store %arg9[%c0_6, %10], %9 {strides = array<i32>} : memref<16x512xf32, #tpu.memory_space<vmem>>, vector<16x256xf32>,
    %c1_i32 = arith.constant 1 : i32
    %12 = arith.cmpi eq, %arg0, %c1_i32 : i32
    %13 = arith.extui %12 : i1 to i32
    %c0_i32 = arith.constant 0 : i32
    %14 = arith.cmpi ne, %13, %c0_i32 : i32
    scf.if %14 {
      %c0_7 = arith.constant 0 : index
      %c0_8 = arith.constant 0 : index
      %15 = vector.load %arg9[%c0_7, %c0_8] : memref<16x512xf32, #tpu.memory_space<vmem>>, vector<16x512xf32>
      %c0_9 = arith.constant 0 : index
      %c0_10 = arith.constant 0 : index
      %16 = vector.load %arg4[%c0_9, %c0_10] : memref<512x128xf32, #tpu.memory_space<vmem>>, vector<512x128xf32>
      %cst_11 = arith.constant dense<0.000000e+00> : vector<16x128xf32>
      %17 = tpu.matmul %15, %16, %cst_11 {dimension_numbers = #tpu.dot_dimension_numbers<[1], [0], [0], [1], [0, 0, 1, 1], [], []>} : vector<16x512xf32>, vector<512x128xf32>, vector<16x128xf32> -> vector<16x128xf32>
      %c0_12 = arith.constant 0 : index
      %c0_13 = arith.constant 0 : index
      %18 = vector.load %arg5[%c0_12, %c0_13] : memref<1x128xf32, #tpu.memory_space<vmem>>, vector<1x128xf32>
      %19 = vector.broadcast %18 : vector<1x128xf32> to vector<16x128xf32>
      %20 = arith.addf %17, %19 : vector<16x128xf32>
      %cst_14 = arith.constant 0.000000e+00 : f32
      %21 = vector.broadcast %cst_14 : f32 to vector<16x128xf32>
      %22 = arith.maximumf %20, %21 : vector<16x128xf32>
      %c0_15 = arith.constant 0 : index
      %c0_16 = arith.constant 0 : index
      %23 = vector.load %arg6[%c0_15, %c0_16] : memref<128x3xf32, #tpu.memory_space<vmem>>, vector<128x3xf32>
      %cst_17 = arith.constant dense<0.000000e+00> : vector<16x3xf32>
      %24 = tpu.matmul %22, %23, %cst_17 {dimension_numbers = #tpu.dot_dimension_numbers<[1], [0], [0], [1], [0, 0, 1, 1], [], []>} : vector<16x128xf32>, vector<128x3xf32>, vector<16x3xf32> -> vector<16x3xf32>
      %c0_18 = arith.constant 0 : index
      %c0_19 = arith.constant 0 : index
      %25 = vector.load %arg7[%c0_18, %c0_19] : memref<1x3xf32, #tpu.memory_space<vmem>>, vector<1x3xf32>
      %26 = vector.broadcast %25 : vector<1x3xf32> to vector<16x3xf32>
      %27 = arith.addf %24, %26 : vector<16x3xf32>
      %c0_20 = arith.constant 0 : index
      %c0_21 = arith.constant 0 : index
      %28 = vector.load %arg8[%c0_20, %c0_21] : memref<16x3xf32, #tpu.memory_space<vmem>>, vector<16x3xf32>
      tpu.vector_store %arg8[%c0_20, %c0_21], %27 {strides = array<i32>} : memref<16x3xf32, #tpu.memory_space<vmem>>, vector<16x3xf32>,
    } else {
    }
    return
  }
  func.func @transform_0(%arg0: i32) -> (i32, i32) {
    %c0_i32 = arith.constant 0 : i32
    %c0_i32_0 = arith.constant 0 : i32
    %c0_i32_1 = arith.constant 0 : i32
    return %c0_i32, %c0_i32_0 : i32, i32
  }
  func.func @transform_1(%arg0: i32) -> (i32, i32) {
    %c0_i32 = arith.constant 0 : i32
    %c0_i32_0 = arith.constant 0 : i32
    return %c0_i32, %arg0 : i32, i32
  }
  func.func @transform_2(%arg0: i32) -> (i32, i32) {
    %c0_i32 = arith.constant 0 : i32
    %c0_i32_0 = arith.constant 0 : i32
    return %c0_i32, %arg0 : i32, i32
  }
  func.func @transform_3(%arg0: i32) -> (i32, i32) {
    %c0_i32 = arith.constant 0 : i32
    %c0_i32_0 = arith.constant 0 : i32
    %c0_i32_1 = arith.constant 0 : i32
    return %c0_i32, %c0_i32_0 : i32, i32
  }
  func.func @transform_4(%arg0: i32) -> (i32, i32) {
    %c0_i32 = arith.constant 0 : i32
    %c0_i32_0 = arith.constant 0 : i32
    %c0_i32_1 = arith.constant 0 : i32
    return %c0_i32, %c0_i32_0 : i32, i32
  }
  func.func @transform_5(%arg0: i32) -> (i32, i32) {
    %c0_i32 = arith.constant 0 : i32
    %c0_i32_0 = arith.constant 0 : i32
    %c0_i32_1 = arith.constant 0 : i32
    return %c0_i32, %c0_i32_0 : i32, i32
  }
  func.func @transform_6(%arg0: i32) -> (i32, i32) {
    %c0_i32 = arith.constant 0 : i32
    %c0_i32_0 = arith.constant 0 : i32
    %c0_i32_1 = arith.constant 0 : i32
    return %c0_i32, %c0_i32_0 : i32, i32
  }
  func.func @transform_7(%arg0: i32) -> (i32, i32) {
    %c0_i32 = arith.constant 0 : i32
    %c0_i32_0 = arith.constant 0 : i32
    %c0_i32_1 = arith.constant 0 : i32
    return %c0_i32, %c0_i32_0 : i32, i32
  }
}

</mosaic_0001>

<bundles_post_ra>
// kernel: posenet_forward.1
= control target key start
LH: loop header
LB: loop body
LE: loop exit
PB: predicated region body
PF: predicated region fallthrough
CT: control target
= control target key end

     0   :  { %s19885_s0 = inlined_call_operand.vmem [shape: bf16[16,12288], index: 0, kind: input, shape index: {}]   ;;  %s19886_s1 = inlined_call_operand.hbm [shape: bf16[12288,512], index: 1, kind: input, shape index: {}]   ;;  %s19887_s2 = inlined_call_operand.hbm [shape: f32[1,512], index: 2, kind: input, shape index: {}]   ;;  %s19888_s3 = inlined_call_operand.hbm [shape: f32[512,128], index: 3, kind: input, shape index: {}]   ;;  %s19889_s4 = inlined_call_operand.hbm [shape: f32[1,128], index: 4, kind: input, shape index: {}]   ;;  %s19890_s5 = inlined_call_operand.vmem [shape: f32[128,3], index: 5, kind: input, shape index: {}]   ;;  %s19891_s6 = inlined_call_operand.hbm [shape: f32[1,3], index: 6, kind: input, shape index: {}]   ;;  %s19892_s7 = inlined_call_operand.vmem [shape: f32[16,3], index: 7, kind: output, shape index: {}]  }
   0x1   :  { %19897 = sst [smem:[#allocation35_spill]] %s19886_s1 }
   0x2   :  { %19898 = sst [smem:[#allocation36_spill]] %s19888_s3 }
   0x3   :  { %19899 = sst [smem:[#allocation37_spill]] %s19889_s4 }
   0x4   :  { %12 = vsyncpa [#allocation4], 0 }
   0x5   :  { %14 = vsyncpa [#allocation4 + $0x1], 0 }
   0x6   :  { %15 = vsyncpa [#allocation6], 0 }
   0x7   :  { %17 = vsyncpa [#allocation6 + $0x1], 0 }
   0x8   :  { %18 = vsyncpa [#allocation9], 0  ;;  %s17072_s24 = smov 0   ;;  %s17074_s25 = smov 0  }
   0x9   :  { %s17076_s26 = smov 0   ;;  %s17078_s27 = smov 0  }
   0xa LB: > { %s17091_s28 = sadd.s32 4294967295, %s17022_s27   ;;  %s17094_s29 = sadd.s32 1, %s17022_s27   ;;  %s17022_s27 = sphi %s17078_s27, %s19958_s27   ;;  %s17018_s26 = sphi %s17076_s26, %s19957_s26   ;;  %s17014_s25 = sphi %s17074_s25, %s19956_s25   ;;  %s17010_s24 = sphi %s17072_s24, %s19955_s24  }
   0xb   : > { %s49_s30 = ssub.s32 %s17022_s27, %s17094_s29  ;;  %s52_s8 = sadd.s32 1, %s17018_s26 }
   0xc   : > { %p50_p0 = scmp.eq.s32.totalorder %s49_s30, 0  ;;  %p59_p1 = scmp.ne.s32.totalorder %s17018_s26, %s17014_s25 }
   0xd   : > { %p60_p2 = scmp.eq.s32.totalorder %s17022_s27, 0  ;;  %p65_p3 = scmp.ne.s32.totalorder %s17014_s25, %s17010_s24 }
   0xe   : > { %s17104_s9 = scalar_select %p50_p0, %s17018_s26, %s52_s8  }
   0xf   : > { %p61_p4 = por %p60_p2, %p59_p1  ;;  %p19893_p5 = scmp.eq.s32.totalorder %s17091_s28, 0 }
  0x10   : > { %p12673_p6 = scmp.ge.s32.totalorder %s17022_s27, 1  ;;  %p207_p7 = scmp.lt.s32.totalorder %s17022_s27, 3 }
  0x11   : > { %p17111_p8 = por %p19893_p5, %p65_p3  ;;  %s17024_s12 = smov [#allocation7]  }
  0x12   : > { %p17115_p9 = pnand %p12673_p6, %p207_p7  ;;  %s222_s13 = sshll.u32 %s17024_s12, 4  ;;  %s223_s13 = int_to_ptr.vmem [resolvable:$true] %s222_s13 }
  0x13   : > { %s19900_s10 = scalar_select %p17111_p8, 1, 0 }
  0x14   : > { %s19901_s11 = scalar_select %p17115_p9, 1, 0 }
  0x15   : > { %p14476_p10 = pneg %p17115_p9  ;;  %p14496_p12 = scmp.lt.s32.totalorder %s17022_s27, 2 }
  0x16   : > { %s16853_s16 = scalar_lea.vmem %s223_s13, 8192  ;;  %p16861_p6 = scmp.lt.s32.totalorder %s223_s13, %s223_s13 }
  0x17   : > { %p17123_p11 = pnand %p14476_p10, %p19893_p5  ;;  %p17128_p13 = pnand %p14496_p12, %p61_p4 }
  0x18   : > { %p16854_p1 = scmp.ne.s32.totalorder %s223_s13, %s16853_s16  ;;  %p16862_p7 = scmp.lt.s32.totalorder %s16853_s16, %s16853_s16 }
  0x19   : > { %p16844_p0 = pneg %p17123_p11 }
  0x1a   : > { %p16863_p10 = por %p16862_p7, %p16861_p6 }
  0x1b   : > { %p16856_p2 = pnand %p16854_p1, %p16844_p0 }
  0x1d   : > { %p16857_p3 = pneg %p16856_p2 }
  0x1f   : > { %p16864_p5 = pnand %p16863_p10, %p16857_p3 }
  0x21   : > { %16867 = shalt.err (!%p16864_p5)
}
  0x22   : > { %s19894_s17 = smov 128   ;;  %s17026_s18 = smov 8  }
  0x23   : > { %s19904_s3 = sld [smem:[#allocation36_spill]]  ;;  %s17027_s21 = smov [#allocation8]  }
  0x24   : > { %s236_s22 = sshll.u32 %s17027_s21, 4  ;;  %s17028_s23 = smov [#allocation10]   ;;  %s237_s22 = int_to_ptr.vmem [resolvable:$true] %s236_s22 }
  0x25   : > { %s250_s24 = sshll.u32 %s17028_s23, 4  ;;  %s16879_s30 = scalar_lea.vmem %s237_s22, 16  ;;  %s251_s24 = int_to_ptr.vmem [resolvable:$true] %s250_s24 }
  0x26   : > { %p16880_p4 = scmp.ne.s32.totalorder %s237_s22, %s16879_s30  ;;  %s16886_s8 = scalar_lea.vmem %s237_s22, 32 }
  0x27   : > { %p16887_p1 = scmp.lt.s32.totalorder %s237_s22, %s237_s22  ;;  %p16888_p2 = scmp.lt.s32.totalorder %s16886_s8, %s16879_s30 }
  0x28   : > { %p16882_p5 = pnand %p16880_p4, %p16844_p0 }
  0x29   : > { %14479 = dma.hbm_to_vmem [thread:$0]  (!%p17123_p11), %s19904_s3, 8192, %s223_s13, [#allocation6], %s19894_s17, %s19894_s17, %s17026_s18  }
  0x2a   : > { %p16883_p12 = pneg %p16882_p5  ;;  %p16889_p3 = por %p16888_p2, %p16887_p1 }
  0x2c   : > { %p16890_p6 = pnand %p16889_p3, %p16883_p12 }
  0x2e   : > { %16893 = shalt.err (!%p16890_p6)
}
  0x2f   : > { %s19905_s4 = sld [smem:[#allocation37_spill]]  ;;  %s17154_s16 = sand.u32 1, %s17018_s26  }
  0x30   : > { %s16905_s19 = scalar_lea.vmem %s251_s24, 16  ;;  %s16912_s20 = scalar_lea.vmem %s251_s24, 32 }
  0x31   : > { %p16906_p7 = scmp.ne.s32.totalorder %s251_s24, %s16905_s19  ;;  %p16913_p5 = scmp.lt.s32.totalorder %s251_s24, %s251_s24 }
  0x32   : > { %p16914_p12 = scmp.lt.s32.totalorder %s16912_s20, %s16905_s19 }
  0x33   : > { %p16908_p10 = pnand %p16906_p7, %p16844_p0 }
  0x34   : > { %p16915_p1 = por %p16914_p12, %p16913_p5 }
  0x35   : > { %14482 = dma.hbm_to_vmem [thread:$0]  (!%p17123_p11), %s19905_s4, 16, %s237_s22, [#allocation9]  }
  0x36   : > { %p16909_p4 = pneg %p16908_p10 }
  0x38   : > { %p16916_p2 = pnand %p16915_p1, %p16909_p4 }
  0x3a   : > { %16919 = shalt.err (!%p16916_p2)
}
  0x3b   : > { %14485 = dma.hbm_to_vmem [thread:$0]  (!%p17123_p11), %s19891_s6, 16, %s251_s24, [#allocation9]  }
  0x3c   : > { %s14458_s22 = smul.u32 12288, %s17154_s16  ;;  %s14327_s30 = sshll.u32 %s17022_s27, 7 }
  0x3d   : > { %s19906_s1 = sld [smem:[#allocation35_spill]]  ;;  %s262_s21 = scalar_lea.sflag [#allocation4], %s17154_s16 }
  0x3e   : > { %s265_s14 = scalar_lea.vmem [#allocation3], %s14458_s22  ;;  %p16922_p11 = pneg %p17128_p13 }
  0x3f   : > { %s272_s19 = sshll.u32 %s265_s14, 4  ;;  %s17172_s19 = int_to_ptr.vmem [resolvable:$true] %s272_s19 }
  0x43   : > { %s17169_s13 = scalar_lea.hbm %s19906_s1, %s14327_s30  ;;  %s16925_s8 = scalar_lea.hbm %s19906_s1, 393216 }
  0x44   : > { %s16920_s23 = scalar_lea.hbm %s17169_s13, 196608  ;;  %p16926_p7 = scmp.lt.s32.totalorder %s17169_s13, %s19906_s1 }
  0x45   : > { %p16921_p0 = scmp.ne.s32.totalorder %s17169_s13, %s16920_s23  ;;  %p16927_p10 = scmp.lt.s32.totalorder %s16925_s8, %s16920_s23 }
  0x47   : > { %p16923_p3 = pnand %p16922_p11, %p16921_p0  ;;  %p16928_p4 = por %p16927_p10, %p16926_p7 }
  0x49   : > { %p16924_p6 = pneg %p16923_p3 }
  0x4b   : > { %p16929_p5 = pnand %p16928_p4, %p16924_p6 }
  0x4d   : > { %16932 = shalt.err (!%p16929_p5)
}
  0x4e   : > { %s16933_s22 = scalar_lea.vmem %s17172_s19, 196608  ;;  %s17029_s14 = smov [#allocation3]  }
  0x4f   : > { %p16934_p12 = scmp.ne.s32.totalorder %s17172_s19, %s16933_s22  ;;  %s16938_s24 = sshll.u32 %s17029_s14, 4  ;;  %s16939_s24 = int_to_ptr.vmem [resolvable:$false] %s16938_s24 }
  0x50   : > { %s16940_s30 = scalar_lea.vmem %s16939_s24, 393216  ;;  %p16941_p0 = scmp.lt.s32.totalorder %s17172_s19, %s16939_s24 }
  0x51   : > { %p16936_p1 = pnand %p16934_p12, %p16922_p11  ;;  %p16942_p3 = scmp.lt.s32.totalorder %s16940_s30, %s16933_s22 }
  0x53   : > { %p16937_p2 = pneg %p16936_p1  ;;  %p16943_p8 = por %p16942_p3, %p16941_p0 }
  0x55   : > { %p16944_p7 = pnand %p16943_p8, %p16937_p2 }
  0x57   : > { %16947 = shalt.err (!%p16944_p7)
}
  0x58   : > { %s17030_s17 = smov 256   ;;  %s19907_s23 = smov 128  }
  0x59   : > { %14489 = dma.hbm_to_vmem [thread:$0]  (!%p17128_p13), %s17169_s13, 196608, %s17172_s19, %s262_s21, %s17030_s17, %s19907_s23, %s17026_s18  }
  0x5a   : > { %s12680_s8 = sshll.u32 %s17154_s16, 1  ;;  %s14328_s12 = sshll.u32 %s17022_s27, 5 }
  0x5b   : > { %s17208_s24 = scalar_lea.hbm %s19887_s2, %s14328_s12  ;;  %s286_s30 = scalar_lea.vmem [#allocation5], %s12680_s8 }
  0x5c   : > { %s294_s20 = sshll.u32 %s286_s30, 4  ;;  %s19908_s1 = sand.u32 1, %s17022_s27   ;;  %s295_s20 = int_to_ptr.vmem [resolvable:$true] %s294_s20 }
  0x5d   : > { %s283_s3 = scalar_lea.sflag [#allocation6], %s19908_s1  ;;  %s16948_s4 = scalar_lea.hbm %s17208_s24, 32 }
  0x5e   : > { %p16949_p8 = scmp.ne.s32.totalorder %s17208_s24, %s16948_s4  ;;  %s16953_s13 = scalar_lea.hbm %s19887_s2, 64 }
  0x5f   : > { %p16954_p4 = scmp.lt.s32.totalorder %s17208_s24, %s19887_s2  ;;  %p16955_p5 = scmp.lt.s32.totalorder %s16953_s13, %s16948_s4 }
  0x60   : > { %p16951_p6 = pnand %p16949_p8, %p16922_p11 }
  0x61   : > { %p16956_p12 = por %p16955_p5, %p16954_p4 }
  0x62   : > { %p16952_p10 = pneg %p16951_p6 }
  0x64   : > { %p16957_p1 = pnand %p16956_p12, %p16952_p10 }
  0x66   : > { %16960 = shalt.err (!%p16957_p1)
}
  0x67   : > { %s16961_s27 = scalar_lea.vmem %s295_s20, 32  ;;  %s17031_s1 = smov [#allocation5]  }
  0x68   : > { %p16962_p2 = scmp.ne.s32.totalorder %s295_s20, %s16961_s27  ;;  %s16966_s17 = sshll.u32 %s17031_s1, 4  ;;  %s16967_s17 = int_to_ptr.vmem [resolvable:$false] %s16966_s17 }
  0x69   : > { %s16968_s23 = scalar_lea.vmem %s16967_s17, 64  ;;  %p16969_p7 = scmp.lt.s32.totalorder %s295_s20, %s16967_s17 }
  0x6a   : > { %p16964_p0 = pnand %p16962_p2, %p16922_p11  ;;  %p16970_p8 = scmp.lt.s32.totalorder %s16968_s23, %s16961_s27 }
  0x6c   : > { %p16965_p3 = pneg %p16964_p0  ;;  %p16971_p6 = por %p16970_p8, %p16969_p7 }
  0x6e   : > { %p16972_p9 = pnand %p16971_p6, %p16965_p3 }
  0x70   : > { %16975 = shalt.err (!%p16972_p9)
}
  0x71   : > { %14492 = dma.hbm_to_vmem [thread:$0]  (!%p17128_p13), %s17208_s24, 32, %s295_s20, %s283_s3  }
  0x72   : > { %p19909_p10 = scmp.ne.s32.totalorder %s19901_s11, 0 }
  0x74   : > { %303 = sbr.rel (%p19909_p10) target bundleno = 2318 (0x90e), region = 48 }
  0x79   : > { %s305_s4 = sand.u32 1, %s17014_s25   ;;  %p19910_p11 = scmp.ne.s32.totalorder %s19900_s10, 0 }
  0x7a   : > { %s14459_s8 = smul.u32 12288, %s305_s4  ;;  %s306_s12 = scalar_lea.sflag [#allocation4], %s305_s4 }
  0x7c   : > { %s17233_s22 = scalar_lea.vmem [#allocation3], %s14459_s8 }
  0x7d   : > { %16993 = dma.done.wait (%p19910_p11), %s306_s12, 196608  }
  0x7e   : > { %16995 = vsyncadd (%p19910_p11), %s306_s12, 4294770688  ;;  %s314_s15 = sand.u32 1, %s17091_s28   ;;  %s12684_s14 = sshll.u32 %s305_s4, 1 }
  0x7f   : > { %s315_s3 = scalar_lea.sflag [#allocation6], %s314_s15  ;;  %s17240_s20 = scalar_lea.vmem [#allocation5], %s12684_s14 }
  0x80   : > { %16997 = dma.done.wait (%p19910_p11), %s315_s3, 32  }
  0x81   : > { %16999 = vsyncadd (%p19910_p11), %s315_s3, 4294967264  ;;  %p19911_p9 = scmp.eq.s32.totalorder %s17091_s28, 0 }
  0x83   : > { %17001 = dma.done.wait (%p19911_p9), [#allocation6], 8192   ;;  %p19912_p13 = pmov %p19911_p9 }
  0x84   : > { %p19913_p4 = pmov %p19911_p9 }
  0x85   : > { %17003 = vsyncadd (%p19912_p13), [#allocation6], 4294959104 }
  0x86   : > { %17005 = dma.done.wait (%p19913_p4), [#allocation9], 32   ;;  %p19914_p5 = pmov %p19913_p4 }
  0x87   : > { %v14538_v0 = vld [vmem:[%s17233_s22 + $0x74] ss:$8 sps:$4 sm:$0xff]   ;;  %v14542_v2 = vld [vmem:[%s17233_s22 + $0x70] ss:$8 sps:$4 sm:$0xff]   ;;  %v14544_v4 = vld [vmem:[%s17233_s22 + $0x64] ss:$8 sps:$4 sm:$0xff]  }
  0x88   : > { %17007 = vsyncadd (%p19914_p5), [#allocation9], 4294967264  ;;  %v14540_v1 = vld [vmem:[%s17233_s22 + $0x174] ss:$8 sps:$4 sm:$0xff]   ;;  %10168 = vmatprep.subr.bf16.mxu0 %v14538_v0  ;;  %v14543_v3 = vld [vmem:[%s17233_s22 + $0x170] ss:$8 sps:$4 sm:$0xff]  }
  0x89   : > { %10211 = vmatprep.subr.bf16.mxu1 %v14540_v1  ;;  %10169 = vmatpush1.bf16.msra.mxu0 %v14542_v2  ;;  %v14546_v5 = vld [vmem:[%s17233_s22 + $0x164] ss:$8 sps:$4 sm:$0xff]   ;;  %v14548_v6 = vld [vmem:[%s17233_s22 + $0x60] ss:$8 sps:$4 sm:$0xff]   ;;  %v14550_v8 = vld [vmem:[%s17233_s22 + $0x54] ss:$8 sps:$4 sm:$0xff]  }
  0x8a   : > { %10212 = vmatpush1.bf16.msra.mxu1 %v14543_v3  ;;  %10170 = vmatprep.subr.bf16.mxu0 %v14544_v4  ;;  %v14549_v7 = vld [vmem:[%s17233_s22 + $0x160] ss:$8 sps:$4 sm:$0xff]   ;;  %v14552_v9 = vld [vmem:[%s17233_s22 + $0x154] ss:$8 sps:$4 sm:$0xff]   ;;  %v14554_v10 = vld [vmem:[%s17233_s22 + $0x50] ss:$8 sps:$4 sm:$0xff]  }
  0x8b   : > { %10213 = vmatprep.subr.bf16.mxu1 %v14546_v5  ;;  %v14555_v11 = vld [vmem:[%s17233_s22 + $0x150] ss:$8 sps:$4 sm:$0xff]   ;;  %v14556_v12 = vld [vmem:[%s17233_s22 + $0x44] ss:$8 sps:$4 sm:$0xff]   ;;  %v14560_v14 = vld [vmem:[%s17233_s22 + $0x40] ss:$8 sps:$4 sm:$0xff]  }
  0x8c   : > { %v14558_v13 = vld [vmem:[%s17233_s22 + $0x144] ss:$8 sps:$4 sm:$0xff]   ;;  %v14561_v15 = vld [vmem:[%s17233_s22 + $0x140] ss:$8 sps:$4 sm:$0xff]   ;;  %v14562_v16 = vld [vmem:[%s17233_s22 + $0x34] ss:$8 sps:$4 sm:$0xff]  }
  0x8d   : > { %10171 = vmatpush1.bf16.msra.mxu0 %v14548_v6  ;;  %v14564_v17 = vld [vmem:[%s17233_s22 + $0x134] ss:$8 sps:$4 sm:$0xff]   ;;  %v14566_v18 = vld [vmem:[%s17233_s22 + $0x30] ss:$8 sps:$4 sm:$0xff]   ;;  %v14568_v20 = vld [vmem:[%s17233_s22 + $0x24] ss:$8 sps:$4 sm:$0xff]  }
  0x8e   : > { %10214 = vmatpush1.bf16.msra.mxu1 %v14549_v7  ;;  %10172 = vmatprep.subr.bf16.mxu0 %v14550_v8  ;;  %v14567_v19 = vld [vmem:[%s17233_s22 + $0x130] ss:$8 sps:$4 sm:$0xff]   ;;  %v14570_v21 = vld [vmem:[%s17233_s22 + $0x124] ss:$8 sps:$4 sm:$0xff]   ;;  %v14572_v22 = vld [vmem:[%s17233_s22 + $0x20] ss:$8 sps:$4 sm:$0xff]  }
  0x8f   : > { %10215 = vmatprep.subr.bf16.mxu1 %v14552_v9  ;;  %v14573_v23 = vld [vmem:[%s17233_s22 + $0x120] ss:$8 sps:$4 sm:$0xff]   ;;  %v14574_v24 = vld [vmem:[%s17233_s22 + $0x14] ss:$8 sps:$4 sm:$0xff]   ;;  %v14578_v26 = vld [vmem:[%s17233_s22 + $0x10] ss:$8 sps:$4 sm:$0xff]  }
  0x90   : > { %v14576_v25 = vld [vmem:[%s17233_s22 + $0x114] ss:$8 sps:$4 sm:$0xff]   ;;  %v14579_v27 = vld [vmem:[%s17233_s22 + $0x110] ss:$8 sps:$4 sm:$0xff]   ;;  %v14580_v28 = vld [vmem:[%s17233_s22 + $0x4] ss:$8 sps:$4 sm:$0xff]  }
  0x91   : > { %10173 = vmatpush1.bf16.msra.mxu0 %v14554_v10  ;;  %v14582_v29 = vld [vmem:[%s17233_s22 + $0x104] ss:$8 sps:$4 sm:$0xff]   ;;  %v14584_v30 = vld [vmem:[%s17233_s22] ss:$8 sps:$4 sm:$0xff]   ;;  %v14586_v32 = vld [vmem:[%s17233_s22 + $0xf4] ss:$8 sps:$4 sm:$0xff]  }
  0x92   : > { %10216 = vmatpush1.bf16.msra.mxu1 %v14555_v11  ;;  %10174 = vmatprep.subr.bf16.mxu0 %v14556_v12  ;;  %v14585_v31 = vld [vmem:[%s17233_s22 + $0x100] ss:$8 sps:$4 sm:$0xff]   ;;  %v14588_v33 = vld [vmem:[%s17233_s22 + $0x1f4] ss:$8 sps:$4 sm:$0xff]   ;;  %v14590_v34 = vld [vmem:[%s17233_s22 + $0xf0] ss:$8 sps:$4 sm:$0xff]  }
  0x93   : > { %10217 = vmatprep.subr.bf16.mxu1 %v14558_v13  ;;  %v14591_v35 = vld [vmem:[%s17233_s22 + $0x1f0] ss:$8 sps:$4 sm:$0xff]   ;;  %v14592_v36 = vld [vmem:[%s17233_s22 + $0xe4] ss:$8 sps:$4 sm:$0xff]   ;;  %v14596_v38 = vld [vmem:[%s17233_s22 + $0xe0] ss:$8 sps:$4 sm:$0xff]  }
  0x94   : > { %v14594_v37 = vld [vmem:[%s17233_s22 + $0x1e4] ss:$8 sps:$4 sm:$0xff]   ;;  %v14597_v39 = vld [vmem:[%s17233_s22 + $0x1e0] ss:$8 sps:$4 sm:$0xff]   ;;  %v14598_v40 = vld [vmem:[%s17233_s22 + $0xd4] ss:$8 sps:$4 sm:$0xff]  }
  0x95   : > { %10175 = vmatpush1.bf16.msra.mxu0 %v14560_v14  ;;  %v14600_v41 = vld [vmem:[%s17233_s22 + $0x1d4] ss:$8 sps:$4 sm:$0xff]   ;;  %v14602_v42 = vld [vmem:[%s17233_s22 + $0xd0] ss:$8 sps:$4 sm:$0xff]   ;;  %v14604_v44 = vld [vmem:[%s17233_s22 + $0xc4] ss:$8 sps:$4 sm:$0xff]  }
  0x96   : > { %10218 = vmatpush1.bf16.msra.mxu1 %v14561_v15  ;;  %10176 = vmatprep.subr.bf16.mxu0 %v14562_v16  ;;  %v14603_v43 = vld [vmem:[%s17233_s22 + $0x1d0] ss:$8 sps:$4 sm:$0xff]   ;;  %v14606_v45 = vld [vmem:[%s17233_s22 + $0x1c4] ss:$8 sps:$4 sm:$0xff]   ;;  %v14608_v46 = vld [vmem:[%s17233_s22 + $0xc0] ss:$8 sps:$4 sm:$0xff]  }
  0x97   : > { %10219 = vmatprep.subr.bf16.mxu1 %v14564_v17  ;;  %v14609_v47 = vld [vmem:[%s17233_s22 + $0x1c0] ss:$8 sps:$4 sm:$0xff]   ;;  %v14610_v52 = vld [vmem:[%s17233_s22 + $0xb4] ss:$8 sps:$4 sm:$0xff]   ;;  %v14614_v56 = vld [vmem:[%s17233_s22 + $0xb0] ss:$8 sps:$4 sm:$0xff]  }
  0x98   : > { %v363_v48 = vld [vmem:[%s19885_s0] sm:$0xff]  ;;  %v364_v50 = vld [vmem:[%s19885_s0 + $0x8] sm:$0xff]  ;;  %v14612_v54 = vld [vmem:[%s17233_s22 + $0x1b4] ss:$8 sps:$4 sm:$0xff]   ;;  %p14322_p12 = scmp.ne.s32.totalorder %s17091_s28, 1 }
  0x99   : > { %10177 = vmatpush1.bf16.msra.mxu0 %v14566_v18  ;;  %v411_v49 = vld [vmem:[%s19885_s0 + $0x180] sm:$0xff]  ;;  %v412_v51 = vld [vmem:[%s19885_s0 + $0x188] sm:$0xff]  ;;  %v14615_v57 = vld [vmem:[%s17233_s22 + $0x1b0] ss:$8 sps:$4 sm:$0xff]  }
  0x9a   : > { %10220 = vmatpush1.bf16.msra.mxu1 %v14567_v19  ;;  %10178 = vmatprep.subr.bf16.mxu0 %v14568_v20  ;;  %v12690_v53 = vcombine.high %v363_v48, %v411_v49  ;;  %v12692_v55 = vcombine.high %v364_v50, %v412_v51  ;;  %v14616_v58 = vld [vmem:[%s17233_s22 + $0xa4] ss:$8 sps:$4 sm:$0xff]   ;;  %v14620_v60 = vld [vmem:[%s17233_s22 + $0xa0] ss:$8 sps:$4 sm:$0xff]   ;;  %v14622_v62 = vld [vmem:[%s17233_s22 + $0x94] ss:$8 sps:$4 sm:$0xff]   ;;  %v12689_v8 = vcombine.low %v363_v48, %v411_v49 }
  0x9b   : > { %10221 = vmatprep.subr.bf16.mxu1 %v14570_v21  ;;  %v14618_v59 = vld [vmem:[%s17233_s22 + $0x1a4] ss:$8 sps:$4 sm:$0xff]   ;;  %v14621_v61 = vld [vmem:[%s17233_s22 + $0x1a0] ss:$8 sps:$4 sm:$0xff]   ;;  %v14624_v63 = vld [vmem:[%s17233_s22 + $0x194] ss:$8 sps:$4 sm:$0xff]   ;;  %v12691_v9 = vcombine.low %v364_v50, %v412_v51 }
  0x9c   : > { %10200 = vmatprep.mubr.bf16.mxu0 %v12690_v53  ;;  %10243 = vmatprep.mubr.bf16.mxu1 %v12692_v55  ;;  %v14626_v0 = vld [vmem:[%s17233_s22 + $0x90] ss:$8 sps:$4 sm:$0xff]   ;;  %v14628_v2 = vld [vmem:[%s17233_s22 + $0x84] ss:$8 sps:$4 sm:$0xff]   ;;  %v14632_v4 = vld [vmem:[%s17233_s22 + $0x80] ss:$8 sps:$4 sm:$0xff]  }
  0x9d   : > { %10179 = vmatpush1.bf16.msra.mxu0 %v14572_v22  ;;  %v14627_v1 = vld [vmem:[%s17233_s22 + $0x190] ss:$8 sps:$4 sm:$0xff]   ;;  %v14630_v3 = vld [vmem:[%s17233_s22 + $0x184] ss:$8 sps:$4 sm:$0xff]   ;;  %v14633_v5 = vld [vmem:[%s17233_s22 + $0x180] ss:$8 sps:$4 sm:$0xff]  }
  0x9e   : > { %10222 = vmatpush1.bf16.msra.mxu1 %v14573_v23  ;;  %10180 = vmatprep.subr.bf16.mxu0 %v14574_v24  ;;  %v14636_v6 = vld [vmem:[%s17233_s22 + $0x274] ss:$8 sps:$4 sm:$0xff]   ;;  %v14634_v10 = vld [vmem:[%s17233_s22 + $0x270] ss:$8 sps:$4 sm:$0xff]   ;;  %v14642_v12 = vld [vmem:[%s17233_s22 + $0x264] ss:$8 sps:$4 sm:$0xff]  }
  0x9f   : > { %10223 = vmatprep.subr.bf16.mxu1 %v14576_v25  ;;  %v14639_v7 = vld [vmem:[%s17233_s22 + $0x374] ss:$8 sps:$4 sm:$0xff]   ;;  %v14637_v11 = vld [vmem:[%s17233_s22 + $0x370] ss:$8 sps:$4 sm:$0xff]   ;;  %v14645_v13 = vld [vmem:[%s17233_s22 + $0x364] ss:$8 sps:$4 sm:$0xff]  }
  0xa0   : > { %v14640_v14 = vld [vmem:[%s17233_s22 + $0x260] ss:$8 sps:$4 sm:$0xff]   ;;  %v14648_v16 = vld [vmem:[%s17233_s22 + $0x254] ss:$8 sps:$4 sm:$0xff]   ;;  %v14646_v18 = vld [vmem:[%s17233_s22 + $0x250] ss:$8 sps:$4 sm:$0xff]  }
  0xa1   : > { %10181 = vmatpush1.bf16.msra.mxu0 %v14578_v26  ;;  %v14643_v15 = vld [vmem:[%s17233_s22 + $0x360] ss:$8 sps:$4 sm:$0xff]   ;;  %v14651_v17 = vld [vmem:[%s17233_s22 + $0x354] ss:$8 sps:$4 sm:$0xff]   ;;  %v14649_v19 = vld [vmem:[%s17233_s22 + $0x350] ss:$8 sps:$4 sm:$0xff]  }
  0xa2   : > { %10224 = vmatpush1.bf16.msra.mxu1 %v14579_v27  ;;  %10182 = vmatprep.subr.bf16.mxu0 %v14580_v28  ;;  %v14654_v20 = vld [vmem:[%s17233_s22 + $0x244] ss:$8 sps:$4 sm:$0xff]   ;;  %v14652_v22 = vld [vmem:[%s17233_s22 + $0x240] ss:$8 sps:$4 sm:$0xff]   ;;  %v14660_v24 = vld [vmem:[%s17233_s22 + $0x234] ss:$8 sps:$4 sm:$0xff]  }
  0xa3   : > { %10225 = vmatprep.subr.bf16.mxu1 %v14582_v29  ;;  %v14657_v21 = vld [vmem:[%s17233_s22 + $0x344] ss:$8 sps:$4 sm:$0xff]   ;;  %v14655_v23 = vld [vmem:[%s17233_s22 + $0x340] ss:$8 sps:$4 sm:$0xff]   ;;  %v14663_v25 = vld [vmem:[%s17233_s22 + $0x334] ss:$8 sps:$4 sm:$0xff]  }
  0xa4   : > { %v14658_v26 = vld [vmem:[%s17233_s22 + $0x230] ss:$8 sps:$4 sm:$0xff]   ;;  %v14666_v28 = vld [vmem:[%s17233_s22 + $0x224] ss:$8 sps:$4 sm:$0xff]   ;;  %v14691_v53 = vld [vmem:[%s17233_s22 + $0x3e0] ss:$8 sps:$4 sm:$0xff]  }
  0xa5   : > { %10183 = vmatpush1.bf16.msra.mxu0 %v14584_v30  ;;  %v14661_v27 = vld [vmem:[%s17233_s22 + $0x330] ss:$8 sps:$4 sm:$0xff]   ;;  %v14669_v29 = vld [vmem:[%s17233_s22 + $0x324] ss:$8 sps:$4 sm:$0xff]   ;;  %v14664_v30 = vld [vmem:[%s17233_s22 + $0x220] ss:$8 sps:$4 sm:$0xff]  }
  0xa6   : > { %10226 = vmatpush1.bf16.msra.mxu1 %v14585_v31  ;;  %10184 = vmatprep.subr.bf16.mxu0 %v14586_v32  ;;  %v14667_v31 = vld [vmem:[%s17233_s22 + $0x320] ss:$8 sps:$4 sm:$0xff]   ;;  %v14672_v32 = vld [vmem:[%s17233_s22 + $0x214] ss:$8 sps:$4 sm:$0xff]   ;;  %v14682_v48 = vld [vmem:[%s17233_s22 + $0x2f0] ss:$8 sps:$4 sm:$0xff]  }
  0xa7   : > { %10227 = vmatprep.subr.bf16.mxu1 %v14588_v33  ;;  %v14675_v33 = vld [vmem:[%s17233_s22 + $0x314] ss:$8 sps:$4 sm:$0xff]   ;;  %v14685_v49 = vld [vmem:[%s17233_s22 + $0x3f0] ss:$8 sps:$4 sm:$0xff]   ;;  %v14690_v50 = vld [vmem:[%s17233_s22 + $0x2e4] ss:$8 sps:$4 sm:$0xff]  }
  0xa8   : > { %v14693_v51 = vld [vmem:[%s17233_s22 + $0x3e4] ss:$8 sps:$4 sm:$0xff]   ;;  %v14699_v55 = vld [vmem:[%s17233_s22 + $0x3d4] ss:$8 sps:$4 sm:$0xff]  }
  0xa9   : > { %10185 = vmatpush2.bf16.msra.mxu0 %v14590_v34  ;;  %v14670_v34 = vld [vmem:[%s17233_s22 + $0x210] ss:$8 sps:$4 sm:$0xff]  }
  0xaa   : > { %10228 = vmatpush2.bf16.msra.mxu1 %v14591_v35  ;;  %10186 = vmatprep.subr.bf16.mxu0 %v14592_v36  ;;  %v14673_v35 = vld [vmem:[%s17233_s22 + $0x310] ss:$8 sps:$4 sm:$0xff]  }
  0xab   : > { %10229 = vmatprep.subr.bf16.mxu1 %v14594_v37  ;;  %v17361_v36 = vld [vmem:[%s19885_s0 + $0x10] sm:$0xff] }
  0xac   : > { %v17366_v37 = vld [vmem:[%s19885_s0 + $0x190] sm:$0xff] }
  0xad   : > { %10187 = vmatpush2.bf16.msra.mxu0 %v14596_v38  ;;  %v17371_v38 = vld [vmem:[%s19885_s0 + $0x18] sm:$0xff] }
  0xae   : > { %10230 = vmatpush2.bf16.msra.mxu1 %v14597_v39  ;;  %10188 = vmatprep.subr.bf16.mxu0 %v14598_v40  ;;  %v17376_v39 = vld [vmem:[%s19885_s0 + $0x198] sm:$0xff]  ;;  %v14678_v40 = vld [vmem:[%s17233_s22 + $0x204] ss:$8 sps:$4 sm:$0xff]  }
  0xaf   : > { %10231 = vmatprep.subr.bf16.mxu1 %v14600_v41  ;;  %v12694_v41 = vcombine.high %v17361_v36, %v17366_v37 }
  0xb1   : > { %10189 = vmatpush2.bf16.msra.mxu0 %v14602_v42  ;;  %v14681_v42 = vld [vmem:[%s17233_s22 + $0x304] ss:$8 sps:$4 sm:$0xff]  }
  0xb2   : > { %10232 = vmatpush2.bf16.msra.mxu1 %v14603_v43  ;;  %10190 = vmatprep.subr.bf16.mxu0 %v14604_v44  ;;  %v12696_v43 = vcombine.high %v17371_v38, %v17376_v39  ;;  %v14676_v44 = vld [vmem:[%s17233_s22 + $0x200] ss:$8 sps:$4 sm:$0xff]  }
  0xb3   : > { %10233 = vmatprep.subr.bf16.mxu1 %v14606_v45  ;;  %v14679_v45 = vld [vmem:[%s17233_s22 + $0x300] ss:$8 sps:$4 sm:$0xff]  }
  0xb5   : > { %10191 = vmatpush2.bf16.msra.mxu0 %v14608_v46  ;;  %v14684_v46 = vld [vmem:[%s17233_s22 + $0x2f4] ss:$8 sps:$4 sm:$0xff]  }
  0xb6   : > { %10234 = vmatpush2.bf16.msra.mxu1 %v14609_v47  ;;  %10192 = vmatprep.subr.bf16.mxu0 %v14610_v52  ;;  %v14687_v47 = vld [vmem:[%s17233_s22 + $0x3f4] ss:$8 sps:$4 sm:$0xff]   ;;  %v14688_v52 = vld [vmem:[%s17233_s22 + $0x2e0] ss:$8 sps:$4 sm:$0xff]  }
  0xb7   : > { %10235 = vmatprep.subr.bf16.mxu1 %v14612_v54  ;;  %v14696_v54 = vld [vmem:[%s17233_s22 + $0x2d4] ss:$8 sps:$4 sm:$0xff]  }
  0xb9   : > { %10193 = vmatpush2.bf16.msra.mxu0 %v14614_v56  ;;  %v14694_v56 = vld [vmem:[%s17233_s22 + $0x2d0] ss:$8 sps:$4 sm:$0xff]  }
  0xba   : > { %10236 = vmatpush2.bf16.msra.mxu1 %v14615_v57  ;;  %10194 = vmatprep.subr.bf16.mxu0 %v14616_v58  ;;  %v14697_v57 = vld [vmem:[%s17233_s22 + $0x3d0] ss:$8 sps:$4 sm:$0xff]   ;;  %v14702_v58 = vld [vmem:[%s17233_s22 + $0x2c4] ss:$8 sps:$4 sm:$0xff]  }
  0xbb   : > { %10237 = vmatprep.subr.bf16.mxu1 %v14618_v59  ;;  %v14705_v59 = vld [vmem:[%s17233_s22 + $0x3c4] ss:$8 sps:$4 sm:$0xff]  }
  0xbd   : > { %10195 = vmatpush2.bf16.msra.mxu0 %v14620_v60  ;;  %v14700_v60 = vld [vmem:[%s17233_s22 + $0x2c0] ss:$8 sps:$4 sm:$0xff]  }
  0xbe   : > { %10238 = vmatpush2.bf16.msra.mxu1 %v14621_v61  ;;  %10196 = vmatprep.subr.bf16.mxu0 %v14622_v62  ;;  %v14703_v61 = vld [vmem:[%s17233_s22 + $0x3c0] ss:$8 sps:$4 sm:$0xff]   ;;  %v14708_v62 = vld [vmem:[%s17233_s22 + $0x2b4] ss:$8 sps:$4 sm:$0xff]  }
  0xbf   : > { %10239 = vmatprep.subr.bf16.mxu1 %v14624_v63  ;;  %v14711_v63 = vld [vmem:[%s17233_s22 + $0x3b4] ss:$8 sps:$4 sm:$0xff]  }
  0xc1   : > { %10197 = vmatpush2.bf16.msra.mxu0 %v14626_v0  ;;  %v14706_v0 = vld [vmem:[%s17233_s22 + $0x2b0] ss:$8 sps:$4 sm:$0xff]  }
  0xc2   : > { %10240 = vmatpush2.bf16.msra.mxu1 %v14627_v1  ;;  %10198 = vmatprep.subr.bf16.mxu0 %v14628_v2  ;;  %v14709_v1 = vld [vmem:[%s17233_s22 + $0x3b0] ss:$8 sps:$4 sm:$0xff]   ;;  %v14714_v2 = vld [vmem:[%s17233_s22 + $0x2a4] ss:$8 sps:$4 sm:$0xff]  }
  0xc3   : > { %10241 = vmatprep.subr.bf16.mxu1 %v14630_v3  ;;  %v14717_v3 = vld [vmem:[%s17233_s22 + $0x3a4] ss:$8 sps:$4 sm:$0xff]  }
  0xc5   : > { %10199 = vmatpush2.bf16.msra.mxu0 %v14632_v4  ;;  %v14712_v4 = vld [vmem:[%s17233_s22 + $0x2a0] ss:$8 sps:$4 sm:$0xff]  }
  0xc6   : > { %10242 = vmatpush2.bf16.msra.mxu1 %v14633_v5  ;;  %10254 = vmatprep.subr.bf16.mxu0 %v14636_v6  ;;  %v14715_v5 = vld [vmem:[%s17233_s22 + $0x3a0] ss:$8 sps:$4 sm:$0xff]   ;;  %v14720_v6 = vld [vmem:[%s17233_s22 + $0x294] ss:$8 sps:$4 sm:$0xff]  }
  0xc7   : > { %10297 = vmatprep.subr.bf16.mxu1 %v14639_v7  ;;  %v14723_v7 = vld [vmem:[%s17233_s22 + $0x394] ss:$8 sps:$4 sm:$0xff]  }
  0xc8   : > { %10201 = vmatmul.mubr.bf16.vlgmr.msra.gmra.mxu0 %v12689_v8  ;;  %v14718_v8 = vld [vmem:[%s17233_s22 + $0x290] ss:$8 sps:$4 sm:$0xff]  }
  0xc9   : > { %10244 = vmatmul.mubr.bf16.vlgmr.msra.gmra.mxu1 %v12691_v9  ;;  %10255 = vmatpush1.bf16.msra.mxu0 %v14634_v10  ;;  %v14721_v9 = vld [vmem:[%s17233_s22 + $0x390] ss:$8 sps:$4 sm:$0xff]   ;;  %v14726_v10 = vld [vmem:[%s17233_s22 + $0x284] ss:$8 sps:$4 sm:$0xff]  }
  0xca   : > { %10298 = vmatpush1.bf16.msra.mxu1 %v14637_v11  ;;  %10256 = vmatprep.subr.bf16.mxu0 %v14642_v12  ;;  %v14729_v11 = vld [vmem:[%s17233_s22 + $0x384] ss:$8 sps:$4 sm:$0xff]   ;;  %v14724_v12 = vld [vmem:[%s17233_s22 + $0x280] ss:$8 sps:$4 sm:$0xff]  }
  0xcb   : > { %10299 = vmatprep.subr.bf16.mxu1 %v14645_v13  ;;  %10286 = vmatprep.mubr.bf16.mxu0 %v12694_v41  ;;  %v14727_v13 = vld [vmem:[%s17233_s22 + $0x380] ss:$8 sps:$4 sm:$0xff]   ;;  %v14757_v41 = vld [vmem:[%s17233_s22 + $0x530] ss:$8 sps:$4 sm:$0xff]  }
  0xcc   : > { %10329 = vmatprep.mubr.bf16.mxu1 %v12696_v43  ;;  %v14765_v43 = vld [vmem:[%s17233_s22 + $0x524] ss:$8 sps:$4 sm:$0xff]  }
  0xcd   : > { %10257 = vmatpush1.bf16.msra.mxu0 %v14640_v14  ;;  %v14732_v14 = vld [vmem:[%s17233_s22 + $0x474] ss:$8 sps:$4 sm:$0xff]  }
  0xce   : > { %10300 = vmatpush1.bf16.msra.mxu1 %v14643_v15  ;;  %10258 = vmatprep.subr.bf16.mxu0 %v14648_v16  ;;  %v14735_v15 = vld [vmem:[%s17233_s22 + $0x574] ss:$8 sps:$4 sm:$0xff]   ;;  %v12693_v16 = vcombine.low %v17361_v36, %v17366_v37  ;;  %v14748_v36 = vld [vmem:[%s17233_s22 + $0x440] ss:$8 sps:$4 sm:$0xff]  }
  0xcf   : > { %10301 = vmatprep.subr.bf16.mxu1 %v14651_v17  ;;  %v12695_v17 = vcombine.low %v17371_v38, %v17376_v39  ;;  %v14751_v37 = vld [vmem:[%s17233_s22 + $0x540] ss:$8 sps:$4 sm:$0xff]   ;;  %v14756_v38 = vld [vmem:[%s17233_s22 + $0x434] ss:$8 sps:$4 sm:$0xff]  }
  0xd0   : > { %v14759_v39 = vld [vmem:[%s17233_s22 + $0x534] ss:$8 sps:$4 sm:$0xff]  }
  0xd1   : > { %10259 = vmatpush1.bf16.msra.mxu0 %v14646_v18  ;;  %v14730_v18 = vld [vmem:[%s17233_s22 + $0x470] ss:$8 sps:$4 sm:$0xff]  }
  0xd2   : > { %10302 = vmatpush1.bf16.msra.mxu1 %v14649_v19  ;;  %10260 = vmatprep.subr.bf16.mxu0 %v14654_v20  ;;  %v14733_v19 = vld [vmem:[%s17233_s22 + $0x570] ss:$8 sps:$4 sm:$0xff]   ;;  %v14738_v20 = vld [vmem:[%s17233_s22 + $0x464] ss:$8 sps:$4 sm:$0xff]  }
  0xd3   : > { %10303 = vmatprep.subr.bf16.mxu1 %v14657_v21  ;;  %v14741_v21 = vld [vmem:[%s17233_s22 + $0x564] ss:$8 sps:$4 sm:$0xff]  }
  0xd5   : > { %10261 = vmatpush1.bf16.msra.mxu0 %v14652_v22  ;;  %v14736_v22 = vld [vmem:[%s17233_s22 + $0x460] ss:$8 sps:$4 sm:$0xff]  }
  0xd6   : > { %10304 = vmatpush1.bf16.msra.mxu1 %v14655_v23  ;;  %10262 = vmatprep.subr.bf16.mxu0 %v14660_v24  ;;  %v14739_v23 = vld [vmem:[%s17233_s22 + $0x560] ss:$8 sps:$4 sm:$0xff]  }
  0xd7   : > { %10305 = vmatprep.subr.bf16.mxu1 %v14663_v25  ;;  %v17433_v24 = vld [vmem:[%s19885_s0 + $0x20] sm:$0xff] }
  0xd8   : > { %v17438_v25 = vld [vmem:[%s19885_s0 + $0x1a0] sm:$0xff] }
  0xd9   : > { %10263 = vmatpush1.bf16.msra.mxu0 %v14658_v26  ;;  %v17443_v26 = vld [vmem:[%s19885_s0 + $0x28] sm:$0xff] }
  0xda   : > { %10306 = vmatpush1.bf16.msra.mxu1 %v14661_v27  ;;  %10264 = vmatprep.subr.bf16.mxu0 %v14666_v28  ;;  %v17448_v27 = vld [vmem:[%s19885_s0 + $0x1a8] sm:$0xff]  ;;  %v14744_v28 = vld [vmem:[%s17233_s22 + $0x454] ss:$8 sps:$4 sm:$0xff]  }
  0xdb   : > { %10307 = vmatprep.subr.bf16.mxu1 %v14669_v29  ;;  %v12698_v29 = vcombine.high %v17433_v24, %v17438_v25 }
  0xdd   : > { %10265 = vmatpush1.bf16.msra.mxu0 %v14664_v30  ;;  %v14747_v30 = vld [vmem:[%s17233_s22 + $0x554] ss:$8 sps:$4 sm:$0xff]  }
  0xde   : > { %10308 = vmatpush1.bf16.msra.mxu1 %v14667_v31  ;;  %10266 = vmatprep.subr.bf16.mxu0 %v14672_v32  ;;  %v12700_v31 = vcombine.high %v17443_v26, %v17448_v27  ;;  %v14742_v32 = vld [vmem:[%s17233_s22 + $0x450] ss:$8 sps:$4 sm:$0xff]  }
  0xdf   : > { %10309 = vmatprep.subr.bf16.mxu1 %v14675_v33  ;;  %v14745_v33 = vld [vmem:[%s17233_s22 + $0x550] ss:$8 sps:$4 sm:$0xff]  }
  0xe1   : > { %10267 = vmatpush1.bf16.msra.mxu0 %v14670_v34  ;;  %v14750_v34 = vld [vmem:[%s17233_s22 + $0x444] ss:$8 sps:$4 sm:$0xff]  }
  0xe2   : > { %10310 = vmatpush1.bf16.msra.mxu1 %v14673_v35  ;;  %10268 = vmatprep.subr.bf16.mxu0 %v14678_v40  ;;  %v14753_v35 = vld [vmem:[%s17233_s22 + $0x544] ss:$8 sps:$4 sm:$0xff]   ;;  %v14754_v40 = vld [vmem:[%s17233_s22 + $0x430] ss:$8 sps:$4 sm:$0xff]  }
  0xe3   : > { %10311 = vmatprep.subr.bf16.mxu1 %v14681_v42  ;;  %v14762_v42 = vld [vmem:[%s17233_s22 + $0x424] ss:$8 sps:$4 sm:$0xff]  }
  0xe5   : > { %10269 = vmatpush1.bf16.msra.mxu0 %v14676_v44  ;;  %v14760_v44 = vld [vmem:[%s17233_s22 + $0x420] ss:$8 sps:$4 sm:$0xff]  }
  0xe6   : > { %10312 = vmatpush1.bf16.msra.mxu1 %v14679_v45  ;;  %10270 = vmatprep.subr.bf16.mxu0 %v14684_v46  ;;  %v14763_v45 = vld [vmem:[%s17233_s22 + $0x520] ss:$8 sps:$4 sm:$0xff]   ;;  %v14768_v46 = vld [vmem:[%s17233_s22 + $0x414] ss:$8 sps:$4 sm:$0xff]  }
  0xe7   : > { %10313 = vmatprep.subr.bf16.mxu1 %v14687_v47  ;;  %v14771_v47 = vld [vmem:[%s17233_s22 + $0x514] ss:$8 sps:$4 sm:$0xff]  }
  0xe9   : > { %10271 = vmatpush2.bf16.msra.mxu0 %v14682_v48  ;;  %v14766_v48 = vld [vmem:[%s17233_s22 + $0x410] ss:$8 sps:$4 sm:$0xff]  }
  0xea   : > { %10314 = vmatpush2.bf16.msra.mxu1 %v14685_v49  ;;  %10272 = vmatprep.subr.bf16.mxu0 %v14690_v50  ;;  %v14769_v49 = vld [vmem:[%s17233_s22 + $0x510] ss:$8 sps:$4 sm:$0xff]   ;;  %v14774_v50 = vld [vmem:[%s17233_s22 + $0x404] ss:$8 sps:$4 sm:$0xff]  }
  0xeb   : > { %10315 = vmatprep.subr.bf16.mxu1 %v14693_v51  ;;  %v14777_v51 = vld [vmem:[%s17233_s22 + $0x504] ss:$8 sps:$4 sm:$0xff]  }
  0xed   : > { %10273 = vmatpush2.bf16.msra.mxu0 %v14688_v52  ;;  %v14772_v52 = vld [vmem:[%s17233_s22 + $0x400] ss:$8 sps:$4 sm:$0xff]  }
  0xee   : > { %10316 = vmatpush2.bf16.msra.mxu1 %v14691_v53  ;;  %10274 = vmatprep.subr.bf16.mxu0 %v14696_v54  ;;  %v14775_v53 = vld [vmem:[%s17233_s22 + $0x500] ss:$8 sps:$4 sm:$0xff]   ;;  %v14780_v54 = vld [vmem:[%s17233_s22 + $0x4f4] ss:$8 sps:$4 sm:$0xff]  }
  0xef   : > { %10317 = vmatprep.subr.bf16.mxu1 %v14699_v55  ;;  %v14783_v55 = vld [vmem:[%s17233_s22 + $0x5f4] ss:$8 sps:$4 sm:$0xff]  }
  0xf1   : > { %10275 = vmatpush2.bf16.msra.mxu0 %v14694_v56  ;;  %v14778_v56 = vld [vmem:[%s17233_s22 + $0x4f0] ss:$8 sps:$4 sm:$0xff]  }
  0xf2   : > { %10318 = vmatpush2.bf16.msra.mxu1 %v14697_v57  ;;  %10276 = vmatprep.subr.bf16.mxu0 %v14702_v58  ;;  %v14781_v57 = vld [vmem:[%s17233_s22 + $0x5f0] ss:$8 sps:$4 sm:$0xff]   ;;  %v14786_v58 = vld [vmem:[%s17233_s22 + $0x4e4] ss:$8 sps:$4 sm:$0xff]  }
  0xf3   : > { %10319 = vmatprep.subr.bf16.mxu1 %v14705_v59  ;;  %v14789_v59 = vld [vmem:[%s17233_s22 + $0x5e4] ss:$8 sps:$4 sm:$0xff]  }
  0xf5   : > { %10277 = vmatpush2.bf16.msra.mxu0 %v14700_v60  ;;  %v14784_v60 = vld [vmem:[%s17233_s22 + $0x4e0] ss:$8 sps:$4 sm:$0xff]  }
  0xf6   : > { %10320 = vmatpush2.bf16.msra.mxu1 %v14703_v61  ;;  %10278 = vmatprep.subr.bf16.mxu0 %v14708_v62  ;;  %v14787_v61 = vld [vmem:[%s17233_s22 + $0x5e0] ss:$8 sps:$4 sm:$0xff]   ;;  %v14792_v62 = vld [vmem:[%s17233_s22 + $0x4d4] ss:$8 sps:$4 sm:$0xff]  }
  0xf7   : > { %10321 = vmatprep.subr.bf16.mxu1 %v14711_v63  ;;  %v14795_v63 = vld [vmem:[%s17233_s22 + $0x5d4] ss:$8 sps:$4 sm:$0xff]  }
  0xf9   : > { %10279 = vmatpush2.bf16.msra.mxu0 %v14706_v0  ;;  %v14790_v0 = vld [vmem:[%s17233_s22 + $0x4d0] ss:$8 sps:$4 sm:$0xff]  }
  0xfa   : > { %10322 = vmatpush2.bf16.msra.mxu1 %v14709_v1  ;;  %10280 = vmatprep.subr.bf16.mxu0 %v14714_v2  ;;  %v14793_v1 = vld [vmem:[%s17233_s22 + $0x5d0] ss:$8 sps:$4 sm:$0xff]   ;;  %v14798_v2 = vld [vmem:[%s17233_s22 + $0x4c4] ss:$8 sps:$4 sm:$0xff]  }
  0xfb   : > { %10323 = vmatprep.subr.bf16.mxu1 %v14717_v3  ;;  %v14801_v3 = vld [vmem:[%s17233_s22 + $0x5c4] ss:$8 sps:$4 sm:$0xff]  }
  0xfd   : > { %10281 = vmatpush2.bf16.msra.mxu0 %v14712_v4  ;;  %v14796_v4 = vld [vmem:[%s17233_s22 + $0x4c0] ss:$8 sps:$4 sm:$0xff]  }
  0xfe   : > { %10324 = vmatpush2.bf16.msra.mxu1 %v14715_v5  ;;  %10282 = vmatprep.subr.bf16.mxu0 %v14720_v6  ;;  %v14799_v5 = vld [vmem:[%s17233_s22 + $0x5c0] ss:$8 sps:$4 sm:$0xff]   ;;  %v14804_v6 = vld [vmem:[%s17233_s22 + $0x4b4] ss:$8 sps:$4 sm:$0xff]  }
  0xff   : > { %10325 = vmatprep.subr.bf16.mxu1 %v14723_v7  ;;  %v14807_v7 = vld [vmem:[%s17233_s22 + $0x5b4] ss:$8 sps:$4 sm:$0xff]  }
 0x101   : > { %10283 = vmatpush2.bf16.msra.mxu0 %v14718_v8  ;;  %v14802_v8 = vld [vmem:[%s17233_s22 + $0x4b0] ss:$8 sps:$4 sm:$0xff]  }
 0x102   : > { %10326 = vmatpush2.bf16.msra.mxu1 %v14721_v9  ;;  %10284 = vmatprep.subr.bf16.mxu0 %v14726_v10  ;;  %v14805_v9 = vld [vmem:[%s17233_s22 + $0x5b0] ss:$8 sps:$4 sm:$0xff]   ;;  %v14810_v10 = vld [vmem:[%s17233_s22 + $0x4a4] ss:$8 sps:$4 sm:$0xff]  }
 0x103   : > { %10327 = vmatprep.subr.bf16.mxu1 %v14729_v11  ;;  %v14813_v11 = vld [vmem:[%s17233_s22 + $0x5a4] ss:$8 sps:$4 sm:$0xff]  }
 0x105   : > { %10285 = vmatpush2.bf16.msra.mxu0 %v14724_v12  ;;  %v14808_v12 = vld [vmem:[%s17233_s22 + $0x4a0] ss:$8 sps:$4 sm:$0xff]  }
 0x106   : > { %10328 = vmatpush2.bf16.msra.mxu1 %v14727_v13  ;;  %10340 = vmatprep.subr.bf16.mxu0 %v14732_v14  ;;  %v14811_v13 = vld [vmem:[%s17233_s22 + $0x5a0] ss:$8 sps:$4 sm:$0xff]   ;;  %v14816_v14 = vld [vmem:[%s17233_s22 + $0x494] ss:$8 sps:$4 sm:$0xff]  }
 0x107   : > { %10383 = vmatprep.subr.bf16.mxu1 %v14735_v15  ;;  %v14819_v15 = vld [vmem:[%s17233_s22 + $0x594] ss:$8 sps:$4 sm:$0xff]  }
 0x108   : > { %10287 = vmatmul.mubr.bf16.vlgmr.msra.gmra.mxu0 %v12693_v16  ;;  %v14814_v16 = vld [vmem:[%s17233_s22 + $0x490] ss:$8 sps:$4 sm:$0xff]  }
 0x109   : > { %10330 = vmatmul.mubr.bf16.vlgmr.msra.gmra.mxu1 %v12695_v17  ;;  %10341 = vmatpush1.bf16.msra.mxu0 %v14730_v18  ;;  %v14817_v17 = vld [vmem:[%s17233_s22 + $0x590] ss:$8 sps:$4 sm:$0xff]   ;;  %v14822_v18 = vld [vmem:[%s17233_s22 + $0x484] ss:$8 sps:$4 sm:$0xff]  }
 0x10a   : > { %10384 = vmatpush1.bf16.msra.mxu1 %v14733_v19  ;;  %10342 = vmatprep.subr.bf16.mxu0 %v14738_v20  ;;  %v14825_v19 = vld [vmem:[%s17233_s22 + $0x584] ss:$8 sps:$4 sm:$0xff]   ;;  %v14820_v20 = vld [vmem:[%s17233_s22 + $0x480] ss:$8 sps:$4 sm:$0xff]  }
 0x10b   : > { %10385 = vmatprep.subr.bf16.mxu1 %v14741_v21  ;;  %10372 = vmatprep.mubr.bf16.mxu0 %v12698_v29  ;;  %v14823_v21 = vld [vmem:[%s17233_s22 + $0x580] ss:$8 sps:$4 sm:$0xff]   ;;  %v14826_v29 = vld [vmem:[%s17233_s22 + $0x670] ss:$8 sps:$4 sm:$0xff]  }
 0x10c   : > { %10415 = vmatprep.mubr.bf16.mxu1 %v12700_v31  ;;  %v17526_v31 = vld [vmem:[%s19885_s0 + $0x38] sm:$0xff] }
 0x10d   : > { %10343 = vmatpush1.bf16.msra.mxu0 %v14736_v22  ;;  %v14828_v22 = vld [vmem:[%s17233_s22 + $0x674] ss:$8 sps:$4 sm:$0xff]  }
 0x10e   : > { %10386 = vmatpush1.bf16.msra.mxu1 %v14739_v23  ;;  %10344 = vmatprep.subr.bf16.mxu0 %v14744_v28  ;;  %v14831_v23 = vld [vmem:[%s17233_s22 + $0x774] ss:$8 sps:$4 sm:$0xff]  }
 0x10f   : > { %10387 = vmatprep.subr.bf16.mxu1 %v14747_v30  ;;  %v17515_v28 = vld [vmem:[%s19885_s0 + $0x30] sm:$0xff] }
 0x110   : > { %v17521_v30 = vld [vmem:[%s19885_s0 + $0x1b0] sm:$0xff] }
 0x111   : > { %10345 = vmatpush1.bf16.msra.mxu0 %v14742_v32  ;;  %v12697_v32 = vcombine.low %v17433_v24, %v17438_v25  ;;  %v12702_v24 = vcombine.high %v17515_v28, %v17521_v30 }
 0x112   : > { %10388 = vmatpush1.bf16.msra.mxu1 %v14745_v33  ;;  %10346 = vmatprep.subr.bf16.mxu0 %v14750_v34  ;;  %v12699_v33 = vcombine.low %v17443_v26, %v17448_v27  ;;  %v17535_v34 = vld [vmem:[%s19885_s0 + $0x1b8] sm:$0xff]  ;;  %v14832_v26 = vld [vmem:[%s17233_s22 + $0x660] ss:$8 sps:$4 sm:$0xff]  }
 0x113   : > { %10389 = vmatprep.subr.bf16.mxu1 %v14753_v35  ;;  %v14829_v35 = vld [vmem:[%s17233_s22 + $0x770] ss:$8 sps:$4 sm:$0xff]   ;;  %v12704_v25 = vcombine.high %v17526_v31, %v17535_v34  ;;  %v14835_v27 = vld [vmem:[%s17233_s22 + $0x760] ss:$8 sps:$4 sm:$0xff]  }
 0x115   : > { %10347 = vmatpush1.bf16.msra.mxu0 %v14748_v36  ;;  %v14834_v36 = vld [vmem:[%s17233_s22 + $0x664] ss:$8 sps:$4 sm:$0xff]  }
 0x116   : > { %10390 = vmatpush1.bf16.msra.mxu1 %v14751_v37  ;;  %10348 = vmatprep.subr.bf16.mxu0 %v14756_v38  ;;  %v14837_v37 = vld [vmem:[%s17233_s22 + $0x764] ss:$8 sps:$4 sm:$0xff]   ;;  %v14840_v38 = vld [vmem:[%s17233_s22 + $0x654] ss:$8 sps:$4 sm:$0xff]  }
 0x117   : > { %10391 = vmatprep.subr.bf16.mxu1 %v14759_v39  ;;  %v14843_v39 = vld [vmem:[%s17233_s22 + $0x754] ss:$8 sps:$4 sm:$0xff]  }
 0x119   : > { %10349 = vmatpush1.bf16.msra.mxu0 %v14754_v40  ;;  %v14838_v40 = vld [vmem:[%s17233_s22 + $0x650] ss:$8 sps:$4 sm:$0xff]  }
 0x11a   : > { %10392 = vmatpush1.bf16.msra.mxu1 %v14757_v41  ;;  %10350 = vmatprep.subr.bf16.mxu0 %v14762_v42  ;;  %v14841_v41 = vld [vmem:[%s17233_s22 + $0x750] ss:$8 sps:$4 sm:$0xff]   ;;  %v14846_v42 = vld [vmem:[%s17233_s22 + $0x644] ss:$8 sps:$4 sm:$0xff]  }
 0x11b   : > { %10393 = vmatprep.subr.bf16.mxu1 %v14765_v43  ;;  %v14849_v43 = vld [vmem:[%s17233_s22 + $0x744] ss:$8 sps:$4 sm:$0xff]  }
 0x11d   : > { %10351 = vmatpush1.bf16.msra.mxu0 %v14760_v44  ;;  %v14844_v44 = vld [vmem:[%s17233_s22 + $0x640] ss:$8 sps:$4 sm:$0xff]  }
 0x11e   : > { %10394 = vmatpush1.bf16.msra.mxu1 %v14763_v45  ;;  %10352 = vmatprep.subr.bf16.mxu0 %v14768_v46  ;;  %v14847_v45 = vld [vmem:[%s17233_s22 + $0x740] ss:$8 sps:$4 sm:$0xff]   ;;  %v14852_v46 = vld [vmem:[%s17233_s22 + $0x634] ss:$8 sps:$4 sm:$0xff]  }
 0x11f   : > { %10395 = vmatprep.subr.bf16.mxu1 %v14771_v47  ;;  %v14855_v47 = vld [vmem:[%s17233_s22 + $0x734] ss:$8 sps:$4 sm:$0xff]  }
 0x121   : > { %10353 = vmatpush1.bf16.msra.mxu0 %v14766_v48  ;;  %v14850_v48 = vld [vmem:[%s17233_s22 + $0x630] ss:$8 sps:$4 sm:$0xff]  }
 0x122   : > { %10396 = vmatpush1.bf16.msra.mxu1 %v14769_v49  ;;  %10354 = vmatprep.subr.bf16.mxu0 %v14774_v50  ;;  %v14853_v49 = vld [vmem:[%s17233_s22 + $0x730] ss:$8 sps:$4 sm:$0xff]   ;;  %v14858_v50 = vld [vmem:[%s17233_s22 + $0x624] ss:$8 sps:$4 sm:$0xff]  }
 0x123   : > { %10397 = vmatprep.subr.bf16.mxu1 %v14777_v51  ;;  %v14861_v51 = vld [vmem:[%s17233_s22 + $0x724] ss:$8 sps:$4 sm:$0xff]  }
 0x125   : > { %10355 = vmatpush1.bf16.msra.mxu0 %v14772_v52  ;;  %v14856_v52 = vld [vmem:[%s17233_s22 + $0x620] ss:$8 sps:$4 sm:$0xff]  }
 0x126   : > { %10398 = vmatpush1.bf16.msra.mxu1 %v14775_v53  ;;  %10356 = vmatprep.subr.bf16.mxu0 %v14780_v54  ;;  %v14859_v53 = vld [vmem:[%s17233_s22 + $0x720] ss:$8 sps:$4 sm:$0xff]   ;;  %v14864_v54 = vld [vmem:[%s17233_s22 + $0x614] ss:$8 sps:$4 sm:$0xff]  }
 0x127   : > { %10399 = vmatprep.subr.bf16.mxu1 %v14783_v55  ;;  %v14867_v55 = vld [vmem:[%s17233_s22 + $0x714] ss:$8 sps:$4 sm:$0xff]  }
 0x129   : > { %10357 = vmatpush2.bf16.msra.mxu0 %v14778_v56  ;;  %v14862_v56 = vld [vmem:[%s17233_s22 + $0x610] ss:$8 sps:$4 sm:$0xff]  }
 0x12a   : > { %10400 = vmatpush2.bf16.msra.mxu1 %v14781_v57  ;;  %10358 = vmatprep.subr.bf16.mxu0 %v14786_v58  ;;  %v14865_v57 = vld [vmem:[%s17233_s22 + $0x710] ss:$8 sps:$4 sm:$0xff]   ;;  %v14870_v58 = vld [vmem:[%s17233_s22 + $0x604] ss:$8 sps:$4 sm:$0xff]  }
 0x12b   : > { %10401 = vmatprep.subr.bf16.mxu1 %v14789_v59  ;;  %v14873_v59 = vld [vmem:[%s17233_s22 + $0x704] ss:$8 sps:$4 sm:$0xff]  }
 0x12d   : > { %10359 = vmatpush2.bf16.msra.mxu0 %v14784_v60  ;;  %v14868_v60 = vld [vmem:[%s17233_s22 + $0x600] ss:$8 sps:$4 sm:$0xff]  }
 0x12e   : > { %10402 = vmatpush2.bf16.msra.mxu1 %v14787_v61  ;;  %10360 = vmatprep.subr.bf16.mxu0 %v14792_v62  ;;  %v14871_v61 = vld [vmem:[%s17233_s22 + $0x700] ss:$8 sps:$4 sm:$0xff]   ;;  %v14876_v62 = vld [vmem:[%s17233_s22 + $0x6f4] ss:$8 sps:$4 sm:$0xff]  }
 0x12f   : > { %10403 = vmatprep.subr.bf16.mxu1 %v14795_v63  ;;  %v14879_v63 = vld [vmem:[%s17233_s22 + $0x7f4] ss:$8 sps:$4 sm:$0xff]  }
 0x131   : > { %10361 = vmatpush2.bf16.msra.mxu0 %v14790_v0  ;;  %v14874_v0 = vld [vmem:[%s17233_s22 + $0x6f0] ss:$8 sps:$4 sm:$0xff]  }
 0x132   : > { %10404 = vmatpush2.bf16.msra.mxu1 %v14793_v1  ;;  %10362 = vmatprep.subr.bf16.mxu0 %v14798_v2  ;;  %v14877_v1 = vld [vmem:[%s17233_s22 + $0x7f0] ss:$8 sps:$4 sm:$0xff]   ;;  %v14882_v2 = vld [vmem:[%s17233_s22 + $0x6e4] ss:$8 sps:$4 sm:$0xff]  }
 0x133   : > { %10405 = vmatprep.subr.bf16.mxu1 %v14801_v3  ;;  %v14885_v3 = vld [vmem:[%s17233_s22 + $0x7e4] ss:$8 sps:$4 sm:$0xff]  }
 0x135   : > { %10363 = vmatpush2.bf16.msra.mxu0 %v14796_v4  ;;  %v14880_v4 = vld [vmem:[%s17233_s22 + $0x6e0] ss:$8 sps:$4 sm:$0xff]  }
 0x136   : > { %10406 = vmatpush2.bf16.msra.mxu1 %v14799_v5  ;;  %10364 = vmatprep.subr.bf16.mxu0 %v14804_v6  ;;  %v14883_v5 = vld [vmem:[%s17233_s22 + $0x7e0] ss:$8 sps:$4 sm:$0xff]   ;;  %v14888_v6 = vld [vmem:[%s17233_s22 + $0x6d4] ss:$8 sps:$4 sm:$0xff]  }
 0x137   : > { %10407 = vmatprep.subr.bf16.mxu1 %v14807_v7  ;;  %v14891_v7 = vld [vmem:[%s17233_s22 + $0x7d4] ss:$8 sps:$4 sm:$0xff]  }
 0x139   : > { %10365 = vmatpush2.bf16.msra.mxu0 %v14802_v8  ;;  %v14886_v8 = vld [vmem:[%s17233_s22 + $0x6d0] ss:$8 sps:$4 sm:$0xff]  }
 0x13a   : > { %10408 = vmatpush2.bf16.msra.mxu1 %v14805_v9  ;;  %10366 = vmatprep.subr.bf16.mxu0 %v14810_v10  ;;  %v14889_v9 = vld [vmem:[%s17233_s22 + $0x7d0] ss:$8 sps:$4 sm:$0xff]   ;;  %v14894_v10 = vld [vmem:[%s17233_s22 + $0x6c4] ss:$8 sps:$4 sm:$0xff]  }
 0x13b   : > { %10409 = vmatprep.subr.bf16.mxu1 %v14813_v11  ;;  %v14897_v11 = vld [vmem:[%s17233_s22 + $0x7c4] ss:$8 sps:$4 sm:$0xff]  }
 0x13d   : > { %10367 = vmatpush2.bf16.msra.mxu0 %v14808_v12  ;;  %v14892_v12 = vld [vmem:[%s17233_s22 + $0x6c0] ss:$8 sps:$4 sm:$0xff]  }
 0x13e   : > { %10410 = vmatpush2.bf16.msra.mxu1 %v14811_v13  ;;  %10368 = vmatprep.subr.bf16.mxu0 %v14816_v14  ;;  %v14895_v13 = vld [vmem:[%s17233_s22 + $0x7c0] ss:$8 sps:$4 sm:$0xff]   ;;  %v14900_v14 = vld [vmem:[%s17233_s22 + $0x6b4] ss:$8 sps:$4 sm:$0xff]  }
 0x13f   : > { %10411 = vmatprep.subr.bf16.mxu1 %v14819_v15  ;;  %v14903_v15 = vld [vmem:[%s17233_s22 + $0x7b4] ss:$8 sps:$4 sm:$0xff]  }
 0x141   : > { %10369 = vmatpush2.bf16.msra.mxu0 %v14814_v16  ;;  %v14898_v16 = vld [vmem:[%s17233_s22 + $0x6b0] ss:$8 sps:$4 sm:$0xff]  }
 0x142   : > { %10412 = vmatpush2.bf16.msra.mxu1 %v14817_v17  ;;  %10370 = vmatprep.subr.bf16.mxu0 %v14822_v18  ;;  %v14901_v17 = vld [vmem:[%s17233_s22 + $0x7b0] ss:$8 sps:$4 sm:$0xff]   ;;  %v14906_v18 = vld [vmem:[%s17233_s22 + $0x6a4] ss:$8 sps:$4 sm:$0xff]  }
 0x143   : > { %10413 = vmatprep.subr.bf16.mxu1 %v14825_v19  ;;  %v14909_v19 = vld [vmem:[%s17233_s22 + $0x7a4] ss:$8 sps:$4 sm:$0xff]  }
 0x145   : > { %10371 = vmatpush2.bf16.msra.mxu0 %v14820_v20  ;;  %v14904_v20 = vld [vmem:[%s17233_s22 + $0x6a0] ss:$8 sps:$4 sm:$0xff]  }
 0x146   : > { %10414 = vmatpush2.bf16.msra.mxu1 %v14823_v21  ;;  %10426 = vmatprep.subr.bf16.mxu0 %v14828_v22  ;;  %v14907_v21 = vld [vmem:[%s17233_s22 + $0x7a0] ss:$8 sps:$4 sm:$0xff]   ;;  %v1998_v22 = vlaneseq }
 0x147   : > { %10469 = vmatprep.subr.bf16.mxu1 %v14831_v23  ;;  %v14912_v23 = vld [vmem:[%s17233_s22 + $0x694] ss:$8 sps:$4 sm:$0xff]  }
 0x148   : > { %10373 = vmatmul.mubr.bf16.vlgmr.msra.gmra.mxu0 %v12697_v32  ;;  %v14910_v32 = vld [vmem:[%s17233_s22 + $0x690] ss:$8 sps:$4 sm:$0xff]  }
 0x149   : > { %10416 = vmatmul.mubr.bf16.vlgmr.msra.gmra.mxu1 %v12699_v33  ;;  %10427 = vmatpush1.bf16.msra.mxu0 %v14826_v29  ;;  %v14915_v29 = vld [vmem:[%s17233_s22 + $0x794] ss:$8 sps:$4 sm:$0xff]   ;;  %v14913_v33 = vld [vmem:[%s17233_s22 + $0x790] ss:$8 sps:$4 sm:$0xff]  }
 0x14a   : > { %10470 = vmatpush1.bf16.msra.mxu1 %v14829_v35  ;;  %10428 = vmatprep.subr.bf16.mxu0 %v14834_v36  ;;  %v1999_v35 = vshrl.u32 %v1998_v22, 7  ;;  %v14918_v36 = vld [vmem:[%s17233_s22 + $0x684] ss:$8 sps:$4 sm:$0xff]   ;;  %v14963_v22 = vld [vmem:[%s17233_s22 + $0x914] ss:$8 sps:$4 sm:$0xff]  }
 0x14b   : > { %10471 = vmatprep.subr.bf16.mxu1 %v14837_v37  ;;  %10458 = vmatprep.mubr.bf16.mxu0 %v12702_v24  ;;  %v14921_v37 = vld [vmem:[%s17233_s22 + $0x784] ss:$8 sps:$4 sm:$0xff]   ;;  %v14916_v24 = vld [vmem:[%s17233_s22 + $0x680] ss:$8 sps:$4 sm:$0xff]  }
 0x14c   : > { %10501 = vmatprep.mubr.bf16.mxu1 %v12704_v25  ;;  %v14919_v25 = vld [vmem:[%s17233_s22 + $0x780] ss:$8 sps:$4 sm:$0xff]  }
 0x14d   : > { %10429 = vmatpush1.bf16.msra.mxu0 %v14832_v26  ;;  %v1996_v26 = vld [vmem:[%s17240_s20] sm:$0x3] }
 0x14e   : > { %10472 = vmatpush1.bf16.msra.mxu1 %v14835_v27  ;;  %10430 = vmatprep.subr.bf16.mxu0 %v14840_v38  ;;  %v2000_v27 = vsub.s32 0, %v1999_v35  ;;  %v14924_v38 = vld [vmem:[%s17233_s22 + $0x874] ss:$8 sps:$4 sm:$0xff]  }
 0x14f   : > { %10473 = vmatprep.subr.bf16.mxu1 %v14843_v39  ;;  %v14927_v39 = vld [vmem:[%s17233_s22 + $0x974] ss:$8 sps:$4 sm:$0xff]  }
 0x151   : > { %10431 = vmatpush1.bf16.msra.mxu0 %v14838_v40  ;;  %v17608_v40 = vld [vmem:[%s19885_s0 + $0x40] sm:$0xff] }
 0x152   : > { %10474 = vmatpush1.bf16.msra.mxu1 %v14841_v41  ;;  %10432 = vmatprep.subr.bf16.mxu0 %v14846_v42  ;;  %v14922_v41 = vld [vmem:[%s17233_s22 + $0x870] ss:$8 sps:$4 sm:$0xff]   ;;  %v2004_v42 = vsub.s32 1, %v1999_v35  ;;  %v14964_v35 = vld [vmem:[%s17233_s22 + $0x800] ss:$8 sps:$4 sm:$0xff]  }
 0x153   : > { %10475 = vmatprep.subr.bf16.mxu1 %v14849_v43  ;;  %v17614_v43 = vld [vmem:[%s19885_s0 + $0x1c0] sm:$0xff] }
 0x155   : > { %10433 = vmatpush1.bf16.msra.mxu0 %v14844_v44  ;;  %v17619_v44 = vld [vmem:[%s19885_s0 + $0x48] sm:$0xff] }
 0x156   : > { %10476 = vmatpush1.bf16.msra.mxu1 %v14847_v45  ;;  %10434 = vmatprep.subr.bf16.mxu0 %v14852_v46  ;;  %v12701_v45 = vcombine.low %v17515_v28, %v17521_v30  ;;  %v12703_v46 = vcombine.low %v17526_v31, %v17535_v34  ;;  %v12706_v28 = vcombine.high %v17608_v40, %v17614_v43 }
 0x157   : > { %10477 = vmatprep.subr.bf16.mxu1 %v14855_v47  ;;  %v17628_v47 = vld [vmem:[%s19885_s0 + $0x1c8] sm:$0xff] }
 0x158   : > { %v12708_v30 = vcombine.high %v17619_v44, %v17628_v47 }
 0x159   : > { %10435 = vmatpush1.bf16.msra.mxu0 %v14850_v48  ;;  %v2001_v48 = vrot.slane %v1996_v26, %v2000_v27  ;;  %v14978_v27 = vld [vmem:[%s17233_s22 + $0x8e4] ss:$8 sps:$4 sm:$0xff]  }
 0x15a   : > { %10478 = vmatpush1.bf16.msra.mxu1 %v14853_v49  ;;  %10436 = vmatprep.subr.bf16.mxu0 %v14858_v50  ;;  %v14925_v49 = vld [vmem:[%s17233_s22 + $0x970] ss:$8 sps:$4 sm:$0xff]   ;;  %v14930_v50 = vld [vmem:[%s17233_s22 + $0x864] ss:$8 sps:$4 sm:$0xff]  }
 0x15b   : > { %10479 = vmatprep.subr.bf16.mxu1 %v14861_v51  ;;  %v14933_v51 = vld [vmem:[%s17233_s22 + $0x964] ss:$8 sps:$4 sm:$0xff]  }
 0x15d   : > { %10437 = vmatpush1.bf16.msra.mxu0 %v14856_v52  ;;  %v2005_v52 = vrot.slane %v1996_v26, %v2004_v42  ;;  %v14973_v26 = vld [vmem:[%s17233_s22 + $0x9f0] ss:$8 sps:$4 sm:$0xff]   ;;  %v14984_v42 = vld [vmem:[%s17233_s22 + $0x8d4] ss:$8 sps:$4 sm:$0xff]  }
 0x15e   : > { %10480 = vmatpush1.bf16.msra.mxu1 %v14859_v53  ;;  %10438 = vmatprep.subr.bf16.mxu0 %v14864_v54  ;;  %v14928_v53 = vld [vmem:[%s17233_s22 + $0x860] ss:$8 sps:$4 sm:$0xff]  }
 0x15f   : > { %10481 = vmatprep.subr.bf16.mxu1 %v14867_v55  ;;  %v14931_v55 = vld [vmem:[%s17233_s22 + $0x960] ss:$8 sps:$4 sm:$0xff]  }
 0x161   : > { %10439 = vmatpush1.bf16.msra.mxu0 %v14862_v56 }
 0x162   : > { %10482 = vmatpush1.bf16.msra.mxu1 %v14865_v57  ;;  %10440 = vmatprep.subr.bf16.mxu0 %v14870_v58  ;;  %v14936_v58 = vld [vmem:[%s17233_s22 + $0x854] ss:$8 sps:$4 sm:$0xff]  }
 0x163   : > { %10483 = vmatprep.subr.bf16.mxu1 %v14873_v59  ;;  %v14939_v59 = vld [vmem:[%s17233_s22 + $0x954] ss:$8 sps:$4 sm:$0xff]  }
 0x165   : > { %10441 = vmatpush1.bf16.msra.mxu0 %v14868_v60 }
 0x166   : > { %10484 = vmatpush1.bf16.msra.mxu1 %v14871_v61  ;;  %10442 = vmatprep.subr.bf16.mxu0 %v14876_v62 }
 0x167   : > { %10485 = vmatprep.subr.bf16.mxu1 %v14879_v63 }
 0x169   : > { %10443 = vmatpush2.bf16.msra.mxu0 %v14874_v0  ;;  %v14934_v0 = vld [vmem:[%s17233_s22 + $0x850] ss:$8 sps:$4 sm:$0xff]  }
 0x16a   : > { %10486 = vmatpush2.bf16.msra.mxu1 %v14877_v1  ;;  %10444 = vmatprep.subr.bf16.mxu0 %v14882_v2 }
 0x16b   : > { %10487 = vmatprep.subr.bf16.mxu1 %v14885_v3  ;;  %v14937_v3 = vld [vmem:[%s17233_s22 + $0x950] ss:$8 sps:$4 sm:$0xff]  }
 0x16d   : > { %10445 = vmatpush2.bf16.msra.mxu0 %v14880_v4 }
 0x16e   : > { %10488 = vmatpush2.bf16.msra.mxu1 %v14883_v5  ;;  %10446 = vmatprep.subr.bf16.mxu0 %v14888_v6  ;;  %v14942_v5 = vld [vmem:[%s17233_s22 + $0x844] ss:$8 sps:$4 sm:$0xff]  }
 0x16f   : > { %10489 = vmatprep.subr.bf16.mxu1 %v14891_v7  ;;  %v14945_v6 = vld [vmem:[%s17233_s22 + $0x944] ss:$8 sps:$4 sm:$0xff]  }
 0x171   : > { %10447 = vmatpush2.bf16.msra.mxu0 %v14886_v8 }
 0x172   : > { %10490 = vmatpush2.bf16.msra.mxu1 %v14889_v9  ;;  %10448 = vmatprep.subr.bf16.mxu0 %v14894_v10  ;;  %v14940_v10 = vld [vmem:[%s17233_s22 + $0x840] ss:$8 sps:$4 sm:$0xff]  }
 0x173   : > { %10491 = vmatprep.subr.bf16.mxu1 %v14897_v11 }
 0x175   : > { %10449 = vmatpush2.bf16.msra.mxu0 %v14892_v12  ;;  %v14943_v12 = vld [vmem:[%s17233_s22 + $0x940] ss:$8 sps:$4 sm:$0xff]  }
 0x176   : > { %10492 = vmatpush2.bf16.msra.mxu1 %v14895_v13  ;;  %10450 = vmatprep.subr.bf16.mxu0 %v14900_v14  ;;  %v14948_v13 = vld [vmem:[%s17233_s22 + $0x834] ss:$8 sps:$4 sm:$0xff]  }
 0x177   : > { %10493 = vmatprep.subr.bf16.mxu1 %v14903_v15  ;;  %v14951_v14 = vld [vmem:[%s17233_s22 + $0x934] ss:$8 sps:$4 sm:$0xff]   ;;  %v14946_v15 = vld [vmem:[%s17233_s22 + $0x830] ss:$8 sps:$4 sm:$0xff]  }
 0x179   : > { %10451 = vmatpush2.bf16.msra.mxu0 %v14898_v16  ;;  %v14949_v16 = vld [vmem:[%s17233_s22 + $0x930] ss:$8 sps:$4 sm:$0xff]  }
 0x17a   : > { %10494 = vmatpush2.bf16.msra.mxu1 %v14901_v17  ;;  %10452 = vmatprep.subr.bf16.mxu0 %v14906_v18  ;;  %v14954_v17 = vld [vmem:[%s17233_s22 + $0x824] ss:$8 sps:$4 sm:$0xff]  }
 0x17b   : > { %10495 = vmatprep.subr.bf16.mxu1 %v14909_v19  ;;  %v14957_v18 = vld [vmem:[%s17233_s22 + $0x924] ss:$8 sps:$4 sm:$0xff]   ;;  %v14952_v19 = vld [vmem:[%s17233_s22 + $0x820] ss:$8 sps:$4 sm:$0xff]  }
 0x17d   : > { %10453 = vmatpush2.bf16.msra.mxu0 %v14904_v20  ;;  %v14955_v20 = vld [vmem:[%s17233_s22 + $0x920] ss:$8 sps:$4 sm:$0xff]  }
 0x17e   : > { %10496 = vmatpush2.bf16.msra.mxu1 %v14907_v21  ;;  %10454 = vmatprep.subr.bf16.mxu0 %v14912_v23  ;;  %v14960_v21 = vld [vmem:[%s17233_s22 + $0x814] ss:$8 sps:$4 sm:$0xff]   ;;  %v14958_v23 = vld [vmem:[%s17233_s22 + $0x810] ss:$8 sps:$4 sm:$0xff]  }
 0x17f   : > { %10497 = vmatprep.subr.bf16.mxu1 %v14915_v29  ;;  %v14961_v29 = vld [vmem:[%s17233_s22 + $0x910] ss:$8 sps:$4 sm:$0xff]  }
 0x181   : > { %10455 = vmatpush2.bf16.msra.mxu0 %v14910_v32  ;;  %v14966_v32 = vld [vmem:[%s17233_s22 + $0x804] ss:$8 sps:$4 sm:$0xff]  }
 0x182   : > { %10498 = vmatpush2.bf16.msra.mxu1 %v14913_v33  ;;  %10456 = vmatprep.subr.bf16.mxu0 %v14918_v36  ;;  %v14969_v33 = vld [vmem:[%s17233_s22 + $0x904] ss:$8 sps:$4 sm:$0xff]   ;;  %v14967_v36 = vld [vmem:[%s17233_s22 + $0x900] ss:$8 sps:$4 sm:$0xff]  }
 0x183   : > { %10499 = vmatprep.subr.bf16.mxu1 %v14921_v37  ;;  %v14972_v37 = vld [vmem:[%s17233_s22 + $0x8f4] ss:$8 sps:$4 sm:$0xff]  }
 0x185   : > { %10457 = vmatpush2.bf16.msra.mxu0 %v14916_v24  ;;  %v14975_v24 = vld [vmem:[%s17233_s22 + $0x9f4] ss:$8 sps:$4 sm:$0xff]  }
 0x186   : > { %10500 = vmatpush2.bf16.msra.mxu1 %v14919_v25  ;;  %10512 = vmatprep.subr.bf16.mxu0 %v14924_v38  ;;  %v14970_v25 = vld [vmem:[%s17233_s22 + $0x8f0] ss:$8 sps:$4 sm:$0xff]   ;;  %v14981_v38 = vld [vmem:[%s17233_s22 + $0x9e4] ss:$8 sps:$4 sm:$0xff]  }
 0x187   : > { %10555 = vmatprep.subr.bf16.mxu1 %v14927_v39  ;;  %v14976_v39 = vld [vmem:[%s17233_s22 + $0x8e0] ss:$8 sps:$4 sm:$0xff]  }
 0x188   : > { %v10202_v31 = vpop.f32.mrf.mxu0  ;;  %10459 = vmatmul.mubr.bf16.vlgmr.msra.gmra.mxu0 %v12701_v45  ;;  %v14987_v45 = vld [vmem:[%s17233_s22 + $0x9d4] ss:$8 sps:$4 sm:$0xff]  }
 0x189   : > { %v10245_v34 = vpop.f32.mrf.mxu1  ;;  %10502 = vmatmul.mubr.bf16.vlgmr.msra.gmra.mxu1 %v12703_v46  ;;  %v10203_v54 = vadd.f32 %v10202_v31, %v2001_v48  ;;  %10513 = vmatpush1.bf16.msra.mxu0 %v14922_v41  ;;  %v14979_v41 = vld [vmem:[%s17233_s22 + $0x9e0] ss:$8 sps:$4 sm:$0xff]   ;;  %v14982_v46 = vld [vmem:[%s17233_s22 + $0x8d0] ss:$8 sps:$4 sm:$0xff]  }
 0x18a   : > { %10556 = vmatpush1.bf16.msra.mxu1 %v14925_v49  ;;  %v10204_v56 = vpop.f32.mrf.mxu0  ;;  %10514 = vmatprep.subr.bf16.mxu0 %v14930_v50  ;;  %v14990_v49 = vld [vmem:[%s17233_s22 + $0x8c4] ss:$8 sps:$4 sm:$0xff]   ;;  %v14994_v31 = vld [vmem:[%s17233_s22 + $0x8b0] ss:$8 sps:$4 sm:$0xff]  }
 0x18b   : > { %v10247_v57 = vpop.f32.mrf.mxu1  ;;  %10557 = vmatprep.subr.bf16.mxu1 %v14933_v51  ;;  %v17641_v60 = vadd.f32 %v10245_v34, %v10203_v54  ;;  %v10205_v61 = vadd.f32 %v10204_v56, %v2005_v52  ;;  %10544 = vmatprep.mubr.bf16.mxu0 %v12706_v28  ;;  %v14993_v50 = vld [vmem:[%s17233_s22 + $0x9c4] ss:$8 sps:$4 sm:$0xff]   ;;  %v14988_v51 = vld [vmem:[%s17233_s22 + $0x8c0] ss:$8 sps:$4 sm:$0xff]   ;;  %v14996_v28 = vld [vmem:[%s17233_s22 + $0x8b4] ss:$8 sps:$4 sm:$0xff]  }
 0x18c   : > { %10587 = vmatprep.mubr.bf16.mxu1 %v12708_v30  ;;  %v10206_v62 = vpop.f32.mrf.mxu0  ;;  %v14999_v30 = vld [vmem:[%s17233_s22 + $0x9b4] ss:$8 sps:$4 sm:$0xff]   ;;  %v14997_v34 = vld [vmem:[%s17233_s22 + $0x9b0] ss:$8 sps:$4 sm:$0xff]   ;;  %v15005_v54 = vld [vmem:[%s17233_s22 + $0x9a4] ss:$8 sps:$4 sm:$0xff]  }
 0x18d   : > { %v10249_v63 = vpop.f32.mrf.mxu1  ;;  %v17644_v1 = vadd.f32 %v10247_v57, %v10205_v61  ;;  %v10207_v2 = vadd.f32 %v10206_v62, %v2001_v48  ;;  %10515 = vmatpush1.bf16.msra.mxu0 %v14928_v53  ;;  %v14985_v48 = vld [vmem:[%s17233_s22 + $0x9d0] ss:$8 sps:$4 sm:$0xff]   ;;  %v15002_v53 = vld [vmem:[%s17233_s22 + $0x8a4] ss:$8 sps:$4 sm:$0xff]   ;;  %v15003_v56 = vld [vmem:[%s17233_s22 + $0x9a0] ss:$8 sps:$4 sm:$0xff]  }
 0x18e   : > { %10558 = vmatpush1.bf16.msra.mxu1 %v14931_v55  ;;  %v10208_v4 = vpop.f32.mrf.mxu0  ;;  %10516 = vmatprep.subr.bf16.mxu0 %v14936_v58  ;;  %v15000_v55 = vld [vmem:[%s17233_s22 + $0x8a0] ss:$8 sps:$4 sm:$0xff]   ;;  %v15008_v57 = vld [vmem:[%s17233_s22 + $0x894] ss:$8 sps:$4 sm:$0xff]   ;;  %v15009_v61 = vld [vmem:[%s17233_s22 + $0x990] ss:$8 sps:$4 sm:$0xff]  }
 0x18f   : > { %10559 = vmatprep.subr.bf16.mxu1 %v14939_v59  ;;  %v17649_v7 = vadd.f32 %v10249_v63, %v10207_v2  ;;  %v10209_v8 = vadd.f32 %v10208_v4, %v2005_v52  ;;  %v10251_v9 = vpop.f32.mrf.mxu1  ;;  %v14991_v52 = vld [vmem:[%s17233_s22 + $0x9c0] ss:$8 sps:$4 sm:$0xff]   ;;  %v15011_v58 = vld [vmem:[%s17233_s22 + $0x994] ss:$8 sps:$4 sm:$0xff]   ;;  %v15006_v59 = vld [vmem:[%s17233_s22 + $0x890] ss:$8 sps:$4 sm:$0xff]  }
 0x190   : > { %v15014_v62 = vld [vmem:[%s17233_s22 + $0x884] ss:$8 sps:$4 sm:$0xff]   ;;  %v15015_v2 = vld [vmem:[%s17233_s22 + $0x980] ss:$8 sps:$4 sm:$0xff]   ;;  %v15023_v4 = vld [vmem:[%s17233_s22 + $0xb74] ss:$8 sps:$4 sm:$0xff]  }
 0x191   : > { %v17652_v11 = vadd.f32 %v10251_v9, %v10209_v8  ;;  %10517 = vmatpush1.bf16.msra.mxu0 %v14934_v0  ;;  %v15017_v63 = vld [vmem:[%s17233_s22 + $0x984] ss:$8 sps:$4 sm:$0xff]   ;;  %v15012_v0 = vld [vmem:[%s17233_s22 + $0x880] ss:$8 sps:$4 sm:$0xff]   ;;  %v12705_v8 = vcombine.low %v17608_v40, %v17614_v43  ;;  %v12707_v9 = vcombine.low %v17619_v44, %v17628_v47  ;;  %v15021_v40 = vld [vmem:[%s17233_s22 + $0xb70] ss:$8 sps:$4 sm:$0xff]  }
 0x192   : > { %10560 = vmatpush1.bf16.msra.mxu1 %v14937_v3  ;;  %10518 = vmatprep.subr.bf16.mxu0 %v14942_v5  ;;  %v15020_v3 = vld [vmem:[%s17233_s22 + $0xa74] ss:$8 sps:$4 sm:$0xff]   ;;  %v15026_v43 = vld [vmem:[%s17233_s22 + $0xa64] ss:$8 sps:$4 sm:$0xff]   ;;  %v15024_v47 = vld [vmem:[%s17233_s22 + $0xa60] ss:$8 sps:$4 sm:$0xff]  }
 0x193   : > { %10561 = vmatprep.subr.bf16.mxu1 %v14945_v6  ;;  %v17708_v5 = vld [vmem:[%s19885_s0 + $0x50] sm:$0xff]  ;;  %v15029_v44 = vld [vmem:[%s17233_s22 + $0xb64] ss:$8 sps:$4 sm:$0xff]  }
 0x194   : > { %v15018_v6 = vld [vmem:[%s17233_s22 + $0xa70] ss:$8 sps:$4 sm:$0xff]  }
 0x195   : > { %10519 = vmatpush1.bf16.msra.mxu0 %v14940_v10  ;;  %v17718_v10 = vld [vmem:[%s19885_s0 + $0x1d0] sm:$0xff] }
 0x196   : > { %10562 = vmatpush1.bf16.msra.mxu1 %v14943_v12  ;;  %10520 = vmatprep.subr.bf16.mxu0 %v14948_v13  ;;  %v17723_v12 = vld [vmem:[%s19885_s0 + $0x58] sm:$0xff] }
 0x197   : > { %10563 = vmatprep.subr.bf16.mxu1 %v14951_v14  ;;  %v17728_v13 = vld [vmem:[%s19885_s0 + $0x1d8] sm:$0xff]  ;;  %v15027_v14 = vld [vmem:[%s17233_s22 + $0xb60] ss:$8 sps:$4 sm:$0xff]  }
 0x199   : > { %10521 = vmatpush1.bf16.msra.mxu0 %v14946_v15  ;;  %v12710_v15 = vcombine.high %v17708_v5, %v17718_v10 }
 0x19a   : > { %10564 = vmatpush1.bf16.msra.mxu1 %v14949_v16  ;;  %10522 = vmatprep.subr.bf16.mxu0 %v14954_v17  ;;  %v12712_v16 = vcombine.high %v17723_v12, %v17728_v13 }
 0x19b   : > { %10565 = vmatprep.subr.bf16.mxu1 %v14957_v18 }
 0x19d   : > { %10523 = vmatpush1.bf16.msra.mxu0 %v14952_v19 }
 0x19e   : > { %10566 = vmatpush1.bf16.msra.mxu1 %v14955_v20  ;;  %10524 = vmatprep.subr.bf16.mxu0 %v14960_v21 }
 0x19f   : > { %10567 = vmatprep.subr.bf16.mxu1 %v14963_v22  ;;  %v15032_v22 = vld [vmem:[%s17233_s22 + $0xa54] ss:$8 sps:$4 sm:$0xff]  }
 0x1a1   : > { %10525 = vmatpush1.bf16.msra.mxu0 %v14958_v23  ;;  %v15035_v23 = vld [vmem:[%s17233_s22 + $0xb54] ss:$8 sps:$4 sm:$0xff]  }
 0x1a2   : > { %10568 = vmatpush1.bf16.msra.mxu1 %v14961_v29  ;;  %10526 = vmatprep.subr.bf16.mxu0 %v14966_v32 }
 0x1a3   : > { %10569 = vmatprep.subr.bf16.mxu1 %v14969_v33  ;;  %v15030_v33 = vld [vmem:[%s17233_s22 + $0xa50] ss:$8 sps:$4 sm:$0xff]  }
 0x1a5   : > { %10527 = vmatpush1.bf16.msra.mxu0 %v14964_v35  ;;  %v15033_v35 = vld [vmem:[%s17233_s22 + $0xb50] ss:$8 sps:$4 sm:$0xff]  }
 0x1a6   : > { %10570 = vmatpush1.bf16.msra.mxu1 %v14967_v36  ;;  %10528 = vmatprep.subr.bf16.mxu0 %v14972_v37 }
 0x1a7   : > { %10571 = vmatprep.subr.bf16.mxu1 %v14975_v24 }
 0x1a9   : > { %10529 = vmatpush2.bf16.msra.mxu0 %v14970_v25 }
 0x1aa   : > { %10572 = vmatpush2.bf16.msra.mxu1 %v14973_v26  ;;  %10530 = vmatprep.subr.bf16.mxu0 %v14978_v27  ;;  %v15041_v26 = vld [vmem:[%s17233_s22 + $0xb44] ss:$8 sps:$4 sm:$0xff]  }
 0x1ab   : > { %10573 = vmatprep.subr.bf16.mxu1 %v14981_v38 }
 0x1ad   : > { %10531 = vmatpush2.bf16.msra.mxu0 %v14976_v39 }
 0x1ae   : > { %10574 = vmatpush2.bf16.msra.mxu1 %v14979_v41  ;;  %10532 = vmatprep.subr.bf16.mxu0 %v14984_v42  ;;  %v15039_v42 = vld [vmem:[%s17233_s22 + $0xb40] ss:$8 sps:$4 sm:$0xff]  }
 0x1af   : > { %10575 = vmatprep.subr.bf16.mxu1 %v14987_v45  ;;  %v15044_v45 = vld [vmem:[%s17233_s22 + $0xa34] ss:$8 sps:$4 sm:$0xff]  }
 0x1b1   : > { %10533 = vmatpush2.bf16.msra.mxu0 %v14982_v46  ;;  %v15047_v46 = vld [vmem:[%s17233_s22 + $0xb34] ss:$8 sps:$4 sm:$0xff]  }
 0x1b2   : > { %10576 = vmatpush2.bf16.msra.mxu1 %v14985_v48  ;;  %10534 = vmatprep.subr.bf16.mxu0 %v14990_v49  ;;  %v15045_v48 = vld [vmem:[%s17233_s22 + $0xb30] ss:$8 sps:$4 sm:$0xff]   ;;  %v15050_v49 = vld [vmem:[%s17233_s22 + $0xa24] ss:$8 sps:$4 sm:$0xff]  }
 0x1b3   : > { %10577 = vmatprep.subr.bf16.mxu1 %v14993_v50  ;;  %v15053_v50 = vld [vmem:[%s17233_s22 + $0xb24] ss:$8 sps:$4 sm:$0xff]  }
 0x1b5   : > { %10535 = vmatpush2.bf16.msra.mxu0 %v14988_v51  ;;  %v15048_v51 = vld [vmem:[%s17233_s22 + $0xa20] ss:$8 sps:$4 sm:$0xff]  }
 0x1b6   : > { %10578 = vmatpush2.bf16.msra.mxu1 %v14991_v52  ;;  %10536 = vmatprep.subr.bf16.mxu0 %v14996_v28  ;;  %v15051_v52 = vld [vmem:[%s17233_s22 + $0xb20] ss:$8 sps:$4 sm:$0xff]   ;;  %v15056_v28 = vld [vmem:[%s17233_s22 + $0xa14] ss:$8 sps:$4 sm:$0xff]  }
 0x1b7   : > { %10579 = vmatprep.subr.bf16.mxu1 %v14999_v30  ;;  %v15059_v30 = vld [vmem:[%s17233_s22 + $0xb14] ss:$8 sps:$4 sm:$0xff]  }
 0x1b9   : > { %10537 = vmatpush2.bf16.msra.mxu0 %v14994_v31  ;;  %v15054_v31 = vld [vmem:[%s17233_s22 + $0xa10] ss:$8 sps:$4 sm:$0xff]  }
 0x1ba   : > { %10580 = vmatpush2.bf16.msra.mxu1 %v14997_v34  ;;  %10538 = vmatprep.subr.bf16.mxu0 %v15002_v53  ;;  %v15057_v34 = vld [vmem:[%s17233_s22 + $0xb10] ss:$8 sps:$4 sm:$0xff]   ;;  %v15062_v53 = vld [vmem:[%s17233_s22 + $0xa04] ss:$8 sps:$4 sm:$0xff]  }
 0x1bb   : > { %10581 = vmatprep.subr.bf16.mxu1 %v15005_v54  ;;  %v15065_v54 = vld [vmem:[%s17233_s22 + $0xb04] ss:$8 sps:$4 sm:$0xff]  }
 0x1bd   : > { %10539 = vmatpush2.bf16.msra.mxu0 %v15000_v55  ;;  %v15060_v55 = vld [vmem:[%s17233_s22 + $0xa00] ss:$8 sps:$4 sm:$0xff]  }
 0x1be   : > { %10582 = vmatpush2.bf16.msra.mxu1 %v15003_v56  ;;  %10540 = vmatprep.subr.bf16.mxu0 %v15008_v57  ;;  %v15063_v56 = vld [vmem:[%s17233_s22 + $0xb00] ss:$8 sps:$4 sm:$0xff]   ;;  %v15068_v57 = vld [vmem:[%s17233_s22 + $0xaf4] ss:$8 sps:$4 sm:$0xff]  }
 0x1bf   : > { %10583 = vmatprep.subr.bf16.mxu1 %v15011_v58  ;;  %v15071_v58 = vld [vmem:[%s17233_s22 + $0xbf4] ss:$8 sps:$4 sm:$0xff]  }
 0x1c1   : > { %10541 = vmatpush2.bf16.msra.mxu0 %v15006_v59  ;;  %v15066_v59 = vld [vmem:[%s17233_s22 + $0xaf0] ss:$8 sps:$4 sm:$0xff]  }
 0x1c2   : > { %10584 = vmatpush2.bf16.msra.mxu1 %v15009_v61  ;;  %10542 = vmatprep.subr.bf16.mxu0 %v15014_v62  ;;  %v15069_v61 = vld [vmem:[%s17233_s22 + $0xbf0] ss:$8 sps:$4 sm:$0xff]   ;;  %v15074_v62 = vld [vmem:[%s17233_s22 + $0xae4] ss:$8 sps:$4 sm:$0xff]  }
 0x1c3   : > { %10585 = vmatprep.subr.bf16.mxu1 %v15017_v63  ;;  %v15077_v63 = vld [vmem:[%s17233_s22 + $0xbe4] ss:$8 sps:$4 sm:$0xff]  }
 0x1c5   : > { %10543 = vmatpush2.bf16.msra.mxu0 %v15012_v0  ;;  %v15072_v0 = vld [vmem:[%s17233_s22 + $0xae0] ss:$8 sps:$4 sm:$0xff]  }
 0x1c6   : > { %10586 = vmatpush2.bf16.msra.mxu1 %v15015_v2  ;;  %10598 = vmatprep.subr.bf16.mxu0 %v15020_v3  ;;  %v15075_v2 = vld [vmem:[%s17233_s22 + $0xbe0] ss:$8 sps:$4 sm:$0xff]   ;;  %v15080_v3 = vld [vmem:[%s17233_s22 + $0xad4] ss:$8 sps:$4 sm:$0xff]  }
 0x1c7   : > { %10641 = vmatprep.subr.bf16.mxu1 %v15023_v4  ;;  %v15083_v4 = vld [vmem:[%s17233_s22 + $0xbd4] ss:$8 sps:$4 sm:$0xff]  }
 0x1c8   : > { %v10288_v17 = vpop.f32.mrf.mxu0  ;;  %10545 = vmatmul.mubr.bf16.vlgmr.msra.gmra.mxu0 %v12705_v8  ;;  %v15081_v8 = vld [vmem:[%s17233_s22 + $0xbd0] ss:$8 sps:$4 sm:$0xff]  }
 0x1c9   : > { %v10331_v18 = vpop.f32.mrf.mxu1  ;;  %10588 = vmatmul.mubr.bf16.vlgmr.msra.gmra.mxu1 %v12707_v9  ;;  %v10289_v19 = vadd.f32 %v10288_v17, %v17641_v60  ;;  %10599 = vmatpush1.bf16.msra.mxu0 %v15018_v6  ;;  %v15078_v6 = vld [vmem:[%s17233_s22 + $0xad0] ss:$8 sps:$4 sm:$0xff]   ;;  %v15086_v9 = vld [vmem:[%s17233_s22 + $0xac4] ss:$8 sps:$4 sm:$0xff]  }
 0x1ca   : > { %10642 = vmatpush1.bf16.msra.mxu1 %v15021_v40  ;;  %v10290_v20 = vpop.f32.mrf.mxu0  ;;  %10600 = vmatprep.subr.bf16.mxu0 %v15026_v43  ;;  %v15089_v40 = vld [vmem:[%s17233_s22 + $0xbc4] ss:$8 sps:$4 sm:$0xff]   ;;  %v15084_v43 = vld [vmem:[%s17233_s22 + $0xac0] ss:$8 sps:$4 sm:$0xff]  }
 0x1cb   : > { %v10333_v21 = vpop.f32.mrf.mxu1  ;;  %10643 = vmatprep.subr.bf16.mxu1 %v15029_v44  ;;  %v17742_v29 = vadd.f32 %v10331_v18, %v10289_v19  ;;  %v10291_v32 = vadd.f32 %v10290_v20, %v17644_v1  ;;  %10630 = vmatprep.mubr.bf16.mxu0 %v12710_v15  ;;  %v15038_v1 = vld [vmem:[%s17233_s22 + $0xa44] ss:$8 sps:$4 sm:$0xff]   ;;  %v15087_v44 = vld [vmem:[%s17233_s22 + $0xbc0] ss:$8 sps:$4 sm:$0xff]   ;;  %v15090_v15 = vld [vmem:[%s17233_s22 + $0xab0] ss:$8 sps:$4 sm:$0xff]  }
 0x1cc   : > { %10673 = vmatprep.mubr.bf16.mxu1 %v12712_v16  ;;  %v10292_v36 = vpop.f32.mrf.mxu0  ;;  %v15093_v16 = vld [vmem:[%s17233_s22 + $0xbb0] ss:$8 sps:$4 sm:$0xff]   ;;  %v15098_v17 = vld [vmem:[%s17233_s22 + $0xaa4] ss:$8 sps:$4 sm:$0xff]   ;;  %v15096_v19 = vld [vmem:[%s17233_s22 + $0xaa0] ss:$8 sps:$4 sm:$0xff]  }
 0x1cd   : > { %v10335_v60 = vpop.f32.mrf.mxu1  ;;  %v17747_v37 = vadd.f32 %v10333_v21, %v10291_v32  ;;  %v10293_v24 = vadd.f32 %v10292_v36, %v17649_v7  ;;  %10601 = vmatpush1.bf16.msra.mxu0 %v15024_v47  ;;  %v15036_v7 = vld [vmem:[%s17233_s22 + $0xa40] ss:$8 sps:$4 sm:$0xff]   ;;  %v15092_v47 = vld [vmem:[%s17233_s22 + $0xab4] ss:$8 sps:$4 sm:$0xff]   ;;  %v15101_v18 = vld [vmem:[%s17233_s22 + $0xba4] ss:$8 sps:$4 sm:$0xff]  }
 0x1ce   : > { %10644 = vmatpush1.bf16.msra.mxu1 %v15027_v14  ;;  %v10294_v25 = vpop.f32.mrf.mxu0  ;;  %10602 = vmatprep.subr.bf16.mxu0 %v15032_v22  ;;  %v15095_v14 = vld [vmem:[%s17233_s22 + $0xbb4] ss:$8 sps:$4 sm:$0xff]   ;;  %v15099_v20 = vld [vmem:[%s17233_s22 + $0xba0] ss:$8 sps:$4 sm:$0xff]   ;;  %v15105_v32 = vld [vmem:[%s17233_s22 + $0xb90] ss:$8 sps:$4 sm:$0xff]  }
 0x1cf   : > { %10645 = vmatprep.subr.bf16.mxu1 %v15035_v23  ;;  %v17752_v27 = vadd.f32 %v10335_v60, %v10293_v24  ;;  %v10295_v38 = vadd.f32 %v10294_v25, %v17652_v11  ;;  %v10337_v39 = vpop.f32.mrf.mxu1  ;;  %v15042_v11 = vld [vmem:[%s17233_s22 + $0xa30] ss:$8 sps:$4 sm:$0xff]   ;;  %v15104_v21 = vld [vmem:[%s17233_s22 + $0xa94] ss:$8 sps:$4 sm:$0xff]   ;;  %v15108_v36 = vld [vmem:[%s17233_s22 + $0xa80] ss:$8 sps:$4 sm:$0xff]  }
 0x1d0   : > { %v15107_v22 = vld [vmem:[%s17233_s22 + $0xb94] ss:$8 sps:$4 sm:$0xff]   ;;  %v15102_v23 = vld [vmem:[%s17233_s22 + $0xa90] ss:$8 sps:$4 sm:$0xff]   ;;  %v15111_v60 = vld [vmem:[%s17233_s22 + $0xb80] ss:$8 sps:$4 sm:$0xff]  }
 0x1d1   : > { %v17755_v41 = vadd.f32 %v10337_v39, %v10295_v38  ;;  %10603 = vmatpush1.bf16.msra.mxu0 %v15030_v33  ;;  %v15110_v33 = vld [vmem:[%s17233_s22 + $0xa84] ss:$8 sps:$4 sm:$0xff]   ;;  %v15116_v24 = vld [vmem:[%s17233_s22 + $0xc74] ss:$8 sps:$4 sm:$0xff]   ;;  %v12709_v38 = vcombine.low %v17708_v5, %v17718_v10  ;;  %v12711_v39 = vcombine.low %v17723_v12, %v17728_v13  ;;  %v15117_v5 = vld [vmem:[%s17233_s22 + $0xd70] ss:$8 sps:$4 sm:$0xff]  }
 0x1d2   : > { %10646 = vmatpush1.bf16.msra.mxu1 %v15033_v35  ;;  %10604 = vmatprep.subr.bf16.mxu0 %v15038_v1  ;;  %v15113_v35 = vld [vmem:[%s17233_s22 + $0xb84] ss:$8 sps:$4 sm:$0xff]   ;;  %v15119_v25 = vld [vmem:[%s17233_s22 + $0xd74] ss:$8 sps:$4 sm:$0xff]   ;;  %v15120_v13 = vld [vmem:[%s17233_s22 + $0xc60] ss:$8 sps:$4 sm:$0xff]  }
 0x1d3   : > { %10647 = vmatprep.subr.bf16.mxu1 %v15041_v26  ;;  %v17812_v1 = vld [vmem:[%s19885_s0 + $0x60] sm:$0xff]  ;;  %v15114_v26 = vld [vmem:[%s17233_s22 + $0xc70] ss:$8 sps:$4 sm:$0xff]  }
 0x1d4   : > { %v15122_v10 = vld [vmem:[%s17233_s22 + $0xc64] ss:$8 sps:$4 sm:$0xff]  }
 0x1d5   : > { %10605 = vmatpush1.bf16.msra.mxu0 %v15036_v7  ;;  %v17822_v7 = vld [vmem:[%s19885_s0 + $0x1e0] sm:$0xff] }
 0x1d6   : > { %10648 = vmatpush1.bf16.msra.mxu1 %v15039_v42  ;;  %10606 = vmatprep.subr.bf16.mxu0 %v15044_v45  ;;  %v17827_v42 = vld [vmem:[%s19885_s0 + $0x68] sm:$0xff] }
 0x1d7   : > { %10649 = vmatprep.subr.bf16.mxu1 %v15047_v46  ;;  %v17832_v45 = vld [vmem:[%s19885_s0 + $0x1e8] sm:$0xff] }
 0x1d8   : > { %v15125_v12 = vld [vmem:[%s17233_s22 + $0xd64] ss:$8 sps:$4 sm:$0xff]   ;;  %v15123_v46 = vld [vmem:[%s17233_s22 + $0xd60] ss:$8 sps:$4 sm:$0xff]  }
 0x1d9   : > { %10607 = vmatpush1.bf16.msra.mxu0 %v15042_v11  ;;  %v12714_v11 = vcombine.high %v17812_v1, %v17822_v7 }
 0x1da   : > { %10650 = vmatpush1.bf16.msra.mxu1 %v15045_v48  ;;  %10608 = vmatprep.subr.bf16.mxu0 %v15050_v49  ;;  %v12716_v48 = vcombine.high %v17827_v42, %v17832_v45 }
 0x1db   : > { %10651 = vmatprep.subr.bf16.mxu1 %v15053_v50 }
 0x1dd   : > { %10609 = vmatpush1.bf16.msra.mxu0 %v15048_v51 }
 0x1de   : > { %10652 = vmatpush1.bf16.msra.mxu1 %v15051_v52  ;;  %10610 = vmatprep.subr.bf16.mxu0 %v15056_v28 }
 0x1df   : > { %10653 = vmatprep.subr.bf16.mxu1 %v15059_v30  ;;  %v15128_v30 = vld [vmem:[%s17233_s22 + $0xc54] ss:$8 sps:$4 sm:$0xff]  }
 0x1e1   : > { %10611 = vmatpush1.bf16.msra.mxu0 %v15054_v31  ;;  %v15131_v31 = vld [vmem:[%s17233_s22 + $0xd54] ss:$8 sps:$4 sm:$0xff]  }
 0x1e2   : > { %10654 = vmatpush1.bf16.msra.mxu1 %v15057_v34  ;;  %10612 = vmatprep.subr.bf16.mxu0 %v15062_v53 }
 0x1e3   : > { %10655 = vmatprep.subr.bf16.mxu1 %v15065_v54  ;;  %v15126_v54 = vld [vmem:[%s17233_s22 + $0xc50] ss:$8 sps:$4 sm:$0xff]  }
 0x1e5   : > { %10613 = vmatpush1.bf16.msra.mxu0 %v15060_v55  ;;  %v15129_v55 = vld [vmem:[%s17233_s22 + $0xd50] ss:$8 sps:$4 sm:$0xff]  }
 0x1e6   : > { %10656 = vmatpush1.bf16.msra.mxu1 %v15063_v56  ;;  %10614 = vmatprep.subr.bf16.mxu0 %v15068_v57 }
 0x1e7   : > { %10657 = vmatprep.subr.bf16.mxu1 %v15071_v58 }
 0x1e9   : > { %10615 = vmatpush2.bf16.msra.mxu0 %v15066_v59 }
 0x1ea   : > { %10658 = vmatpush2.bf16.msra.mxu1 %v15069_v61  ;;  %10616 = vmatprep.subr.bf16.mxu0 %v15074_v62  ;;  %v15137_v61 = vld [vmem:[%s17233_s22 + $0xd44] ss:$8 sps:$4 sm:$0xff]  }
 0x1eb   : > { %10659 = vmatprep.subr.bf16.mxu1 %v15077_v63 }
 0x1ed   : > { %10617 = vmatpush2.bf16.msra.mxu0 %v15072_v0 }
 0x1ee   : > { %10660 = vmatpush2.bf16.msra.mxu1 %v15075_v2  ;;  %10618 = vmatprep.subr.bf16.mxu0 %v15080_v3  ;;  %v15135_v3 = vld [vmem:[%s17233_s22 + $0xd40] ss:$8 sps:$4 sm:$0xff]  }
 0x1ef   : > { %10661 = vmatprep.subr.bf16.mxu1 %v15083_v4  ;;  %v15140_v4 = vld [vmem:[%s17233_s22 + $0xc34] ss:$8 sps:$4 sm:$0xff]  }
 0x1f1   : > { %10619 = vmatpush2.bf16.msra.mxu0 %v15078_v6  ;;  %v15143_v6 = vld [vmem:[%s17233_s22 + $0xd34] ss:$8 sps:$4 sm:$0xff]  }
 0x1f2   : > { %10662 = vmatpush2.bf16.msra.mxu1 %v15081_v8  ;;  %10620 = vmatprep.subr.bf16.mxu0 %v15086_v9  ;;  %v15141_v8 = vld [vmem:[%s17233_s22 + $0xd30] ss:$8 sps:$4 sm:$0xff]   ;;  %v15146_v9 = vld [vmem:[%s17233_s22 + $0xc24] ss:$8 sps:$4 sm:$0xff]  }
 0x1f3   : > { %10663 = vmatprep.subr.bf16.mxu1 %v15089_v40  ;;  %v15149_v40 = vld [vmem:[%s17233_s22 + $0xd24] ss:$8 sps:$4 sm:$0xff]  }
 0x1f5   : > { %10621 = vmatpush2.bf16.msra.mxu0 %v15084_v43  ;;  %v15144_v43 = vld [vmem:[%s17233_s22 + $0xc20] ss:$8 sps:$4 sm:$0xff]  }
 0x1f6   : > { %10664 = vmatpush2.bf16.msra.mxu1 %v15087_v44  ;;  %10622 = vmatprep.subr.bf16.mxu0 %v15092_v47  ;;  %v15147_v44 = vld [vmem:[%s17233_s22 + $0xd20] ss:$8 sps:$4 sm:$0xff]   ;;  %v15152_v47 = vld [vmem:[%s17233_s22 + $0xc14] ss:$8 sps:$4 sm:$0xff]  }
 0x1f7   : > { %10665 = vmatprep.subr.bf16.mxu1 %v15095_v14  ;;  %v15155_v14 = vld [vmem:[%s17233_s22 + $0xd14] ss:$8 sps:$4 sm:$0xff]  }
 0x1f9   : > { %10623 = vmatpush2.bf16.msra.mxu0 %v15090_v15  ;;  %v15150_v15 = vld [vmem:[%s17233_s22 + $0xc10] ss:$8 sps:$4 sm:$0xff]  }
 0x1fa   : > { %10666 = vmatpush2.bf16.msra.mxu1 %v15093_v16  ;;  %10624 = vmatprep.subr.bf16.mxu0 %v15098_v17  ;;  %v15153_v16 = vld [vmem:[%s17233_s22 + $0xd10] ss:$8 sps:$4 sm:$0xff]   ;;  %v15158_v17 = vld [vmem:[%s17233_s22 + $0xc04] ss:$8 sps:$4 sm:$0xff]  }
 0x1fb   : > { %10667 = vmatprep.subr.bf16.mxu1 %v15101_v18  ;;  %v15161_v18 = vld [vmem:[%s17233_s22 + $0xd04] ss:$8 sps:$4 sm:$0xff]  }
 0x1fd   : > { %10625 = vmatpush2.bf16.msra.mxu0 %v15096_v19  ;;  %v15156_v19 = vld [vmem:[%s17233_s22 + $0xc00] ss:$8 sps:$4 sm:$0xff]  }
 0x1fe   : > { %10668 = vmatpush2.bf16.msra.mxu1 %v15099_v20  ;;  %10626 = vmatprep.subr.bf16.mxu0 %v15104_v21  ;;  %v15159_v20 = vld [vmem:[%s17233_s22 + $0xd00] ss:$8 sps:$4 sm:$0xff]   ;;  %v15164_v21 = vld [vmem:[%s17233_s22 + $0xcf4] ss:$8 sps:$4 sm:$0xff]  }
 0x1ff   : > { %10669 = vmatprep.subr.bf16.mxu1 %v15107_v22  ;;  %v15167_v22 = vld [vmem:[%s17233_s22 + $0xdf4] ss:$8 sps:$4 sm:$0xff]  }
 0x201   : > { %10627 = vmatpush2.bf16.msra.mxu0 %v15102_v23  ;;  %v15162_v23 = vld [vmem:[%s17233_s22 + $0xcf0] ss:$8 sps:$4 sm:$0xff]  }
 0x202   : > { %10670 = vmatpush2.bf16.msra.mxu1 %v15105_v32  ;;  %10628 = vmatprep.subr.bf16.mxu0 %v15110_v33  ;;  %v15165_v32 = vld [vmem:[%s17233_s22 + $0xdf0] ss:$8 sps:$4 sm:$0xff]   ;;  %v15170_v33 = vld [vmem:[%s17233_s22 + $0xce4] ss:$8 sps:$4 sm:$0xff]  }
 0x203   : > { %10671 = vmatprep.subr.bf16.mxu1 %v15113_v35  ;;  %v15173_v35 = vld [vmem:[%s17233_s22 + $0xde4] ss:$8 sps:$4 sm:$0xff]  }
 0x205   : > { %10629 = vmatpush2.bf16.msra.mxu0 %v15108_v36  ;;  %v15168_v36 = vld [vmem:[%s17233_s22 + $0xce0] ss:$8 sps:$4 sm:$0xff]  }
 0x206   : > { %10672 = vmatpush2.bf16.msra.mxu1 %v15111_v60  ;;  %10684 = vmatprep.subr.bf16.mxu0 %v15116_v24  ;;  %v15171_v60 = vld [vmem:[%s17233_s22 + $0xde0] ss:$8 sps:$4 sm:$0xff]   ;;  %v15176_v24 = vld [vmem:[%s17233_s22 + $0xcd4] ss:$8 sps:$4 sm:$0xff]  }
 0x207   : > { %10727 = vmatprep.subr.bf16.mxu1 %v15119_v25  ;;  %v15179_v25 = vld [vmem:[%s17233_s22 + $0xdd4] ss:$8 sps:$4 sm:$0xff]  }
 0x208   : > { %v10374_v49 = vpop.f32.mrf.mxu0  ;;  %10631 = vmatmul.mubr.bf16.vlgmr.msra.gmra.mxu0 %v12709_v38  ;;  %v15177_v38 = vld [vmem:[%s17233_s22 + $0xdd0] ss:$8 sps:$4 sm:$0xff]  }
 0x209   : > { %v10417_v50 = vpop.f32.mrf.mxu1  ;;  %10674 = vmatmul.mubr.bf16.vlgmr.msra.gmra.mxu1 %v12711_v39  ;;  %v10375_v51 = vadd.f32 %v10374_v49, %v17742_v29  ;;  %10685 = vmatpush1.bf16.msra.mxu0 %v15114_v26  ;;  %v15174_v26 = vld [vmem:[%s17233_s22 + $0xcd0] ss:$8 sps:$4 sm:$0xff]   ;;  %v15182_v39 = vld [vmem:[%s17233_s22 + $0xcc4] ss:$8 sps:$4 sm:$0xff]  }
 0x20a   : > { %10728 = vmatpush1.bf16.msra.mxu1 %v15117_v5  ;;  %v10376_v52 = vpop.f32.mrf.mxu0  ;;  %10686 = vmatprep.subr.bf16.mxu0 %v15122_v10  ;;  %v15185_v5 = vld [vmem:[%s17233_s22 + $0xdc4] ss:$8 sps:$4 sm:$0xff]   ;;  %v15180_v10 = vld [vmem:[%s17233_s22 + $0xcc0] ss:$8 sps:$4 sm:$0xff]  }
 0x20b   : > { %v10419_v28 = vpop.f32.mrf.mxu1  ;;  %10729 = vmatprep.subr.bf16.mxu1 %v15125_v12  ;;  %v17846_v34 = vadd.f32 %v10417_v50, %v10375_v51  ;;  %v10377_v53 = vadd.f32 %v10376_v52, %v17747_v37  ;;  %10716 = vmatprep.mubr.bf16.mxu0 %v12714_v11  ;;  %v15134_v37 = vld [vmem:[%s17233_s22 + $0xc44] ss:$8 sps:$4 sm:$0xff]   ;;  %v15183_v12 = vld [vmem:[%s17233_s22 + $0xdc0] ss:$8 sps:$4 sm:$0xff]   ;;  %v15186_v11 = vld [vmem:[%s17233_s22 + $0xcb0] ss:$8 sps:$4 sm:$0xff]  }
 0x20c   : > { %10759 = vmatprep.mubr.bf16.mxu1 %v12716_v48  ;;  %v10378_v56 = vpop.f32.mrf.mxu0  ;;  %v15189_v48 = vld [vmem:[%s17233_s22 + $0xdb0] ss:$8 sps:$4 sm:$0xff]   ;;  %v15194_v49 = vld [vmem:[%s17233_s22 + $0xca4] ss:$8 sps:$4 sm:$0xff]   ;;  %v15192_v51 = vld [vmem:[%s17233_s22 + $0xca0] ss:$8 sps:$4 sm:$0xff]  }
 0x20d   : > { %v10421_v29 = vpop.f32.mrf.mxu1  ;;  %v17851_v57 = vadd.f32 %v10419_v28, %v10377_v53  ;;  %v10379_v58 = vadd.f32 %v10378_v56, %v17752_v27  ;;  %10687 = vmatpush1.bf16.msra.mxu0 %v15120_v13  ;;  %v15132_v27 = vld [vmem:[%s17233_s22 + $0xc40] ss:$8 sps:$4 sm:$0xff]   ;;  %v15188_v13 = vld [vmem:[%s17233_s22 + $0xcb4] ss:$8 sps:$4 sm:$0xff]   ;;  %v15197_v50 = vld [vmem:[%s17233_s22 + $0xda4] ss:$8 sps:$4 sm:$0xff]  }
 0x20e   : > { %10730 = vmatpush1.bf16.msra.mxu1 %v15123_v46  ;;  %v10380_v59 = vpop.f32.mrf.mxu0  ;;  %10688 = vmatprep.subr.bf16.mxu0 %v15128_v30  ;;  %v15191_v46 = vld [vmem:[%s17233_s22 + $0xdb4] ss:$8 sps:$4 sm:$0xff]   ;;  %v15195_v52 = vld [vmem:[%s17233_s22 + $0xda0] ss:$8 sps:$4 sm:$0xff]   ;;  %v15201_v53 = vld [vmem:[%s17233_s22 + $0xd90] ss:$8 sps:$4 sm:$0xff]  }
 0x20f   : > { %10731 = vmatprep.subr.bf16.mxu1 %v15131_v31  ;;  %v17856_v62 = vadd.f32 %v10421_v29, %v10379_v58  ;;  %v10381_v63 = vadd.f32 %v10380_v59, %v17755_v41  ;;  %v10423_v0 = vpop.f32.mrf.mxu1  ;;  %v15138_v41 = vld [vmem:[%s17233_s22 + $0xc30] ss:$8 sps:$4 sm:$0xff]   ;;  %v15200_v28 = vld [vmem:[%s17233_s22 + $0xc94] ss:$8 sps:$4 sm:$0xff]   ;;  %v15204_v56 = vld [vmem:[%s17233_s22 + $0xc80] ss:$8 sps:$4 sm:$0xff]  }
 0x210   : > { %v15203_v30 = vld [vmem:[%s17233_s22 + $0xd94] ss:$8 sps:$4 sm:$0xff]   ;;  %v15198_v31 = vld [vmem:[%s17233_s22 + $0xc90] ss:$8 sps:$4 sm:$0xff]   ;;  %v15207_v29 = vld [vmem:[%s17233_s22 + $0xd80] ss:$8 sps:$4 sm:$0xff]  }
 0x211   : > { %v17859_v2 = vadd.f32 %v10423_v0, %v10381_v63  ;;  %10689 = vmatpush1.bf16.msra.mxu0 %v15126_v54  ;;  %v15206_v54 = vld [vmem:[%s17233_s22 + $0xc84] ss:$8 sps:$4 sm:$0xff]   ;;  %v15212_v58 = vld [vmem:[%s17233_s22 + $0xe74] ss:$8 sps:$4 sm:$0xff]   ;;  %v12713_v63 = vcombine.low %v17812_v1, %v17822_v7  ;;  %v12715_v0 = vcombine.low %v17827_v42, %v17832_v45  ;;  %v15213_v1 = vld [vmem:[%s17233_s22 + $0xf70] ss:$8 sps:$4 sm:$0xff]  }
 0x212   : > { %10732 = vmatpush1.bf16.msra.mxu1 %v15129_v55  ;;  %10690 = vmatprep.subr.bf16.mxu0 %v15134_v37  ;;  %v15209_v55 = vld [vmem:[%s17233_s22 + $0xd84] ss:$8 sps:$4 sm:$0xff]   ;;  %v15215_v59 = vld [vmem:[%s17233_s22 + $0xf74] ss:$8 sps:$4 sm:$0xff]   ;;  %v15216_v45 = vld [vmem:[%s17233_s22 + $0xe60] ss:$8 sps:$4 sm:$0xff]  }
 0x213   : > { %10733 = vmatprep.subr.bf16.mxu1 %v15137_v61  ;;  %v17916_v37 = vld [vmem:[%s19885_s0 + $0x70] sm:$0xff]  ;;  %v15218_v7 = vld [vmem:[%s17233_s22 + $0xe64] ss:$8 sps:$4 sm:$0xff]  }
 0x214   : > { %v15210_v61 = vld [vmem:[%s17233_s22 + $0xe70] ss:$8 sps:$4 sm:$0xff]   ;;  %v15221_v42 = vld [vmem:[%s17233_s22 + $0xf64] ss:$8 sps:$4 sm:$0xff]  }
 0x215   : > { %10691 = vmatpush1.bf16.msra.mxu0 %v15132_v27  ;;  %v17926_v27 = vld [vmem:[%s19885_s0 + $0x1f0] sm:$0xff] }
 0x216   : > { %10734 = vmatpush1.bf16.msra.mxu1 %v15135_v3  ;;  %10692 = vmatprep.subr.bf16.mxu0 %v15140_v4  ;;  %v17931_v3 = vld [vmem:[%s19885_s0 + $0x78] sm:$0xff] }
 0x217   : > { %10735 = vmatprep.subr.bf16.mxu1 %v15143_v6  ;;  %v17936_v4 = vld [vmem:[%s19885_s0 + $0x1f8] sm:$0xff]  ;;  %v15219_v6 = vld [vmem:[%s17233_s22 + $0xf60] ss:$8 sps:$4 sm:$0xff]  }
 0x219   : > { %10693 = vmatpush1.bf16.msra.mxu0 %v15138_v41  ;;  %v12718_v41 = vcombine.high %v17916_v37, %v17926_v27 }
 0x21a   : > { %10736 = vmatpush1.bf16.msra.mxu1 %v15141_v8  ;;  %10694 = vmatprep.subr.bf16.mxu0 %v15146_v9  ;;  %v12720_v8 = vcombine.high %v17931_v3, %v17936_v4 }
 0x21b   : > { %10737 = vmatprep.subr.bf16.mxu1 %v15149_v40 }
 0x21d   : > { %10695 = vmatpush1.bf16.msra.mxu0 %v15144_v43 }
 0x21e   : > { %10738 = vmatpush1.bf16.msra.mxu1 %v15147_v44  ;;  %10696 = vmatprep.subr.bf16.mxu0 %v15152_v47 }
 0x21f   : > { %10739 = vmatprep.subr.bf16.mxu1 %v15155_v14  ;;  %v15224_v14 = vld [vmem:[%s17233_s22 + $0xe54] ss:$8 sps:$4 sm:$0xff]  }
 0x221   : > { %10697 = vmatpush1.bf16.msra.mxu0 %v15150_v15  ;;  %v15227_v15 = vld [vmem:[%s17233_s22 + $0xf54] ss:$8 sps:$4 sm:$0xff]  }
 0x222   : > { %10740 = vmatpush1.bf16.msra.mxu1 %v15153_v16  ;;  %10698 = vmatprep.subr.bf16.mxu0 %v15158_v17 }
 0x223   : > { %10741 = vmatprep.subr.bf16.mxu1 %v15161_v18  ;;  %v15222_v18 = vld [vmem:[%s17233_s22 + $0xe50] ss:$8 sps:$4 sm:$0xff]  }
 0x225   : > { %10699 = vmatpush1.bf16.msra.mxu0 %v15156_v19  ;;  %v15225_v19 = vld [vmem:[%s17233_s22 + $0xf50] ss:$8 sps:$4 sm:$0xff]  }
 0x226   : > { %10742 = vmatpush1.bf16.msra.mxu1 %v15159_v20  ;;  %10700 = vmatprep.subr.bf16.mxu0 %v15164_v21 }
 0x227   : > { %10743 = vmatprep.subr.bf16.mxu1 %v15167_v22 }
 0x229   : > { %10701 = vmatpush2.bf16.msra.mxu0 %v15162_v23 }
 0x22a   : > { %10744 = vmatpush2.bf16.msra.mxu1 %v15165_v32  ;;  %10702 = vmatprep.subr.bf16.mxu0 %v15170_v33  ;;  %v15233_v32 = vld [vmem:[%s17233_s22 + $0xf44] ss:$8 sps:$4 sm:$0xff]  }
 0x22b   : > { %10745 = vmatprep.subr.bf16.mxu1 %v15173_v35 }
 0x22d   : > { %10703 = vmatpush2.bf16.msra.mxu0 %v15168_v36 }
 0x22e   : > { %10746 = vmatpush2.bf16.msra.mxu1 %v15171_v60  ;;  %10704 = vmatprep.subr.bf16.mxu0 %v15176_v24  ;;  %v15231_v24 = vld [vmem:[%s17233_s22 + $0xf40] ss:$8 sps:$4 sm:$0xff]  }
 0x22f   : > { %10747 = vmatprep.subr.bf16.mxu1 %v15179_v25  ;;  %v15236_v25 = vld [vmem:[%s17233_s22 + $0xe34] ss:$8 sps:$4 sm:$0xff]  }
 0x231   : > { %10705 = vmatpush2.bf16.msra.mxu0 %v15174_v26  ;;  %v15239_v26 = vld [vmem:[%s17233_s22 + $0xf34] ss:$8 sps:$4 sm:$0xff]  }
 0x232   : > { %10748 = vmatpush2.bf16.msra.mxu1 %v15177_v38  ;;  %10706 = vmatprep.subr.bf16.mxu0 %v15182_v39  ;;  %v15237_v38 = vld [vmem:[%s17233_s22 + $0xf30] ss:$8 sps:$4 sm:$0xff]   ;;  %v15242_v39 = vld [vmem:[%s17233_s22 + $0xe24] ss:$8 sps:$4 sm:$0xff]  }
 0x233   : > { %10749 = vmatprep.subr.bf16.mxu1 %v15185_v5  ;;  %v15245_v5 = vld [vmem:[%s17233_s22 + $0xf24] ss:$8 sps:$4 sm:$0xff]  }
 0x235   : > { %10707 = vmatpush2.bf16.msra.mxu0 %v15180_v10  ;;  %v15240_v10 = vld [vmem:[%s17233_s22 + $0xe20] ss:$8 sps:$4 sm:$0xff]  }
 0x236   : > { %10750 = vmatpush2.bf16.msra.mxu1 %v15183_v12  ;;  %10708 = vmatprep.subr.bf16.mxu0 %v15188_v13  ;;  %v15243_v12 = vld [vmem:[%s17233_s22 + $0xf20] ss:$8 sps:$4 sm:$0xff]   ;;  %v15248_v13 = vld [vmem:[%s17233_s22 + $0xe14] ss:$8 sps:$4 sm:$0xff]  }
 0x237   : > { %10751 = vmatprep.subr.bf16.mxu1 %v15191_v46  ;;  %v15251_v46 = vld [vmem:[%s17233_s22 + $0xf14] ss:$8 sps:$4 sm:$0xff]  }
 0x239   : > { %10709 = vmatpush2.bf16.msra.mxu0 %v15186_v11  ;;  %v15246_v11 = vld [vmem:[%s17233_s22 + $0xe10] ss:$8 sps:$4 sm:$0xff]  }
 0x23a   : > { %10752 = vmatpush2.bf16.msra.mxu1 %v15189_v48  ;;  %10710 = vmatprep.subr.bf16.mxu0 %v15194_v49  ;;  %v15249_v48 = vld [vmem:[%s17233_s22 + $0xf10] ss:$8 sps:$4 sm:$0xff]   ;;  %v15254_v49 = vld [vmem:[%s17233_s22 + $0xe04] ss:$8 sps:$4 sm:$0xff]  }
 0x23b   : > { %10753 = vmatprep.subr.bf16.mxu1 %v15197_v50  ;;  %v15257_v50 = vld [vmem:[%s17233_s22 + $0xf04] ss:$8 sps:$4 sm:$0xff]  }
 0x23d   : > { %10711 = vmatpush2.bf16.msra.mxu0 %v15192_v51  ;;  %v15252_v51 = vld [vmem:[%s17233_s22 + $0xe00] ss:$8 sps:$4 sm:$0xff]  }
 0x23e   : > { %10754 = vmatpush2.bf16.msra.mxu1 %v15195_v52  ;;  %10712 = vmatprep.subr.bf16.mxu0 %v15200_v28  ;;  %v15255_v52 = vld [vmem:[%s17233_s22 + $0xf00] ss:$8 sps:$4 sm:$0xff]   ;;  %v15260_v28 = vld [vmem:[%s17233_s22 + $0xef4] ss:$8 sps:$4 sm:$0xff]  }
 0x23f   : > { %10755 = vmatprep.subr.bf16.mxu1 %v15203_v30  ;;  %v15263_v30 = vld [vmem:[%s17233_s22 + $0xff4] ss:$8 sps:$4 sm:$0xff]  }
 0x241   : > { %10713 = vmatpush2.bf16.msra.mxu0 %v15198_v31  ;;  %v15258_v31 = vld [vmem:[%s17233_s22 + $0xef0] ss:$8 sps:$4 sm:$0xff]  }
 0x242   : > { %10756 = vmatpush2.bf16.msra.mxu1 %v15201_v53  ;;  %10714 = vmatprep.subr.bf16.mxu0 %v15206_v54  ;;  %v15261_v53 = vld [vmem:[%s17233_s22 + $0xff0] ss:$8 sps:$4 sm:$0xff]   ;;  %v15266_v54 = vld [vmem:[%s17233_s22 + $0xee4] ss:$8 sps:$4 sm:$0xff]  }
 0x243   : > { %10757 = vmatprep.subr.bf16.mxu1 %v15209_v55  ;;  %v15269_v55 = vld [vmem:[%s17233_s22 + $0xfe4] ss:$8 sps:$4 sm:$0xff]  }
 0x245   : > { %10715 = vmatpush2.bf16.msra.mxu0 %v15204_v56  ;;  %v15264_v56 = vld [vmem:[%s17233_s22 + $0xee0] ss:$8 sps:$4 sm:$0xff]  }
 0x246   : > { %10758 = vmatpush2.bf16.msra.mxu1 %v15207_v29  ;;  %10770 = vmatprep.subr.bf16.mxu0 %v15212_v58  ;;  %v15267_v29 = vld [vmem:[%s17233_s22 + $0xfe0] ss:$8 sps:$4 sm:$0xff]   ;;  %v15272_v58 = vld [vmem:[%s17233_s22 + $0xed4] ss:$8 sps:$4 sm:$0xff]  }
 0x247   : > { %10813 = vmatprep.subr.bf16.mxu1 %v15215_v59  ;;  %v15275_v59 = vld [vmem:[%s17233_s22 + $0xfd4] ss:$8 sps:$4 sm:$0xff]  }
 0x248   : > { %v10460_v9 = vpop.f32.mrf.mxu0  ;;  %10717 = vmatmul.mubr.bf16.vlgmr.msra.gmra.mxu0 %v12713_v63  ;;  %v15273_v63 = vld [vmem:[%s17233_s22 + $0xfd0] ss:$8 sps:$4 sm:$0xff]  }
 0x249   : > { %v10503_v40 = vpop.f32.mrf.mxu1  ;;  %10760 = vmatmul.mubr.bf16.vlgmr.msra.gmra.mxu1 %v12715_v0  ;;  %v10461_v43 = vadd.f32 %v10460_v9, %v17846_v34  ;;  %10771 = vmatpush1.bf16.msra.mxu0 %v15210_v61  ;;  %v15270_v61 = vld [vmem:[%s17233_s22 + $0xed0] ss:$8 sps:$4 sm:$0xff]   ;;  %v15278_v0 = vld [vmem:[%s17233_s22 + $0xec4] ss:$8 sps:$4 sm:$0xff]  }
 0x24a   : > { %10814 = vmatpush1.bf16.msra.mxu1 %v15213_v1  ;;  %v10462_v44 = vpop.f32.mrf.mxu0  ;;  %10772 = vmatprep.subr.bf16.mxu0 %v15218_v7  ;;  %v15281_v1 = vld [vmem:[%s17233_s22 + $0xfc4] ss:$8 sps:$4 sm:$0xff]   ;;  %v15276_v7 = vld [vmem:[%s17233_s22 + $0xec0] ss:$8 sps:$4 sm:$0xff]  }
 0x24b   : > { %v10505_v47 = vpop.f32.mrf.mxu1  ;;  %10815 = vmatprep.subr.bf16.mxu1 %v15221_v42  ;;  %v17950_v16 = vadd.f32 %v10503_v40, %v10461_v43  ;;  %v10463_v17 = vadd.f32 %v10462_v44, %v17851_v57  ;;  %10802 = vmatprep.mubr.bf16.mxu0 %v12718_v41  ;;  %v15230_v57 = vld [vmem:[%s17233_s22 + $0xe44] ss:$8 sps:$4 sm:$0xff]   ;;  %v15279_v42 = vld [vmem:[%s17233_s22 + $0xfc0] ss:$8 sps:$4 sm:$0xff]   ;;  %v15282_v41 = vld [vmem:[%s17233_s22 + $0xeb0] ss:$8 sps:$4 sm:$0xff]  }
 0x24c   : > { %10845 = vmatprep.mubr.bf16.mxu1 %v12720_v8  ;;  %v10464_v20 = vpop.f32.mrf.mxu0  ;;  %v15285_v8 = vld [vmem:[%s17233_s22 + $0xfb0] ss:$8 sps:$4 sm:$0xff]   ;;  %v15290_v9 = vld [vmem:[%s17233_s22 + $0xea4] ss:$8 sps:$4 sm:$0xff]   ;;  %v15288_v43 = vld [vmem:[%s17233_s22 + $0xea0] ss:$8 sps:$4 sm:$0xff]  }
 0x24d   : > { %v10507_v34 = vpop.f32.mrf.mxu1  ;;  %v17955_v21 = vadd.f32 %v10505_v47, %v10463_v17  ;;  %v10465_v22 = vadd.f32 %v10464_v20, %v17856_v62  ;;  %10773 = vmatpush1.bf16.msra.mxu0 %v15216_v45  ;;  %v15228_v62 = vld [vmem:[%s17233_s22 + $0xe40] ss:$8 sps:$4 sm:$0xff]   ;;  %v15284_v45 = vld [vmem:[%s17233_s22 + $0xeb4] ss:$8 sps:$4 sm:$0xff]   ;;  %v15293_v40 = vld [vmem:[%s17233_s22 + $0xfa4] ss:$8 sps:$4 sm:$0xff]  }
 0x24e   : > { %10816 = vmatpush1.bf16.msra.mxu1 %v15219_v6  ;;  %v10466_v23 = vpop.f32.mrf.mxu0  ;;  %10774 = vmatprep.subr.bf16.mxu0 %v15224_v14  ;;  %v15287_v6 = vld [vmem:[%s17233_s22 + $0xfb4] ss:$8 sps:$4 sm:$0xff]   ;;  %v15291_v44 = vld [vmem:[%s17233_s22 + $0xfa0] ss:$8 sps:$4 sm:$0xff]   ;;  %v15297_v17 = vld [vmem:[%s17233_s22 + $0xf90] ss:$8 sps:$4 sm:$0xff]  }
 0x24f   : > { %10817 = vmatprep.subr.bf16.mxu1 %v15227_v15  ;;  %v17960_v33 = vadd.f32 %v10507_v34, %v10465_v22  ;;  %v10467_v35 = vadd.f32 %v10466_v23, %v17859_v2  ;;  %v10509_v36 = vpop.f32.mrf.mxu1  ;;  %v15234_v2 = vld [vmem:[%s17233_s22 + $0xe30] ss:$8 sps:$4 sm:$0xff]   ;;  %v15296_v47 = vld [vmem:[%s17233_s22 + $0xe94] ss:$8 sps:$4 sm:$0xff]   ;;  %v15300_v20 = vld [vmem:[%s17233_s22 + $0xe80] ss:$8 sps:$4 sm:$0xff]  }
 0x250   : > { %v15299_v14 = vld [vmem:[%s17233_s22 + $0xf94] ss:$8 sps:$4 sm:$0xff]   ;;  %v15294_v15 = vld [vmem:[%s17233_s22 + $0xe90] ss:$8 sps:$4 sm:$0xff]   ;;  %v15303_v34 = vld [vmem:[%s17233_s22 + $0xf80] ss:$8 sps:$4 sm:$0xff]  }
 0x251   : > { %v17963_v60 = vadd.f32 %v10509_v36, %v10467_v35  ;;  %10775 = vmatpush1.bf16.msra.mxu0 %v15222_v18  ;;  %v15302_v18 = vld [vmem:[%s17233_s22 + $0xe84] ss:$8 sps:$4 sm:$0xff]   ;;  %v15308_v22 = vld [vmem:[%s17233_s22 + $0x1074] ss:$8 sps:$4 sm:$0xff]   ;;  %v12717_v35 = vcombine.low %v17916_v37, %v17926_v27  ;;  %v12719_v36 = vcombine.low %v17931_v3, %v17936_v4  ;;  %v15309_v37 = vld [vmem:[%s17233_s22 + $0x1170] ss:$8 sps:$4 sm:$0xff]  }
 0x252   : > { %10818 = vmatpush1.bf16.msra.mxu1 %v15225_v19  ;;  %10776 = vmatprep.subr.bf16.mxu0 %v15230_v57  ;;  %v15305_v19 = vld [vmem:[%s17233_s22 + $0xf84] ss:$8 sps:$4 sm:$0xff]   ;;  %v15311_v23 = vld [vmem:[%s17233_s22 + $0x1174] ss:$8 sps:$4 sm:$0xff]   ;;  %v15312_v4 = vld [vmem:[%s17233_s22 + $0x1060] ss:$8 sps:$4 sm:$0xff]  }
 0x253   : > { %10819 = vmatprep.subr.bf16.mxu1 %v15233_v32  ;;  %v18020_v57 = vld [vmem:[%s19885_s0 + $0x80] sm:$0xff]  ;;  %v15306_v32 = vld [vmem:[%s17233_s22 + $0x1070] ss:$8 sps:$4 sm:$0xff]  }
 0x254   : > { %v15314_v27 = vld [vmem:[%s17233_s22 + $0x1064] ss:$8 sps:$4 sm:$0xff]  }
 0x255   : > { %10777 = vmatpush1.bf16.msra.mxu0 %v15228_v62  ;;  %v18030_v62 = vld [vmem:[%s19885_s0 + $0x200] sm:$0xff] }
 0x256   : > { %10820 = vmatpush1.bf16.msra.mxu1 %v15231_v24  ;;  %10778 = vmatprep.subr.bf16.mxu0 %v15236_v25  ;;  %v18035_v24 = vld [vmem:[%s19885_s0 + $0x88] sm:$0xff] }
 0x257   : > { %10821 = vmatprep.subr.bf16.mxu1 %v15239_v26  ;;  %v18040_v25 = vld [vmem:[%s19885_s0 + $0x208] sm:$0xff] }
 0x258   : > { %v15317_v3 = vld [vmem:[%s17233_s22 + $0x1164] ss:$8 sps:$4 sm:$0xff]   ;;  %v15315_v26 = vld [vmem:[%s17233_s22 + $0x1160] ss:$8 sps:$4 sm:$0xff]  }
 0x259   : > { %10779 = vmatpush1.bf16.msra.mxu0 %v15234_v2  ;;  %v12722_v2 = vcombine.high %v18020_v57, %v18030_v62 }
 0x25a   : > { %10822 = vmatpush1.bf16.msra.mxu1 %v15237_v38  ;;  %10780 = vmatprep.subr.bf16.mxu0 %v15242_v39  ;;  %v12724_v38 = vcombine.high %v18035_v24, %v18040_v25 }
 0x25b   : > { %10823 = vmatprep.subr.bf16.mxu1 %v15245_v5 }
 0x25d   : > { %10781 = vmatpush1.bf16.msra.mxu0 %v15240_v10 }
 0x25e   : > { %10824 = vmatpush1.bf16.msra.mxu1 %v15243_v12  ;;  %10782 = vmatprep.subr.bf16.mxu0 %v15248_v13 }
 0x25f   : > { %10825 = vmatprep.subr.bf16.mxu1 %v15251_v46  ;;  %v15320_v46 = vld [vmem:[%s17233_s22 + $0x1054] ss:$8 sps:$4 sm:$0xff]  }
 0x261   : > { %10783 = vmatpush1.bf16.msra.mxu0 %v15246_v11  ;;  %v15323_v11 = vld [vmem:[%s17233_s22 + $0x1154] ss:$8 sps:$4 sm:$0xff]  }
 0x262   : > { %10826 = vmatpush1.bf16.msra.mxu1 %v15249_v48  ;;  %10784 = vmatprep.subr.bf16.mxu0 %v15254_v49 }
 0x263   : > { %10827 = vmatprep.subr.bf16.mxu1 %v15257_v50  ;;  %v15318_v50 = vld [vmem:[%s17233_s22 + $0x1050] ss:$8 sps:$4 sm:$0xff]  }
 0x265   : > { %10785 = vmatpush1.bf16.msra.mxu0 %v15252_v51  ;;  %v15321_v51 = vld [vmem:[%s17233_s22 + $0x1150] ss:$8 sps:$4 sm:$0xff]  }
 0x266   : > { %10828 = vmatpush1.bf16.msra.mxu1 %v15255_v52  ;;  %10786 = vmatprep.subr.bf16.mxu0 %v15260_v28 }
 0x267   : > { %10829 = vmatprep.subr.bf16.mxu1 %v15263_v30 }
 0x269   : > { %10787 = vmatpush2.bf16.msra.mxu0 %v15258_v31 }
 0x26a   : > { %10830 = vmatpush2.bf16.msra.mxu1 %v15261_v53  ;;  %10788 = vmatprep.subr.bf16.mxu0 %v15266_v54  ;;  %v15329_v53 = vld [vmem:[%s17233_s22 + $0x1144] ss:$8 sps:$4 sm:$0xff]  }
 0x26b   : > { %10831 = vmatprep.subr.bf16.mxu1 %v15269_v55 }
 0x26d   : > { %10789 = vmatpush2.bf16.msra.mxu0 %v15264_v56 }
 0x26e   : > { %10832 = vmatpush2.bf16.msra.mxu1 %v15267_v29  ;;  %10790 = vmatprep.subr.bf16.mxu0 %v15272_v58  ;;  %v15327_v58 = vld [vmem:[%s17233_s22 + $0x1140] ss:$8 sps:$4 sm:$0xff]  }
 0x26f   : > { %10833 = vmatprep.subr.bf16.mxu1 %v15275_v59  ;;  %v15332_v59 = vld [vmem:[%s17233_s22 + $0x1034] ss:$8 sps:$4 sm:$0xff]  }
 0x271   : > { %10791 = vmatpush2.bf16.msra.mxu0 %v15270_v61  ;;  %v15335_v61 = vld [vmem:[%s17233_s22 + $0x1134] ss:$8 sps:$4 sm:$0xff]  }
 0x272   : > { %10834 = vmatpush2.bf16.msra.mxu1 %v15273_v63  ;;  %10792 = vmatprep.subr.bf16.mxu0 %v15278_v0  ;;  %v15333_v63 = vld [vmem:[%s17233_s22 + $0x1130] ss:$8 sps:$4 sm:$0xff]   ;;  %v15338_v0 = vld [vmem:[%s17233_s22 + $0x1024] ss:$8 sps:$4 sm:$0xff]  }
 0x273   : > { %10835 = vmatprep.subr.bf16.mxu1 %v15281_v1  ;;  %v15341_v1 = vld [vmem:[%s17233_s22 + $0x1124] ss:$8 sps:$4 sm:$0xff]  }
 0x275   : > { %10793 = vmatpush2.bf16.msra.mxu0 %v15276_v7  ;;  %v15336_v7 = vld [vmem:[%s17233_s22 + $0x1020] ss:$8 sps:$4 sm:$0xff]  }
 0x276   : > { %10836 = vmatpush2.bf16.msra.mxu1 %v15279_v42  ;;  %10794 = vmatprep.subr.bf16.mxu0 %v15284_v45  ;;  %v15339_v42 = vld [vmem:[%s17233_s22 + $0x1120] ss:$8 sps:$4 sm:$0xff]   ;;  %v15344_v45 = vld [vmem:[%s17233_s22 + $0x1014] ss:$8 sps:$4 sm:$0xff]  }
 0x277   : > { %10837 = vmatprep.subr.bf16.mxu1 %v15287_v6  ;;  %v15347_v6 = vld [vmem:[%s17233_s22 + $0x1114] ss:$8 sps:$4 sm:$0xff]  }
 0x279   : > { %10795 = vmatpush2.bf16.msra.mxu0 %v15282_v41  ;;  %v15342_v41 = vld [vmem:[%s17233_s22 + $0x1010] ss:$8 sps:$4 sm:$0xff]  }
 0x27a   : > { %10838 = vmatpush2.bf16.msra.mxu1 %v15285_v8  ;;  %10796 = vmatprep.subr.bf16.mxu0 %v15290_v9  ;;  %v15345_v8 = vld [vmem:[%s17233_s22 + $0x1110] ss:$8 sps:$4 sm:$0xff]   ;;  %v15350_v9 = vld [vmem:[%s17233_s22 + $0x1004] ss:$8 sps:$4 sm:$0xff]  }
 0x27b   : > { %10839 = vmatprep.subr.bf16.mxu1 %v15293_v40  ;;  %v15353_v40 = vld [vmem:[%s17233_s22 + $0x1104] ss:$8 sps:$4 sm:$0xff]  }
 0x27d   : > { %10797 = vmatpush2.bf16.msra.mxu0 %v15288_v43  ;;  %v15348_v43 = vld [vmem:[%s17233_s22 + $0x1000] ss:$8 sps:$4 sm:$0xff]  }
 0x27e   : > { %10840 = vmatpush2.bf16.msra.mxu1 %v15291_v44  ;;  %10798 = vmatprep.subr.bf16.mxu0 %v15296_v47  ;;  %v15351_v44 = vld [vmem:[%s17233_s22 + $0x1100] ss:$8 sps:$4 sm:$0xff]   ;;  %v15356_v47 = vld [vmem:[%s17233_s22 + $0x10f4] ss:$8 sps:$4 sm:$0xff]  }
 0x27f   : > { %10841 = vmatprep.subr.bf16.mxu1 %v15299_v14  ;;  %v15359_v14 = vld [vmem:[%s17233_s22 + $0x11f4] ss:$8 sps:$4 sm:$0xff]  }
 0x281   : > { %10799 = vmatpush2.bf16.msra.mxu0 %v15294_v15  ;;  %v15354_v15 = vld [vmem:[%s17233_s22 + $0x10f0] ss:$8 sps:$4 sm:$0xff]  }
 0x282   : > { %10842 = vmatpush2.bf16.msra.mxu1 %v15297_v17  ;;  %10800 = vmatprep.subr.bf16.mxu0 %v15302_v18  ;;  %v15357_v17 = vld [vmem:[%s17233_s22 + $0x11f0] ss:$8 sps:$4 sm:$0xff]   ;;  %v15362_v18 = vld [vmem:[%s17233_s22 + $0x10e4] ss:$8 sps:$4 sm:$0xff]  }
 0x283   : > { %10843 = vmatprep.subr.bf16.mxu1 %v15305_v19  ;;  %v15365_v19 = vld [vmem:[%s17233_s22 + $0x11e4] ss:$8 sps:$4 sm:$0xff]  }
 0x285   : > { %10801 = vmatpush2.bf16.msra.mxu0 %v15300_v20  ;;  %v15360_v20 = vld [vmem:[%s17233_s22 + $0x10e0] ss:$8 sps:$4 sm:$0xff]  }
 0x286   : > { %10844 = vmatpush2.bf16.msra.mxu1 %v15303_v34  ;;  %10856 = vmatprep.subr.bf16.mxu0 %v15308_v22  ;;  %v15363_v34 = vld [vmem:[%s17233_s22 + $0x11e0] ss:$8 sps:$4 sm:$0xff]   ;;  %v15368_v22 = vld [vmem:[%s17233_s22 + $0x10d4] ss:$8 sps:$4 sm:$0xff]  }
 0x287   : > { %10899 = vmatprep.subr.bf16.mxu1 %v15311_v23  ;;  %v15371_v23 = vld [vmem:[%s17233_s22 + $0x11d4] ss:$8 sps:$4 sm:$0xff]  }
 0x288   : > { %v10546_v39 = vpop.f32.mrf.mxu0  ;;  %10803 = vmatmul.mubr.bf16.vlgmr.msra.gmra.mxu0 %v12717_v35  ;;  %v15369_v35 = vld [vmem:[%s17233_s22 + $0x11d0] ss:$8 sps:$4 sm:$0xff]  }
 0x289   : > { %v10589_v5 = vpop.f32.mrf.mxu1  ;;  %10846 = vmatmul.mubr.bf16.vlgmr.msra.gmra.mxu1 %v12719_v36  ;;  %v10547_v10 = vadd.f32 %v10546_v39, %v17950_v16  ;;  %10857 = vmatpush1.bf16.msra.mxu0 %v15306_v32  ;;  %v15366_v32 = vld [vmem:[%s17233_s22 + $0x10d0] ss:$8 sps:$4 sm:$0xff]   ;;  %v15374_v36 = vld [vmem:[%s17233_s22 + $0x10c4] ss:$8 sps:$4 sm:$0xff]  }
 0x28a   : > { %10900 = vmatpush1.bf16.msra.mxu1 %v15309_v37  ;;  %v10548_v12 = vpop.f32.mrf.mxu0  ;;  %10858 = vmatprep.subr.bf16.mxu0 %v15314_v27  ;;  %v15377_v37 = vld [vmem:[%s17233_s22 + $0x11c4] ss:$8 sps:$4 sm:$0xff]   ;;  %v15372_v27 = vld [vmem:[%s17233_s22 + $0x10c0] ss:$8 sps:$4 sm:$0xff]  }
 0x28b   : > { %v10591_v13 = vpop.f32.mrf.mxu1  ;;  %10901 = vmatprep.subr.bf16.mxu1 %v15317_v3  ;;  %v18054_v48 = vadd.f32 %v10589_v5, %v10547_v10  ;;  %v10549_v49 = vadd.f32 %v10548_v12, %v17955_v21  ;;  %10888 = vmatprep.mubr.bf16.mxu0 %v12722_v2  ;;  %v15326_v21 = vld [vmem:[%s17233_s22 + $0x1044] ss:$8 sps:$4 sm:$0xff]   ;;  %v15375_v3 = vld [vmem:[%s17233_s22 + $0x11c0] ss:$8 sps:$4 sm:$0xff]   ;;  %v15378_v2 = vld [vmem:[%s17233_s22 + $0x10b0] ss:$8 sps:$4 sm:$0xff]  }
 0x28c   : > { %10931 = vmatprep.mubr.bf16.mxu1 %v12724_v38  ;;  %v10550_v52 = vpop.f32.mrf.mxu0  ;;  %v15381_v38 = vld [vmem:[%s17233_s22 + $0x11b0] ss:$8 sps:$4 sm:$0xff]   ;;  %v15386_v39 = vld [vmem:[%s17233_s22 + $0x10a4] ss:$8 sps:$4 sm:$0xff]   ;;  %v15384_v10 = vld [vmem:[%s17233_s22 + $0x10a0] ss:$8 sps:$4 sm:$0xff]  }
 0x28d   : > { %v10593_v16 = vpop.f32.mrf.mxu1  ;;  %v18059_v28 = vadd.f32 %v10591_v13, %v10549_v49  ;;  %v10551_v30 = vadd.f32 %v10550_v52, %v17960_v33  ;;  %10859 = vmatpush1.bf16.msra.mxu0 %v15312_v4  ;;  %v15324_v33 = vld [vmem:[%s17233_s22 + $0x1040] ss:$8 sps:$4 sm:$0xff]   ;;  %v15380_v4 = vld [vmem:[%s17233_s22 + $0x10b4] ss:$8 sps:$4 sm:$0xff]   ;;  %v15389_v5 = vld [vmem:[%s17233_s22 + $0x11a4] ss:$8 sps:$4 sm:$0xff]  }
 0x28e   : > { %10902 = vmatpush1.bf16.msra.mxu1 %v15315_v26  ;;  %v10552_v31 = vpop.f32.mrf.mxu0  ;;  %10860 = vmatprep.subr.bf16.mxu0 %v15320_v46  ;;  %v15383_v26 = vld [vmem:[%s17233_s22 + $0x11b4] ss:$8 sps:$4 sm:$0xff]   ;;  %v15387_v12 = vld [vmem:[%s17233_s22 + $0x11a0] ss:$8 sps:$4 sm:$0xff]   ;;  %v15393_v49 = vld [vmem:[%s17233_s22 + $0x1190] ss:$8 sps:$4 sm:$0xff]  }
 0x28f   : > { %10903 = vmatprep.subr.bf16.mxu1 %v15323_v11  ;;  %v18064_v54 = vadd.f32 %v10593_v16, %v10551_v30  ;;  %v10553_v55 = vadd.f32 %v10552_v31, %v17963_v60  ;;  %v10595_v56 = vpop.f32.mrf.mxu1  ;;  %v15330_v60 = vld [vmem:[%s17233_s22 + $0x1030] ss:$8 sps:$4 sm:$0xff]   ;;  %v15392_v13 = vld [vmem:[%s17233_s22 + $0x1094] ss:$8 sps:$4 sm:$0xff]   ;;  %v15396_v52 = vld [vmem:[%s17233_s22 + $0x1080] ss:$8 sps:$4 sm:$0xff]  }
 0x290   : > { %v15395_v46 = vld [vmem:[%s17233_s22 + $0x1194] ss:$8 sps:$4 sm:$0xff]   ;;  %v15390_v11 = vld [vmem:[%s17233_s22 + $0x1090] ss:$8 sps:$4 sm:$0xff]   ;;  %v15399_v16 = vld [vmem:[%s17233_s22 + $0x1180] ss:$8 sps:$4 sm:$0xff]  }
 0x291   : > { %v18067_v29 = vadd.f32 %v10595_v56, %v10553_v55  ;;  %10861 = vmatpush1.bf16.msra.mxu0 %v15318_v50  ;;  %v15398_v50 = vld [vmem:[%s17233_s22 + $0x1084] ss:$8 sps:$4 sm:$0xff]   ;;  %v15404_v30 = vld [vmem:[%s17233_s22 + $0x1274] ss:$8 sps:$4 sm:$0xff]   ;;  %v12721_v55 = vcombine.low %v18020_v57, %v18030_v62  ;;  %v12723_v56 = vcombine.low %v18035_v24, %v18040_v25  ;;  %v15405_v57 = vld [vmem:[%s17233_s22 + $0x1370] ss:$8 sps:$4 sm:$0xff]  }
 0x292   : > { %10904 = vmatpush1.bf16.msra.mxu1 %v15321_v51  ;;  %10862 = vmatprep.subr.bf16.mxu0 %v15326_v21  ;;  %v15401_v51 = vld [vmem:[%s17233_s22 + $0x1184] ss:$8 sps:$4 sm:$0xff]   ;;  %v15407_v31 = vld [vmem:[%s17233_s22 + $0x1374] ss:$8 sps:$4 sm:$0xff]   ;;  %v15408_v25 = vld [vmem:[%s17233_s22 + $0x1260] ss:$8 sps:$4 sm:$0xff]  }
 0x293   : > { %10905 = vmatprep.subr.bf16.mxu1 %v15329_v53  ;;  %v18124_v21 = vld [vmem:[%s19885_s0 + $0x90] sm:$0xff]  ;;  %v15410_v62 = vld [vmem:[%s17233_s22 + $0x1264] ss:$8 sps:$4 sm:$0xff]  }
 0x294   : > { %v15402_v53 = vld [vmem:[%s17233_s22 + $0x1270] ss:$8 sps:$4 sm:$0xff]   ;;  %v15413_v24 = vld [vmem:[%s17233_s22 + $0x1364] ss:$8 sps:$4 sm:$0xff]  }
 0x295   : > { %10863 = vmatpush1.bf16.msra.mxu0 %v15324_v33  ;;  %v18134_v33 = vld [vmem:[%s19885_s0 + $0x210] sm:$0xff] }
 0x296   : > { %10906 = vmatpush1.bf16.msra.mxu1 %v15327_v58  ;;  %10864 = vmatprep.subr.bf16.mxu0 %v15332_v59  ;;  %v18139_v58 = vld [vmem:[%s19885_s0 + $0x98] sm:$0xff] }
 0x297   : > { %10907 = vmatprep.subr.bf16.mxu1 %v15335_v61  ;;  %v18144_v59 = vld [vmem:[%s19885_s0 + $0x218] sm:$0xff]  ;;  %v15411_v61 = vld [vmem:[%s17233_s22 + $0x1360] ss:$8 sps:$4 sm:$0xff]  }
 0x299   : > { %10865 = vmatpush1.bf16.msra.mxu0 %v15330_v60  ;;  %v12726_v60 = vcombine.high %v18124_v21, %v18134_v33 }
 0x29a   : > { %10908 = vmatpush1.bf16.msra.mxu1 %v15333_v63  ;;  %10866 = vmatprep.subr.bf16.mxu0 %v15338_v0  ;;  %v12728_v63 = vcombine.high %v18139_v58, %v18144_v59 }
 0x29b   : > { %10909 = vmatprep.subr.bf16.mxu1 %v15341_v1 }
 0x29d   : > { %10867 = vmatpush1.bf16.msra.mxu0 %v15336_v7 }
 0x29e   : > { %10910 = vmatpush1.bf16.msra.mxu1 %v15339_v42  ;;  %10868 = vmatprep.subr.bf16.mxu0 %v15344_v45 }
 0x29f   : > { %10911 = vmatprep.subr.bf16.mxu1 %v15347_v6  ;;  %v15416_v6 = vld [vmem:[%s17233_s22 + $0x1254] ss:$8 sps:$4 sm:$0xff]  }
 0x2a1   : > { %10869 = vmatpush1.bf16.msra.mxu0 %v15342_v41  ;;  %v15419_v41 = vld [vmem:[%s17233_s22 + $0x1354] ss:$8 sps:$4 sm:$0xff]  }
 0x2a2   : > { %10912 = vmatpush1.bf16.msra.mxu1 %v15345_v8  ;;  %10870 = vmatprep.subr.bf16.mxu0 %v15350_v9 }
 0x2a3   : > { %10913 = vmatprep.subr.bf16.mxu1 %v15353_v40  ;;  %v15414_v40 = vld [vmem:[%s17233_s22 + $0x1250] ss:$8 sps:$4 sm:$0xff]  }
 0x2a5   : > { %10871 = vmatpush1.bf16.msra.mxu0 %v15348_v43  ;;  %v15417_v43 = vld [vmem:[%s17233_s22 + $0x1350] ss:$8 sps:$4 sm:$0xff]  }
 0x2a6   : > { %10914 = vmatpush1.bf16.msra.mxu1 %v15351_v44  ;;  %10872 = vmatprep.subr.bf16.mxu0 %v15356_v47 }
 0x2a7   : > { %10915 = vmatprep.subr.bf16.mxu1 %v15359_v14 }
 0x2a9   : > { %10873 = vmatpush2.bf16.msra.mxu0 %v15354_v15 }
 0x2aa   : > { %10916 = vmatpush2.bf16.msra.mxu1 %v15357_v17  ;;  %10874 = vmatprep.subr.bf16.mxu0 %v15362_v18  ;;  %v15425_v17 = vld [vmem:[%s17233_s22 + $0x1344] ss:$8 sps:$4 sm:$0xff]  }
 0x2ab   : > { %10917 = vmatprep.subr.bf16.mxu1 %v15365_v19 }
 0x2ad   : > { %10875 = vmatpush2.bf16.msra.mxu0 %v15360_v20 }
 0x2ae   : > { %10918 = vmatpush2.bf16.msra.mxu1 %v15363_v34  ;;  %10876 = vmatprep.subr.bf16.mxu0 %v15368_v22  ;;  %v15423_v22 = vld [vmem:[%s17233_s22 + $0x1340] ss:$8 sps:$4 sm:$0xff]  }
 0x2af   : > { %10919 = vmatprep.subr.bf16.mxu1 %v15371_v23  ;;  %v15428_v23 = vld [vmem:[%s17233_s22 + $0x1234] ss:$8 sps:$4 sm:$0xff]  }
 0x2b1   : > { %10877 = vmatpush2.bf16.msra.mxu0 %v15366_v32  ;;  %v15431_v32 = vld [vmem:[%s17233_s22 + $0x1334] ss:$8 sps:$4 sm:$0xff]  }
 0x2b2   : > { %10920 = vmatpush2.bf16.msra.mxu1 %v15369_v35  ;;  %10878 = vmatprep.subr.bf16.mxu0 %v15374_v36  ;;  %v15429_v35 = vld [vmem:[%s17233_s22 + $0x1330] ss:$8 sps:$4 sm:$0xff]   ;;  %v15434_v36 = vld [vmem:[%s17233_s22 + $0x1224] ss:$8 sps:$4 sm:$0xff]  }
 0x2b3   : > { %10921 = vmatprep.subr.bf16.mxu1 %v15377_v37  ;;  %v15437_v37 = vld [vmem:[%s17233_s22 + $0x1324] ss:$8 sps:$4 sm:$0xff]  }
 0x2b5   : > { %10879 = vmatpush2.bf16.msra.mxu0 %v15372_v27  ;;  %v15432_v27 = vld [vmem:[%s17233_s22 + $0x1220] ss:$8 sps:$4 sm:$0xff]  }
 0x2b6   : > { %10922 = vmatpush2.bf16.msra.mxu1 %v15375_v3  ;;  %10880 = vmatprep.subr.bf16.mxu0 %v15380_v4  ;;  %v15435_v3 = vld [vmem:[%s17233_s22 + $0x1320] ss:$8 sps:$4 sm:$0xff]   ;;  %v15440_v4 = vld [vmem:[%s17233_s22 + $0x1214] ss:$8 sps:$4 sm:$0xff]  }
 0x2b7   : > { %10923 = vmatprep.subr.bf16.mxu1 %v15383_v26  ;;  %v15443_v26 = vld [vmem:[%s17233_s22 + $0x1314] ss:$8 sps:$4 sm:$0xff]  }
 0x2b9   : > { %10881 = vmatpush2.bf16.msra.mxu0 %v15378_v2  ;;  %v15438_v2 = vld [vmem:[%s17233_s22 + $0x1210] ss:$8 sps:$4 sm:$0xff]  }
 0x2ba   : > { %10924 = vmatpush2.bf16.msra.mxu1 %v15381_v38  ;;  %10882 = vmatprep.subr.bf16.mxu0 %v15386_v39  ;;  %v15441_v38 = vld [vmem:[%s17233_s22 + $0x1310] ss:$8 sps:$4 sm:$0xff]   ;;  %v15446_v39 = vld [vmem:[%s17233_s22 + $0x1204] ss:$8 sps:$4 sm:$0xff]  }
 0x2bb   : > { %10925 = vmatprep.subr.bf16.mxu1 %v15389_v5  ;;  %v15449_v5 = vld [vmem:[%s17233_s22 + $0x1304] ss:$8 sps:$4 sm:$0xff]  }
 0x2bd   : > { %10883 = vmatpush2.bf16.msra.mxu0 %v15384_v10  ;;  %v15444_v10 = vld [vmem:[%s17233_s22 + $0x1200] ss:$8 sps:$4 sm:$0xff]  }
 0x2be   : > { %10926 = vmatpush2.bf16.msra.mxu1 %v15387_v12  ;;  %10884 = vmatprep.subr.bf16.mxu0 %v15392_v13  ;;  %v15447_v12 = vld [vmem:[%s17233_s22 + $0x1300] ss:$8 sps:$4 sm:$0xff]   ;;  %v15452_v13 = vld [vmem:[%s17233_s22 + $0x12f4] ss:$8 sps:$4 sm:$0xff]  }
 0x2bf   : > { %10927 = vmatprep.subr.bf16.mxu1 %v15395_v46  ;;  %v15455_v46 = vld [vmem:[%s17233_s22 + $0x13f4] ss:$8 sps:$4 sm:$0xff]  }
 0x2c1   : > { %10885 = vmatpush2.bf16.msra.mxu0 %v15390_v11  ;;  %v15450_v11 = vld [vmem:[%s17233_s22 + $0x12f0] ss:$8 sps:$4 sm:$0xff]  }
 0x2c2   : > { %10928 = vmatpush2.bf16.msra.mxu1 %v15393_v49  ;;  %10886 = vmatprep.subr.bf16.mxu0 %v15398_v50  ;;  %v15453_v49 = vld [vmem:[%s17233_s22 + $0x13f0] ss:$8 sps:$4 sm:$0xff]   ;;  %v15458_v50 = vld [vmem:[%s17233_s22 + $0x12e4] ss:$8 sps:$4 sm:$0xff]  }
 0x2c3   : > { %10929 = vmatprep.subr.bf16.mxu1 %v15401_v51  ;;  %v15461_v51 = vld [vmem:[%s17233_s22 + $0x13e4] ss:$8 sps:$4 sm:$0xff]  }
 0x2c5   : > { %10887 = vmatpush2.bf16.msra.mxu0 %v15396_v52  ;;  %v15456_v52 = vld [vmem:[%s17233_s22 + $0x12e0] ss:$8 sps:$4 sm:$0xff]  }
 0x2c6   : > { %10930 = vmatpush2.bf16.msra.mxu1 %v15399_v16  ;;  %10942 = vmatprep.subr.bf16.mxu0 %v15404_v30  ;;  %v15459_v16 = vld [vmem:[%s17233_s22 + $0x13e0] ss:$8 sps:$4 sm:$0xff]   ;;  %v15464_v30 = vld [vmem:[%s17233_s22 + $0x12d4] ss:$8 sps:$4 sm:$0xff]  }
 0x2c7   : > { %10985 = vmatprep.subr.bf16.mxu1 %v15407_v31  ;;  %v15467_v31 = vld [vmem:[%s17233_s22 + $0x13d4] ss:$8 sps:$4 sm:$0xff]  }
 0x2c8   : > { %v10632_v0 = vpop.f32.mrf.mxu0  ;;  %10889 = vmatmul.mubr.bf16.vlgmr.msra.gmra.mxu0 %v12721_v55  ;;  %v15465_v55 = vld [vmem:[%s17233_s22 + $0x13d0] ss:$8 sps:$4 sm:$0xff]  }
 0x2c9   : > { %v10675_v1 = vpop.f32.mrf.mxu1  ;;  %10932 = vmatmul.mubr.bf16.vlgmr.msra.gmra.mxu1 %v12723_v56  ;;  %v10633_v7 = vadd.f32 %v10632_v0, %v18054_v48  ;;  %10943 = vmatpush1.bf16.msra.mxu0 %v15402_v53  ;;  %v15462_v53 = vld [vmem:[%s17233_s22 + $0x12d0] ss:$8 sps:$4 sm:$0xff]   ;;  %v15470_v56 = vld [vmem:[%s17233_s22 + $0x12c4] ss:$8 sps:$4 sm:$0xff]  }
 0x2ca   : > { %10986 = vmatpush1.bf16.msra.mxu1 %v15405_v57  ;;  %v10634_v42 = vpop.f32.mrf.mxu0  ;;  %10944 = vmatprep.subr.bf16.mxu0 %v15410_v62  ;;  %v15473_v57 = vld [vmem:[%s17233_s22 + $0x13c4] ss:$8 sps:$4 sm:$0xff]   ;;  %v15468_v62 = vld [vmem:[%s17233_s22 + $0x12c0] ss:$8 sps:$4 sm:$0xff]  }
 0x2cb   : > { %v10677_v45 = vpop.f32.mrf.mxu1  ;;  %10987 = vmatprep.subr.bf16.mxu1 %v15413_v24  ;;  %v18158_v8 = vadd.f32 %v10675_v1, %v10633_v7  ;;  %v10635_v9 = vadd.f32 %v10634_v42, %v18059_v28  ;;  %10974 = vmatprep.mubr.bf16.mxu0 %v12726_v60  ;;  %v15422_v28 = vld [vmem:[%s17233_s22 + $0x1244] ss:$8 sps:$4 sm:$0xff]   ;;  %v15471_v24 = vld [vmem:[%s17233_s22 + $0x13c0] ss:$8 sps:$4 sm:$0xff]   ;;  %v15474_v60 = vld [vmem:[%s17233_s22 + $0x12b0] ss:$8 sps:$4 sm:$0xff]  }
 0x2cc   : > { %11017 = vmatprep.mubr.bf16.mxu1 %v12728_v63  ;;  %v10636_v44 = vpop.f32.mrf.mxu0  ;;  %v15477_v63 = vld [vmem:[%s17233_s22 + $0x13b0] ss:$8 sps:$4 sm:$0xff]   ;;  %v15482_v0 = vld [vmem:[%s17233_s22 + $0x12a4] ss:$8 sps:$4 sm:$0xff]   ;;  %v15480_v7 = vld [vmem:[%s17233_s22 + $0x12a0] ss:$8 sps:$4 sm:$0xff]  }
 0x2cd   : > { %v10679_v48 = vpop.f32.mrf.mxu1  ;;  %v18163_v47 = vadd.f32 %v10677_v45, %v10635_v9  ;;  %v10637_v14 = vadd.f32 %v10636_v44, %v18064_v54  ;;  %10945 = vmatpush1.bf16.msra.mxu0 %v15408_v25  ;;  %v15420_v54 = vld [vmem:[%s17233_s22 + $0x1240] ss:$8 sps:$4 sm:$0xff]   ;;  %v15476_v25 = vld [vmem:[%s17233_s22 + $0x12b4] ss:$8 sps:$4 sm:$0xff]   ;;  %v15485_v1 = vld [vmem:[%s17233_s22 + $0x13a4] ss:$8 sps:$4 sm:$0xff]  }
 0x2ce   : > { %10988 = vmatpush1.bf16.msra.mxu1 %v15411_v61  ;;  %v10638_v15 = vpop.f32.mrf.mxu0  ;;  %10946 = vmatprep.subr.bf16.mxu0 %v15416_v6  ;;  %v15479_v61 = vld [vmem:[%s17233_s22 + $0x13b4] ss:$8 sps:$4 sm:$0xff]   ;;  %v15483_v42 = vld [vmem:[%s17233_s22 + $0x13a0] ss:$8 sps:$4 sm:$0xff]   ;;  %v15489_v9 = vld [vmem:[%s17233_s22 + $0x1390] ss:$8 sps:$4 sm:$0xff]  }
 0x2cf   : > { %10989 = vmatprep.subr.bf16.mxu1 %v15419_v41  ;;  %v18168_v18 = vadd.f32 %v10679_v48, %v10637_v14  ;;  %v10639_v19 = vadd.f32 %v10638_v15, %v18067_v29  ;;  %v10681_v20 = vpop.f32.mrf.mxu1  ;;  %v15426_v29 = vld [vmem:[%s17233_s22 + $0x1230] ss:$8 sps:$4 sm:$0xff]   ;;  %v15488_v45 = vld [vmem:[%s17233_s22 + $0x1294] ss:$8 sps:$4 sm:$0xff]   ;;  %v15492_v44 = vld [vmem:[%s17233_s22 + $0x1280] ss:$8 sps:$4 sm:$0xff]  }
 0x2d0   : > { %v15491_v6 = vld [vmem:[%s17233_s22 + $0x1394] ss:$8 sps:$4 sm:$0xff]   ;;  %v15486_v41 = vld [vmem:[%s17233_s22 + $0x1290] ss:$8 sps:$4 sm:$0xff]   ;;  %v15495_v48 = vld [vmem:[%s17233_s22 + $0x1380] ss:$8 sps:$4 sm:$0xff]  }
 0x2d1   : > { %v18171_v34 = vadd.f32 %v10681_v20, %v10639_v19  ;;  %10947 = vmatpush1.bf16.msra.mxu0 %v15414_v40  ;;  %v15494_v40 = vld [vmem:[%s17233_s22 + $0x1284] ss:$8 sps:$4 sm:$0xff]   ;;  %v15500_v14 = vld [vmem:[%s17233_s22 + $0x1474] ss:$8 sps:$4 sm:$0xff]   ;;  %v12725_v19 = vcombine.low %v18124_v21, %v18134_v33  ;;  %v12727_v20 = vcombine.low %v18139_v58, %v18144_v59  ;;  %v15501_v21 = vld [vmem:[%s17233_s22 + $0x1570] ss:$8 sps:$4 sm:$0xff]  }
 0x2d2   : > { %10990 = vmatpush1.bf16.msra.mxu1 %v15417_v43  ;;  %10948 = vmatprep.subr.bf16.mxu0 %v15422_v28  ;;  %v15497_v43 = vld [vmem:[%s17233_s22 + $0x1384] ss:$8 sps:$4 sm:$0xff]   ;;  %v15503_v15 = vld [vmem:[%s17233_s22 + $0x1574] ss:$8 sps:$4 sm:$0xff]   ;;  %v15504_v59 = vld [vmem:[%s17233_s22 + $0x1460] ss:$8 sps:$4 sm:$0xff]  }
 0x2d3   : > { %10991 = vmatprep.subr.bf16.mxu1 %v15425_v17  ;;  %v18228_v28 = vld [vmem:[%s19885_s0 + $0xa0] sm:$0xff]  ;;  %v15498_v17 = vld [vmem:[%s17233_s22 + $0x1470] ss:$8 sps:$4 sm:$0xff]  }
 0x2d4   : > { %v15506_v33 = vld [vmem:[%s17233_s22 + $0x1464] ss:$8 sps:$4 sm:$0xff]  }
 0x2d5   : > { %10949 = vmatpush1.bf16.msra.mxu0 %v15420_v54  ;;  %v18238_v54 = vld [vmem:[%s19885_s0 + $0x220] sm:$0xff] }
 0x2d6   : > { %10992 = vmatpush1.bf16.msra.mxu1 %v15423_v22  ;;  %10950 = vmatprep.subr.bf16.mxu0 %v15428_v23  ;;  %v18243_v22 = vld [vmem:[%s19885_s0 + $0xa8] sm:$0xff] }
 0x2d7   : > { %10993 = vmatprep.subr.bf16.mxu1 %v15431_v32  ;;  %v18248_v23 = vld [vmem:[%s19885_s0 + $0x228] sm:$0xff] }
 0x2d8   : > { %v15509_v58 = vld [vmem:[%s17233_s22 + $0x1564] ss:$8 sps:$4 sm:$0xff]   ;;  %v15507_v32 = vld [vmem:[%s17233_s22 + $0x1560] ss:$8 sps:$4 sm:$0xff]  }
 0x2d9   : > { %10951 = vmatpush1.bf16.msra.mxu0 %v15426_v29  ;;  %v12730_v29 = vcombine.high %v18228_v28, %v18238_v54 }
 0x2da   : > { %10994 = vmatpush1.bf16.msra.mxu1 %v15429_v35  ;;  %10952 = vmatprep.subr.bf16.mxu0 %v15434_v36  ;;  %v12732_v35 = vcombine.high %v18243_v22, %v18248_v23 }
 0x2db   : > { %10995 = vmatprep.subr.bf16.mxu1 %v15437_v37 }
 0x2dd   : > { %10953 = vmatpush1.bf16.msra.mxu0 %v15432_v27 }
 0x2de   : > { %10996 = vmatpush1.bf16.msra.mxu1 %v15435_v3  ;;  %10954 = vmatprep.subr.bf16.mxu0 %v15440_v4 }
 0x2df   : > { %10997 = vmatprep.subr.bf16.mxu1 %v15443_v26  ;;  %v15512_v26 = vld [vmem:[%s17233_s22 + $0x1454] ss:$8 sps:$4 sm:$0xff]  }
 0x2e1   : > { %10955 = vmatpush1.bf16.msra.mxu0 %v15438_v2  ;;  %v15515_v2 = vld [vmem:[%s17233_s22 + $0x1554] ss:$8 sps:$4 sm:$0xff]  }
 0x2e2   : > { %10998 = vmatpush1.bf16.msra.mxu1 %v15441_v38  ;;  %10956 = vmatprep.subr.bf16.mxu0 %v15446_v39 }
 0x2e3   : > { %10999 = vmatprep.subr.bf16.mxu1 %v15449_v5  ;;  %v15510_v5 = vld [vmem:[%s17233_s22 + $0x1450] ss:$8 sps:$4 sm:$0xff]  }
 0x2e5   : > { %10957 = vmatpush1.bf16.msra.mxu0 %v15444_v10  ;;  %v15513_v10 = vld [vmem:[%s17233_s22 + $0x1550] ss:$8 sps:$4 sm:$0xff]  }
 0x2e6   : > { %11000 = vmatpush1.bf16.msra.mxu1 %v15447_v12  ;;  %10958 = vmatprep.subr.bf16.mxu0 %v15452_v13 }
 0x2e7   : > { %11001 = vmatprep.subr.bf16.mxu1 %v15455_v46 }
 0x2e9   : > { %10959 = vmatpush2.bf16.msra.mxu0 %v15450_v11 }
 0x2ea   : > { %11002 = vmatpush2.bf16.msra.mxu1 %v15453_v49  ;;  %10960 = vmatprep.subr.bf16.mxu0 %v15458_v50  ;;  %v15521_v49 = vld [vmem:[%s17233_s22 + $0x1544] ss:$8 sps:$4 sm:$0xff]  }
 0x2eb   : > { %11003 = vmatprep.subr.bf16.mxu1 %v15461_v51 }
 0x2ed   : > { %10961 = vmatpush2.bf16.msra.mxu0 %v15456_v52 }
 0x2ee   : > { %11004 = vmatpush2.bf16.msra.mxu1 %v15459_v16  ;;  %10962 = vmatprep.subr.bf16.mxu0 %v15464_v30  ;;  %v15519_v30 = vld [vmem:[%s17233_s22 + $0x1540] ss:$8 sps:$4 sm:$0xff]  }
 0x2ef   : > { %11005 = vmatprep.subr.bf16.mxu1 %v15467_v31  ;;  %v15524_v31 = vld [vmem:[%s17233_s22 + $0x1434] ss:$8 sps:$4 sm:$0xff]  }
 0x2f1   : > { %10963 = vmatpush2.bf16.msra.mxu0 %v15462_v53  ;;  %v15527_v53 = vld [vmem:[%s17233_s22 + $0x1534] ss:$8 sps:$4 sm:$0xff]  }
 0x2f2   : > { %11006 = vmatpush2.bf16.msra.mxu1 %v15465_v55  ;;  %10964 = vmatprep.subr.bf16.mxu0 %v15470_v56  ;;  %v15525_v55 = vld [vmem:[%s17233_s22 + $0x1530] ss:$8 sps:$4 sm:$0xff]   ;;  %v15530_v56 = vld [vmem:[%s17233_s22 + $0x1424] ss:$8 sps:$4 sm:$0xff]  }
 0x2f3   : > { %11007 = vmatprep.subr.bf16.mxu1 %v15473_v57  ;;  %v15533_v57 = vld [vmem:[%s17233_s22 + $0x1524] ss:$8 sps:$4 sm:$0xff]  }
 0x2f5   : > { %10965 = vmatpush2.bf16.msra.mxu0 %v15468_v62  ;;  %v15528_v62 = vld [vmem:[%s17233_s22 + $0x1420] ss:$8 sps:$4 sm:$0xff]  }
 0x2f6   : > { %11008 = vmatpush2.bf16.msra.mxu1 %v15471_v24  ;;  %10966 = vmatprep.subr.bf16.mxu0 %v15476_v25  ;;  %v15531_v24 = vld [vmem:[%s17233_s22 + $0x1520] ss:$8 sps:$4 sm:$0xff]   ;;  %v15536_v25 = vld [vmem:[%s17233_s22 + $0x1414] ss:$8 sps:$4 sm:$0xff]  }
 0x2f7   : > { %11009 = vmatprep.subr.bf16.mxu1 %v15479_v61  ;;  %v15539_v61 = vld [vmem:[%s17233_s22 + $0x1514] ss:$8 sps:$4 sm:$0xff]  }
 0x2f9   : > { %10967 = vmatpush2.bf16.msra.mxu0 %v15474_v60  ;;  %v15534_v60 = vld [vmem:[%s17233_s22 + $0x1410] ss:$8 sps:$4 sm:$0xff]  }
 0x2fa   : > { %11010 = vmatpush2.bf16.msra.mxu1 %v15477_v63  ;;  %10968 = vmatprep.subr.bf16.mxu0 %v15482_v0  ;;  %v15537_v63 = vld [vmem:[%s17233_s22 + $0x1510] ss:$8 sps:$4 sm:$0xff]   ;;  %v15542_v0 = vld [vmem:[%s17233_s22 + $0x1404] ss:$8 sps:$4 sm:$0xff]  }
 0x2fb   : > { %11011 = vmatprep.subr.bf16.mxu1 %v15485_v1  ;;  %v15545_v1 = vld [vmem:[%s17233_s22 + $0x1504] ss:$8 sps:$4 sm:$0xff]  }
 0x2fd   : > { %10969 = vmatpush2.bf16.msra.mxu0 %v15480_v7  ;;  %v15540_v7 = vld [vmem:[%s17233_s22 + $0x1400] ss:$8 sps:$4 sm:$0xff]  }
 0x2fe   : > { %11012 = vmatpush2.bf16.msra.mxu1 %v15483_v42  ;;  %10970 = vmatprep.subr.bf16.mxu0 %v15488_v45  ;;  %v15543_v42 = vld [vmem:[%s17233_s22 + $0x1500] ss:$8 sps:$4 sm:$0xff]   ;;  %v15548_v45 = vld [vmem:[%s17233_s22 + $0x14f4] ss:$8 sps:$4 sm:$0xff]  }
 0x2ff   : > { %11013 = vmatprep.subr.bf16.mxu1 %v15491_v6  ;;  %v15551_v6 = vld [vmem:[%s17233_s22 + $0x15f4] ss:$8 sps:$4 sm:$0xff]  }
 0x301   : > { %10971 = vmatpush2.bf16.msra.mxu0 %v15486_v41  ;;  %v15546_v41 = vld [vmem:[%s17233_s22 + $0x14f0] ss:$8 sps:$4 sm:$0xff]  }
 0x302   : > { %11014 = vmatpush2.bf16.msra.mxu1 %v15489_v9  ;;  %10972 = vmatprep.subr.bf16.mxu0 %v15494_v40  ;;  %v15549_v9 = vld [vmem:[%s17233_s22 + $0x15f0] ss:$8 sps:$4 sm:$0xff]   ;;  %v15554_v40 = vld [vmem:[%s17233_s22 + $0x14e4] ss:$8 sps:$4 sm:$0xff]  }
 0x303   : > { %11015 = vmatprep.subr.bf16.mxu1 %v15497_v43  ;;  %v15557_v43 = vld [vmem:[%s17233_s22 + $0x15e4] ss:$8 sps:$4 sm:$0xff]  }
 0x305   : > { %10973 = vmatpush2.bf16.msra.mxu0 %v15492_v44  ;;  %v15552_v44 = vld [vmem:[%s17233_s22 + $0x14e0] ss:$8 sps:$4 sm:$0xff]  }
 0x306   : > { %11016 = vmatpush2.bf16.msra.mxu1 %v15495_v48  ;;  %11028 = vmatprep.subr.bf16.mxu0 %v15500_v14  ;;  %v15555_v48 = vld [vmem:[%s17233_s22 + $0x15e0] ss:$8 sps:$4 sm:$0xff]   ;;  %v15560_v14 = vld [vmem:[%s17233_s22 + $0x14d4] ss:$8 sps:$4 sm:$0xff]  }
 0x307   : > { %11071 = vmatprep.subr.bf16.mxu1 %v15503_v15  ;;  %v15563_v15 = vld [vmem:[%s17233_s22 + $0x15d4] ss:$8 sps:$4 sm:$0xff]  }
 0x308   : > { %v10718_v36 = vpop.f32.mrf.mxu0  ;;  %10975 = vmatmul.mubr.bf16.vlgmr.msra.gmra.mxu0 %v12725_v19  ;;  %v15561_v19 = vld [vmem:[%s17233_s22 + $0x15d0] ss:$8 sps:$4 sm:$0xff]  }
 0x309   : > { %v10761_v37 = vpop.f32.mrf.mxu1  ;;  %11018 = vmatmul.mubr.bf16.vlgmr.msra.gmra.mxu1 %v12727_v20  ;;  %v10719_v27 = vadd.f32 %v10718_v36, %v18158_v8  ;;  %11029 = vmatpush1.bf16.msra.mxu0 %v15498_v17  ;;  %v15558_v17 = vld [vmem:[%s17233_s22 + $0x14d0] ss:$8 sps:$4 sm:$0xff]   ;;  %v15566_v20 = vld [vmem:[%s17233_s22 + $0x14c4] ss:$8 sps:$4 sm:$0xff]  }
 0x30a   : > { %11072 = vmatpush1.bf16.msra.mxu1 %v15501_v21  ;;  %v10720_v3 = vpop.f32.mrf.mxu0  ;;  %11030 = vmatprep.subr.bf16.mxu0 %v15506_v33  ;;  %v15569_v21 = vld [vmem:[%s17233_s22 + $0x15c4] ss:$8 sps:$4 sm:$0xff]   ;;  %v15564_v33 = vld [vmem:[%s17233_s22 + $0x14c0] ss:$8 sps:$4 sm:$0xff]  }
 0x30b   : > { %v10763_v4 = vpop.f32.mrf.mxu1  ;;  %11073 = vmatprep.subr.bf16.mxu1 %v15509_v58  ;;  %v18262_v38 = vadd.f32 %v10761_v37, %v10719_v27  ;;  %v10721_v39 = vadd.f32 %v10720_v3, %v18163_v47  ;;  %11060 = vmatprep.mubr.bf16.mxu0 %v12730_v29  ;;  %v15518_v47 = vld [vmem:[%s17233_s22 + $0x1444] ss:$8 sps:$4 sm:$0xff]   ;;  %v15567_v58 = vld [vmem:[%s17233_s22 + $0x15c0] ss:$8 sps:$4 sm:$0xff]   ;;  %v15570_v29 = vld [vmem:[%s17233_s22 + $0x14b0] ss:$8 sps:$4 sm:$0xff]  }
 0x30c   : > { %11103 = vmatprep.mubr.bf16.mxu1 %v12732_v35  ;;  %v10722_v12 = vpop.f32.mrf.mxu0  ;;  %v15573_v35 = vld [vmem:[%s17233_s22 + $0x15b0] ss:$8 sps:$4 sm:$0xff]   ;;  %v15578_v36 = vld [vmem:[%s17233_s22 + $0x14a4] ss:$8 sps:$4 sm:$0xff]   ;;  %v15576_v27 = vld [vmem:[%s17233_s22 + $0x14a0] ss:$8 sps:$4 sm:$0xff]  }
 0x30d   : > { %v10765_v8 = vpop.f32.mrf.mxu1  ;;  %v18267_v13 = vadd.f32 %v10763_v4, %v10721_v39  ;;  %v10723_v46 = vadd.f32 %v10722_v12, %v18168_v18  ;;  %11031 = vmatpush1.bf16.msra.mxu0 %v15504_v59  ;;  %v15516_v18 = vld [vmem:[%s17233_s22 + $0x1440] ss:$8 sps:$4 sm:$0xff]   ;;  %v15572_v59 = vld [vmem:[%s17233_s22 + $0x14b4] ss:$8 sps:$4 sm:$0xff]   ;;  %v15581_v37 = vld [vmem:[%s17233_s22 + $0x15a4] ss:$8 sps:$4 sm:$0xff]  }
 0x30e   : > { %11074 = vmatpush1.bf16.msra.mxu1 %v15507_v32  ;;  %v10724_v11 = vpop.f32.mrf.mxu0  ;;  %11032 = vmatprep.subr.bf16.mxu0 %v15512_v26  ;;  %v15575_v32 = vld [vmem:[%s17233_s22 + $0x15b4] ss:$8 sps:$4 sm:$0xff]   ;;  %v15579_v3 = vld [vmem:[%s17233_s22 + $0x15a0] ss:$8 sps:$4 sm:$0xff]   ;;  %v15585_v39 = vld [vmem:[%s17233_s22 + $0x1590] ss:$8 sps:$4 sm:$0xff]  }
 0x30f   : > { %11075 = vmatprep.subr.bf16.mxu1 %v15515_v2  ;;  %v18272_v50 = vadd.f32 %v10765_v8, %v10723_v46  ;;  %v10725_v51 = vadd.f32 %v10724_v11, %v18171_v34  ;;  %v10767_v52 = vpop.f32.mrf.mxu1  ;;  %v15522_v34 = vld [vmem:[%s17233_s22 + $0x1430] ss:$8 sps:$4 sm:$0xff]   ;;  %v15584_v4 = vld [vmem:[%s17233_s22 + $0x1494] ss:$8 sps:$4 sm:$0xff]   ;;  %v15588_v12 = vld [vmem:[%s17233_s22 + $0x1480] ss:$8 sps:$4 sm:$0xff]  }
 0x310   : > { %v15587_v26 = vld [vmem:[%s17233_s22 + $0x1594] ss:$8 sps:$4 sm:$0xff]   ;;  %v15582_v2 = vld [vmem:[%s17233_s22 + $0x1490] ss:$8 sps:$4 sm:$0xff]   ;;  %v15591_v8 = vld [vmem:[%s17233_s22 + $0x1580] ss:$8 sps:$4 sm:$0xff]  }
 0x311   : > { %v18275_v16 = vadd.f32 %v10767_v52, %v10725_v51  ;;  %11033 = vmatpush1.bf16.msra.mxu0 %v15510_v5  ;;  %v15590_v5 = vld [vmem:[%s17233_s22 + $0x1484] ss:$8 sps:$4 sm:$0xff]   ;;  %v15596_v46 = vld [vmem:[%s17233_s22 + $0x1674] ss:$8 sps:$4 sm:$0xff]   ;;  %v12729_v51 = vcombine.low %v18228_v28, %v18238_v54  ;;  %v12731_v52 = vcombine.low %v18243_v22, %v18248_v23  ;;  %v15597_v28 = vld [vmem:[%s17233_s22 + $0x1770] ss:$8 sps:$4 sm:$0xff]  }
 0x312   : > { %11076 = vmatpush1.bf16.msra.mxu1 %v15513_v10  ;;  %11034 = vmatprep.subr.bf16.mxu0 %v15518_v47  ;;  %v15593_v10 = vld [vmem:[%s17233_s22 + $0x1584] ss:$8 sps:$4 sm:$0xff]   ;;  %v15599_v11 = vld [vmem:[%s17233_s22 + $0x1774] ss:$8 sps:$4 sm:$0xff]   ;;  %v15600_v23 = vld [vmem:[%s17233_s22 + $0x1660] ss:$8 sps:$4 sm:$0xff]  }
 0x313   : > { %11077 = vmatprep.subr.bf16.mxu1 %v15521_v49  ;;  %v18332_v47 = vld [vmem:[%s19885_s0 + $0xb0] sm:$0xff]  ;;  %v15602_v54 = vld [vmem:[%s17233_s22 + $0x1664] ss:$8 sps:$4 sm:$0xff]  }
 0x314   : > { %v15594_v49 = vld [vmem:[%s17233_s22 + $0x1670] ss:$8 sps:$4 sm:$0xff]   ;;  %v15605_v22 = vld [vmem:[%s17233_s22 + $0x1764] ss:$8 sps:$4 sm:$0xff]  }
 0x315   : > { %11035 = vmatpush1.bf16.msra.mxu0 %v15516_v18  ;;  %v18342_v18 = vld [vmem:[%s19885_s0 + $0x230] sm:$0xff] }
 0x316   : > { %11078 = vmatpush1.bf16.msra.mxu1 %v15519_v30  ;;  %11036 = vmatprep.subr.bf16.mxu0 %v15524_v31  ;;  %v18347_v30 = vld [vmem:[%s19885_s0 + $0xb8] sm:$0xff] }
 0x317   : > { %11079 = vmatprep.subr.bf16.mxu1 %v15527_v53  ;;  %v18352_v31 = vld [vmem:[%s19885_s0 + $0x238] sm:$0xff]  ;;  %v15603_v53 = vld [vmem:[%s17233_s22 + $0x1760] ss:$8 sps:$4 sm:$0xff]  }
 0x319   : > { %11037 = vmatpush1.bf16.msra.mxu0 %v15522_v34  ;;  %v12734_v34 = vcombine.high %v18332_v47, %v18342_v18 }
 0x31a   : > { %11080 = vmatpush1.bf16.msra.mxu1 %v15525_v55  ;;  %11038 = vmatprep.subr.bf16.mxu0 %v15530_v56  ;;  %v12736_v55 = vcombine.high %v18347_v30, %v18352_v31 }
 0x31b   : > { %11081 = vmatprep.subr.bf16.mxu1 %v15533_v57 }
 0x31d   : > { %11039 = vmatpush1.bf16.msra.mxu0 %v15528_v62 }
 0x31e   : > { %11082 = vmatpush1.bf16.msra.mxu1 %v15531_v24  ;;  %11040 = vmatprep.subr.bf16.mxu0 %v15536_v25 }
 0x31f   : > { %11083 = vmatprep.subr.bf16.mxu1 %v15539_v61  ;;  %v15608_v61 = vld [vmem:[%s17233_s22 + $0x1654] ss:$8 sps:$4 sm:$0xff]  }
 0x321   : > { %11041 = vmatpush1.bf16.msra.mxu0 %v15534_v60  ;;  %v15611_v60 = vld [vmem:[%s17233_s22 + $0x1754] ss:$8 sps:$4 sm:$0xff]  }
 0x322   : > { %11084 = vmatpush1.bf16.msra.mxu1 %v15537_v63  ;;  %11042 = vmatprep.subr.bf16.mxu0 %v15542_v0 }
 0x323   : > { %11085 = vmatprep.subr.bf16.mxu1 %v15545_v1  ;;  %v15606_v1 = vld [vmem:[%s17233_s22 + $0x1650] ss:$8 sps:$4 sm:$0xff]  }
 0x325   : > { %11043 = vmatpush1.bf16.msra.mxu0 %v15540_v7  ;;  %v15609_v7 = vld [vmem:[%s17233_s22 + $0x1750] ss:$8 sps:$4 sm:$0xff]  }
 0x326   : > { %11086 = vmatpush1.bf16.msra.mxu1 %v15543_v42  ;;  %11044 = vmatprep.subr.bf16.mxu0 %v15548_v45 }
 0x327   : > { %11087 = vmatprep.subr.bf16.mxu1 %v15551_v6 }
 0x329   : > { %11045 = vmatpush2.bf16.msra.mxu0 %v15546_v41 }
 0x32a   : > { %11088 = vmatpush2.bf16.msra.mxu1 %v15549_v9  ;;  %11046 = vmatprep.subr.bf16.mxu0 %v15554_v40  ;;  %v15617_v9 = vld [vmem:[%s17233_s22 + $0x1744] ss:$8 sps:$4 sm:$0xff]  }
 0x32b   : > { %11089 = vmatprep.subr.bf16.mxu1 %v15557_v43 }
 0x32d   : > { %11047 = vmatpush2.bf16.msra.mxu0 %v15552_v44 }
 0x32e   : > { %11090 = vmatpush2.bf16.msra.mxu1 %v15555_v48  ;;  %11048 = vmatprep.subr.bf16.mxu0 %v15560_v14  ;;  %v15615_v14 = vld [vmem:[%s17233_s22 + $0x1740] ss:$8 sps:$4 sm:$0xff]  }
 0x32f   : > { %11091 = vmatprep.subr.bf16.mxu1 %v15563_v15  ;;  %v15620_v15 = vld [vmem:[%s17233_s22 + $0x1634] ss:$8 sps:$4 sm:$0xff]  }
 0x331   : > { %11049 = vmatpush2.bf16.msra.mxu0 %v15558_v17  ;;  %v15623_v17 = vld [vmem:[%s17233_s22 + $0x1734] ss:$8 sps:$4 sm:$0xff]  }
 0x332   : > { %11092 = vmatpush2.bf16.msra.mxu1 %v15561_v19  ;;  %11050 = vmatprep.subr.bf16.mxu0 %v15566_v20  ;;  %v15621_v19 = vld [vmem:[%s17233_s22 + $0x1730] ss:$8 sps:$4 sm:$0xff]   ;;  %v15626_v20 = vld [vmem:[%s17233_s22 + $0x1624] ss:$8 sps:$4 sm:$0xff]  }
 0x333   : > { %11093 = vmatprep.subr.bf16.mxu1 %v15569_v21  ;;  %v15629_v21 = vld [vmem:[%s17233_s22 + $0x1724] ss:$8 sps:$4 sm:$0xff]  }
 0x335   : > { %11051 = vmatpush2.bf16.msra.mxu0 %v15564_v33  ;;  %v15624_v33 = vld [vmem:[%s17233_s22 + $0x1620] ss:$8 sps:$4 sm:$0xff]  }
 0x336   : > { %11094 = vmatpush2.bf16.msra.mxu1 %v15567_v58  ;;  %11052 = vmatprep.subr.bf16.mxu0 %v15572_v59  ;;  %v15627_v58 = vld [vmem:[%s17233_s22 + $0x1720] ss:$8 sps:$4 sm:$0xff]   ;;  %v15632_v59 = vld [vmem:[%s17233_s22 + $0x1614] ss:$8 sps:$4 sm:$0xff]  }
 0x337   : > { %11095 = vmatprep.subr.bf16.mxu1 %v15575_v32  ;;  %v15635_v32 = vld [vmem:[%s17233_s22 + $0x1714] ss:$8 sps:$4 sm:$0xff]  }
 0x339   : > { %11053 = vmatpush2.bf16.msra.mxu0 %v15570_v29  ;;  %v15630_v29 = vld [vmem:[%s17233_s22 + $0x1610] ss:$8 sps:$4 sm:$0xff]  }
 0x33a   : > { %11096 = vmatpush2.bf16.msra.mxu1 %v15573_v35  ;;  %11054 = vmatprep.subr.bf16.mxu0 %v15578_v36  ;;  %v15633_v35 = vld [vmem:[%s17233_s22 + $0x1710] ss:$8 sps:$4 sm:$0xff]   ;;  %v15638_v36 = vld [vmem:[%s17233_s22 + $0x1604] ss:$8 sps:$4 sm:$0xff]  }
 0x33b   : > { %11097 = vmatprep.subr.bf16.mxu1 %v15581_v37  ;;  %v15641_v37 = vld [vmem:[%s17233_s22 + $0x1704] ss:$8 sps:$4 sm:$0xff]  }
 0x33d   : > { %11055 = vmatpush2.bf16.msra.mxu0 %v15576_v27  ;;  %v15636_v27 = vld [vmem:[%s17233_s22 + $0x1600] ss:$8 sps:$4 sm:$0xff]  }
 0x33e   : > { %11098 = vmatpush2.bf16.msra.mxu1 %v15579_v3  ;;  %11056 = vmatprep.subr.bf16.mxu0 %v15584_v4  ;;  %v15639_v3 = vld [vmem:[%s17233_s22 + $0x1700] ss:$8 sps:$4 sm:$0xff]   ;;  %v15644_v4 = vld [vmem:[%s17233_s22 + $0x16f4] ss:$8 sps:$4 sm:$0xff]  }
 0x33f   : > { %11099 = vmatprep.subr.bf16.mxu1 %v15587_v26  ;;  %v15647_v26 = vld [vmem:[%s17233_s22 + $0x17f4] ss:$8 sps:$4 sm:$0xff]  }
 0x341   : > { %11057 = vmatpush2.bf16.msra.mxu0 %v15582_v2  ;;  %v15642_v2 = vld [vmem:[%s17233_s22 + $0x16f0] ss:$8 sps:$4 sm:$0xff]  }
 0x342   : > { %11100 = vmatpush2.bf16.msra.mxu1 %v15585_v39  ;;  %11058 = vmatprep.subr.bf16.mxu0 %v15590_v5  ;;  %v15645_v39 = vld [vmem:[%s17233_s22 + $0x17f0] ss:$8 sps:$4 sm:$0xff]   ;;  %v15650_v5 = vld [vmem:[%s17233_s22 + $0x16e4] ss:$8 sps:$4 sm:$0xff]  }
 0x343   : > { %11101 = vmatprep.subr.bf16.mxu1 %v15593_v10  ;;  %v15653_v10 = vld [vmem:[%s17233_s22 + $0x17e4] ss:$8 sps:$4 sm:$0xff]  }
 0x345   : > { %11059 = vmatpush2.bf16.msra.mxu0 %v15588_v12  ;;  %v15648_v12 = vld [vmem:[%s17233_s22 + $0x16e0] ss:$8 sps:$4 sm:$0xff]  }
 0x346   : > { %11102 = vmatpush2.bf16.msra.mxu1 %v15591_v8  ;;  %11114 = vmatprep.subr.bf16.mxu0 %v15596_v46  ;;  %v15651_v8 = vld [vmem:[%s17233_s22 + $0x17e0] ss:$8 sps:$4 sm:$0xff]   ;;  %v15656_v46 = vld [vmem:[%s17233_s22 + $0x16d4] ss:$8 sps:$4 sm:$0xff]  }
 0x347   : > { %11157 = vmatprep.subr.bf16.mxu1 %v15599_v11  ;;  %v15659_v11 = vld [vmem:[%s17233_s22 + $0x17d4] ss:$8 sps:$4 sm:$0xff]  }
 0x348   : > { %v10804_v56 = vpop.f32.mrf.mxu0  ;;  %11061 = vmatmul.mubr.bf16.vlgmr.msra.gmra.mxu0 %v12729_v51  ;;  %v15657_v51 = vld [vmem:[%s17233_s22 + $0x17d0] ss:$8 sps:$4 sm:$0xff]  }
 0x349   : > { %v10847_v57 = vpop.f32.mrf.mxu1  ;;  %11104 = vmatmul.mubr.bf16.vlgmr.msra.gmra.mxu1 %v12731_v52  ;;  %v10805_v62 = vadd.f32 %v10804_v56, %v18262_v38  ;;  %11115 = vmatpush1.bf16.msra.mxu0 %v15594_v49  ;;  %v15654_v49 = vld [vmem:[%s17233_s22 + $0x16d0] ss:$8 sps:$4 sm:$0xff]   ;;  %v15662_v52 = vld [vmem:[%s17233_s22 + $0x16c4] ss:$8 sps:$4 sm:$0xff]  }
 0x34a   : > { %11158 = vmatpush1.bf16.msra.mxu1 %v15597_v28  ;;  %v10806_v24 = vpop.f32.mrf.mxu0  ;;  %11116 = vmatprep.subr.bf16.mxu0 %v15602_v54  ;;  %v15665_v28 = vld [vmem:[%s17233_s22 + $0x17c4] ss:$8 sps:$4 sm:$0xff]   ;;  %v15660_v54 = vld [vmem:[%s17233_s22 + $0x16c0] ss:$8 sps:$4 sm:$0xff]  }
 0x34b   : > { %v10849_v25 = vpop.f32.mrf.mxu1  ;;  %11159 = vmatprep.subr.bf16.mxu1 %v15605_v22  ;;  %v18366_v63 = vadd.f32 %v10847_v57, %v10805_v62  ;;  %v10807_v0 = vadd.f32 %v10806_v24, %v18267_v13  ;;  %11146 = vmatprep.mubr.bf16.mxu0 %v12734_v34  ;;  %v15614_v13 = vld [vmem:[%s17233_s22 + $0x1644] ss:$8 sps:$4 sm:$0xff]   ;;  %v15663_v22 = vld [vmem:[%s17233_s22 + $0x17c0] ss:$8 sps:$4 sm:$0xff]   ;;  %v15666_v34 = vld [vmem:[%s17233_s22 + $0x16b0] ss:$8 sps:$4 sm:$0xff]  }
 0x34c   : > { %11189 = vmatprep.mubr.bf16.mxu1 %v12736_v55  ;;  %v10808_v42 = vpop.f32.mrf.mxu0  ;;  %v15669_v55 = vld [vmem:[%s17233_s22 + $0x17b0] ss:$8 sps:$4 sm:$0xff]   ;;  %v15674_v56 = vld [vmem:[%s17233_s22 + $0x16a4] ss:$8 sps:$4 sm:$0xff]   ;;  %v15672_v62 = vld [vmem:[%s17233_s22 + $0x16a0] ss:$8 sps:$4 sm:$0xff]  }
 0x34d   : > { %v10851_v38 = vpop.f32.mrf.mxu1  ;;  %v18371_v45 = vadd.f32 %v10849_v25, %v10807_v0  ;;  %v10809_v6 = vadd.f32 %v10808_v42, %v18272_v50  ;;  %11117 = vmatpush1.bf16.msra.mxu0 %v15600_v23  ;;  %v15612_v50 = vld [vmem:[%s17233_s22 + $0x1640] ss:$8 sps:$4 sm:$0xff]   ;;  %v15668_v23 = vld [vmem:[%s17233_s22 + $0x16b4] ss:$8 sps:$4 sm:$0xff]   ;;  %v15677_v57 = vld [vmem:[%s17233_s22 + $0x17a4] ss:$8 sps:$4 sm:$0xff]  }
 0x34e   : > { %11160 = vmatpush1.bf16.msra.mxu1 %v15603_v53  ;;  %v10810_v41 = vpop.f32.mrf.mxu0  ;;  %11118 = vmatprep.subr.bf16.mxu0 %v15608_v61  ;;  %v15671_v53 = vld [vmem:[%s17233_s22 + $0x17b4] ss:$8 sps:$4 sm:$0xff]   ;;  %v15675_v24 = vld [vmem:[%s17233_s22 + $0x17a0] ss:$8 sps:$4 sm:$0xff]   ;;  %v15681_v0 = vld [vmem:[%s17233_s22 + $0x1790] ss:$8 sps:$4 sm:$0xff]  }
 0x34f   : > { %11161 = vmatprep.subr.bf16.mxu1 %v15611_v60  ;;  %v18376_v40 = vadd.f32 %v10851_v38, %v10809_v6  ;;  %v10811_v43 = vadd.f32 %v10810_v41, %v18275_v16  ;;  %v10853_v44 = vpop.f32.mrf.mxu1  ;;  %v15618_v16 = vld [vmem:[%s17233_s22 + $0x1630] ss:$8 sps:$4 sm:$0xff]   ;;  %v15680_v25 = vld [vmem:[%s17233_s22 + $0x1694] ss:$8 sps:$4 sm:$0xff]   ;;  %v15684_v42 = vld [vmem:[%s17233_s22 + $0x1680] ss:$8 sps:$4 sm:$0xff]  }
 0x350   : > { %v15683_v61 = vld [vmem:[%s17233_s22 + $0x1794] ss:$8 sps:$4 sm:$0xff]   ;;  %v15678_v60 = vld [vmem:[%s17233_s22 + $0x1690] ss:$8 sps:$4 sm:$0xff]   ;;  %v15687_v38 = vld [vmem:[%s17233_s22 + $0x1780] ss:$8 sps:$4 sm:$0xff]  }
 0x351   : > { %v18379_v48 = vadd.f32 %v10853_v44, %v10811_v43  ;;  %11119 = vmatpush1.bf16.msra.mxu0 %v15606_v1  ;;  %v15686_v1 = vld [vmem:[%s17233_s22 + $0x1684] ss:$8 sps:$4 sm:$0xff]   ;;  %v15692_v6 = vld [vmem:[%s17233_s22 + $0x1874] ss:$8 sps:$4 sm:$0xff]   ;;  %v12733_v43 = vcombine.low %v18332_v47, %v18342_v18  ;;  %v12735_v44 = vcombine.low %v18347_v30, %v18352_v31  ;;  %v15693_v47 = vld [vmem:[%s17233_s22 + $0x1970] ss:$8 sps:$4 sm:$0xff]  }
 0x352   : > { %11162 = vmatpush1.bf16.msra.mxu1 %v15609_v7  ;;  %11120 = vmatprep.subr.bf16.mxu0 %v15614_v13  ;;  %v15689_v7 = vld [vmem:[%s17233_s22 + $0x1784] ss:$8 sps:$4 sm:$0xff]   ;;  %v15695_v41 = vld [vmem:[%s17233_s22 + $0x1974] ss:$8 sps:$4 sm:$0xff]   ;;  %v15696_v31 = vld [vmem:[%s17233_s22 + $0x1860] ss:$8 sps:$4 sm:$0xff]  }
 0x353   : > { %11163 = vmatprep.subr.bf16.mxu1 %v15617_v9  ;;  %v18436_v13 = vld [vmem:[%s19885_s0 + $0xc0] sm:$0xff]  ;;  %v15690_v9 = vld [vmem:[%s17233_s22 + $0x1870] ss:$8 sps:$4 sm:$0xff]  }
 0x354   : > { %v15698_v18 = vld [vmem:[%s17233_s22 + $0x1864] ss:$8 sps:$4 sm:$0xff]  }
 0x355   : > { %11121 = vmatpush1.bf16.msra.mxu0 %v15612_v50  ;;  %v18446_v50 = vld [vmem:[%s19885_s0 + $0x240] sm:$0xff] }
 0x356   : > { %11164 = vmatpush1.bf16.msra.mxu1 %v15615_v14  ;;  %11122 = vmatprep.subr.bf16.mxu0 %v15620_v15  ;;  %v18451_v14 = vld [vmem:[%s19885_s0 + $0xc8] sm:$0xff] }
 0x357   : > { %11165 = vmatprep.subr.bf16.mxu1 %v15623_v17  ;;  %v18456_v15 = vld [vmem:[%s19885_s0 + $0x248] sm:$0xff] }
 0x358   : > { %v15701_v30 = vld [vmem:[%s17233_s22 + $0x1964] ss:$8 sps:$4 sm:$0xff]   ;;  %v15699_v17 = vld [vmem:[%s17233_s22 + $0x1960] ss:$8 sps:$4 sm:$0xff]  }
 0x359   : > { %11123 = vmatpush1.bf16.msra.mxu0 %v15618_v16  ;;  %v12738_v16 = vcombine.high %v18436_v13, %v18446_v50 }
 0x35a   : > { %11166 = vmatpush1.bf16.msra.mxu1 %v15621_v19  ;;  %11124 = vmatprep.subr.bf16.mxu0 %v15626_v20  ;;  %v12740_v19 = vcombine.high %v18451_v14, %v18456_v15  ;;  %v15704_v20 = vld [vmem:[%s17233_s22 + $0x1854] ss:$8 sps:$4 sm:$0xff]  }
 0x35b   : > { %11167 = vmatprep.subr.bf16.mxu1 %v15629_v21  ;;  %v15707_v21 = vld [vmem:[%s17233_s22 + $0x1954] ss:$8 sps:$4 sm:$0xff]  }
 0x35d   : > { %11125 = vmatpush1.bf16.msra.mxu0 %v15624_v33  ;;  %v15702_v33 = vld [vmem:[%s17233_s22 + $0x1850] ss:$8 sps:$4 sm:$0xff]  }
 0x35e   : > { %11168 = vmatpush1.bf16.msra.mxu1 %v15627_v58  ;;  %11126 = vmatprep.subr.bf16.mxu0 %v15632_v59  ;;  %v15705_v58 = vld [vmem:[%s17233_s22 + $0x1950] ss:$8 sps:$4 sm:$0xff]   ;;  %v15710_v59 = vld [vmem:[%s17233_s22 + $0x1844] ss:$8 sps:$4 sm:$0xff]  }
 0x35f   : > { %11169 = vmatprep.subr.bf16.mxu1 %v15635_v32  ;;  %v15713_v32 = vld [vmem:[%s17233_s22 + $0x1944] ss:$8 sps:$4 sm:$0xff]  }
 0x361   : > { %11127 = vmatpush1.bf16.msra.mxu0 %v15630_v29  ;;  %v15708_v29 = vld [vmem:[%s17233_s22 + $0x1840] ss:$8 sps:$4 sm:$0xff]  }
 0x362   : > { %11170 = vmatpush1.bf16.msra.mxu1 %v15633_v35  ;;  %11128 = vmatprep.subr.bf16.mxu0 %v15638_v36  ;;  %v15711_v35 = vld [vmem:[%s17233_s22 + $0x1940] ss:$8 sps:$4 sm:$0xff]   ;;  %v15716_v36 = vld [vmem:[%s17233_s22 + $0x1834] ss:$8 sps:$4 sm:$0xff]  }
 0x363   : > { %11171 = vmatprep.subr.bf16.mxu1 %v15641_v37  ;;  %v15719_v37 = vld [vmem:[%s17233_s22 + $0x1934] ss:$8 sps:$4 sm:$0xff]  }
 0x365   : > { %11129 = vmatpush1.bf16.msra.mxu0 %v15636_v27  ;;  %v15714_v27 = vld [vmem:[%s17233_s22 + $0x1830] ss:$8 sps:$4 sm:$0xff]  }
 0x366   : > { %11172 = vmatpush1.bf16.msra.mxu1 %v15639_v3  ;;  %11130 = vmatprep.subr.bf16.mxu0 %v15644_v4  ;;  %v15717_v3 = vld [vmem:[%s17233_s22 + $0x1930] ss:$8 sps:$4 sm:$0xff]   ;;  %v15722_v4 = vld [vmem:[%s17233_s22 + $0x1824] ss:$8 sps:$4 sm:$0xff]  }
 0x367   : > { %11173 = vmatprep.subr.bf16.mxu1 %v15647_v26  ;;  %v15725_v26 = vld [vmem:[%s17233_s22 + $0x1924] ss:$8 sps:$4 sm:$0xff]  }
 0x369   : > { %11131 = vmatpush2.bf16.msra.mxu0 %v15642_v2  ;;  %v15720_v2 = vld [vmem:[%s17233_s22 + $0x1820] ss:$8 sps:$4 sm:$0xff]  }
 0x36a   : > { %11174 = vmatpush2.bf16.msra.mxu1 %v15645_v39  ;;  %11132 = vmatprep.subr.bf16.mxu0 %v15650_v5  ;;  %v15723_v39 = vld [vmem:[%s17233_s22 + $0x1920] ss:$8 sps:$4 sm:$0xff]   ;;  %v15728_v5 = vld [vmem:[%s17233_s22 + $0x1814] ss:$8 sps:$4 sm:$0xff]  }
 0x36b   : > { %11175 = vmatprep.subr.bf16.mxu1 %v15653_v10  ;;  %v15731_v10 = vld [vmem:[%s17233_s22 + $0x1914] ss:$8 sps:$4 sm:$0xff]  }
 0x36d   : > { %11133 = vmatpush2.bf16.msra.mxu0 %v15648_v12  ;;  %v15726_v12 = vld [vmem:[%s17233_s22 + $0x1810] ss:$8 sps:$4 sm:$0xff]  }
 0x36e   : > { %11176 = vmatpush2.bf16.msra.mxu1 %v15651_v8  ;;  %11134 = vmatprep.subr.bf16.mxu0 %v15656_v46  ;;  %v15729_v8 = vld [vmem:[%s17233_s22 + $0x1910] ss:$8 sps:$4 sm:$0xff]   ;;  %v15734_v46 = vld [vmem:[%s17233_s22 + $0x1804] ss:$8 sps:$4 sm:$0xff]  }
 0x36f   : > { %11177 = vmatprep.subr.bf16.mxu1 %v15659_v11  ;;  %v15737_v11 = vld [vmem:[%s17233_s22 + $0x1904] ss:$8 sps:$4 sm:$0xff]  }
 0x371   : > { %11135 = vmatpush2.bf16.msra.mxu0 %v15654_v49  ;;  %v15732_v49 = vld [vmem:[%s17233_s22 + $0x1800] ss:$8 sps:$4 sm:$0xff]  }
 0x372   : > { %11178 = vmatpush2.bf16.msra.mxu1 %v15657_v51  ;;  %11136 = vmatprep.subr.bf16.mxu0 %v15662_v52  ;;  %v15735_v51 = vld [vmem:[%s17233_s22 + $0x1900] ss:$8 sps:$4 sm:$0xff]   ;;  %v15740_v52 = vld [vmem:[%s17233_s22 + $0x18f4] ss:$8 sps:$4 sm:$0xff]  }
 0x373   : > { %11179 = vmatprep.subr.bf16.mxu1 %v15665_v28  ;;  %v15743_v28 = vld [vmem:[%s17233_s22 + $0x19f4] ss:$8 sps:$4 sm:$0xff]  }
 0x375   : > { %11137 = vmatpush2.bf16.msra.mxu0 %v15660_v54  ;;  %v15738_v54 = vld [vmem:[%s17233_s22 + $0x18f0] ss:$8 sps:$4 sm:$0xff]  }
 0x376   : > { %11180 = vmatpush2.bf16.msra.mxu1 %v15663_v22  ;;  %11138 = vmatprep.subr.bf16.mxu0 %v15668_v23  ;;  %v15741_v22 = vld [vmem:[%s17233_s22 + $0x19f0] ss:$8 sps:$4 sm:$0xff]   ;;  %v15746_v23 = vld [vmem:[%s17233_s22 + $0x18e4] ss:$8 sps:$4 sm:$0xff]  }
 0x377   : > { %11181 = vmatprep.subr.bf16.mxu1 %v15671_v53  ;;  %v15749_v53 = vld [vmem:[%s17233_s22 + $0x19e4] ss:$8 sps:$4 sm:$0xff]  }
 0x379   : > { %11139 = vmatpush2.bf16.msra.mxu0 %v15666_v34  ;;  %v15744_v34 = vld [vmem:[%s17233_s22 + $0x18e0] ss:$8 sps:$4 sm:$0xff]  }
 0x37a   : > { %11182 = vmatpush2.bf16.msra.mxu1 %v15669_v55  ;;  %11140 = vmatprep.subr.bf16.mxu0 %v15674_v56  ;;  %v15747_v55 = vld [vmem:[%s17233_s22 + $0x19e0] ss:$8 sps:$4 sm:$0xff]   ;;  %v15752_v56 = vld [vmem:[%s17233_s22 + $0x18d4] ss:$8 sps:$4 sm:$0xff]  }
 0x37b   : > { %11183 = vmatprep.subr.bf16.mxu1 %v15677_v57  ;;  %v15755_v57 = vld [vmem:[%s17233_s22 + $0x19d4] ss:$8 sps:$4 sm:$0xff]  }
 0x37d   : > { %11141 = vmatpush2.bf16.msra.mxu0 %v15672_v62  ;;  %v15750_v62 = vld [vmem:[%s17233_s22 + $0x18d0] ss:$8 sps:$4 sm:$0xff]  }
 0x37e   : > { %11184 = vmatpush2.bf16.msra.mxu1 %v15675_v24  ;;  %11142 = vmatprep.subr.bf16.mxu0 %v15680_v25  ;;  %v15753_v24 = vld [vmem:[%s17233_s22 + $0x19d0] ss:$8 sps:$4 sm:$0xff]   ;;  %v15758_v25 = vld [vmem:[%s17233_s22 + $0x18c4] ss:$8 sps:$4 sm:$0xff]  }
 0x37f   : > { %11185 = vmatprep.subr.bf16.mxu1 %v15683_v61  ;;  %v15761_v61 = vld [vmem:[%s17233_s22 + $0x19c4] ss:$8 sps:$4 sm:$0xff]  }
 0x381   : > { %11143 = vmatpush2.bf16.msra.mxu0 %v15678_v60  ;;  %v15756_v60 = vld [vmem:[%s17233_s22 + $0x18c0] ss:$8 sps:$4 sm:$0xff]  }
 0x382   : > { %11186 = vmatpush2.bf16.msra.mxu1 %v15681_v0  ;;  %11144 = vmatprep.subr.bf16.mxu0 %v15686_v1  ;;  %v15759_v0 = vld [vmem:[%s17233_s22 + $0x19c0] ss:$8 sps:$4 sm:$0xff]   ;;  %v15764_v1 = vld [vmem:[%s17233_s22 + $0x18b4] ss:$8 sps:$4 sm:$0xff]  }
 0x383   : > { %11187 = vmatprep.subr.bf16.mxu1 %v15689_v7  ;;  %v15767_v7 = vld [vmem:[%s17233_s22 + $0x19b4] ss:$8 sps:$4 sm:$0xff]  }
 0x385   : > { %11145 = vmatpush2.bf16.msra.mxu0 %v15684_v42  ;;  %v15762_v42 = vld [vmem:[%s17233_s22 + $0x18b0] ss:$8 sps:$4 sm:$0xff]  }
 0x386   : > { %11188 = vmatpush2.bf16.msra.mxu1 %v15687_v38  ;;  %11200 = vmatprep.subr.bf16.mxu0 %v15692_v6  ;;  %v15765_v38 = vld [vmem:[%s17233_s22 + $0x19b0] ss:$8 sps:$4 sm:$0xff]   ;;  %v15770_v6 = vld [vmem:[%s17233_s22 + $0x18a4] ss:$8 sps:$4 sm:$0xff]  }
 0x387   : > { %11243 = vmatprep.subr.bf16.mxu1 %v15695_v41  ;;  %v15773_v41 = vld [vmem:[%s17233_s22 + $0x19a4] ss:$8 sps:$4 sm:$0xff]  }
 0x388   : > { %11147 = vmatmul.mubr.bf16.vlgmr.msra.gmra.mxu0 %v12733_v43  ;;  %v15771_v43 = vld [vmem:[%s17233_s22 + $0x19a0] ss:$8 sps:$4 sm:$0xff]  }
 0x389   : > { %11190 = vmatmul.mubr.bf16.vlgmr.msra.gmra.mxu1 %v12735_v44  ;;  %11201 = vmatpush1.bf16.msra.mxu0 %v15690_v9  ;;  %v15768_v9 = vld [vmem:[%s17233_s22 + $0x18a0] ss:$8 sps:$4 sm:$0xff]   ;;  %v15776_v44 = vld [vmem:[%s17233_s22 + $0x1894] ss:$8 sps:$4 sm:$0xff]  }
 0x38a   : > { %11244 = vmatpush1.bf16.msra.mxu1 %v15693_v47  ;;  %11202 = vmatprep.subr.bf16.mxu0 %v15698_v18  ;;  %v15779_v47 = vld [vmem:[%s17233_s22 + $0x1994] ss:$8 sps:$4 sm:$0xff]   ;;  %v15774_v18 = vld [vmem:[%s17233_s22 + $0x1890] ss:$8 sps:$4 sm:$0xff]  }
 0x38b   : > { %11245 = vmatprep.subr.bf16.mxu1 %v15701_v30  ;;  %11232 = vmatprep.mubr.bf16.mxu0 %v12738_v16  ;;  %v15777_v30 = vld [vmem:[%s17233_s22 + $0x1990] ss:$8 sps:$4 sm:$0xff]   ;;  %v15780_v16 = vld [vmem:[%s17233_s22 + $0x1880] ss:$8 sps:$4 sm:$0xff]  }
 0x38c   : > { %11275 = vmatprep.mubr.bf16.mxu1 %v12740_v19  ;;  %v15783_v19 = vld [vmem:[%s17233_s22 + $0x1980] ss:$8 sps:$4 sm:$0xff]  }
 0x38d   : > { %11203 = vmatpush1.bf16.msra.mxu0 %v15696_v31  ;;  %v15782_v31 = vld [vmem:[%s17233_s22 + $0x1884] ss:$8 sps:$4 sm:$0xff]  }
 0x38e   : > { %11246 = vmatpush1.bf16.msra.mxu1 %v15699_v17  ;;  %11204 = vmatprep.subr.bf16.mxu0 %v15704_v20  ;;  %v15785_v17 = vld [vmem:[%s17233_s22 + $0x1984] ss:$8 sps:$4 sm:$0xff]   ;;  %v15788_v20 = vld [vmem:[%s17233_s22 + $0x1a74] ss:$8 sps:$4 sm:$0xff]  }
 0x38f   : > { %11247 = vmatprep.subr.bf16.mxu1 %v15707_v21  ;;  %v15791_v21 = vld [vmem:[%s17233_s22 + $0x1b74] ss:$8 sps:$4 sm:$0xff]  }
 0x391   : > { %11205 = vmatpush1.bf16.msra.mxu0 %v15702_v33  ;;  %v18528_v33 = vld [vmem:[%s19885_s0 + $0xd0] sm:$0xff] }
 0x392   : > { %11248 = vmatpush1.bf16.msra.mxu1 %v15705_v58  ;;  %11206 = vmatprep.subr.bf16.mxu0 %v15710_v59  ;;  %v15786_v58 = vld [vmem:[%s17233_s22 + $0x1a70] ss:$8 sps:$4 sm:$0xff]   ;;  %v12737_v59 = vcombine.low %v18436_v13, %v18446_v50  ;;  %v15794_v50 = vld [vmem:[%s17233_s22 + $0x1a64] ss:$8 sps:$4 sm:$0xff]  }
 0x393   : > { %11249 = vmatprep.subr.bf16.mxu1 %v15713_v32  ;;  %v12739_v32 = vcombine.low %v18451_v14, %v18456_v15  ;;  %v15789_v13 = vld [vmem:[%s17233_s22 + $0x1b70] ss:$8 sps:$4 sm:$0xff]   ;;  %v15797_v14 = vld [vmem:[%s17233_s22 + $0x1b64] ss:$8 sps:$4 sm:$0xff]   ;;  %v15792_v15 = vld [vmem:[%s17233_s22 + $0x1a60] ss:$8 sps:$4 sm:$0xff]  }
 0x395   : > { %11207 = vmatpush1.bf16.msra.mxu0 %v15708_v29  ;;  %v18538_v29 = vld [vmem:[%s19885_s0 + $0x250] sm:$0xff] }
 0x396   : > { %11250 = vmatpush1.bf16.msra.mxu1 %v15711_v35  ;;  %11208 = vmatprep.subr.bf16.mxu0 %v15716_v36  ;;  %v18543_v35 = vld [vmem:[%s19885_s0 + $0xd8] sm:$0xff] }
 0x397   : > { %11251 = vmatprep.subr.bf16.mxu1 %v15719_v37  ;;  %v18548_v36 = vld [vmem:[%s19885_s0 + $0x258] sm:$0xff]  ;;  %v15795_v37 = vld [vmem:[%s17233_s22 + $0x1b60] ss:$8 sps:$4 sm:$0xff]  }
 0x399   : > { %11209 = vmatpush1.bf16.msra.mxu0 %v15714_v27  ;;  %v12742_v27 = vcombine.high %v18528_v33, %v18538_v29 }
 0x39a   : > { %11252 = vmatpush1.bf16.msra.mxu1 %v15717_v3  ;;  %11210 = vmatprep.subr.bf16.mxu0 %v15722_v4  ;;  %v12744_v3 = vcombine.high %v18543_v35, %v18548_v36  ;;  %v15800_v4 = vld [vmem:[%s17233_s22 + $0x1a54] ss:$8 sps:$4 sm:$0xff]  }
 0x39b   : > { %11253 = vmatprep.subr.bf16.mxu1 %v15725_v26  ;;  %v15803_v26 = vld [vmem:[%s17233_s22 + $0x1b54] ss:$8 sps:$4 sm:$0xff]  }
 0x39d   : > { %11211 = vmatpush1.bf16.msra.mxu0 %v15720_v2  ;;  %v15798_v2 = vld [vmem:[%s17233_s22 + $0x1a50] ss:$8 sps:$4 sm:$0xff]  }
 0x39e   : > { %11254 = vmatpush1.bf16.msra.mxu1 %v15723_v39  ;;  %11212 = vmatprep.subr.bf16.mxu0 %v15728_v5  ;;  %v15801_v39 = vld [vmem:[%s17233_s22 + $0x1b50] ss:$8 sps:$4 sm:$0xff]   ;;  %v15806_v5 = vld [vmem:[%s17233_s22 + $0x1a44] ss:$8 sps:$4 sm:$0xff]  }
 0x39f   : > { %11255 = vmatprep.subr.bf16.mxu1 %v15731_v10  ;;  %v15809_v10 = vld [vmem:[%s17233_s22 + $0x1b44] ss:$8 sps:$4 sm:$0xff]  }
 0x3a1   : > { %11213 = vmatpush1.bf16.msra.mxu0 %v15726_v12  ;;  %v15804_v12 = vld [vmem:[%s17233_s22 + $0x1a40] ss:$8 sps:$4 sm:$0xff]  }
 0x3a2   : > { %11256 = vmatpush1.bf16.msra.mxu1 %v15729_v8  ;;  %11214 = vmatprep.subr.bf16.mxu0 %v15734_v46  ;;  %v15807_v8 = vld [vmem:[%s17233_s22 + $0x1b40] ss:$8 sps:$4 sm:$0xff]   ;;  %v15812_v46 = vld [vmem:[%s17233_s22 + $0x1a34] ss:$8 sps:$4 sm:$0xff]  }
 0x3a3   : > { %11257 = vmatprep.subr.bf16.mxu1 %v15737_v11  ;;  %v15815_v11 = vld [vmem:[%s17233_s22 + $0x1b34] ss:$8 sps:$4 sm:$0xff]  }
 0x3a5   : > { %11215 = vmatpush1.bf16.msra.mxu0 %v15732_v49  ;;  %v15810_v49 = vld [vmem:[%s17233_s22 + $0x1a30] ss:$8 sps:$4 sm:$0xff]  }
 0x3a6   : > { %11258 = vmatpush1.bf16.msra.mxu1 %v15735_v51  ;;  %11216 = vmatprep.subr.bf16.mxu0 %v15740_v52  ;;  %v15813_v51 = vld [vmem:[%s17233_s22 + $0x1b30] ss:$8 sps:$4 sm:$0xff]   ;;  %v15818_v52 = vld [vmem:[%s17233_s22 + $0x1a24] ss:$8 sps:$4 sm:$0xff]  }
 0x3a7   : > { %11259 = vmatprep.subr.bf16.mxu1 %v15743_v28  ;;  %v15821_v28 = vld [vmem:[%s17233_s22 + $0x1b24] ss:$8 sps:$4 sm:$0xff]  }
 0x3a9   : > { %11217 = vmatpush2.bf16.msra.mxu0 %v15738_v54  ;;  %v15816_v54 = vld [vmem:[%s17233_s22 + $0x1a20] ss:$8 sps:$4 sm:$0xff]  }
 0x3aa   : > { %11260 = vmatpush2.bf16.msra.mxu1 %v15741_v22  ;;  %11218 = vmatprep.subr.bf16.mxu0 %v15746_v23  ;;  %v15819_v22 = vld [vmem:[%s17233_s22 + $0x1b20] ss:$8 sps:$4 sm:$0xff]   ;;  %v15824_v23 = vld [vmem:[%s17233_s22 + $0x1a14] ss:$8 sps:$4 sm:$0xff]  }
 0x3ab   : > { %11261 = vmatprep.subr.bf16.mxu1 %v15749_v53  ;;  %v15827_v53 = vld [vmem:[%s17233_s22 + $0x1b14] ss:$8 sps:$4 sm:$0xff]  }
 0x3ad   : > { %11219 = vmatpush2.bf16.msra.mxu0 %v15744_v34  ;;  %v15822_v34 = vld [vmem:[%s17233_s22 + $0x1a10] ss:$8 sps:$4 sm:$0xff]  }
 0x3ae   : > { %11262 = vmatpush2.bf16.msra.mxu1 %v15747_v55  ;;  %11220 = vmatprep.subr.bf16.mxu0 %v15752_v56  ;;  %v15825_v55 = vld [vmem:[%s17233_s22 + $0x1b10] ss:$8 sps:$4 sm:$0xff]   ;;  %v15830_v56 = vld [vmem:[%s17233_s22 + $0x1a04] ss:$8 sps:$4 sm:$0xff]  }
 0x3af   : > { %11263 = vmatprep.subr.bf16.mxu1 %v15755_v57  ;;  %v15833_v57 = vld [vmem:[%s17233_s22 + $0x1b04] ss:$8 sps:$4 sm:$0xff]  }
 0x3b1   : > { %11221 = vmatpush2.bf16.msra.mxu0 %v15750_v62  ;;  %v15828_v62 = vld [vmem:[%s17233_s22 + $0x1a00] ss:$8 sps:$4 sm:$0xff]  }
 0x3b2   : > { %11264 = vmatpush2.bf16.msra.mxu1 %v15753_v24  ;;  %11222 = vmatprep.subr.bf16.mxu0 %v15758_v25  ;;  %v15831_v24 = vld [vmem:[%s17233_s22 + $0x1b00] ss:$8 sps:$4 sm:$0xff]   ;;  %v15836_v25 = vld [vmem:[%s17233_s22 + $0x1af4] ss:$8 sps:$4 sm:$0xff]  }
 0x3b3   : > { %11265 = vmatprep.subr.bf16.mxu1 %v15761_v61  ;;  %v15839_v61 = vld [vmem:[%s17233_s22 + $0x1bf4] ss:$8 sps:$4 sm:$0xff]  }
 0x3b5   : > { %11223 = vmatpush2.bf16.msra.mxu0 %v15756_v60  ;;  %v15834_v60 = vld [vmem:[%s17233_s22 + $0x1af0] ss:$8 sps:$4 sm:$0xff]  }
 0x3b6   : > { %11266 = vmatpush2.bf16.msra.mxu1 %v15759_v0  ;;  %11224 = vmatprep.subr.bf16.mxu0 %v15764_v1  ;;  %v15837_v0 = vld [vmem:[%s17233_s22 + $0x1bf0] ss:$8 sps:$4 sm:$0xff]   ;;  %v15842_v1 = vld [vmem:[%s17233_s22 + $0x1ae4] ss:$8 sps:$4 sm:$0xff]  }
 0x3b7   : > { %11267 = vmatprep.subr.bf16.mxu1 %v15767_v7  ;;  %v15845_v7 = vld [vmem:[%s17233_s22 + $0x1be4] ss:$8 sps:$4 sm:$0xff]  }
 0x3b9   : > { %11225 = vmatpush2.bf16.msra.mxu0 %v15762_v42  ;;  %v15840_v42 = vld [vmem:[%s17233_s22 + $0x1ae0] ss:$8 sps:$4 sm:$0xff]  }
 0x3ba   : > { %11268 = vmatpush2.bf16.msra.mxu1 %v15765_v38  ;;  %11226 = vmatprep.subr.bf16.mxu0 %v15770_v6  ;;  %v15843_v38 = vld [vmem:[%s17233_s22 + $0x1be0] ss:$8 sps:$4 sm:$0xff]   ;;  %v15848_v6 = vld [vmem:[%s17233_s22 + $0x1ad4] ss:$8 sps:$4 sm:$0xff]  }
 0x3bb   : > { %11269 = vmatprep.subr.bf16.mxu1 %v15773_v41  ;;  %v15851_v41 = vld [vmem:[%s17233_s22 + $0x1bd4] ss:$8 sps:$4 sm:$0xff]  }
 0x3bd   : > { %11227 = vmatpush2.bf16.msra.mxu0 %v15768_v9  ;;  %v15846_v9 = vld [vmem:[%s17233_s22 + $0x1ad0] ss:$8 sps:$4 sm:$0xff]  }
 0x3be   : > { %11270 = vmatpush2.bf16.msra.mxu1 %v15771_v43  ;;  %11228 = vmatprep.subr.bf16.mxu0 %v15776_v44  ;;  %v15849_v43 = vld [vmem:[%s17233_s22 + $0x1bd0] ss:$8 sps:$4 sm:$0xff]   ;;  %v15854_v44 = vld [vmem:[%s17233_s22 + $0x1ac4] ss:$8 sps:$4 sm:$0xff]  }
 0x3bf   : > { %11271 = vmatprep.subr.bf16.mxu1 %v15779_v47  ;;  %v15857_v47 = vld [vmem:[%s17233_s22 + $0x1bc4] ss:$8 sps:$4 sm:$0xff]  }
 0x3c1   : > { %11229 = vmatpush2.bf16.msra.mxu0 %v15774_v18  ;;  %v15852_v18 = vld [vmem:[%s17233_s22 + $0x1ac0] ss:$8 sps:$4 sm:$0xff]  }
 0x3c2   : > { %11272 = vmatpush2.bf16.msra.mxu1 %v15777_v30  ;;  %11230 = vmatprep.subr.bf16.mxu0 %v15782_v31  ;;  %v15855_v30 = vld [vmem:[%s17233_s22 + $0x1bc0] ss:$8 sps:$4 sm:$0xff]   ;;  %v15860_v31 = vld [vmem:[%s17233_s22 + $0x1ab4] ss:$8 sps:$4 sm:$0xff]  }
 0x3c3   : > { %11273 = vmatprep.subr.bf16.mxu1 %v15785_v17  ;;  %v15863_v17 = vld [vmem:[%s17233_s22 + $0x1bb4] ss:$8 sps:$4 sm:$0xff]  }
 0x3c5   : > { %11231 = vmatpush2.bf16.msra.mxu0 %v15780_v16  ;;  %v15858_v16 = vld [vmem:[%s17233_s22 + $0x1ab0] ss:$8 sps:$4 sm:$0xff]  }
 0x3c6   : > { %11274 = vmatpush2.bf16.msra.mxu1 %v15783_v19  ;;  %11286 = vmatprep.subr.bf16.mxu0 %v15788_v20  ;;  %v15861_v19 = vld [vmem:[%s17233_s22 + $0x1bb0] ss:$8 sps:$4 sm:$0xff]   ;;  %v15866_v20 = vld [vmem:[%s17233_s22 + $0x1aa4] ss:$8 sps:$4 sm:$0xff]  }
 0x3c7   : > { %11329 = vmatprep.subr.bf16.mxu1 %v15791_v21  ;;  %v15869_v21 = vld [vmem:[%s17233_s22 + $0x1ba4] ss:$8 sps:$4 sm:$0xff]  }
 0x3c8   : > { %11233 = vmatmul.mubr.bf16.vlgmr.msra.gmra.mxu0 %v12737_v59  ;;  %v15867_v59 = vld [vmem:[%s17233_s22 + $0x1ba0] ss:$8 sps:$4 sm:$0xff]  }
 0x3c9   : > { %11276 = vmatmul.mubr.bf16.vlgmr.msra.gmra.mxu1 %v12739_v32  ;;  %11287 = vmatpush1.bf16.msra.mxu0 %v15786_v58  ;;  %v15864_v58 = vld [vmem:[%s17233_s22 + $0x1aa0] ss:$8 sps:$4 sm:$0xff]   ;;  %v15872_v32 = vld [vmem:[%s17233_s22 + $0x1a94] ss:$8 sps:$4 sm:$0xff]  }
 0x3ca   : > { %11330 = vmatpush1.bf16.msra.mxu1 %v15789_v13  ;;  %11288 = vmatprep.subr.bf16.mxu0 %v15794_v50  ;;  %v15875_v13 = vld [vmem:[%s17233_s22 + $0x1b94] ss:$8 sps:$4 sm:$0xff]   ;;  %v15870_v50 = vld [vmem:[%s17233_s22 + $0x1a90] ss:$8 sps:$4 sm:$0xff]  }
 0x3cb   : > { %11331 = vmatprep.subr.bf16.mxu1 %v15797_v14  ;;  %11318 = vmatprep.mubr.bf16.mxu0 %v12742_v27  ;;  %v15873_v14 = vld [vmem:[%s17233_s22 + $0x1b90] ss:$8 sps:$4 sm:$0xff]   ;;  %v15876_v27 = vld [vmem:[%s17233_s22 + $0x1a80] ss:$8 sps:$4 sm:$0xff]  }
 0x3cc   : > { %11361 = vmatprep.mubr.bf16.mxu1 %v12744_v3  ;;  %v15879_v3 = vld [vmem:[%s17233_s22 + $0x1b80] ss:$8 sps:$4 sm:$0xff]  }
 0x3cd   : > { %11289 = vmatpush1.bf16.msra.mxu0 %v15792_v15  ;;  %v15878_v15 = vld [vmem:[%s17233_s22 + $0x1a84] ss:$8 sps:$4 sm:$0xff]  }
 0x3ce   : > { %11332 = vmatpush1.bf16.msra.mxu1 %v15795_v37  ;;  %11290 = vmatprep.subr.bf16.mxu0 %v15800_v4  ;;  %v15881_v37 = vld [vmem:[%s17233_s22 + $0x1b84] ss:$8 sps:$4 sm:$0xff]   ;;  %v15884_v4 = vld [vmem:[%s17233_s22 + $0x1c74] ss:$8 sps:$4 sm:$0xff]  }
 0x3cf   : > { %11333 = vmatprep.subr.bf16.mxu1 %v15803_v26  ;;  %v15887_v26 = vld [vmem:[%s17233_s22 + $0x1d74] ss:$8 sps:$4 sm:$0xff]  }
 0x3d1   : > { %11291 = vmatpush1.bf16.msra.mxu0 %v15798_v2  ;;  %v18620_v2 = vld [vmem:[%s19885_s0 + $0xe0] sm:$0xff] }
 0x3d2   : > { %11334 = vmatpush1.bf16.msra.mxu1 %v15801_v39  ;;  %11292 = vmatprep.subr.bf16.mxu0 %v15806_v5  ;;  %v12741_v39 = vcombine.low %v18528_v33, %v18538_v29  ;;  %v12743_v5 = vcombine.low %v18543_v35, %v18548_v36  ;;  %v15882_v33 = vld [vmem:[%s17233_s22 + $0x1c70] ss:$8 sps:$4 sm:$0xff]   ;;  %v15890_v35 = vld [vmem:[%s17233_s22 + $0x1c64] ss:$8 sps:$4 sm:$0xff]  }
 0x3d3   : > { %11335 = vmatprep.subr.bf16.mxu1 %v15809_v10  ;;  %v18629_v10 = vld [vmem:[%s19885_s0 + $0x260] sm:$0xff]  ;;  %v15885_v29 = vld [vmem:[%s17233_s22 + $0x1d70] ss:$8 sps:$4 sm:$0xff]  }
 0x3d4   : > { %v15893_v36 = vld [vmem:[%s17233_s22 + $0x1d64] ss:$8 sps:$4 sm:$0xff]  }
 0x3d5   : > { %11293 = vmatpush1.bf16.msra.mxu0 %v15804_v12  ;;  %v18634_v12 = vld [vmem:[%s19885_s0 + $0xe8] sm:$0xff] }
 0x3d6   : > { %11336 = vmatpush1.bf16.msra.mxu1 %v15807_v8  ;;  %11294 = vmatprep.subr.bf16.mxu0 %v15812_v46  ;;  %v18639_v8 = vld [vmem:[%s19885_s0 + $0x268] sm:$0xff]  ;;  %v12746_v46 = vcombine.high %v18620_v2, %v18629_v10 }
 0x3d7   : > { %11337 = vmatprep.subr.bf16.mxu1 %v15815_v11  ;;  %v12748_v11 = vcombine.high %v18634_v12, %v18639_v8 }
 0x3d9   : > { %11295 = vmatpush1.bf16.msra.mxu0 %v15810_v49  ;;  %v15888_v49 = vld [vmem:[%s17233_s22 + $0x1c60] ss:$8 sps:$4 sm:$0xff]  }
 0x3da   : > { %11338 = vmatpush1.bf16.msra.mxu1 %v15813_v51  ;;  %11296 = vmatprep.subr.bf16.mxu0 %v15818_v52  ;;  %v15891_v51 = vld [vmem:[%s17233_s22 + $0x1d60] ss:$8 sps:$4 sm:$0xff]   ;;  %v15896_v52 = vld [vmem:[%s17233_s22 + $0x1c54] ss:$8 sps:$4 sm:$0xff]  }
 0x3db   : > { %11339 = vmatprep.subr.bf16.mxu1 %v15821_v28  ;;  %v15899_v28 = vld [vmem:[%s17233_s22 + $0x1d54] ss:$8 sps:$4 sm:$0xff]  }
 0x3dd   : > { %11297 = vmatpush1.bf16.msra.mxu0 %v15816_v54  ;;  %v15894_v54 = vld [vmem:[%s17233_s22 + $0x1c50] ss:$8 sps:$4 sm:$0xff]  }
 0x3de   : > { %11340 = vmatpush1.bf16.msra.mxu1 %v15819_v22  ;;  %11298 = vmatprep.subr.bf16.mxu0 %v15824_v23  ;;  %v15897_v22 = vld [vmem:[%s17233_s22 + $0x1d50] ss:$8 sps:$4 sm:$0xff]   ;;  %v15902_v23 = vld [vmem:[%s17233_s22 + $0x1c44] ss:$8 sps:$4 sm:$0xff]  }
 0x3df   : > { %11341 = vmatprep.subr.bf16.mxu1 %v15827_v53  ;;  %v15905_v53 = vld [vmem:[%s17233_s22 + $0x1d44] ss:$8 sps:$4 sm:$0xff]  }
 0x3e1   : > { %11299 = vmatpush1.bf16.msra.mxu0 %v15822_v34  ;;  %v15900_v34 = vld [vmem:[%s17233_s22 + $0x1c40] ss:$8 sps:$4 sm:$0xff]  }
 0x3e2   : > { %11342 = vmatpush1.bf16.msra.mxu1 %v15825_v55  ;;  %11300 = vmatprep.subr.bf16.mxu0 %v15830_v56  ;;  %v15903_v55 = vld [vmem:[%s17233_s22 + $0x1d40] ss:$8 sps:$4 sm:$0xff]   ;;  %v15908_v56 = vld [vmem:[%s17233_s22 + $0x1c34] ss:$8 sps:$4 sm:$0xff]  }
 0x3e3   : > { %11343 = vmatprep.subr.bf16.mxu1 %v15833_v57  ;;  %v15911_v57 = vld [vmem:[%s17233_s22 + $0x1d34] ss:$8 sps:$4 sm:$0xff]  }
 0x3e5   : > { %11301 = vmatpush1.bf16.msra.mxu0 %v15828_v62  ;;  %v15906_v62 = vld [vmem:[%s17233_s22 + $0x1c30] ss:$8 sps:$4 sm:$0xff]  }
 0x3e6   : > { %11344 = vmatpush1.bf16.msra.mxu1 %v15831_v24  ;;  %11302 = vmatprep.subr.bf16.mxu0 %v15836_v25  ;;  %v15909_v24 = vld [vmem:[%s17233_s22 + $0x1d30] ss:$8 sps:$4 sm:$0xff]   ;;  %v15914_v25 = vld [vmem:[%s17233_s22 + $0x1c24] ss:$8 sps:$4 sm:$0xff]  }
 0x3e7   : > { %11345 = vmatprep.subr.bf16.mxu1 %v15839_v61  ;;  %v15917_v61 = vld [vmem:[%s17233_s22 + $0x1d24] ss:$8 sps:$4 sm:$0xff]  }
 0x3e9   : > { %11303 = vmatpush2.bf16.msra.mxu0 %v15834_v60  ;;  %v15912_v60 = vld [vmem:[%s17233_s22 + $0x1c20] ss:$8 sps:$4 sm:$0xff]  }
 0x3ea   : > { %11346 = vmatpush2.bf16.msra.mxu1 %v15837_v0  ;;  %11304 = vmatprep.subr.bf16.mxu0 %v15842_v1  ;;  %v15915_v0 = vld [vmem:[%s17233_s22 + $0x1d20] ss:$8 sps:$4 sm:$0xff]   ;;  %v15920_v1 = vld [vmem:[%s17233_s22 + $0x1c14] ss:$8 sps:$4 sm:$0xff]  }
 0x3eb   : > { %11347 = vmatprep.subr.bf16.mxu1 %v15845_v7  ;;  %v15923_v7 = vld [vmem:[%s17233_s22 + $0x1d14] ss:$8 sps:$4 sm:$0xff]  }
 0x3ed   : > { %11305 = vmatpush2.bf16.msra.mxu0 %v15840_v42  ;;  %v15918_v42 = vld [vmem:[%s17233_s22 + $0x1c10] ss:$8 sps:$4 sm:$0xff]  }
 0x3ee   : > { %11348 = vmatpush2.bf16.msra.mxu1 %v15843_v38  ;;  %11306 = vmatprep.subr.bf16.mxu0 %v15848_v6  ;;  %v15921_v38 = vld [vmem:[%s17233_s22 + $0x1d10] ss:$8 sps:$4 sm:$0xff]   ;;  %v15926_v6 = vld [vmem:[%s17233_s22 + $0x1c04] ss:$8 sps:$4 sm:$0xff]  }
 0x3ef   : > { %11349 = vmatprep.subr.bf16.mxu1 %v15851_v41  ;;  %v15929_v41 = vld [vmem:[%s17233_s22 + $0x1d04] ss:$8 sps:$4 sm:$0xff]  }
 0x3f1   : > { %11307 = vmatpush2.bf16.msra.mxu0 %v15846_v9  ;;  %v15924_v9 = vld [vmem:[%s17233_s22 + $0x1c00] ss:$8 sps:$4 sm:$0xff]  }
 0x3f2   : > { %11350 = vmatpush2.bf16.msra.mxu1 %v15849_v43  ;;  %11308 = vmatprep.subr.bf16.mxu0 %v15854_v44  ;;  %v15927_v43 = vld [vmem:[%s17233_s22 + $0x1d00] ss:$8 sps:$4 sm:$0xff]   ;;  %v15932_v44 = vld [vmem:[%s17233_s22 + $0x1cf4] ss:$8 sps:$4 sm:$0xff]  }
 0x3f3   : > { %11351 = vmatprep.subr.bf16.mxu1 %v15857_v47  ;;  %v15935_v47 = vld [vmem:[%s17233_s22 + $0x1df4] ss:$8 sps:$4 sm:$0xff]  }
 0x3f5   : > { %11309 = vmatpush2.bf16.msra.mxu0 %v15852_v18  ;;  %v15930_v18 = vld [vmem:[%s17233_s22 + $0x1cf0] ss:$8 sps:$4 sm:$0xff]  }
 0x3f6   : > { %11352 = vmatpush2.bf16.msra.mxu1 %v15855_v30  ;;  %11310 = vmatprep.subr.bf16.mxu0 %v15860_v31  ;;  %v15933_v30 = vld [vmem:[%s17233_s22 + $0x1df0] ss:$8 sps:$4 sm:$0xff]   ;;  %v15938_v31 = vld [vmem:[%s17233_s22 + $0x1ce4] ss:$8 sps:$4 sm:$0xff]  }
 0x3f7   : > { %11353 = vmatprep.subr.bf16.mxu1 %v15863_v17  ;;  %v15941_v17 = vld [vmem:[%s17233_s22 + $0x1de4] ss:$8 sps:$4 sm:$0xff]  }
 0x3f9   : > { %11311 = vmatpush2.bf16.msra.mxu0 %v15858_v16  ;;  %v15936_v16 = vld [vmem:[%s17233_s22 + $0x1ce0] ss:$8 sps:$4 sm:$0xff]  }
 0x3fa   : > { %11354 = vmatpush2.bf16.msra.mxu1 %v15861_v19  ;;  %11312 = vmatprep.subr.bf16.mxu0 %v15866_v20  ;;  %v15939_v19 = vld [vmem:[%s17233_s22 + $0x1de0] ss:$8 sps:$4 sm:$0xff]   ;;  %v15944_v20 = vld [vmem:[%s17233_s22 + $0x1cd4] ss:$8 sps:$4 sm:$0xff]  }
 0x3fb   : > { %11355 = vmatprep.subr.bf16.mxu1 %v15869_v21  ;;  %v15947_v21 = vld [vmem:[%s17233_s22 + $0x1dd4] ss:$8 sps:$4 sm:$0xff]  }
 0x3fd   : > { %11313 = vmatpush2.bf16.msra.mxu0 %v15864_v58  ;;  %v15942_v58 = vld [vmem:[%s17233_s22 + $0x1cd0] ss:$8 sps:$4 sm:$0xff]  }
 0x3fe   : > { %11356 = vmatpush2.bf16.msra.mxu1 %v15867_v59  ;;  %11314 = vmatprep.subr.bf16.mxu0 %v15872_v32  ;;  %v15945_v59 = vld [vmem:[%s17233_s22 + $0x1dd0] ss:$8 sps:$4 sm:$0xff]   ;;  %v15950_v32 = vld [vmem:[%s17233_s22 + $0x1cc4] ss:$8 sps:$4 sm:$0xff]  }
 0x3ff   : > { %11357 = vmatprep.subr.bf16.mxu1 %v15875_v13  ;;  %v15953_v13 = vld [vmem:[%s17233_s22 + $0x1dc4] ss:$8 sps:$4 sm:$0xff]  }
 0x401   : > { %11315 = vmatpush2.bf16.msra.mxu0 %v15870_v50  ;;  %v15948_v50 = vld [vmem:[%s17233_s22 + $0x1cc0] ss:$8 sps:$4 sm:$0xff]  }
 0x402   : > { %11358 = vmatpush2.bf16.msra.mxu1 %v15873_v14  ;;  %11316 = vmatprep.subr.bf16.mxu0 %v15878_v15  ;;  %v15951_v14 = vld [vmem:[%s17233_s22 + $0x1dc0] ss:$8 sps:$4 sm:$0xff]   ;;  %v15956_v15 = vld [vmem:[%s17233_s22 + $0x1cb4] ss:$8 sps:$4 sm:$0xff]  }
 0x403   : > { %11359 = vmatprep.subr.bf16.mxu1 %v15881_v37  ;;  %v15959_v37 = vld [vmem:[%s17233_s22 + $0x1db4] ss:$8 sps:$4 sm:$0xff]  }
 0x405   : > { %11317 = vmatpush2.bf16.msra.mxu0 %v15876_v27  ;;  %v15954_v27 = vld [vmem:[%s17233_s22 + $0x1cb0] ss:$8 sps:$4 sm:$0xff]  }
 0x406   : > { %11360 = vmatpush2.bf16.msra.mxu1 %v15879_v3  ;;  %11372 = vmatprep.subr.bf16.mxu0 %v15884_v4  ;;  %v15957_v3 = vld [vmem:[%s17233_s22 + $0x1db0] ss:$8 sps:$4 sm:$0xff]   ;;  %v15962_v4 = vld [vmem:[%s17233_s22 + $0x1ca4] ss:$8 sps:$4 sm:$0xff]  }
 0x407   : > { %11415 = vmatprep.subr.bf16.mxu1 %v15887_v26  ;;  %v15965_v26 = vld [vmem:[%s17233_s22 + $0x1da4] ss:$8 sps:$4 sm:$0xff]  }
 0x408   : > { %11319 = vmatmul.mubr.bf16.vlgmr.msra.gmra.mxu0 %v12741_v39  ;;  %v15960_v39 = vld [vmem:[%s17233_s22 + $0x1ca0] ss:$8 sps:$4 sm:$0xff]  }
 0x409   : > { %11362 = vmatmul.mubr.bf16.vlgmr.msra.gmra.mxu1 %v12743_v5  ;;  %11373 = vmatpush1.bf16.msra.mxu0 %v15882_v33  ;;  %v15963_v5 = vld [vmem:[%s17233_s22 + $0x1da0] ss:$8 sps:$4 sm:$0xff]   ;;  %v15968_v33 = vld [vmem:[%s17233_s22 + $0x1c94] ss:$8 sps:$4 sm:$0xff]  }
 0x40a   : > { %11416 = vmatpush1.bf16.msra.mxu1 %v15885_v29  ;;  %11374 = vmatprep.subr.bf16.mxu0 %v15890_v35  ;;  %v15971_v29 = vld [vmem:[%s17233_s22 + $0x1d94] ss:$8 sps:$4 sm:$0xff]   ;;  %v15966_v35 = vld [vmem:[%s17233_s22 + $0x1c90] ss:$8 sps:$4 sm:$0xff]  }
 0x40b   : > { %11417 = vmatprep.subr.bf16.mxu1 %v15893_v36  ;;  %11404 = vmatprep.mubr.bf16.mxu0 %v12746_v46  ;;  %v15969_v36 = vld [vmem:[%s17233_s22 + $0x1d90] ss:$8 sps:$4 sm:$0xff]   ;;  %v15974_v46 = vld [vmem:[%s17233_s22 + $0x1c84] ss:$8 sps:$4 sm:$0xff]  }
 0x40c   : > { %11447 = vmatprep.mubr.bf16.mxu1 %v12748_v11  ;;  %v15977_v11 = vld [vmem:[%s17233_s22 + $0x1d84] ss:$8 sps:$4 sm:$0xff]  }
 0x40d   : > { %11375 = vmatpush1.bf16.msra.mxu0 %v15888_v49  ;;  %v15972_v49 = vld [vmem:[%s17233_s22 + $0x1c80] ss:$8 sps:$4 sm:$0xff]  }
 0x40e   : > { %11418 = vmatpush1.bf16.msra.mxu1 %v15891_v51  ;;  %11376 = vmatprep.subr.bf16.mxu0 %v15896_v52  ;;  %v15975_v51 = vld [vmem:[%s17233_s22 + $0x1d80] ss:$8 sps:$4 sm:$0xff]   ;;  %v15980_v52 = vld [vmem:[%s17233_s22 + $0x1e74] ss:$8 sps:$4 sm:$0xff]  }
 0x40f   : > { %11419 = vmatprep.subr.bf16.mxu1 %v15899_v28  ;;  %v15983_v28 = vld [vmem:[%s17233_s22 + $0x1f74] ss:$8 sps:$4 sm:$0xff]  }
 0x411   : > { %11377 = vmatpush1.bf16.msra.mxu0 %v15894_v54  ;;  %v18712_v54 = vld [vmem:[%s19885_s0 + $0xf0] sm:$0xff] }
 0x412   : > { %11420 = vmatpush1.bf16.msra.mxu1 %v15897_v22  ;;  %11378 = vmatprep.subr.bf16.mxu0 %v15902_v23  ;;  %v12745_v22 = vcombine.low %v18620_v2, %v18629_v10  ;;  %v12747_v23 = vcombine.low %v18634_v12, %v18639_v8  ;;  %v15978_v2 = vld [vmem:[%s17233_s22 + $0x1e70] ss:$8 sps:$4 sm:$0xff]   ;;  %v15986_v12 = vld [vmem:[%s17233_s22 + $0x1e64] ss:$8 sps:$4 sm:$0xff]  }
 0x413   : > { %11421 = vmatprep.subr.bf16.mxu1 %v15905_v53  ;;  %v18721_v53 = vld [vmem:[%s19885_s0 + $0x270] sm:$0xff]  ;;  %v15989_v8 = vld [vmem:[%s17233_s22 + $0x1f64] ss:$8 sps:$4 sm:$0xff]  }
 0x414   : > { %v15981_v10 = vld [vmem:[%s17233_s22 + $0x1f70] ss:$8 sps:$4 sm:$0xff]  }
 0x415   : > { %11379 = vmatpush1.bf16.msra.mxu0 %v15900_v34  ;;  %v18726_v34 = vld [vmem:[%s19885_s0 + $0xf8] sm:$0xff] }
 0x416   : > { %11422 = vmatpush1.bf16.msra.mxu1 %v15903_v55  ;;  %11380 = vmatprep.subr.bf16.mxu0 %v15908_v56  ;;  %v18731_v55 = vld [vmem:[%s19885_s0 + $0x278] sm:$0xff]  ;;  %v12750_v56 = vcombine.high %v18712_v54, %v18721_v53 }
 0x417   : > { %11423 = vmatprep.subr.bf16.mxu1 %v15911_v57  ;;  %v12752_v57 = vcombine.high %v18726_v34, %v18731_v55 }
 0x419   : > { %11381 = vmatpush1.bf16.msra.mxu0 %v15906_v62  ;;  %v15984_v62 = vld [vmem:[%s17233_s22 + $0x1e60] ss:$8 sps:$4 sm:$0xff]  }
 0x41a   : > { %11424 = vmatpush1.bf16.msra.mxu1 %v15909_v24  ;;  %11382 = vmatprep.subr.bf16.mxu0 %v15914_v25  ;;  %v15987_v24 = vld [vmem:[%s17233_s22 + $0x1f60] ss:$8 sps:$4 sm:$0xff]   ;;  %v15992_v25 = vld [vmem:[%s17233_s22 + $0x1e54] ss:$8 sps:$4 sm:$0xff]  }
 0x41b   : > { %11425 = vmatprep.subr.bf16.mxu1 %v15917_v61  ;;  %v15995_v61 = vld [vmem:[%s17233_s22 + $0x1f54] ss:$8 sps:$4 sm:$0xff]  }
 0x41d   : > { %11383 = vmatpush1.bf16.msra.mxu0 %v15912_v60  ;;  %v15990_v60 = vld [vmem:[%s17233_s22 + $0x1e50] ss:$8 sps:$4 sm:$0xff]  }
 0x41e   : > { %11426 = vmatpush1.bf16.msra.mxu1 %v15915_v0  ;;  %11384 = vmatprep.subr.bf16.mxu0 %v15920_v1  ;;  %v15993_v0 = vld [vmem:[%s17233_s22 + $0x1f50] ss:$8 sps:$4 sm:$0xff]   ;;  %v15998_v1 = vld [vmem:[%s17233_s22 + $0x1e44] ss:$8 sps:$4 sm:$0xff]  }
 0x41f   : > { %11427 = vmatprep.subr.bf16.mxu1 %v15923_v7  ;;  %v16001_v7 = vld [vmem:[%s17233_s22 + $0x1f44] ss:$8 sps:$4 sm:$0xff]  }
 0x421   : > { %11385 = vmatpush1.bf16.msra.mxu0 %v15918_v42  ;;  %v15996_v42 = vld [vmem:[%s17233_s22 + $0x1e40] ss:$8 sps:$4 sm:$0xff]  }
 0x422   : > { %11428 = vmatpush1.bf16.msra.mxu1 %v15921_v38  ;;  %11386 = vmatprep.subr.bf16.mxu0 %v15926_v6  ;;  %v15999_v38 = vld [vmem:[%s17233_s22 + $0x1f40] ss:$8 sps:$4 sm:$0xff]   ;;  %v16004_v6 = vld [vmem:[%s17233_s22 + $0x1e34] ss:$8 sps:$4 sm:$0xff]  }
 0x423   : > { %11429 = vmatprep.subr.bf16.mxu1 %v15929_v41  ;;  %v16007_v41 = vld [vmem:[%s17233_s22 + $0x1f34] ss:$8 sps:$4 sm:$0xff]  }
 0x425   : > { %11387 = vmatpush1.bf16.msra.mxu0 %v15924_v9  ;;  %v16002_v9 = vld [vmem:[%s17233_s22 + $0x1e30] ss:$8 sps:$4 sm:$0xff]  }
 0x426   : > { %11430 = vmatpush1.bf16.msra.mxu1 %v15927_v43  ;;  %11388 = vmatprep.subr.bf16.mxu0 %v15932_v44  ;;  %v16005_v43 = vld [vmem:[%s17233_s22 + $0x1f30] ss:$8 sps:$4 sm:$0xff]   ;;  %v16010_v44 = vld [vmem:[%s17233_s22 + $0x1e24] ss:$8 sps:$4 sm:$0xff]  }
 0x427   : > { %11431 = vmatprep.subr.bf16.mxu1 %v15935_v47  ;;  %v16013_v47 = vld [vmem:[%s17233_s22 + $0x1f24] ss:$8 sps:$4 sm:$0xff]  }
 0x429   : > { %11389 = vmatpush2.bf16.msra.mxu0 %v15930_v18  ;;  %v16008_v18 = vld [vmem:[%s17233_s22 + $0x1e20] ss:$8 sps:$4 sm:$0xff]  }
 0x42a   : > { %11432 = vmatpush2.bf16.msra.mxu1 %v15933_v30  ;;  %11390 = vmatprep.subr.bf16.mxu0 %v15938_v31  ;;  %v16011_v30 = vld [vmem:[%s17233_s22 + $0x1f20] ss:$8 sps:$4 sm:$0xff]   ;;  %v16016_v31 = vld [vmem:[%s17233_s22 + $0x1e14] ss:$8 sps:$4 sm:$0xff]  }
 0x42b   : > { %11433 = vmatprep.subr.bf16.mxu1 %v15941_v17  ;;  %v16019_v17 = vld [vmem:[%s17233_s22 + $0x1f14] ss:$8 sps:$4 sm:$0xff]  }
 0x42d   : > { %11391 = vmatpush2.bf16.msra.mxu0 %v15936_v16  ;;  %v16014_v16 = vld [vmem:[%s17233_s22 + $0x1e10] ss:$8 sps:$4 sm:$0xff]  }
 0x42e   : > { %11434 = vmatpush2.bf16.msra.mxu1 %v15939_v19  ;;  %11392 = vmatprep.subr.bf16.mxu0 %v15944_v20  ;;  %v16017_v19 = vld [vmem:[%s17233_s22 + $0x1f10] ss:$8 sps:$4 sm:$0xff]   ;;  %v16022_v20 = vld [vmem:[%s17233_s22 + $0x1e04] ss:$8 sps:$4 sm:$0xff]  }
 0x42f   : > { %11435 = vmatprep.subr.bf16.mxu1 %v15947_v21  ;;  %v16025_v21 = vld [vmem:[%s17233_s22 + $0x1f04] ss:$8 sps:$4 sm:$0xff]  }
 0x431   : > { %11393 = vmatpush2.bf16.msra.mxu0 %v15942_v58  ;;  %v16020_v58 = vld [vmem:[%s17233_s22 + $0x1e00] ss:$8 sps:$4 sm:$0xff]  }
 0x432   : > { %11436 = vmatpush2.bf16.msra.mxu1 %v15945_v59  ;;  %11394 = vmatprep.subr.bf16.mxu0 %v15950_v32  ;;  %v16023_v59 = vld [vmem:[%s17233_s22 + $0x1f00] ss:$8 sps:$4 sm:$0xff]   ;;  %v16028_v32 = vld [vmem:[%s17233_s22 + $0x1ef4] ss:$8 sps:$4 sm:$0xff]  }
 0x433   : > { %11437 = vmatprep.subr.bf16.mxu1 %v15953_v13  ;;  %v16031_v13 = vld [vmem:[%s17233_s22 + $0x1ff4] ss:$8 sps:$4 sm:$0xff]  }
 0x435   : > { %11395 = vmatpush2.bf16.msra.mxu0 %v15948_v50  ;;  %v16026_v50 = vld [vmem:[%s17233_s22 + $0x1ef0] ss:$8 sps:$4 sm:$0xff]  }
 0x436   : > { %11438 = vmatpush2.bf16.msra.mxu1 %v15951_v14  ;;  %11396 = vmatprep.subr.bf16.mxu0 %v15956_v15  ;;  %v16029_v14 = vld [vmem:[%s17233_s22 + $0x1ff0] ss:$8 sps:$4 sm:$0xff]   ;;  %v16034_v15 = vld [vmem:[%s17233_s22 + $0x1ee4] ss:$8 sps:$4 sm:$0xff]  }
 0x437   : > { %11439 = vmatprep.subr.bf16.mxu1 %v15959_v37  ;;  %v16037_v37 = vld [vmem:[%s17233_s22 + $0x1fe4] ss:$8 sps:$4 sm:$0xff]  }
 0x439   : > { %11397 = vmatpush2.bf16.msra.mxu0 %v15954_v27  ;;  %v16032_v27 = vld [vmem:[%s17233_s22 + $0x1ee0] ss:$8 sps:$4 sm:$0xff]  }
 0x43a   : > { %11440 = vmatpush2.bf16.msra.mxu1 %v15957_v3  ;;  %11398 = vmatprep.subr.bf16.mxu0 %v15962_v4  ;;  %v16035_v3 = vld [vmem:[%s17233_s22 + $0x1fe0] ss:$8 sps:$4 sm:$0xff]   ;;  %v16040_v4 = vld [vmem:[%s17233_s22 + $0x1ed4] ss:$8 sps:$4 sm:$0xff]  }
 0x43b   : > { %11441 = vmatprep.subr.bf16.mxu1 %v15965_v26  ;;  %v16043_v26 = vld [vmem:[%s17233_s22 + $0x1fd4] ss:$8 sps:$4 sm:$0xff]  }
 0x43d   : > { %11399 = vmatpush2.bf16.msra.mxu0 %v15960_v39  ;;  %v16038_v39 = vld [vmem:[%s17233_s22 + $0x1ed0] ss:$8 sps:$4 sm:$0xff]  }
 0x43e   : > { %11442 = vmatpush2.bf16.msra.mxu1 %v15963_v5  ;;  %11400 = vmatprep.subr.bf16.mxu0 %v15968_v33  ;;  %v16041_v5 = vld [vmem:[%s17233_s22 + $0x1fd0] ss:$8 sps:$4 sm:$0xff]   ;;  %v16046_v33 = vld [vmem:[%s17233_s22 + $0x1ec4] ss:$8 sps:$4 sm:$0xff]  }
 0x43f   : > { %11443 = vmatprep.subr.bf16.mxu1 %v15971_v29  ;;  %v16049_v29 = vld [vmem:[%s17233_s22 + $0x1fc4] ss:$8 sps:$4 sm:$0xff]  }
 0x441   : > { %11401 = vmatpush2.bf16.msra.mxu0 %v15966_v35  ;;  %v16044_v35 = vld [vmem:[%s17233_s22 + $0x1ec0] ss:$8 sps:$4 sm:$0xff]  }
 0x442   : > { %11444 = vmatpush2.bf16.msra.mxu1 %v15969_v36  ;;  %11402 = vmatprep.subr.bf16.mxu0 %v15974_v46  ;;  %v16047_v36 = vld [vmem:[%s17233_s22 + $0x1fc0] ss:$8 sps:$4 sm:$0xff]   ;;  %v16052_v46 = vld [vmem:[%s17233_s22 + $0x1eb4] ss:$8 sps:$4 sm:$0xff]  }
 0x443   : > { %11445 = vmatprep.subr.bf16.mxu1 %v15977_v11  ;;  %v16055_v11 = vld [vmem:[%s17233_s22 + $0x1fb4] ss:$8 sps:$4 sm:$0xff]  }
 0x445   : > { %11403 = vmatpush2.bf16.msra.mxu0 %v15972_v49  ;;  %v16050_v49 = vld [vmem:[%s17233_s22 + $0x1eb0] ss:$8 sps:$4 sm:$0xff]  }
 0x446   : > { %11446 = vmatpush2.bf16.msra.mxu1 %v15975_v51  ;;  %11458 = vmatprep.subr.bf16.mxu0 %v15980_v52  ;;  %v16053_v51 = vld [vmem:[%s17233_s22 + $0x1fb0] ss:$8 sps:$4 sm:$0xff]   ;;  %v16058_v52 = vld [vmem:[%s17233_s22 + $0x1ea4] ss:$8 sps:$4 sm:$0xff]  }
 0x447   : > { %11501 = vmatprep.subr.bf16.mxu1 %v15983_v28  ;;  %v16061_v28 = vld [vmem:[%s17233_s22 + $0x1fa4] ss:$8 sps:$4 sm:$0xff]  }
 0x448   : > { %11405 = vmatmul.mubr.bf16.vlgmr.msra.gmra.mxu0 %v12745_v22  ;;  %v16056_v22 = vld [vmem:[%s17233_s22 + $0x1ea0] ss:$8 sps:$4 sm:$0xff]  }
 0x449   : > { %11448 = vmatmul.mubr.bf16.vlgmr.msra.gmra.mxu1 %v12747_v23  ;;  %11459 = vmatpush1.bf16.msra.mxu0 %v15978_v2  ;;  %v16059_v23 = vld [vmem:[%s17233_s22 + $0x1fa0] ss:$8 sps:$4 sm:$0xff]   ;;  %v16064_v2 = vld [vmem:[%s17233_s22 + $0x1e94] ss:$8 sps:$4 sm:$0xff]  }
 0x44a   : > { %11502 = vmatpush1.bf16.msra.mxu1 %v15981_v10  ;;  %11460 = vmatprep.subr.bf16.mxu0 %v15986_v12  ;;  %v16067_v10 = vld [vmem:[%s17233_s22 + $0x1f94] ss:$8 sps:$4 sm:$0xff]   ;;  %v16062_v12 = vld [vmem:[%s17233_s22 + $0x1e90] ss:$8 sps:$4 sm:$0xff]  }
 0x44b   : > { %11503 = vmatprep.subr.bf16.mxu1 %v15989_v8  ;;  %11490 = vmatprep.mubr.bf16.mxu0 %v12750_v56  ;;  %v16065_v8 = vld [vmem:[%s17233_s22 + $0x1f90] ss:$8 sps:$4 sm:$0xff]   ;;  %v16070_v56 = vld [vmem:[%s17233_s22 + $0x1e84] ss:$8 sps:$4 sm:$0xff]  }
 0x44c   : > { %11533 = vmatprep.mubr.bf16.mxu1 %v12752_v57  ;;  %v16073_v57 = vld [vmem:[%s17233_s22 + $0x1f84] ss:$8 sps:$4 sm:$0xff]  }
 0x44d   : > { %11461 = vmatpush1.bf16.msra.mxu0 %v15984_v62  ;;  %v16068_v62 = vld [vmem:[%s17233_s22 + $0x1e80] ss:$8 sps:$4 sm:$0xff]  }
 0x44e   : > { %11504 = vmatpush1.bf16.msra.mxu1 %v15987_v24  ;;  %11462 = vmatprep.subr.bf16.mxu0 %v15992_v25  ;;  %v16071_v24 = vld [vmem:[%s17233_s22 + $0x1f80] ss:$8 sps:$4 sm:$0xff]   ;;  %v16076_v25 = vld [vmem:[%s17233_s22 + $0x2074] ss:$8 sps:$4 sm:$0xff]  }
 0x44f   : > { %11505 = vmatprep.subr.bf16.mxu1 %v15995_v61  ;;  %v16079_v61 = vld [vmem:[%s17233_s22 + $0x2174] ss:$8 sps:$4 sm:$0xff]  }
 0x451   : > { %11463 = vmatpush1.bf16.msra.mxu0 %v15990_v60  ;;  %v18804_v60 = vld [vmem:[%s19885_s0 + $0x100] sm:$0xff] }
 0x452   : > { %11506 = vmatpush1.bf16.msra.mxu1 %v15993_v0  ;;  %11464 = vmatprep.subr.bf16.mxu0 %v15998_v1  ;;  %v12749_v0 = vcombine.low %v18712_v54, %v18721_v53  ;;  %v12751_v1 = vcombine.low %v18726_v34, %v18731_v55  ;;  %v16074_v54 = vld [vmem:[%s17233_s22 + $0x2070] ss:$8 sps:$4 sm:$0xff]   ;;  %v16082_v34 = vld [vmem:[%s17233_s22 + $0x2064] ss:$8 sps:$4 sm:$0xff]  }
 0x453   : > { %11507 = vmatprep.subr.bf16.mxu1 %v16001_v7  ;;  %v18813_v7 = vld [vmem:[%s19885_s0 + $0x280] sm:$0xff]  ;;  %v16077_v53 = vld [vmem:[%s17233_s22 + $0x2170] ss:$8 sps:$4 sm:$0xff]  }
 0x454   : > { %v16085_v55 = vld [vmem:[%s17233_s22 + $0x2164] ss:$8 sps:$4 sm:$0xff]  }
 0x455   : > { %11465 = vmatpush1.bf16.msra.mxu0 %v15996_v42  ;;  %v18818_v42 = vld [vmem:[%s19885_s0 + $0x108] sm:$0xff] }
 0x456   : > { %11508 = vmatpush1.bf16.msra.mxu1 %v15999_v38  ;;  %11466 = vmatprep.subr.bf16.mxu0 %v16004_v6  ;;  %v18823_v38 = vld [vmem:[%s19885_s0 + $0x288] sm:$0xff]  ;;  %v12754_v6 = vcombine.high %v18804_v60, %v18813_v7 }
 0x457   : > { %11509 = vmatprep.subr.bf16.mxu1 %v16007_v41  ;;  %v12756_v41 = vcombine.high %v18818_v42, %v18823_v38 }
 0x459   : > { %11467 = vmatpush1.bf16.msra.mxu0 %v16002_v9  ;;  %v16080_v9 = vld [vmem:[%s17233_s22 + $0x2060] ss:$8 sps:$4 sm:$0xff]  }
 0x45a   : > { %11510 = vmatpush1.bf16.msra.mxu1 %v16005_v43  ;;  %11468 = vmatprep.subr.bf16.mxu0 %v16010_v44  ;;  %v16083_v43 = vld [vmem:[%s17233_s22 + $0x2160] ss:$8 sps:$4 sm:$0xff]   ;;  %v16088_v44 = vld [vmem:[%s17233_s22 + $0x2054] ss:$8 sps:$4 sm:$0xff]  }
 0x45b   : > { %11511 = vmatprep.subr.bf16.mxu1 %v16013_v47  ;;  %v16091_v47 = vld [vmem:[%s17233_s22 + $0x2154] ss:$8 sps:$4 sm:$0xff]  }
 0x45d   : > { %11469 = vmatpush1.bf16.msra.mxu0 %v16008_v18  ;;  %v16086_v18 = vld [vmem:[%s17233_s22 + $0x2050] ss:$8 sps:$4 sm:$0xff]  }
 0x45e   : > { %11512 = vmatpush1.bf16.msra.mxu1 %v16011_v30  ;;  %11470 = vmatprep.subr.bf16.mxu0 %v16016_v31  ;;  %v16089_v30 = vld [vmem:[%s17233_s22 + $0x2150] ss:$8 sps:$4 sm:$0xff]   ;;  %v16094_v31 = vld [vmem:[%s17233_s22 + $0x2044] ss:$8 sps:$4 sm:$0xff]  }
 0x45f   : > { %11513 = vmatprep.subr.bf16.mxu1 %v16019_v17  ;;  %v16097_v17 = vld [vmem:[%s17233_s22 + $0x2144] ss:$8 sps:$4 sm:$0xff]  }
 0x461   : > { %11471 = vmatpush1.bf16.msra.mxu0 %v16014_v16  ;;  %v16092_v16 = vld [vmem:[%s17233_s22 + $0x2040] ss:$8 sps:$4 sm:$0xff]  }
 0x462   : > { %11514 = vmatpush1.bf16.msra.mxu1 %v16017_v19  ;;  %11472 = vmatprep.subr.bf16.mxu0 %v16022_v20  ;;  %v16095_v19 = vld [vmem:[%s17233_s22 + $0x2140] ss:$8 sps:$4 sm:$0xff]   ;;  %v16100_v20 = vld [vmem:[%s17233_s22 + $0x2034] ss:$8 sps:$4 sm:$0xff]  }
 0x463   : > { %11515 = vmatprep.subr.bf16.mxu1 %v16025_v21  ;;  %v16103_v21 = vld [vmem:[%s17233_s22 + $0x2134] ss:$8 sps:$4 sm:$0xff]  }
 0x465   : > { %11473 = vmatpush1.bf16.msra.mxu0 %v16020_v58  ;;  %v16098_v58 = vld [vmem:[%s17233_s22 + $0x2030] ss:$8 sps:$4 sm:$0xff]  }
 0x466   : > { %11516 = vmatpush1.bf16.msra.mxu1 %v16023_v59  ;;  %11474 = vmatprep.subr.bf16.mxu0 %v16028_v32  ;;  %v16101_v59 = vld [vmem:[%s17233_s22 + $0x2130] ss:$8 sps:$4 sm:$0xff]   ;;  %v16106_v32 = vld [vmem:[%s17233_s22 + $0x2024] ss:$8 sps:$4 sm:$0xff]  }
 0x467   : > { %11517 = vmatprep.subr.bf16.mxu1 %v16031_v13  ;;  %v16109_v13 = vld [vmem:[%s17233_s22 + $0x2124] ss:$8 sps:$4 sm:$0xff]  }
 0x469   : > { %11475 = vmatpush2.bf16.msra.mxu0 %v16026_v50  ;;  %v16104_v50 = vld [vmem:[%s17233_s22 + $0x2020] ss:$8 sps:$4 sm:$0xff]  }
 0x46a   : > { %11518 = vmatpush2.bf16.msra.mxu1 %v16029_v14  ;;  %11476 = vmatprep.subr.bf16.mxu0 %v16034_v15  ;;  %v16107_v14 = vld [vmem:[%s17233_s22 + $0x2120] ss:$8 sps:$4 sm:$0xff]   ;;  %v16112_v15 = vld [vmem:[%s17233_s22 + $0x2014] ss:$8 sps:$4 sm:$0xff]  }
 0x46b   : > { %11519 = vmatprep.subr.bf16.mxu1 %v16037_v37  ;;  %v16115_v37 = vld [vmem:[%s17233_s22 + $0x2114] ss:$8 sps:$4 sm:$0xff]  }
 0x46d   : > { %11477 = vmatpush2.bf16.msra.mxu0 %v16032_v27  ;;  %v16110_v27 = vld [vmem:[%s17233_s22 + $0x2010] ss:$8 sps:$4 sm:$0xff]  }
 0x46e   : > { %11520 = vmatpush2.bf16.msra.mxu1 %v16035_v3  ;;  %11478 = vmatprep.subr.bf16.mxu0 %v16040_v4  ;;  %v16113_v3 = vld [vmem:[%s17233_s22 + $0x2110] ss:$8 sps:$4 sm:$0xff]   ;;  %v16118_v4 = vld [vmem:[%s17233_s22 + $0x2004] ss:$8 sps:$4 sm:$0xff]  }
 0x46f   : > { %11521 = vmatprep.subr.bf16.mxu1 %v16043_v26  ;;  %v16121_v26 = vld [vmem:[%s17233_s22 + $0x2104] ss:$8 sps:$4 sm:$0xff]  }
 0x471   : > { %11479 = vmatpush2.bf16.msra.mxu0 %v16038_v39  ;;  %v16116_v39 = vld [vmem:[%s17233_s22 + $0x2000] ss:$8 sps:$4 sm:$0xff]  }
 0x472   : > { %11522 = vmatpush2.bf16.msra.mxu1 %v16041_v5  ;;  %11480 = vmatprep.subr.bf16.mxu0 %v16046_v33  ;;  %v16119_v5 = vld [vmem:[%s17233_s22 + $0x2100] ss:$8 sps:$4 sm:$0xff]   ;;  %v16124_v33 = vld [vmem:[%s17233_s22 + $0x20f4] ss:$8 sps:$4 sm:$0xff]  }
 0x473   : > { %11523 = vmatprep.subr.bf16.mxu1 %v16049_v29  ;;  %v16127_v29 = vld [vmem:[%s17233_s22 + $0x21f4] ss:$8 sps:$4 sm:$0xff]  }
 0x475   : > { %11481 = vmatpush2.bf16.msra.mxu0 %v16044_v35  ;;  %v16122_v35 = vld [vmem:[%s17233_s22 + $0x20f0] ss:$8 sps:$4 sm:$0xff]  }
 0x476   : > { %11524 = vmatpush2.bf16.msra.mxu1 %v16047_v36  ;;  %11482 = vmatprep.subr.bf16.mxu0 %v16052_v46  ;;  %v16125_v36 = vld [vmem:[%s17233_s22 + $0x21f0] ss:$8 sps:$4 sm:$0xff]   ;;  %v16130_v46 = vld [vmem:[%s17233_s22 + $0x20e4] ss:$8 sps:$4 sm:$0xff]  }
 0x477   : > { %11525 = vmatprep.subr.bf16.mxu1 %v16055_v11  ;;  %v16133_v11 = vld [vmem:[%s17233_s22 + $0x21e4] ss:$8 sps:$4 sm:$0xff]  }
 0x479   : > { %11483 = vmatpush2.bf16.msra.mxu0 %v16050_v49  ;;  %v16128_v49 = vld [vmem:[%s17233_s22 + $0x20e0] ss:$8 sps:$4 sm:$0xff]  }
 0x47a   : > { %11526 = vmatpush2.bf16.msra.mxu1 %v16053_v51  ;;  %11484 = vmatprep.subr.bf16.mxu0 %v16058_v52  ;;  %v16131_v51 = vld [vmem:[%s17233_s22 + $0x21e0] ss:$8 sps:$4 sm:$0xff]   ;;  %v16136_v52 = vld [vmem:[%s17233_s22 + $0x20d4] ss:$8 sps:$4 sm:$0xff]  }
 0x47b   : > { %11527 = vmatprep.subr.bf16.mxu1 %v16061_v28  ;;  %v16139_v28 = vld [vmem:[%s17233_s22 + $0x21d4] ss:$8 sps:$4 sm:$0xff]  }
 0x47d   : > { %11485 = vmatpush2.bf16.msra.mxu0 %v16056_v22  ;;  %v16134_v22 = vld [vmem:[%s17233_s22 + $0x20d0] ss:$8 sps:$4 sm:$0xff]  }
 0x47e   : > { %11528 = vmatpush2.bf16.msra.mxu1 %v16059_v23  ;;  %11486 = vmatprep.subr.bf16.mxu0 %v16064_v2  ;;  %v16137_v23 = vld [vmem:[%s17233_s22 + $0x21d0] ss:$8 sps:$4 sm:$0xff]   ;;  %v16142_v2 = vld [vmem:[%s17233_s22 + $0x20c4] ss:$8 sps:$4 sm:$0xff]  }
 0x47f   : > { %11529 = vmatprep.subr.bf16.mxu1 %v16067_v10  ;;  %v16145_v10 = vld [vmem:[%s17233_s22 + $0x21c4] ss:$8 sps:$4 sm:$0xff]  }
 0x481   : > { %11487 = vmatpush2.bf16.msra.mxu0 %v16062_v12  ;;  %v16140_v12 = vld [vmem:[%s17233_s22 + $0x20c0] ss:$8 sps:$4 sm:$0xff]  }
 0x482   : > { %11530 = vmatpush2.bf16.msra.mxu1 %v16065_v8  ;;  %11488 = vmatprep.subr.bf16.mxu0 %v16070_v56  ;;  %v16143_v8 = vld [vmem:[%s17233_s22 + $0x21c0] ss:$8 sps:$4 sm:$0xff]   ;;  %v16148_v56 = vld [vmem:[%s17233_s22 + $0x20b4] ss:$8 sps:$4 sm:$0xff]  }
 0x483   : > { %11531 = vmatprep.subr.bf16.mxu1 %v16073_v57  ;;  %v16151_v57 = vld [vmem:[%s17233_s22 + $0x21b4] ss:$8 sps:$4 sm:$0xff]  }
 0x485   : > { %11489 = vmatpush2.bf16.msra.mxu0 %v16068_v62  ;;  %v16146_v62 = vld [vmem:[%s17233_s22 + $0x20b0] ss:$8 sps:$4 sm:$0xff]  }
 0x486   : > { %11532 = vmatpush2.bf16.msra.mxu1 %v16071_v24  ;;  %11544 = vmatprep.subr.bf16.mxu0 %v16076_v25  ;;  %v16149_v24 = vld [vmem:[%s17233_s22 + $0x21b0] ss:$8 sps:$4 sm:$0xff]   ;;  %v16154_v25 = vld [vmem:[%s17233_s22 + $0x20a4] ss:$8 sps:$4 sm:$0xff]  }
 0x487   : > { %11587 = vmatprep.subr.bf16.mxu1 %v16079_v61  ;;  %v16157_v61 = vld [vmem:[%s17233_s22 + $0x21a4] ss:$8 sps:$4 sm:$0xff]  }
 0x488   : > { %11491 = vmatmul.mubr.bf16.vlgmr.msra.gmra.mxu0 %v12749_v0  ;;  %v16152_v0 = vld [vmem:[%s17233_s22 + $0x20a0] ss:$8 sps:$4 sm:$0xff]  }
 0x489   : > { %11534 = vmatmul.mubr.bf16.vlgmr.msra.gmra.mxu1 %v12751_v1  ;;  %11545 = vmatpush1.bf16.msra.mxu0 %v16074_v54  ;;  %v16155_v1 = vld [vmem:[%s17233_s22 + $0x21a0] ss:$8 sps:$4 sm:$0xff]   ;;  %v16160_v54 = vld [vmem:[%s17233_s22 + $0x2094] ss:$8 sps:$4 sm:$0xff]  }
 0x48a   : > { %11588 = vmatpush1.bf16.msra.mxu1 %v16077_v53  ;;  %11546 = vmatprep.subr.bf16.mxu0 %v16082_v34  ;;  %v16163_v53 = vld [vmem:[%s17233_s22 + $0x2194] ss:$8 sps:$4 sm:$0xff]   ;;  %v16158_v34 = vld [vmem:[%s17233_s22 + $0x2090] ss:$8 sps:$4 sm:$0xff]  }
 0x48b   : > { %11589 = vmatprep.subr.bf16.mxu1 %v16085_v55  ;;  %11576 = vmatprep.mubr.bf16.mxu0 %v12754_v6  ;;  %v16161_v55 = vld [vmem:[%s17233_s22 + $0x2190] ss:$8 sps:$4 sm:$0xff]   ;;  %v16166_v6 = vld [vmem:[%s17233_s22 + $0x2084] ss:$8 sps:$4 sm:$0xff]  }
 0x48c   : > { %11619 = vmatprep.mubr.bf16.mxu1 %v12756_v41  ;;  %v16169_v41 = vld [vmem:[%s17233_s22 + $0x2184] ss:$8 sps:$4 sm:$0xff]  }
 0x48d   : > { %11547 = vmatpush1.bf16.msra.mxu0 %v16080_v9  ;;  %v16164_v9 = vld [vmem:[%s17233_s22 + $0x2080] ss:$8 sps:$4 sm:$0xff]  }
 0x48e   : > { %11590 = vmatpush1.bf16.msra.mxu1 %v16083_v43  ;;  %11548 = vmatprep.subr.bf16.mxu0 %v16088_v44  ;;  %v16167_v43 = vld [vmem:[%s17233_s22 + $0x2180] ss:$8 sps:$4 sm:$0xff]   ;;  %v16172_v44 = vld [vmem:[%s17233_s22 + $0x2274] ss:$8 sps:$4 sm:$0xff]  }
 0x48f   : > { %11591 = vmatprep.subr.bf16.mxu1 %v16091_v47  ;;  %v16175_v47 = vld [vmem:[%s17233_s22 + $0x2374] ss:$8 sps:$4 sm:$0xff]  }
 0x491   : > { %11549 = vmatpush1.bf16.msra.mxu0 %v16086_v18  ;;  %v18896_v18 = vld [vmem:[%s19885_s0 + $0x110] sm:$0xff] }
 0x492   : > { %11592 = vmatpush1.bf16.msra.mxu1 %v16089_v30  ;;  %11550 = vmatprep.subr.bf16.mxu0 %v16094_v31  ;;  %v12753_v30 = vcombine.low %v18804_v60, %v18813_v7  ;;  %v12755_v31 = vcombine.low %v18818_v42, %v18823_v38  ;;  %v16170_v60 = vld [vmem:[%s17233_s22 + $0x2270] ss:$8 sps:$4 sm:$0xff]   ;;  %v16178_v42 = vld [vmem:[%s17233_s22 + $0x2264] ss:$8 sps:$4 sm:$0xff]  }
 0x493   : > { %11593 = vmatprep.subr.bf16.mxu1 %v16097_v17  ;;  %v18905_v17 = vld [vmem:[%s19885_s0 + $0x290] sm:$0xff]  ;;  %v16181_v38 = vld [vmem:[%s17233_s22 + $0x2364] ss:$8 sps:$4 sm:$0xff]  }
 0x494   : > { %v16173_v7 = vld [vmem:[%s17233_s22 + $0x2370] ss:$8 sps:$4 sm:$0xff]  }
 0x495   : > { %11551 = vmatpush1.bf16.msra.mxu0 %v16092_v16  ;;  %v18910_v16 = vld [vmem:[%s19885_s0 + $0x118] sm:$0xff] }
 0x496   : > { %11594 = vmatpush1.bf16.msra.mxu1 %v16095_v19  ;;  %11552 = vmatprep.subr.bf16.mxu0 %v16100_v20  ;;  %v18915_v19 = vld [vmem:[%s19885_s0 + $0x298] sm:$0xff]  ;;  %v12758_v20 = vcombine.high %v18896_v18, %v18905_v17 }
 0x497   : > { %11595 = vmatprep.subr.bf16.mxu1 %v16103_v21  ;;  %v12760_v21 = vcombine.high %v18910_v16, %v18915_v19 }
 0x499   : > { %11553 = vmatpush1.bf16.msra.mxu0 %v16098_v58  ;;  %v16176_v58 = vld [vmem:[%s17233_s22 + $0x2260] ss:$8 sps:$4 sm:$0xff]  }
 0x49a   : > { %11596 = vmatpush1.bf16.msra.mxu1 %v16101_v59  ;;  %11554 = vmatprep.subr.bf16.mxu0 %v16106_v32  ;;  %v16179_v59 = vld [vmem:[%s17233_s22 + $0x2360] ss:$8 sps:$4 sm:$0xff]   ;;  %v16184_v32 = vld [vmem:[%s17233_s22 + $0x2254] ss:$8 sps:$4 sm:$0xff]  }
 0x49b   : > { %11597 = vmatprep.subr.bf16.mxu1 %v16109_v13  ;;  %v16187_v13 = vld [vmem:[%s17233_s22 + $0x2354] ss:$8 sps:$4 sm:$0xff]  }
 0x49d   : > { %11555 = vmatpush1.bf16.msra.mxu0 %v16104_v50  ;;  %v16182_v50 = vld [vmem:[%s17233_s22 + $0x2250] ss:$8 sps:$4 sm:$0xff]  }
 0x49e   : > { %11598 = vmatpush1.bf16.msra.mxu1 %v16107_v14  ;;  %11556 = vmatprep.subr.bf16.mxu0 %v16112_v15  ;;  %v16185_v14 = vld [vmem:[%s17233_s22 + $0x2350] ss:$8 sps:$4 sm:$0xff]   ;;  %v16190_v15 = vld [vmem:[%s17233_s22 + $0x2244] ss:$8 sps:$4 sm:$0xff]  }
 0x49f   : > { %11599 = vmatprep.subr.bf16.mxu1 %v16115_v37  ;;  %v16193_v37 = vld [vmem:[%s17233_s22 + $0x2344] ss:$8 sps:$4 sm:$0xff]  }
 0x4a1   : > { %11557 = vmatpush1.bf16.msra.mxu0 %v16110_v27  ;;  %v16188_v27 = vld [vmem:[%s17233_s22 + $0x2240] ss:$8 sps:$4 sm:$0xff]  }
 0x4a2   : > { %11600 = vmatpush1.bf16.msra.mxu1 %v16113_v3  ;;  %11558 = vmatprep.subr.bf16.mxu0 %v16118_v4  ;;  %v16191_v3 = vld [vmem:[%s17233_s22 + $0x2340] ss:$8 sps:$4 sm:$0xff]   ;;  %v16196_v4 = vld [vmem:[%s17233_s22 + $0x2234] ss:$8 sps:$4 sm:$0xff]  }
 0x4a3   : > { %11601 = vmatprep.subr.bf16.mxu1 %v16121_v26  ;;  %v16199_v26 = vld [vmem:[%s17233_s22 + $0x2334] ss:$8 sps:$4 sm:$0xff]  }
 0x4a5   : > { %11559 = vmatpush1.bf16.msra.mxu0 %v16116_v39  ;;  %v16194_v39 = vld [vmem:[%s17233_s22 + $0x2230] ss:$8 sps:$4 sm:$0xff]  }
 0x4a6   : > { %11602 = vmatpush1.bf16.msra.mxu1 %v16119_v5  ;;  %11560 = vmatprep.subr.bf16.mxu0 %v16124_v33  ;;  %v16197_v5 = vld [vmem:[%s17233_s22 + $0x2330] ss:$8 sps:$4 sm:$0xff]   ;;  %v16202_v33 = vld [vmem:[%s17233_s22 + $0x2224] ss:$8 sps:$4 sm:$0xff]  }
 0x4a7   : > { %11603 = vmatprep.subr.bf16.mxu1 %v16127_v29  ;;  %v16205_v29 = vld [vmem:[%s17233_s22 + $0x2324] ss:$8 sps:$4 sm:$0xff]  }
 0x4a9   : > { %11561 = vmatpush2.bf16.msra.mxu0 %v16122_v35  ;;  %v16200_v35 = vld [vmem:[%s17233_s22 + $0x2220] ss:$8 sps:$4 sm:$0xff]  }
 0x4aa   : > { %11604 = vmatpush2.bf16.msra.mxu1 %v16125_v36  ;;  %11562 = vmatprep.subr.bf16.mxu0 %v16130_v46  ;;  %v16203_v36 = vld [vmem:[%s17233_s22 + $0x2320] ss:$8 sps:$4 sm:$0xff]   ;;  %v16208_v46 = vld [vmem:[%s17233_s22 + $0x2214] ss:$8 sps:$4 sm:$0xff]  }
 0x4ab   : > { %11605 = vmatprep.subr.bf16.mxu1 %v16133_v11  ;;  %v16211_v11 = vld [vmem:[%s17233_s22 + $0x2314] ss:$8 sps:$4 sm:$0xff]  }
 0x4ad   : > { %11563 = vmatpush2.bf16.msra.mxu0 %v16128_v49  ;;  %v16206_v49 = vld [vmem:[%s17233_s22 + $0x2210] ss:$8 sps:$4 sm:$0xff]  }
 0x4ae   : > { %11606 = vmatpush2.bf16.msra.mxu1 %v16131_v51  ;;  %11564 = vmatprep.subr.bf16.mxu0 %v16136_v52  ;;  %v16209_v51 = vld [vmem:[%s17233_s22 + $0x2310] ss:$8 sps:$4 sm:$0xff]   ;;  %v16214_v52 = vld [vmem:[%s17233_s22 + $0x2204] ss:$8 sps:$4 sm:$0xff]  }
 0x4af   : > { %11607 = vmatprep.subr.bf16.mxu1 %v16139_v28  ;;  %v16217_v28 = vld [vmem:[%s17233_s22 + $0x2304] ss:$8 sps:$4 sm:$0xff]  }
 0x4b1   : > { %11565 = vmatpush2.bf16.msra.mxu0 %v16134_v22  ;;  %v16212_v22 = vld [vmem:[%s17233_s22 + $0x2200] ss:$8 sps:$4 sm:$0xff]  }
 0x4b2   : > { %11608 = vmatpush2.bf16.msra.mxu1 %v16137_v23  ;;  %11566 = vmatprep.subr.bf16.mxu0 %v16142_v2  ;;  %v16215_v23 = vld [vmem:[%s17233_s22 + $0x2300] ss:$8 sps:$4 sm:$0xff]   ;;  %v16220_v2 = vld [vmem:[%s17233_s22 + $0x22f4] ss:$8 sps:$4 sm:$0xff]  }
 0x4b3   : > { %11609 = vmatprep.subr.bf16.mxu1 %v16145_v10  ;;  %v16223_v10 = vld [vmem:[%s17233_s22 + $0x23f4] ss:$8 sps:$4 sm:$0xff]  }
 0x4b5   : > { %11567 = vmatpush2.bf16.msra.mxu0 %v16140_v12  ;;  %v16218_v12 = vld [vmem:[%s17233_s22 + $0x22f0] ss:$8 sps:$4 sm:$0xff]  }
 0x4b6   : > { %11610 = vmatpush2.bf16.msra.mxu1 %v16143_v8  ;;  %11568 = vmatprep.subr.bf16.mxu0 %v16148_v56  ;;  %v16221_v8 = vld [vmem:[%s17233_s22 + $0x23f0] ss:$8 sps:$4 sm:$0xff]   ;;  %v16226_v56 = vld [vmem:[%s17233_s22 + $0x22e4] ss:$8 sps:$4 sm:$0xff]  }
 0x4b7   : > { %11611 = vmatprep.subr.bf16.mxu1 %v16151_v57  ;;  %v16229_v57 = vld [vmem:[%s17233_s22 + $0x23e4] ss:$8 sps:$4 sm:$0xff]  }
 0x4b9   : > { %11569 = vmatpush2.bf16.msra.mxu0 %v16146_v62  ;;  %v16224_v62 = vld [vmem:[%s17233_s22 + $0x22e0] ss:$8 sps:$4 sm:$0xff]  }
 0x4ba   : > { %11612 = vmatpush2.bf16.msra.mxu1 %v16149_v24  ;;  %11570 = vmatprep.subr.bf16.mxu0 %v16154_v25  ;;  %v16227_v24 = vld [vmem:[%s17233_s22 + $0x23e0] ss:$8 sps:$4 sm:$0xff]   ;;  %v16232_v25 = vld [vmem:[%s17233_s22 + $0x22d4] ss:$8 sps:$4 sm:$0xff]  }
 0x4bb   : > { %11613 = vmatprep.subr.bf16.mxu1 %v16157_v61  ;;  %v16235_v61 = vld [vmem:[%s17233_s22 + $0x23d4] ss:$8 sps:$4 sm:$0xff]  }
 0x4bd   : > { %11571 = vmatpush2.bf16.msra.mxu0 %v16152_v0  ;;  %v16230_v0 = vld [vmem:[%s17233_s22 + $0x22d0] ss:$8 sps:$4 sm:$0xff]  }
 0x4be   : > { %11614 = vmatpush2.bf16.msra.mxu1 %v16155_v1  ;;  %11572 = vmatprep.subr.bf16.mxu0 %v16160_v54  ;;  %v16233_v1 = vld [vmem:[%s17233_s22 + $0x23d0] ss:$8 sps:$4 sm:$0xff]   ;;  %v16238_v54 = vld [vmem:[%s17233_s22 + $0x22c4] ss:$8 sps:$4 sm:$0xff]  }
 0x4bf   : > { %11615 = vmatprep.subr.bf16.mxu1 %v16163_v53  ;;  %v16241_v53 = vld [vmem:[%s17233_s22 + $0x23c4] ss:$8 sps:$4 sm:$0xff]  }
 0x4c1   : > { %11573 = vmatpush2.bf16.msra.mxu0 %v16158_v34  ;;  %v16236_v34 = vld [vmem:[%s17233_s22 + $0x22c0] ss:$8 sps:$4 sm:$0xff]  }
 0x4c2   : > { %11616 = vmatpush2.bf16.msra.mxu1 %v16161_v55  ;;  %11574 = vmatprep.subr.bf16.mxu0 %v16166_v6  ;;  %v16239_v55 = vld [vmem:[%s17233_s22 + $0x23c0] ss:$8 sps:$4 sm:$0xff]   ;;  %v16244_v6 = vld [vmem:[%s17233_s22 + $0x22b4] ss:$8 sps:$4 sm:$0xff]  }
 0x4c3   : > { %11617 = vmatprep.subr.bf16.mxu1 %v16169_v41  ;;  %v16247_v41 = vld [vmem:[%s17233_s22 + $0x23b4] ss:$8 sps:$4 sm:$0xff]  }
 0x4c5   : > { %11575 = vmatpush2.bf16.msra.mxu0 %v16164_v9  ;;  %v16242_v9 = vld [vmem:[%s17233_s22 + $0x22b0] ss:$8 sps:$4 sm:$0xff]  }
 0x4c6   : > { %11618 = vmatpush2.bf16.msra.mxu1 %v16167_v43  ;;  %11630 = vmatprep.subr.bf16.mxu0 %v16172_v44  ;;  %v16245_v43 = vld [vmem:[%s17233_s22 + $0x23b0] ss:$8 sps:$4 sm:$0xff]   ;;  %v16250_v44 = vld [vmem:[%s17233_s22 + $0x22a4] ss:$8 sps:$4 sm:$0xff]  }
 0x4c7   : > { %11673 = vmatprep.subr.bf16.mxu1 %v16175_v47  ;;  %v16253_v47 = vld [vmem:[%s17233_s22 + $0x23a4] ss:$8 sps:$4 sm:$0xff]  }
 0x4c8   : > { %11577 = vmatmul.mubr.bf16.vlgmr.msra.gmra.mxu0 %v12753_v30  ;;  %v16248_v30 = vld [vmem:[%s17233_s22 + $0x22a0] ss:$8 sps:$4 sm:$0xff]  }
 0x4c9   : > { %11620 = vmatmul.mubr.bf16.vlgmr.msra.gmra.mxu1 %v12755_v31  ;;  %11631 = vmatpush1.bf16.msra.mxu0 %v16170_v60  ;;  %v16251_v31 = vld [vmem:[%s17233_s22 + $0x23a0] ss:$8 sps:$4 sm:$0xff]   ;;  %v16256_v60 = vld [vmem:[%s17233_s22 + $0x2294] ss:$8 sps:$4 sm:$0xff]  }
 0x4ca   : > { %11674 = vmatpush1.bf16.msra.mxu1 %v16173_v7  ;;  %11632 = vmatprep.subr.bf16.mxu0 %v16178_v42  ;;  %v16259_v7 = vld [vmem:[%s17233_s22 + $0x2394] ss:$8 sps:$4 sm:$0xff]   ;;  %v16254_v42 = vld [vmem:[%s17233_s22 + $0x2290] ss:$8 sps:$4 sm:$0xff]  }
 0x4cb   : > { %11675 = vmatprep.subr.bf16.mxu1 %v16181_v38  ;;  %11662 = vmatprep.mubr.bf16.mxu0 %v12758_v20  ;;  %v16257_v38 = vld [vmem:[%s17233_s22 + $0x2390] ss:$8 sps:$4 sm:$0xff]   ;;  %v16262_v20 = vld [vmem:[%s17233_s22 + $0x2284] ss:$8 sps:$4 sm:$0xff]  }
 0x4cc   : > { %11705 = vmatprep.mubr.bf16.mxu1 %v12760_v21  ;;  %v16265_v21 = vld [vmem:[%s17233_s22 + $0x2384] ss:$8 sps:$4 sm:$0xff]  }
 0x4cd   : > { %11633 = vmatpush1.bf16.msra.mxu0 %v16176_v58  ;;  %v16260_v58 = vld [vmem:[%s17233_s22 + $0x2280] ss:$8 sps:$4 sm:$0xff]  }
 0x4ce   : > { %11676 = vmatpush1.bf16.msra.mxu1 %v16179_v59  ;;  %11634 = vmatprep.subr.bf16.mxu0 %v16184_v32  ;;  %v16263_v59 = vld [vmem:[%s17233_s22 + $0x2380] ss:$8 sps:$4 sm:$0xff]   ;;  %v16268_v32 = vld [vmem:[%s17233_s22 + $0x2474] ss:$8 sps:$4 sm:$0xff]  }
 0x4cf   : > { %11677 = vmatprep.subr.bf16.mxu1 %v16187_v13  ;;  %v16271_v13 = vld [vmem:[%s17233_s22 + $0x2574] ss:$8 sps:$4 sm:$0xff]  }
 0x4d1   : > { %11635 = vmatpush1.bf16.msra.mxu0 %v16182_v50  ;;  %v18988_v50 = vld [vmem:[%s19885_s0 + $0x120] sm:$0xff] }
 0x4d2   : > { %11678 = vmatpush1.bf16.msra.mxu1 %v16185_v14  ;;  %11636 = vmatprep.subr.bf16.mxu0 %v16190_v15  ;;  %v12757_v14 = vcombine.low %v18896_v18, %v18905_v17  ;;  %v12759_v15 = vcombine.low %v18910_v16, %v18915_v19  ;;  %v16266_v18 = vld [vmem:[%s17233_s22 + $0x2470] ss:$8 sps:$4 sm:$0xff]   ;;  %v16274_v16 = vld [vmem:[%s17233_s22 + $0x2464] ss:$8 sps:$4 sm:$0xff]  }
 0x4d3   : > { %11679 = vmatprep.subr.bf16.mxu1 %v16193_v37  ;;  %v18997_v37 = vld [vmem:[%s19885_s0 + $0x2a0] sm:$0xff]  ;;  %v16269_v17 = vld [vmem:[%s17233_s22 + $0x2570] ss:$8 sps:$4 sm:$0xff]  }
 0x4d4   : > { %v16277_v19 = vld [vmem:[%s17233_s22 + $0x2564] ss:$8 sps:$4 sm:$0xff]  }
 0x4d5   : > { %11637 = vmatpush1.bf16.msra.mxu0 %v16188_v27  ;;  %v19002_v27 = vld [vmem:[%s19885_s0 + $0x128] sm:$0xff] }
 0x4d6   : > { %11680 = vmatpush1.bf16.msra.mxu1 %v16191_v3  ;;  %11638 = vmatprep.subr.bf16.mxu0 %v16196_v4  ;;  %v19007_v3 = vld [vmem:[%s19885_s0 + $0x2a8] sm:$0xff]  ;;  %v12762_v4 = vcombine.high %v18988_v50, %v18997_v37 }
 0x4d7   : > { %11681 = vmatprep.subr.bf16.mxu1 %v16199_v26  ;;  %v12764_v26 = vcombine.high %v19002_v27, %v19007_v3 }
 0x4d9   : > { %11639 = vmatpush1.bf16.msra.mxu0 %v16194_v39  ;;  %v16272_v39 = vld [vmem:[%s17233_s22 + $0x2460] ss:$8 sps:$4 sm:$0xff]  }
 0x4da   : > { %11682 = vmatpush1.bf16.msra.mxu1 %v16197_v5  ;;  %11640 = vmatprep.subr.bf16.mxu0 %v16202_v33  ;;  %v16275_v5 = vld [vmem:[%s17233_s22 + $0x2560] ss:$8 sps:$4 sm:$0xff]   ;;  %v16280_v33 = vld [vmem:[%s17233_s22 + $0x2454] ss:$8 sps:$4 sm:$0xff]  }
 0x4db   : > { %11683 = vmatprep.subr.bf16.mxu1 %v16205_v29  ;;  %v16283_v29 = vld [vmem:[%s17233_s22 + $0x2554] ss:$8 sps:$4 sm:$0xff]  }
 0x4dd   : > { %11641 = vmatpush1.bf16.msra.mxu0 %v16200_v35  ;;  %v16278_v35 = vld [vmem:[%s17233_s22 + $0x2450] ss:$8 sps:$4 sm:$0xff]  }
 0x4de   : > { %11684 = vmatpush1.bf16.msra.mxu1 %v16203_v36  ;;  %11642 = vmatprep.subr.bf16.mxu0 %v16208_v46  ;;  %v16281_v36 = vld [vmem:[%s17233_s22 + $0x2550] ss:$8 sps:$4 sm:$0xff]   ;;  %v16286_v46 = vld [vmem:[%s17233_s22 + $0x2444] ss:$8 sps:$4 sm:$0xff]  }
 0x4df   : > { %11685 = vmatprep.subr.bf16.mxu1 %v16211_v11  ;;  %v16289_v11 = vld [vmem:[%s17233_s22 + $0x2544] ss:$8 sps:$4 sm:$0xff]  }
 0x4e1   : > { %11643 = vmatpush1.bf16.msra.mxu0 %v16206_v49  ;;  %v16284_v49 = vld [vmem:[%s17233_s22 + $0x2440] ss:$8 sps:$4 sm:$0xff]  }
 0x4e2   : > { %11686 = vmatpush1.bf16.msra.mxu1 %v16209_v51  ;;  %11644 = vmatprep.subr.bf16.mxu0 %v16214_v52  ;;  %v16287_v51 = vld [vmem:[%s17233_s22 + $0x2540] ss:$8 sps:$4 sm:$0xff]   ;;  %v16292_v52 = vld [vmem:[%s17233_s22 + $0x2434] ss:$8 sps:$4 sm:$0xff]  }
 0x4e3   : > { %11687 = vmatprep.subr.bf16.mxu1 %v16217_v28  ;;  %v16295_v28 = vld [vmem:[%s17233_s22 + $0x2534] ss:$8 sps:$4 sm:$0xff]  }
 0x4e5   : > { %11645 = vmatpush1.bf16.msra.mxu0 %v16212_v22  ;;  %v16290_v22 = vld [vmem:[%s17233_s22 + $0x2430] ss:$8 sps:$4 sm:$0xff]  }
 0x4e6   : > { %11688 = vmatpush1.bf16.msra.mxu1 %v16215_v23  ;;  %11646 = vmatprep.subr.bf16.mxu0 %v16220_v2  ;;  %v16293_v23 = vld [vmem:[%s17233_s22 + $0x2530] ss:$8 sps:$4 sm:$0xff]   ;;  %v16298_v2 = vld [vmem:[%s17233_s22 + $0x2424] ss:$8 sps:$4 sm:$0xff]  }
 0x4e7   : > { %11689 = vmatprep.subr.bf16.mxu1 %v16223_v10  ;;  %v16301_v10 = vld [vmem:[%s17233_s22 + $0x2524] ss:$8 sps:$4 sm:$0xff]  }
 0x4e9   : > { %11647 = vmatpush2.bf16.msra.mxu0 %v16218_v12  ;;  %v16296_v12 = vld [vmem:[%s17233_s22 + $0x2420] ss:$8 sps:$4 sm:$0xff]  }
 0x4ea   : > { %11690 = vmatpush2.bf16.msra.mxu1 %v16221_v8  ;;  %11648 = vmatprep.subr.bf16.mxu0 %v16226_v56  ;;  %v16299_v8 = vld [vmem:[%s17233_s22 + $0x2520] ss:$8 sps:$4 sm:$0xff]   ;;  %v16304_v56 = vld [vmem:[%s17233_s22 + $0x2414] ss:$8 sps:$4 sm:$0xff]  }
 0x4eb   : > { %11691 = vmatprep.subr.bf16.mxu1 %v16229_v57  ;;  %v16307_v57 = vld [vmem:[%s17233_s22 + $0x2514] ss:$8 sps:$4 sm:$0xff]  }
 0x4ed   : > { %11649 = vmatpush2.bf16.msra.mxu0 %v16224_v62  ;;  %v16302_v62 = vld [vmem:[%s17233_s22 + $0x2410] ss:$8 sps:$4 sm:$0xff]  }
 0x4ee   : > { %11692 = vmatpush2.bf16.msra.mxu1 %v16227_v24  ;;  %11650 = vmatprep.subr.bf16.mxu0 %v16232_v25  ;;  %v16305_v24 = vld [vmem:[%s17233_s22 + $0x2510] ss:$8 sps:$4 sm:$0xff]   ;;  %v16310_v25 = vld [vmem:[%s17233_s22 + $0x2404] ss:$8 sps:$4 sm:$0xff]  }
 0x4ef   : > { %11693 = vmatprep.subr.bf16.mxu1 %v16235_v61  ;;  %v16313_v61 = vld [vmem:[%s17233_s22 + $0x2504] ss:$8 sps:$4 sm:$0xff]  }
 0x4f1   : > { %11651 = vmatpush2.bf16.msra.mxu0 %v16230_v0  ;;  %v16308_v0 = vld [vmem:[%s17233_s22 + $0x2400] ss:$8 sps:$4 sm:$0xff]  }
 0x4f2   : > { %11694 = vmatpush2.bf16.msra.mxu1 %v16233_v1  ;;  %11652 = vmatprep.subr.bf16.mxu0 %v16238_v54  ;;  %v16311_v1 = vld [vmem:[%s17233_s22 + $0x2500] ss:$8 sps:$4 sm:$0xff]   ;;  %v16316_v54 = vld [vmem:[%s17233_s22 + $0x24f4] ss:$8 sps:$4 sm:$0xff]  }
 0x4f3   : > { %11695 = vmatprep.subr.bf16.mxu1 %v16241_v53  ;;  %v16319_v53 = vld [vmem:[%s17233_s22 + $0x25f4] ss:$8 sps:$4 sm:$0xff]  }
 0x4f5   : > { %11653 = vmatpush2.bf16.msra.mxu0 %v16236_v34  ;;  %v16314_v34 = vld [vmem:[%s17233_s22 + $0x24f0] ss:$8 sps:$4 sm:$0xff]  }
 0x4f6   : > { %11696 = vmatpush2.bf16.msra.mxu1 %v16239_v55  ;;  %11654 = vmatprep.subr.bf16.mxu0 %v16244_v6  ;;  %v16317_v55 = vld [vmem:[%s17233_s22 + $0x25f0] ss:$8 sps:$4 sm:$0xff]   ;;  %v16322_v6 = vld [vmem:[%s17233_s22 + $0x24e4] ss:$8 sps:$4 sm:$0xff]  }
 0x4f7   : > { %11697 = vmatprep.subr.bf16.mxu1 %v16247_v41  ;;  %v16325_v41 = vld [vmem:[%s17233_s22 + $0x25e4] ss:$8 sps:$4 sm:$0xff]  }
 0x4f9   : > { %11655 = vmatpush2.bf16.msra.mxu0 %v16242_v9  ;;  %v16320_v9 = vld [vmem:[%s17233_s22 + $0x24e0] ss:$8 sps:$4 sm:$0xff]  }
 0x4fa   : > { %11698 = vmatpush2.bf16.msra.mxu1 %v16245_v43  ;;  %11656 = vmatprep.subr.bf16.mxu0 %v16250_v44  ;;  %v16323_v43 = vld [vmem:[%s17233_s22 + $0x25e0] ss:$8 sps:$4 sm:$0xff]   ;;  %v16328_v44 = vld [vmem:[%s17233_s22 + $0x24d4] ss:$8 sps:$4 sm:$0xff]  }
 0x4fb   : > { %11699 = vmatprep.subr.bf16.mxu1 %v16253_v47  ;;  %v16331_v47 = vld [vmem:[%s17233_s22 + $0x25d4] ss:$8 sps:$4 sm:$0xff]  }
 0x4fd   : > { %11657 = vmatpush2.bf16.msra.mxu0 %v16248_v30  ;;  %v16326_v30 = vld [vmem:[%s17233_s22 + $0x24d0] ss:$8 sps:$4 sm:$0xff]  }
 0x4fe   : > { %11700 = vmatpush2.bf16.msra.mxu1 %v16251_v31  ;;  %11658 = vmatprep.subr.bf16.mxu0 %v16256_v60  ;;  %v16329_v31 = vld [vmem:[%s17233_s22 + $0x25d0] ss:$8 sps:$4 sm:$0xff]   ;;  %v16334_v60 = vld [vmem:[%s17233_s22 + $0x24c4] ss:$8 sps:$4 sm:$0xff]  }
 0x4ff   : > { %11701 = vmatprep.subr.bf16.mxu1 %v16259_v7  ;;  %v16337_v7 = vld [vmem:[%s17233_s22 + $0x25c4] ss:$8 sps:$4 sm:$0xff]  }
 0x501   : > { %11659 = vmatpush2.bf16.msra.mxu0 %v16254_v42  ;;  %v16332_v42 = vld [vmem:[%s17233_s22 + $0x24c0] ss:$8 sps:$4 sm:$0xff]  }
 0x502   : > { %11702 = vmatpush2.bf16.msra.mxu1 %v16257_v38  ;;  %11660 = vmatprep.subr.bf16.mxu0 %v16262_v20  ;;  %v16335_v38 = vld [vmem:[%s17233_s22 + $0x25c0] ss:$8 sps:$4 sm:$0xff]   ;;  %v16340_v20 = vld [vmem:[%s17233_s22 + $0x24b4] ss:$8 sps:$4 sm:$0xff]  }
 0x503   : > { %11703 = vmatprep.subr.bf16.mxu1 %v16265_v21  ;;  %v16343_v21 = vld [vmem:[%s17233_s22 + $0x25b4] ss:$8 sps:$4 sm:$0xff]  }
 0x505   : > { %11661 = vmatpush2.bf16.msra.mxu0 %v16260_v58  ;;  %v16338_v58 = vld [vmem:[%s17233_s22 + $0x24b0] ss:$8 sps:$4 sm:$0xff]  }
 0x506   : > { %11704 = vmatpush2.bf16.msra.mxu1 %v16263_v59  ;;  %11716 = vmatprep.subr.bf16.mxu0 %v16268_v32  ;;  %v16341_v59 = vld [vmem:[%s17233_s22 + $0x25b0] ss:$8 sps:$4 sm:$0xff]   ;;  %v16346_v32 = vld [vmem:[%s17233_s22 + $0x24a4] ss:$8 sps:$4 sm:$0xff]  }
 0x507   : > { %11759 = vmatprep.subr.bf16.mxu1 %v16271_v13  ;;  %v16349_v13 = vld [vmem:[%s17233_s22 + $0x25a4] ss:$8 sps:$4 sm:$0xff]  }
 0x508   : > { %11663 = vmatmul.mubr.bf16.vlgmr.msra.gmra.mxu0 %v12757_v14  ;;  %v16344_v14 = vld [vmem:[%s17233_s22 + $0x24a0] ss:$8 sps:$4 sm:$0xff]  }
 0x509   : > { %11706 = vmatmul.mubr.bf16.vlgmr.msra.gmra.mxu1 %v12759_v15  ;;  %11717 = vmatpush1.bf16.msra.mxu0 %v16266_v18  ;;  %v16347_v15 = vld [vmem:[%s17233_s22 + $0x25a0] ss:$8 sps:$4 sm:$0xff]   ;;  %v16352_v18 = vld [vmem:[%s17233_s22 + $0x2494] ss:$8 sps:$4 sm:$0xff]  }
 0x50a   : > { %11760 = vmatpush1.bf16.msra.mxu1 %v16269_v17  ;;  %11718 = vmatprep.subr.bf16.mxu0 %v16274_v16  ;;  %v16355_v17 = vld [vmem:[%s17233_s22 + $0x2594] ss:$8 sps:$4 sm:$0xff]   ;;  %v16350_v16 = vld [vmem:[%s17233_s22 + $0x2490] ss:$8 sps:$4 sm:$0xff]  }
 0x50b   : > { %11761 = vmatprep.subr.bf16.mxu1 %v16277_v19  ;;  %11748 = vmatprep.mubr.bf16.mxu0 %v12762_v4  ;;  %v16353_v19 = vld [vmem:[%s17233_s22 + $0x2590] ss:$8 sps:$4 sm:$0xff]   ;;  %v16358_v4 = vld [vmem:[%s17233_s22 + $0x2484] ss:$8 sps:$4 sm:$0xff]  }
 0x50c   : > { %11791 = vmatprep.mubr.bf16.mxu1 %v12764_v26  ;;  %v16361_v26 = vld [vmem:[%s17233_s22 + $0x2584] ss:$8 sps:$4 sm:$0xff]  }
 0x50d   : > { %11719 = vmatpush1.bf16.msra.mxu0 %v16272_v39  ;;  %v16356_v39 = vld [vmem:[%s17233_s22 + $0x2480] ss:$8 sps:$4 sm:$0xff]  }
 0x50e   : > { %11762 = vmatpush1.bf16.msra.mxu1 %v16275_v5  ;;  %11720 = vmatprep.subr.bf16.mxu0 %v16280_v33  ;;  %v16359_v5 = vld [vmem:[%s17233_s22 + $0x2580] ss:$8 sps:$4 sm:$0xff]   ;;  %v16364_v33 = vld [vmem:[%s17233_s22 + $0x2674] ss:$8 sps:$4 sm:$0xff]  }
 0x50f   : > { %11763 = vmatprep.subr.bf16.mxu1 %v16283_v29  ;;  %v16367_v29 = vld [vmem:[%s17233_s22 + $0x2774] ss:$8 sps:$4 sm:$0xff]  }
 0x511   : > { %11721 = vmatpush1.bf16.msra.mxu0 %v16278_v35  ;;  %v19080_v35 = vld [vmem:[%s19885_s0 + $0x130] sm:$0xff] }
 0x512   : > { %11764 = vmatpush1.bf16.msra.mxu1 %v16281_v36  ;;  %11722 = vmatprep.subr.bf16.mxu0 %v16286_v46  ;;  %v12761_v36 = vcombine.low %v18988_v50, %v18997_v37  ;;  %v12763_v46 = vcombine.low %v19002_v27, %v19007_v3  ;;  %v16362_v50 = vld [vmem:[%s17233_s22 + $0x2670] ss:$8 sps:$4 sm:$0xff]   ;;  %v16370_v27 = vld [vmem:[%s17233_s22 + $0x2664] ss:$8 sps:$4 sm:$0xff]  }
 0x513   : > { %11765 = vmatprep.subr.bf16.mxu1 %v16289_v11  ;;  %v19089_v11 = vld [vmem:[%s19885_s0 + $0x2b0] sm:$0xff]  ;;  %v16373_v3 = vld [vmem:[%s17233_s22 + $0x2764] ss:$8 sps:$4 sm:$0xff]  }
 0x514   : > { %v16365_v37 = vld [vmem:[%s17233_s22 + $0x2770] ss:$8 sps:$4 sm:$0xff]  }
 0x515   : > { %11723 = vmatpush1.bf16.msra.mxu0 %v16284_v49  ;;  %v19094_v49 = vld [vmem:[%s19885_s0 + $0x138] sm:$0xff] }
 0x516   : > { %11766 = vmatpush1.bf16.msra.mxu1 %v16287_v51  ;;  %11724 = vmatprep.subr.bf16.mxu0 %v16292_v52  ;;  %v19099_v51 = vld [vmem:[%s19885_s0 + $0x2b8] sm:$0xff]  ;;  %v12766_v52 = vcombine.high %v19080_v35, %v19089_v11 }
 0x517   : > { %11767 = vmatprep.subr.bf16.mxu1 %v16295_v28  ;;  %v12768_v28 = vcombine.high %v19094_v49, %v19099_v51 }
 0x519   : > { %11725 = vmatpush1.bf16.msra.mxu0 %v16290_v22  ;;  %v16368_v22 = vld [vmem:[%s17233_s22 + $0x2660] ss:$8 sps:$4 sm:$0xff]  }
 0x51a   : > { %11768 = vmatpush1.bf16.msra.mxu1 %v16293_v23  ;;  %11726 = vmatprep.subr.bf16.mxu0 %v16298_v2  ;;  %v16371_v23 = vld [vmem:[%s17233_s22 + $0x2760] ss:$8 sps:$4 sm:$0xff]   ;;  %v16376_v2 = vld [vmem:[%s17233_s22 + $0x2654] ss:$8 sps:$4 sm:$0xff]  }
 0x51b   : > { %11769 = vmatprep.subr.bf16.mxu1 %v16301_v10  ;;  %v16379_v10 = vld [vmem:[%s17233_s22 + $0x2754] ss:$8 sps:$4 sm:$0xff]  }
 0x51d   : > { %11727 = vmatpush1.bf16.msra.mxu0 %v16296_v12  ;;  %v16374_v12 = vld [vmem:[%s17233_s22 + $0x2650] ss:$8 sps:$4 sm:$0xff]  }
 0x51e   : > { %11770 = vmatpush1.bf16.msra.mxu1 %v16299_v8  ;;  %11728 = vmatprep.subr.bf16.mxu0 %v16304_v56  ;;  %v16377_v8 = vld [vmem:[%s17233_s22 + $0x2750] ss:$8 sps:$4 sm:$0xff]   ;;  %v16382_v56 = vld [vmem:[%s17233_s22 + $0x2644] ss:$8 sps:$4 sm:$0xff]  }
 0x51f   : > { %11771 = vmatprep.subr.bf16.mxu1 %v16307_v57  ;;  %v16385_v57 = vld [vmem:[%s17233_s22 + $0x2744] ss:$8 sps:$4 sm:$0xff]  }
 0x521   : > { %11729 = vmatpush1.bf16.msra.mxu0 %v16302_v62  ;;  %v16380_v62 = vld [vmem:[%s17233_s22 + $0x2640] ss:$8 sps:$4 sm:$0xff]  }
 0x522   : > { %11772 = vmatpush1.bf16.msra.mxu1 %v16305_v24  ;;  %11730 = vmatprep.subr.bf16.mxu0 %v16310_v25  ;;  %v16383_v24 = vld [vmem:[%s17233_s22 + $0x2740] ss:$8 sps:$4 sm:$0xff]   ;;  %v16388_v25 = vld [vmem:[%s17233_s22 + $0x2634] ss:$8 sps:$4 sm:$0xff]  }
 0x523   : > { %11773 = vmatprep.subr.bf16.mxu1 %v16313_v61  ;;  %v16391_v61 = vld [vmem:[%s17233_s22 + $0x2734] ss:$8 sps:$4 sm:$0xff]  }
 0x525   : > { %11731 = vmatpush1.bf16.msra.mxu0 %v16308_v0  ;;  %v16386_v0 = vld [vmem:[%s17233_s22 + $0x2630] ss:$8 sps:$4 sm:$0xff]  }
 0x526   : > { %11774 = vmatpush1.bf16.msra.mxu1 %v16311_v1  ;;  %11732 = vmatprep.subr.bf16.mxu0 %v16316_v54  ;;  %v16389_v1 = vld [vmem:[%s17233_s22 + $0x2730] ss:$8 sps:$4 sm:$0xff]   ;;  %v16394_v54 = vld [vmem:[%s17233_s22 + $0x2624] ss:$8 sps:$4 sm:$0xff]  }
 0x527   : > { %11775 = vmatprep.subr.bf16.mxu1 %v16319_v53  ;;  %v16397_v53 = vld [vmem:[%s17233_s22 + $0x2724] ss:$8 sps:$4 sm:$0xff]  }
 0x529   : > { %11733 = vmatpush2.bf16.msra.mxu0 %v16314_v34  ;;  %v16392_v34 = vld [vmem:[%s17233_s22 + $0x2620] ss:$8 sps:$4 sm:$0xff]  }
 0x52a   : > { %11776 = vmatpush2.bf16.msra.mxu1 %v16317_v55  ;;  %11734 = vmatprep.subr.bf16.mxu0 %v16322_v6  ;;  %v16395_v55 = vld [vmem:[%s17233_s22 + $0x2720] ss:$8 sps:$4 sm:$0xff]   ;;  %v16400_v6 = vld [vmem:[%s17233_s22 + $0x2614] ss:$8 sps:$4 sm:$0xff]  }
 0x52b   : > { %11777 = vmatprep.subr.bf16.mxu1 %v16325_v41  ;;  %v16403_v41 = vld [vmem:[%s17233_s22 + $0x2714] ss:$8 sps:$4 sm:$0xff]  }
 0x52d   : > { %11735 = vmatpush2.bf16.msra.mxu0 %v16320_v9  ;;  %v16398_v9 = vld [vmem:[%s17233_s22 + $0x2610] ss:$8 sps:$4 sm:$0xff]  }
 0x52e   : > { %11778 = vmatpush2.bf16.msra.mxu1 %v16323_v43  ;;  %11736 = vmatprep.subr.bf16.mxu0 %v16328_v44  ;;  %v16401_v43 = vld [vmem:[%s17233_s22 + $0x2710] ss:$8 sps:$4 sm:$0xff]   ;;  %v16406_v44 = vld [vmem:[%s17233_s22 + $0x2604] ss:$8 sps:$4 sm:$0xff]  }
 0x52f   : > { %11779 = vmatprep.subr.bf16.mxu1 %v16331_v47  ;;  %v16409_v47 = vld [vmem:[%s17233_s22 + $0x2704] ss:$8 sps:$4 sm:$0xff]  }
 0x531   : > { %11737 = vmatpush2.bf16.msra.mxu0 %v16326_v30  ;;  %v16404_v30 = vld [vmem:[%s17233_s22 + $0x2600] ss:$8 sps:$4 sm:$0xff]  }
 0x532   : > { %11780 = vmatpush2.bf16.msra.mxu1 %v16329_v31  ;;  %11738 = vmatprep.subr.bf16.mxu0 %v16334_v60  ;;  %v16407_v31 = vld [vmem:[%s17233_s22 + $0x2700] ss:$8 sps:$4 sm:$0xff]   ;;  %v16412_v60 = vld [vmem:[%s17233_s22 + $0x26f4] ss:$8 sps:$4 sm:$0xff]  }
 0x533   : > { %11781 = vmatprep.subr.bf16.mxu1 %v16337_v7  ;;  %v16415_v7 = vld [vmem:[%s17233_s22 + $0x27f4] ss:$8 sps:$4 sm:$0xff]  }
 0x535   : > { %11739 = vmatpush2.bf16.msra.mxu0 %v16332_v42  ;;  %v16410_v42 = vld [vmem:[%s17233_s22 + $0x26f0] ss:$8 sps:$4 sm:$0xff]  }
 0x536   : > { %11782 = vmatpush2.bf16.msra.mxu1 %v16335_v38  ;;  %11740 = vmatprep.subr.bf16.mxu0 %v16340_v20  ;;  %v16413_v38 = vld [vmem:[%s17233_s22 + $0x27f0] ss:$8 sps:$4 sm:$0xff]   ;;  %v16418_v20 = vld [vmem:[%s17233_s22 + $0x26e4] ss:$8 sps:$4 sm:$0xff]  }
 0x537   : > { %11783 = vmatprep.subr.bf16.mxu1 %v16343_v21  ;;  %v16421_v21 = vld [vmem:[%s17233_s22 + $0x27e4] ss:$8 sps:$4 sm:$0xff]  }
 0x539   : > { %11741 = vmatpush2.bf16.msra.mxu0 %v16338_v58  ;;  %v16416_v58 = vld [vmem:[%s17233_s22 + $0x26e0] ss:$8 sps:$4 sm:$0xff]  }
 0x53a   : > { %11784 = vmatpush2.bf16.msra.mxu1 %v16341_v59  ;;  %11742 = vmatprep.subr.bf16.mxu0 %v16346_v32  ;;  %v16419_v59 = vld [vmem:[%s17233_s22 + $0x27e0] ss:$8 sps:$4 sm:$0xff]   ;;  %v16424_v32 = vld [vmem:[%s17233_s22 + $0x26d4] ss:$8 sps:$4 sm:$0xff]  }
 0x53b   : > { %11785 = vmatprep.subr.bf16.mxu1 %v16349_v13  ;;  %v16427_v13 = vld [vmem:[%s17233_s22 + $0x27d4] ss:$8 sps:$4 sm:$0xff]  }
 0x53d   : > { %11743 = vmatpush2.bf16.msra.mxu0 %v16344_v14  ;;  %v16422_v14 = vld [vmem:[%s17233_s22 + $0x26d0] ss:$8 sps:$4 sm:$0xff]  }
 0x53e   : > { %11786 = vmatpush2.bf16.msra.mxu1 %v16347_v15  ;;  %11744 = vmatprep.subr.bf16.mxu0 %v16352_v18  ;;  %v16425_v15 = vld [vmem:[%s17233_s22 + $0x27d0] ss:$8 sps:$4 sm:$0xff]   ;;  %v16430_v18 = vld [vmem:[%s17233_s22 + $0x26c4] ss:$8 sps:$4 sm:$0xff]  }
 0x53f   : > { %11787 = vmatprep.subr.bf16.mxu1 %v16355_v17  ;;  %v16433_v17 = vld [vmem:[%s17233_s22 + $0x27c4] ss:$8 sps:$4 sm:$0xff]  }
 0x541   : > { %11745 = vmatpush2.bf16.msra.mxu0 %v16350_v16  ;;  %v16428_v16 = vld [vmem:[%s17233_s22 + $0x26c0] ss:$8 sps:$4 sm:$0xff]  }
 0x542   : > { %11788 = vmatpush2.bf16.msra.mxu1 %v16353_v19  ;;  %11746 = vmatprep.subr.bf16.mxu0 %v16358_v4  ;;  %v16431_v19 = vld [vmem:[%s17233_s22 + $0x27c0] ss:$8 sps:$4 sm:$0xff]   ;;  %v16436_v4 = vld [vmem:[%s17233_s22 + $0x26b4] ss:$8 sps:$4 sm:$0xff]  }
 0x543   : > { %11789 = vmatprep.subr.bf16.mxu1 %v16361_v26  ;;  %v16439_v26 = vld [vmem:[%s17233_s22 + $0x27b4] ss:$8 sps:$4 sm:$0xff]  }
 0x545   : > { %11747 = vmatpush2.bf16.msra.mxu0 %v16356_v39  ;;  %v16434_v39 = vld [vmem:[%s17233_s22 + $0x26b0] ss:$8 sps:$4 sm:$0xff]  }
 0x546   : > { %11790 = vmatpush2.bf16.msra.mxu1 %v16359_v5  ;;  %11802 = vmatprep.subr.bf16.mxu0 %v16364_v33  ;;  %v16437_v5 = vld [vmem:[%s17233_s22 + $0x27b0] ss:$8 sps:$4 sm:$0xff]   ;;  %v16442_v33 = vld [vmem:[%s17233_s22 + $0x26a4] ss:$8 sps:$4 sm:$0xff]  }
 0x547   : > { %11845 = vmatprep.subr.bf16.mxu1 %v16367_v29  ;;  %v16445_v29 = vld [vmem:[%s17233_s22 + $0x27a4] ss:$8 sps:$4 sm:$0xff]  }
 0x548   : > { %11749 = vmatmul.mubr.bf16.vlgmr.msra.gmra.mxu0 %v12761_v36  ;;  %v16440_v36 = vld [vmem:[%s17233_s22 + $0x26a0] ss:$8 sps:$4 sm:$0xff]  }
 0x549   : > { %11792 = vmatmul.mubr.bf16.vlgmr.msra.gmra.mxu1 %v12763_v46  ;;  %11803 = vmatpush1.bf16.msra.mxu0 %v16362_v50  ;;  %v16443_v46 = vld [vmem:[%s17233_s22 + $0x27a0] ss:$8 sps:$4 sm:$0xff]   ;;  %v16448_v50 = vld [vmem:[%s17233_s22 + $0x2694] ss:$8 sps:$4 sm:$0xff]  }
 0x54a   : > { %11846 = vmatpush1.bf16.msra.mxu1 %v16365_v37  ;;  %11804 = vmatprep.subr.bf16.mxu0 %v16370_v27  ;;  %v16451_v37 = vld [vmem:[%s17233_s22 + $0x2794] ss:$8 sps:$4 sm:$0xff]   ;;  %v16446_v27 = vld [vmem:[%s17233_s22 + $0x2690] ss:$8 sps:$4 sm:$0xff]  }
 0x54b   : > { %11847 = vmatprep.subr.bf16.mxu1 %v16373_v3  ;;  %11834 = vmatprep.mubr.bf16.mxu0 %v12766_v52  ;;  %v16449_v3 = vld [vmem:[%s17233_s22 + $0x2790] ss:$8 sps:$4 sm:$0xff]   ;;  %v16454_v52 = vld [vmem:[%s17233_s22 + $0x2684] ss:$8 sps:$4 sm:$0xff]  }
 0x54c   : > { %11877 = vmatprep.mubr.bf16.mxu1 %v12768_v28  ;;  %v16457_v28 = vld [vmem:[%s17233_s22 + $0x2784] ss:$8 sps:$4 sm:$0xff]  }
 0x54d   : > { %11805 = vmatpush1.bf16.msra.mxu0 %v16368_v22  ;;  %v16452_v22 = vld [vmem:[%s17233_s22 + $0x2680] ss:$8 sps:$4 sm:$0xff]  }
 0x54e   : > { %11848 = vmatpush1.bf16.msra.mxu1 %v16371_v23  ;;  %11806 = vmatprep.subr.bf16.mxu0 %v16376_v2  ;;  %v16455_v23 = vld [vmem:[%s17233_s22 + $0x2780] ss:$8 sps:$4 sm:$0xff]   ;;  %v16460_v2 = vld [vmem:[%s17233_s22 + $0x2874] ss:$8 sps:$4 sm:$0xff]  }
 0x54f   : > { %11849 = vmatprep.subr.bf16.mxu1 %v16379_v10  ;;  %v16463_v10 = vld [vmem:[%s17233_s22 + $0x2974] ss:$8 sps:$4 sm:$0xff]  }
 0x551   : > { %11807 = vmatpush1.bf16.msra.mxu0 %v16374_v12  ;;  %v19172_v12 = vld [vmem:[%s19885_s0 + $0x140] sm:$0xff] }
 0x552   : > { %11850 = vmatpush1.bf16.msra.mxu1 %v16377_v8  ;;  %11808 = vmatprep.subr.bf16.mxu0 %v16382_v56  ;;  %v12765_v8 = vcombine.low %v19080_v35, %v19089_v11  ;;  %v12767_v56 = vcombine.low %v19094_v49, %v19099_v51  ;;  %v16458_v35 = vld [vmem:[%s17233_s22 + $0x2870] ss:$8 sps:$4 sm:$0xff]   ;;  %v16466_v49 = vld [vmem:[%s17233_s22 + $0x2864] ss:$8 sps:$4 sm:$0xff]  }
 0x553   : > { %11851 = vmatprep.subr.bf16.mxu1 %v16385_v57  ;;  %v19181_v57 = vld [vmem:[%s19885_s0 + $0x2c0] sm:$0xff]  ;;  %v16461_v11 = vld [vmem:[%s17233_s22 + $0x2970] ss:$8 sps:$4 sm:$0xff]  }
 0x554   : > { %v16469_v51 = vld [vmem:[%s17233_s22 + $0x2964] ss:$8 sps:$4 sm:$0xff]  }
 0x555   : > { %11809 = vmatpush1.bf16.msra.mxu0 %v16380_v62  ;;  %v19186_v62 = vld [vmem:[%s19885_s0 + $0x148] sm:$0xff] }
 0x556   : > { %11852 = vmatpush1.bf16.msra.mxu1 %v16383_v24  ;;  %11810 = vmatprep.subr.bf16.mxu0 %v16388_v25  ;;  %v19191_v24 = vld [vmem:[%s19885_s0 + $0x2c8] sm:$0xff]  ;;  %v12770_v25 = vcombine.high %v19172_v12, %v19181_v57 }
 0x557   : > { %11853 = vmatprep.subr.bf16.mxu1 %v16391_v61  ;;  %v12772_v61 = vcombine.high %v19186_v62, %v19191_v24 }
 0x559   : > { %11811 = vmatpush1.bf16.msra.mxu0 %v16386_v0  ;;  %v16464_v0 = vld [vmem:[%s17233_s22 + $0x2860] ss:$8 sps:$4 sm:$0xff]  }
 0x55a   : > { %11854 = vmatpush1.bf16.msra.mxu1 %v16389_v1  ;;  %11812 = vmatprep.subr.bf16.mxu0 %v16394_v54  ;;  %v16467_v1 = vld [vmem:[%s17233_s22 + $0x2960] ss:$8 sps:$4 sm:$0xff]   ;;  %v16472_v54 = vld [vmem:[%s17233_s22 + $0x2854] ss:$8 sps:$4 sm:$0xff]  }
 0x55b   : > { %11855 = vmatprep.subr.bf16.mxu1 %v16397_v53  ;;  %v16475_v53 = vld [vmem:[%s17233_s22 + $0x2954] ss:$8 sps:$4 sm:$0xff]  }
 0x55d   : > { %11813 = vmatpush1.bf16.msra.mxu0 %v16392_v34  ;;  %v16470_v34 = vld [vmem:[%s17233_s22 + $0x2850] ss:$8 sps:$4 sm:$0xff]  }
 0x55e   : > { %11856 = vmatpush1.bf16.msra.mxu1 %v16395_v55  ;;  %11814 = vmatprep.subr.bf16.mxu0 %v16400_v6  ;;  %v16473_v55 = vld [vmem:[%s17233_s22 + $0x2950] ss:$8 sps:$4 sm:$0xff]   ;;  %v16478_v6 = vld [vmem:[%s17233_s22 + $0x2844] ss:$8 sps:$4 sm:$0xff]  }
 0x55f   : > { %11857 = vmatprep.subr.bf16.mxu1 %v16403_v41  ;;  %v16481_v41 = vld [vmem:[%s17233_s22 + $0x2944] ss:$8 sps:$4 sm:$0xff]  }
 0x561   : > { %11815 = vmatpush1.bf16.msra.mxu0 %v16398_v9  ;;  %v16476_v9 = vld [vmem:[%s17233_s22 + $0x2840] ss:$8 sps:$4 sm:$0xff]  }
 0x562   : > { %11858 = vmatpush1.bf16.msra.mxu1 %v16401_v43  ;;  %11816 = vmatprep.subr.bf16.mxu0 %v16406_v44  ;;  %v16479_v43 = vld [vmem:[%s17233_s22 + $0x2940] ss:$8 sps:$4 sm:$0xff]   ;;  %v16484_v44 = vld [vmem:[%s17233_s22 + $0x2834] ss:$8 sps:$4 sm:$0xff]  }
 0x563   : > { %11859 = vmatprep.subr.bf16.mxu1 %v16409_v47  ;;  %v16487_v47 = vld [vmem:[%s17233_s22 + $0x2934] ss:$8 sps:$4 sm:$0xff]  }
 0x565   : > { %11817 = vmatpush1.bf16.msra.mxu0 %v16404_v30  ;;  %v16482_v30 = vld [vmem:[%s17233_s22 + $0x2830] ss:$8 sps:$4 sm:$0xff]  }
 0x566   : > { %11860 = vmatpush1.bf16.msra.mxu1 %v16407_v31  ;;  %11818 = vmatprep.subr.bf16.mxu0 %v16412_v60  ;;  %v16485_v31 = vld [vmem:[%s17233_s22 + $0x2930] ss:$8 sps:$4 sm:$0xff]   ;;  %v16490_v60 = vld [vmem:[%s17233_s22 + $0x2824] ss:$8 sps:$4 sm:$0xff]  }
 0x567   : > { %11861 = vmatprep.subr.bf16.mxu1 %v16415_v7  ;;  %v16493_v7 = vld [vmem:[%s17233_s22 + $0x2924] ss:$8 sps:$4 sm:$0xff]  }
 0x569   : > { %11819 = vmatpush2.bf16.msra.mxu0 %v16410_v42  ;;  %v16488_v42 = vld [vmem:[%s17233_s22 + $0x2820] ss:$8 sps:$4 sm:$0xff]  }
 0x56a   : > { %11862 = vmatpush2.bf16.msra.mxu1 %v16413_v38  ;;  %11820 = vmatprep.subr.bf16.mxu0 %v16418_v20  ;;  %v16491_v38 = vld [vmem:[%s17233_s22 + $0x2920] ss:$8 sps:$4 sm:$0xff]   ;;  %v16496_v20 = vld [vmem:[%s17233_s22 + $0x2814] ss:$8 sps:$4 sm:$0xff]  }
 0x56b   : > { %11863 = vmatprep.subr.bf16.mxu1 %v16421_v21  ;;  %v16499_v21 = vld [vmem:[%s17233_s22 + $0x2914] ss:$8 sps:$4 sm:$0xff]  }
 0x56d   : > { %11821 = vmatpush2.bf16.msra.mxu0 %v16416_v58  ;;  %v16494_v58 = vld [vmem:[%s17233_s22 + $0x2810] ss:$8 sps:$4 sm:$0xff]  }
 0x56e   : > { %11864 = vmatpush2.bf16.msra.mxu1 %v16419_v59  ;;  %11822 = vmatprep.subr.bf16.mxu0 %v16424_v32  ;;  %v16497_v59 = vld [vmem:[%s17233_s22 + $0x2910] ss:$8 sps:$4 sm:$0xff]   ;;  %v16502_v32 = vld [vmem:[%s17233_s22 + $0x2804] ss:$8 sps:$4 sm:$0xff]  }
 0x56f   : > { %11865 = vmatprep.subr.bf16.mxu1 %v16427_v13  ;;  %v16505_v13 = vld [vmem:[%s17233_s22 + $0x2904] ss:$8 sps:$4 sm:$0xff]  }
 0x571   : > { %11823 = vmatpush2.bf16.msra.mxu0 %v16422_v14  ;;  %v16500_v14 = vld [vmem:[%s17233_s22 + $0x2800] ss:$8 sps:$4 sm:$0xff]  }
 0x572   : > { %11866 = vmatpush2.bf16.msra.mxu1 %v16425_v15  ;;  %11824 = vmatprep.subr.bf16.mxu0 %v16430_v18  ;;  %v16503_v15 = vld [vmem:[%s17233_s22 + $0x2900] ss:$8 sps:$4 sm:$0xff]   ;;  %v16508_v18 = vld [vmem:[%s17233_s22 + $0x28f4] ss:$8 sps:$4 sm:$0xff]  }
 0x573   : > { %11867 = vmatprep.subr.bf16.mxu1 %v16433_v17  ;;  %v16511_v17 = vld [vmem:[%s17233_s22 + $0x29f4] ss:$8 sps:$4 sm:$0xff]  }
 0x575   : > { %11825 = vmatpush2.bf16.msra.mxu0 %v16428_v16  ;;  %v16506_v16 = vld [vmem:[%s17233_s22 + $0x28f0] ss:$8 sps:$4 sm:$0xff]  }
 0x576   : > { %11868 = vmatpush2.bf16.msra.mxu1 %v16431_v19  ;;  %11826 = vmatprep.subr.bf16.mxu0 %v16436_v4  ;;  %v16509_v19 = vld [vmem:[%s17233_s22 + $0x29f0] ss:$8 sps:$4 sm:$0xff]   ;;  %v16514_v4 = vld [vmem:[%s17233_s22 + $0x28e4] ss:$8 sps:$4 sm:$0xff]  }
 0x577   : > { %11869 = vmatprep.subr.bf16.mxu1 %v16439_v26  ;;  %v16517_v26 = vld [vmem:[%s17233_s22 + $0x29e4] ss:$8 sps:$4 sm:$0xff]  }
 0x579   : > { %11827 = vmatpush2.bf16.msra.mxu0 %v16434_v39  ;;  %v16512_v39 = vld [vmem:[%s17233_s22 + $0x28e0] ss:$8 sps:$4 sm:$0xff]  }
 0x57a   : > { %11870 = vmatpush2.bf16.msra.mxu1 %v16437_v5  ;;  %11828 = vmatprep.subr.bf16.mxu0 %v16442_v33  ;;  %v16515_v5 = vld [vmem:[%s17233_s22 + $0x29e0] ss:$8 sps:$4 sm:$0xff]   ;;  %v16520_v33 = vld [vmem:[%s17233_s22 + $0x28d4] ss:$8 sps:$4 sm:$0xff]  }
 0x57b   : > { %11871 = vmatprep.subr.bf16.mxu1 %v16445_v29  ;;  %v16523_v29 = vld [vmem:[%s17233_s22 + $0x29d4] ss:$8 sps:$4 sm:$0xff]  }
 0x57d   : > { %11829 = vmatpush2.bf16.msra.mxu0 %v16440_v36  ;;  %v16518_v36 = vld [vmem:[%s17233_s22 + $0x28d0] ss:$8 sps:$4 sm:$0xff]  }
 0x57e   : > { %11872 = vmatpush2.bf16.msra.mxu1 %v16443_v46  ;;  %11830 = vmatprep.subr.bf16.mxu0 %v16448_v50  ;;  %v16521_v46 = vld [vmem:[%s17233_s22 + $0x29d0] ss:$8 sps:$4 sm:$0xff]   ;;  %v16526_v50 = vld [vmem:[%s17233_s22 + $0x28c4] ss:$8 sps:$4 sm:$0xff]  }
 0x57f   : > { %11873 = vmatprep.subr.bf16.mxu1 %v16451_v37  ;;  %v16529_v37 = vld [vmem:[%s17233_s22 + $0x29c4] ss:$8 sps:$4 sm:$0xff]  }
 0x581   : > { %11831 = vmatpush2.bf16.msra.mxu0 %v16446_v27  ;;  %v16524_v27 = vld [vmem:[%s17233_s22 + $0x28c0] ss:$8 sps:$4 sm:$0xff]  }
 0x582   : > { %11874 = vmatpush2.bf16.msra.mxu1 %v16449_v3  ;;  %11832 = vmatprep.subr.bf16.mxu0 %v16454_v52  ;;  %v16527_v3 = vld [vmem:[%s17233_s22 + $0x29c0] ss:$8 sps:$4 sm:$0xff]   ;;  %v16532_v52 = vld [vmem:[%s17233_s22 + $0x28b4] ss:$8 sps:$4 sm:$0xff]  }
 0x583   : > { %11875 = vmatprep.subr.bf16.mxu1 %v16457_v28  ;;  %v16535_v28 = vld [vmem:[%s17233_s22 + $0x29b4] ss:$8 sps:$4 sm:$0xff]  }
 0x585   : > { %11833 = vmatpush2.bf16.msra.mxu0 %v16452_v22  ;;  %v16530_v22 = vld [vmem:[%s17233_s22 + $0x28b0] ss:$8 sps:$4 sm:$0xff]  }
 0x586   : > { %11876 = vmatpush2.bf16.msra.mxu1 %v16455_v23  ;;  %11888 = vmatprep.subr.bf16.mxu0 %v16460_v2  ;;  %v16533_v23 = vld [vmem:[%s17233_s22 + $0x29b0] ss:$8 sps:$4 sm:$0xff]   ;;  %v16538_v2 = vld [vmem:[%s17233_s22 + $0x28a4] ss:$8 sps:$4 sm:$0xff]  }
 0x587   : > { %11931 = vmatprep.subr.bf16.mxu1 %v16463_v10  ;;  %v16541_v10 = vld [vmem:[%s17233_s22 + $0x29a4] ss:$8 sps:$4 sm:$0xff]  }
 0x588   : > { %11835 = vmatmul.mubr.bf16.vlgmr.msra.gmra.mxu0 %v12765_v8  ;;  %v16536_v8 = vld [vmem:[%s17233_s22 + $0x28a0] ss:$8 sps:$4 sm:$0xff]  }
 0x589   : > { %11878 = vmatmul.mubr.bf16.vlgmr.msra.gmra.mxu1 %v12767_v56  ;;  %11889 = vmatpush1.bf16.msra.mxu0 %v16458_v35  ;;  %v16539_v56 = vld [vmem:[%s17233_s22 + $0x29a0] ss:$8 sps:$4 sm:$0xff]   ;;  %v16544_v35 = vld [vmem:[%s17233_s22 + $0x2894] ss:$8 sps:$4 sm:$0xff]  }
 0x58a   : > { %11932 = vmatpush1.bf16.msra.mxu1 %v16461_v11  ;;  %11890 = vmatprep.subr.bf16.mxu0 %v16466_v49  ;;  %v16547_v11 = vld [vmem:[%s17233_s22 + $0x2994] ss:$8 sps:$4 sm:$0xff]   ;;  %v16542_v49 = vld [vmem:[%s17233_s22 + $0x2890] ss:$8 sps:$4 sm:$0xff]  }
 0x58b   : > { %11933 = vmatprep.subr.bf16.mxu1 %v16469_v51  ;;  %11920 = vmatprep.mubr.bf16.mxu0 %v12770_v25  ;;  %v16545_v51 = vld [vmem:[%s17233_s22 + $0x2990] ss:$8 sps:$4 sm:$0xff]   ;;  %v16550_v25 = vld [vmem:[%s17233_s22 + $0x2884] ss:$8 sps:$4 sm:$0xff]  }
 0x58c   : > { %11963 = vmatprep.mubr.bf16.mxu1 %v12772_v61  ;;  %v16553_v61 = vld [vmem:[%s17233_s22 + $0x2984] ss:$8 sps:$4 sm:$0xff]  }
 0x58d   : > { %11891 = vmatpush1.bf16.msra.mxu0 %v16464_v0  ;;  %v16548_v0 = vld [vmem:[%s17233_s22 + $0x2880] ss:$8 sps:$4 sm:$0xff]  }
 0x58e   : > { %11934 = vmatpush1.bf16.msra.mxu1 %v16467_v1  ;;  %11892 = vmatprep.subr.bf16.mxu0 %v16472_v54  ;;  %v16551_v1 = vld [vmem:[%s17233_s22 + $0x2980] ss:$8 sps:$4 sm:$0xff]   ;;  %v16556_v54 = vld [vmem:[%s17233_s22 + $0x2a74] ss:$8 sps:$4 sm:$0xff]  }
 0x58f   : > { %11935 = vmatprep.subr.bf16.mxu1 %v16475_v53  ;;  %v16559_v53 = vld [vmem:[%s17233_s22 + $0x2b74] ss:$8 sps:$4 sm:$0xff]  }
 0x591   : > { %11893 = vmatpush1.bf16.msra.mxu0 %v16470_v34  ;;  %v19264_v34 = vld [vmem:[%s19885_s0 + $0x150] sm:$0xff] }
 0x592   : > { %11936 = vmatpush1.bf16.msra.mxu1 %v16473_v55  ;;  %11894 = vmatprep.subr.bf16.mxu0 %v16478_v6  ;;  %v12769_v55 = vcombine.low %v19172_v12, %v19181_v57  ;;  %v12771_v6 = vcombine.low %v19186_v62, %v19191_v24  ;;  %v16554_v12 = vld [vmem:[%s17233_s22 + $0x2a70] ss:$8 sps:$4 sm:$0xff]   ;;  %v16562_v62 = vld [vmem:[%s17233_s22 + $0x2a64] ss:$8 sps:$4 sm:$0xff]  }
 0x593   : > { %11937 = vmatprep.subr.bf16.mxu1 %v16481_v41  ;;  %v19273_v41 = vld [vmem:[%s19885_s0 + $0x2d0] sm:$0xff]  ;;  %v16565_v24 = vld [vmem:[%s17233_s22 + $0x2b64] ss:$8 sps:$4 sm:$0xff]  }
 0x594   : > { %v16557_v57 = vld [vmem:[%s17233_s22 + $0x2b70] ss:$8 sps:$4 sm:$0xff]  }
 0x595   : > { %11895 = vmatpush1.bf16.msra.mxu0 %v16476_v9  ;;  %v19278_v9 = vld [vmem:[%s19885_s0 + $0x158] sm:$0xff] }
 0x596   : > { %11938 = vmatpush1.bf16.msra.mxu1 %v16479_v43  ;;  %11896 = vmatprep.subr.bf16.mxu0 %v16484_v44  ;;  %v19283_v43 = vld [vmem:[%s19885_s0 + $0x2d8] sm:$0xff]  ;;  %v12774_v44 = vcombine.high %v19264_v34, %v19273_v41 }
 0x597   : > { %11939 = vmatprep.subr.bf16.mxu1 %v16487_v47  ;;  %v12776_v47 = vcombine.high %v19278_v9, %v19283_v43 }
 0x599   : > { %11897 = vmatpush1.bf16.msra.mxu0 %v16482_v30  ;;  %v16560_v30 = vld [vmem:[%s17233_s22 + $0x2a60] ss:$8 sps:$4 sm:$0xff]  }
 0x59a   : > { %11940 = vmatpush1.bf16.msra.mxu1 %v16485_v31  ;;  %11898 = vmatprep.subr.bf16.mxu0 %v16490_v60  ;;  %v16563_v31 = vld [vmem:[%s17233_s22 + $0x2b60] ss:$8 sps:$4 sm:$0xff]   ;;  %v16568_v60 = vld [vmem:[%s17233_s22 + $0x2a54] ss:$8 sps:$4 sm:$0xff]  }
 0x59b   : > { %11941 = vmatprep.subr.bf16.mxu1 %v16493_v7  ;;  %v16571_v7 = vld [vmem:[%s17233_s22 + $0x2b54] ss:$8 sps:$4 sm:$0xff]  }
 0x59d   : > { %11899 = vmatpush1.bf16.msra.mxu0 %v16488_v42  ;;  %v16566_v42 = vld [vmem:[%s17233_s22 + $0x2a50] ss:$8 sps:$4 sm:$0xff]  }
 0x59e   : > { %11942 = vmatpush1.bf16.msra.mxu1 %v16491_v38  ;;  %11900 = vmatprep.subr.bf16.mxu0 %v16496_v20  ;;  %v16569_v38 = vld [vmem:[%s17233_s22 + $0x2b50] ss:$8 sps:$4 sm:$0xff]   ;;  %v16574_v20 = vld [vmem:[%s17233_s22 + $0x2a44] ss:$8 sps:$4 sm:$0xff]  }
 0x59f   : > { %11943 = vmatprep.subr.bf16.mxu1 %v16499_v21  ;;  %v16577_v21 = vld [vmem:[%s17233_s22 + $0x2b44] ss:$8 sps:$4 sm:$0xff]  }
 0x5a1   : > { %11901 = vmatpush1.bf16.msra.mxu0 %v16494_v58  ;;  %v16572_v58 = vld [vmem:[%s17233_s22 + $0x2a40] ss:$8 sps:$4 sm:$0xff]  }
 0x5a2   : > { %11944 = vmatpush1.bf16.msra.mxu1 %v16497_v59  ;;  %11902 = vmatprep.subr.bf16.mxu0 %v16502_v32  ;;  %v16575_v59 = vld [vmem:[%s17233_s22 + $0x2b40] ss:$8 sps:$4 sm:$0xff]   ;;  %v16580_v32 = vld [vmem:[%s17233_s22 + $0x2a34] ss:$8 sps:$4 sm:$0xff]  }
 0x5a3   : > { %11945 = vmatprep.subr.bf16.mxu1 %v16505_v13  ;;  %v16583_v13 = vld [vmem:[%s17233_s22 + $0x2b34] ss:$8 sps:$4 sm:$0xff]  }
 0x5a5   : > { %11903 = vmatpush1.bf16.msra.mxu0 %v16500_v14  ;;  %v16578_v14 = vld [vmem:[%s17233_s22 + $0x2a30] ss:$8 sps:$4 sm:$0xff]  }
 0x5a6   : > { %11946 = vmatpush1.bf16.msra.mxu1 %v16503_v15  ;;  %11904 = vmatprep.subr.bf16.mxu0 %v16508_v18  ;;  %v16581_v15 = vld [vmem:[%s17233_s22 + $0x2b30] ss:$8 sps:$4 sm:$0xff]   ;;  %v16586_v18 = vld [vmem:[%s17233_s22 + $0x2a24] ss:$8 sps:$4 sm:$0xff]  }
 0x5a7   : > { %11947 = vmatprep.subr.bf16.mxu1 %v16511_v17  ;;  %v16589_v17 = vld [vmem:[%s17233_s22 + $0x2b24] ss:$8 sps:$4 sm:$0xff]  }
 0x5a9   : > { %11905 = vmatpush2.bf16.msra.mxu0 %v16506_v16  ;;  %v16584_v16 = vld [vmem:[%s17233_s22 + $0x2a20] ss:$8 sps:$4 sm:$0xff]  }
 0x5aa   : > { %11948 = vmatpush2.bf16.msra.mxu1 %v16509_v19  ;;  %11906 = vmatprep.subr.bf16.mxu0 %v16514_v4  ;;  %v16587_v19 = vld [vmem:[%s17233_s22 + $0x2b20] ss:$8 sps:$4 sm:$0xff]   ;;  %v16592_v4 = vld [vmem:[%s17233_s22 + $0x2a14] ss:$8 sps:$4 sm:$0xff]  }
 0x5ab   : > { %11949 = vmatprep.subr.bf16.mxu1 %v16517_v26  ;;  %v16595_v26 = vld [vmem:[%s17233_s22 + $0x2b14] ss:$8 sps:$4 sm:$0xff]  }
 0x5ad   : > { %11907 = vmatpush2.bf16.msra.mxu0 %v16512_v39  ;;  %v16590_v39 = vld [vmem:[%s17233_s22 + $0x2a10] ss:$8 sps:$4 sm:$0xff]  }
 0x5ae   : > { %11950 = vmatpush2.bf16.msra.mxu1 %v16515_v5  ;;  %11908 = vmatprep.subr.bf16.mxu0 %v16520_v33  ;;  %v16593_v5 = vld [vmem:[%s17233_s22 + $0x2b10] ss:$8 sps:$4 sm:$0xff]   ;;  %v16598_v33 = vld [vmem:[%s17233_s22 + $0x2a04] ss:$8 sps:$4 sm:$0xff]  }
 0x5af   : > { %11951 = vmatprep.subr.bf16.mxu1 %v16523_v29  ;;  %v16601_v29 = vld [vmem:[%s17233_s22 + $0x2b04] ss:$8 sps:$4 sm:$0xff]  }
 0x5b1   : > { %11909 = vmatpush2.bf16.msra.mxu0 %v16518_v36  ;;  %v16596_v36 = vld [vmem:[%s17233_s22 + $0x2a00] ss:$8 sps:$4 sm:$0xff]  }
 0x5b2   : > { %11952 = vmatpush2.bf16.msra.mxu1 %v16521_v46  ;;  %11910 = vmatprep.subr.bf16.mxu0 %v16526_v50  ;;  %v16599_v46 = vld [vmem:[%s17233_s22 + $0x2b00] ss:$8 sps:$4 sm:$0xff]   ;;  %v16604_v50 = vld [vmem:[%s17233_s22 + $0x2af4] ss:$8 sps:$4 sm:$0xff]  }
 0x5b3   : > { %11953 = vmatprep.subr.bf16.mxu1 %v16529_v37  ;;  %v16607_v37 = vld [vmem:[%s17233_s22 + $0x2bf4] ss:$8 sps:$4 sm:$0xff]  }
 0x5b5   : > { %11911 = vmatpush2.bf16.msra.mxu0 %v16524_v27  ;;  %v16602_v27 = vld [vmem:[%s17233_s22 + $0x2af0] ss:$8 sps:$4 sm:$0xff]  }
 0x5b6   : > { %11954 = vmatpush2.bf16.msra.mxu1 %v16527_v3  ;;  %11912 = vmatprep.subr.bf16.mxu0 %v16532_v52  ;;  %v16605_v3 = vld [vmem:[%s17233_s22 + $0x2bf0] ss:$8 sps:$4 sm:$0xff]   ;;  %v16610_v52 = vld [vmem:[%s17233_s22 + $0x2ae4] ss:$8 sps:$4 sm:$0xff]  }
 0x5b7   : > { %11955 = vmatprep.subr.bf16.mxu1 %v16535_v28  ;;  %v16613_v28 = vld [vmem:[%s17233_s22 + $0x2be4] ss:$8 sps:$4 sm:$0xff]  }
 0x5b9   : > { %11913 = vmatpush2.bf16.msra.mxu0 %v16530_v22  ;;  %v16608_v22 = vld [vmem:[%s17233_s22 + $0x2ae0] ss:$8 sps:$4 sm:$0xff]  }
 0x5ba   : > { %11956 = vmatpush2.bf16.msra.mxu1 %v16533_v23  ;;  %11914 = vmatprep.subr.bf16.mxu0 %v16538_v2  ;;  %v16611_v23 = vld [vmem:[%s17233_s22 + $0x2be0] ss:$8 sps:$4 sm:$0xff]   ;;  %v16616_v2 = vld [vmem:[%s17233_s22 + $0x2ad4] ss:$8 sps:$4 sm:$0xff]  }
 0x5bb   : > { %11957 = vmatprep.subr.bf16.mxu1 %v16541_v10  ;;  %v16619_v10 = vld [vmem:[%s17233_s22 + $0x2bd4] ss:$8 sps:$4 sm:$0xff]  }
 0x5bd   : > { %11915 = vmatpush2.bf16.msra.mxu0 %v16536_v8  ;;  %v16614_v8 = vld [vmem:[%s17233_s22 + $0x2ad0] ss:$8 sps:$4 sm:$0xff]  }
 0x5be   : > { %11958 = vmatpush2.bf16.msra.mxu1 %v16539_v56  ;;  %11916 = vmatprep.subr.bf16.mxu0 %v16544_v35  ;;  %v16617_v56 = vld [vmem:[%s17233_s22 + $0x2bd0] ss:$8 sps:$4 sm:$0xff]   ;;  %v16622_v35 = vld [vmem:[%s17233_s22 + $0x2ac4] ss:$8 sps:$4 sm:$0xff]  }
 0x5bf   : > { %11959 = vmatprep.subr.bf16.mxu1 %v16547_v11  ;;  %v16625_v11 = vld [vmem:[%s17233_s22 + $0x2bc4] ss:$8 sps:$4 sm:$0xff]  }
 0x5c1   : > { %11917 = vmatpush2.bf16.msra.mxu0 %v16542_v49  ;;  %v16620_v49 = vld [vmem:[%s17233_s22 + $0x2ac0] ss:$8 sps:$4 sm:$0xff]  }
 0x5c2   : > { %11960 = vmatpush2.bf16.msra.mxu1 %v16545_v51  ;;  %11918 = vmatprep.subr.bf16.mxu0 %v16550_v25  ;;  %v16623_v51 = vld [vmem:[%s17233_s22 + $0x2bc0] ss:$8 sps:$4 sm:$0xff]   ;;  %v16628_v25 = vld [vmem:[%s17233_s22 + $0x2ab4] ss:$8 sps:$4 sm:$0xff]  }
 0x5c3   : > { %11961 = vmatprep.subr.bf16.mxu1 %v16553_v61  ;;  %v16631_v61 = vld [vmem:[%s17233_s22 + $0x2bb4] ss:$8 sps:$4 sm:$0xff]  }
 0x5c5   : > { %11919 = vmatpush2.bf16.msra.mxu0 %v16548_v0  ;;  %v16626_v0 = vld [vmem:[%s17233_s22 + $0x2ab0] ss:$8 sps:$4 sm:$0xff]  }
 0x5c6   : > { %11962 = vmatpush2.bf16.msra.mxu1 %v16551_v1  ;;  %11974 = vmatprep.subr.bf16.mxu0 %v16556_v54  ;;  %v16629_v1 = vld [vmem:[%s17233_s22 + $0x2bb0] ss:$8 sps:$4 sm:$0xff]   ;;  %v16634_v54 = vld [vmem:[%s17233_s22 + $0x2aa4] ss:$8 sps:$4 sm:$0xff]  }
 0x5c7   : > { %12017 = vmatprep.subr.bf16.mxu1 %v16559_v53  ;;  %v16637_v53 = vld [vmem:[%s17233_s22 + $0x2ba4] ss:$8 sps:$4 sm:$0xff]  }
 0x5c8   : > { %11921 = vmatmul.mubr.bf16.vlgmr.msra.gmra.mxu0 %v12769_v55  ;;  %v16632_v55 = vld [vmem:[%s17233_s22 + $0x2aa0] ss:$8 sps:$4 sm:$0xff]  }
 0x5c9   : > { %11964 = vmatmul.mubr.bf16.vlgmr.msra.gmra.mxu1 %v12771_v6  ;;  %11975 = vmatpush1.bf16.msra.mxu0 %v16554_v12  ;;  %v16635_v6 = vld [vmem:[%s17233_s22 + $0x2ba0] ss:$8 sps:$4 sm:$0xff]   ;;  %v16640_v12 = vld [vmem:[%s17233_s22 + $0x2a94] ss:$8 sps:$4 sm:$0xff]  }
 0x5ca   : > { %12018 = vmatpush1.bf16.msra.mxu1 %v16557_v57  ;;  %11976 = vmatprep.subr.bf16.mxu0 %v16562_v62  ;;  %v16643_v57 = vld [vmem:[%s17233_s22 + $0x2b94] ss:$8 sps:$4 sm:$0xff]   ;;  %v16638_v62 = vld [vmem:[%s17233_s22 + $0x2a90] ss:$8 sps:$4 sm:$0xff]  }
 0x5cb   : > { %12019 = vmatprep.subr.bf16.mxu1 %v16565_v24  ;;  %12006 = vmatprep.mubr.bf16.mxu0 %v12774_v44  ;;  %v16641_v24 = vld [vmem:[%s17233_s22 + $0x2b90] ss:$8 sps:$4 sm:$0xff]   ;;  %v16646_v44 = vld [vmem:[%s17233_s22 + $0x2a84] ss:$8 sps:$4 sm:$0xff]  }
 0x5cc   : > { %12049 = vmatprep.mubr.bf16.mxu1 %v12776_v47  ;;  %v16649_v47 = vld [vmem:[%s17233_s22 + $0x2b84] ss:$8 sps:$4 sm:$0xff]  }
 0x5cd   : > { %11977 = vmatpush1.bf16.msra.mxu0 %v16560_v30  ;;  %v16644_v30 = vld [vmem:[%s17233_s22 + $0x2a80] ss:$8 sps:$4 sm:$0xff]  }
 0x5ce   : > { %12020 = vmatpush1.bf16.msra.mxu1 %v16563_v31  ;;  %11978 = vmatprep.subr.bf16.mxu0 %v16568_v60  ;;  %v16647_v31 = vld [vmem:[%s17233_s22 + $0x2b80] ss:$8 sps:$4 sm:$0xff]   ;;  %v16652_v60 = vld [vmem:[%s17233_s22 + $0x2c74] ss:$8 sps:$4 sm:$0xff]  }
 0x5cf   : > { %12021 = vmatprep.subr.bf16.mxu1 %v16571_v7  ;;  %v16655_v7 = vld [vmem:[%s17233_s22 + $0x2d74] ss:$8 sps:$4 sm:$0xff]  }
 0x5d1   : > { %11979 = vmatpush1.bf16.msra.mxu0 %v16566_v42  ;;  %v19356_v42 = vld [vmem:[%s19885_s0 + $0x160] sm:$0xff] }
 0x5d2   : > { %12022 = vmatpush1.bf16.msra.mxu1 %v16569_v38  ;;  %11980 = vmatprep.subr.bf16.mxu0 %v16574_v20  ;;  %v12773_v38 = vcombine.low %v19264_v34, %v19273_v41  ;;  %v12775_v20 = vcombine.low %v19278_v9, %v19283_v43  ;;  %v16650_v34 = vld [vmem:[%s17233_s22 + $0x2c70] ss:$8 sps:$4 sm:$0xff]   ;;  %v16658_v9 = vld [vmem:[%s17233_s22 + $0x2c64] ss:$8 sps:$4 sm:$0xff]  }
 0x5d3   : > { %12023 = vmatprep.subr.bf16.mxu1 %v16577_v21  ;;  %v19365_v21 = vld [vmem:[%s19885_s0 + $0x2e0] sm:$0xff]  ;;  %v16653_v41 = vld [vmem:[%s17233_s22 + $0x2d70] ss:$8 sps:$4 sm:$0xff]  }
 0x5d4   : > { %v16661_v43 = vld [vmem:[%s17233_s22 + $0x2d64] ss:$8 sps:$4 sm:$0xff]  }
 0x5d5   : > { %11981 = vmatpush1.bf16.msra.mxu0 %v16572_v58  ;;  %v19370_v58 = vld [vmem:[%s19885_s0 + $0x168] sm:$0xff] }
 0x5d6   : > { %12024 = vmatpush1.bf16.msra.mxu1 %v16575_v59  ;;  %11982 = vmatprep.subr.bf16.mxu0 %v16580_v32  ;;  %v19375_v59 = vld [vmem:[%s19885_s0 + $0x2e8] sm:$0xff]  ;;  %v12778_v32 = vcombine.high %v19356_v42, %v19365_v21 }
 0x5d7   : > { %12025 = vmatprep.subr.bf16.mxu1 %v16583_v13  ;;  %v12780_v13 = vcombine.high %v19370_v58, %v19375_v59 }
 0x5d9   : > { %11983 = vmatpush1.bf16.msra.mxu0 %v16578_v14  ;;  %v16656_v14 = vld [vmem:[%s17233_s22 + $0x2c60] ss:$8 sps:$4 sm:$0xff]  }
 0x5da   : > { %12026 = vmatpush1.bf16.msra.mxu1 %v16581_v15  ;;  %11984 = vmatprep.subr.bf16.mxu0 %v16586_v18  ;;  %v16659_v15 = vld [vmem:[%s17233_s22 + $0x2d60] ss:$8 sps:$4 sm:$0xff]   ;;  %v16664_v18 = vld [vmem:[%s17233_s22 + $0x2c54] ss:$8 sps:$4 sm:$0xff]  }
 0x5db   : > { %12027 = vmatprep.subr.bf16.mxu1 %v16589_v17  ;;  %v16667_v17 = vld [vmem:[%s17233_s22 + $0x2d54] ss:$8 sps:$4 sm:$0xff]  }
 0x5dd   : > { %11985 = vmatpush1.bf16.msra.mxu0 %v16584_v16  ;;  %v16662_v16 = vld [vmem:[%s17233_s22 + $0x2c50] ss:$8 sps:$4 sm:$0xff]  }
 0x5de   : > { %12028 = vmatpush1.bf16.msra.mxu1 %v16587_v19  ;;  %11986 = vmatprep.subr.bf16.mxu0 %v16592_v4  ;;  %v16665_v19 = vld [vmem:[%s17233_s22 + $0x2d50] ss:$8 sps:$4 sm:$0xff]   ;;  %v16670_v4 = vld [vmem:[%s17233_s22 + $0x2c44] ss:$8 sps:$4 sm:$0xff]  }
 0x5df   : > { %12029 = vmatprep.subr.bf16.mxu1 %v16595_v26  ;;  %v16673_v26 = vld [vmem:[%s17233_s22 + $0x2d44] ss:$8 sps:$4 sm:$0xff]  }
 0x5e1   : > { %11987 = vmatpush1.bf16.msra.mxu0 %v16590_v39  ;;  %v16668_v39 = vld [vmem:[%s17233_s22 + $0x2c40] ss:$8 sps:$4 sm:$0xff]  }
 0x5e2   : > { %12030 = vmatpush1.bf16.msra.mxu1 %v16593_v5  ;;  %11988 = vmatprep.subr.bf16.mxu0 %v16598_v33  ;;  %v16671_v5 = vld [vmem:[%s17233_s22 + $0x2d40] ss:$8 sps:$4 sm:$0xff]   ;;  %v16676_v33 = vld [vmem:[%s17233_s22 + $0x2c34] ss:$8 sps:$4 sm:$0xff]  }
 0x5e3   : > { %12031 = vmatprep.subr.bf16.mxu1 %v16601_v29  ;;  %v16679_v29 = vld [vmem:[%s17233_s22 + $0x2d34] ss:$8 sps:$4 sm:$0xff]  }
 0x5e5   : > { %11989 = vmatpush1.bf16.msra.mxu0 %v16596_v36  ;;  %v16674_v36 = vld [vmem:[%s17233_s22 + $0x2c30] ss:$8 sps:$4 sm:$0xff]  }
 0x5e6   : > { %12032 = vmatpush1.bf16.msra.mxu1 %v16599_v46  ;;  %11990 = vmatprep.subr.bf16.mxu0 %v16604_v50  ;;  %v16677_v46 = vld [vmem:[%s17233_s22 + $0x2d30] ss:$8 sps:$4 sm:$0xff]   ;;  %v16682_v50 = vld [vmem:[%s17233_s22 + $0x2c24] ss:$8 sps:$4 sm:$0xff]  }
 0x5e7   : > { %12033 = vmatprep.subr.bf16.mxu1 %v16607_v37  ;;  %v16685_v37 = vld [vmem:[%s17233_s22 + $0x2d24] ss:$8 sps:$4 sm:$0xff]  }
 0x5e9   : > { %11991 = vmatpush2.bf16.msra.mxu0 %v16602_v27  ;;  %v16680_v27 = vld [vmem:[%s17233_s22 + $0x2c20] ss:$8 sps:$4 sm:$0xff]  }
 0x5ea   : > { %12034 = vmatpush2.bf16.msra.mxu1 %v16605_v3  ;;  %11992 = vmatprep.subr.bf16.mxu0 %v16610_v52  ;;  %v16683_v3 = vld [vmem:[%s17233_s22 + $0x2d20] ss:$8 sps:$4 sm:$0xff]   ;;  %v16688_v52 = vld [vmem:[%s17233_s22 + $0x2c14] ss:$8 sps:$4 sm:$0xff]  }
 0x5eb   : > { %12035 = vmatprep.subr.bf16.mxu1 %v16613_v28  ;;  %v16691_v28 = vld [vmem:[%s17233_s22 + $0x2d14] ss:$8 sps:$4 sm:$0xff]  }
 0x5ed   : > { %11993 = vmatpush2.bf16.msra.mxu0 %v16608_v22  ;;  %v16686_v22 = vld [vmem:[%s17233_s22 + $0x2c10] ss:$8 sps:$4 sm:$0xff]  }
 0x5ee   : > { %12036 = vmatpush2.bf16.msra.mxu1 %v16611_v23  ;;  %11994 = vmatprep.subr.bf16.mxu0 %v16616_v2  ;;  %v16689_v23 = vld [vmem:[%s17233_s22 + $0x2d10] ss:$8 sps:$4 sm:$0xff]   ;;  %v16694_v2 = vld [vmem:[%s17233_s22 + $0x2c04] ss:$8 sps:$4 sm:$0xff]  }
 0x5ef   : > { %12037 = vmatprep.subr.bf16.mxu1 %v16619_v10  ;;  %v16697_v10 = vld [vmem:[%s17233_s22 + $0x2d04] ss:$8 sps:$4 sm:$0xff]  }
 0x5f1   : > { %11995 = vmatpush2.bf16.msra.mxu0 %v16614_v8  ;;  %v16692_v8 = vld [vmem:[%s17233_s22 + $0x2c00] ss:$8 sps:$4 sm:$0xff]  }
 0x5f2   : > { %12038 = vmatpush2.bf16.msra.mxu1 %v16617_v56  ;;  %11996 = vmatprep.subr.bf16.mxu0 %v16622_v35  ;;  %v16695_v56 = vld [vmem:[%s17233_s22 + $0x2d00] ss:$8 sps:$4 sm:$0xff]   ;;  %v16700_v35 = vld [vmem:[%s17233_s22 + $0x2cf4] ss:$8 sps:$4 sm:$0xff]  }
 0x5f3   : > { %12039 = vmatprep.subr.bf16.mxu1 %v16625_v11  ;;  %v16703_v11 = vld [vmem:[%s17233_s22 + $0x2df4] ss:$8 sps:$4 sm:$0xff]  }
 0x5f5   : > { %11997 = vmatpush2.bf16.msra.mxu0 %v16620_v49  ;;  %v16698_v49 = vld [vmem:[%s17233_s22 + $0x2cf0] ss:$8 sps:$4 sm:$0xff]  }
 0x5f6   : > { %12040 = vmatpush2.bf16.msra.mxu1 %v16623_v51  ;;  %11998 = vmatprep.subr.bf16.mxu0 %v16628_v25  ;;  %v16701_v51 = vld [vmem:[%s17233_s22 + $0x2df0] ss:$8 sps:$4 sm:$0xff]   ;;  %v16706_v25 = vld [vmem:[%s17233_s22 + $0x2ce4] ss:$8 sps:$4 sm:$0xff]  }
 0x5f7   : > { %12041 = vmatprep.subr.bf16.mxu1 %v16631_v61  ;;  %v16709_v61 = vld [vmem:[%s17233_s22 + $0x2de4] ss:$8 sps:$4 sm:$0xff]  }
 0x5f9   : > { %11999 = vmatpush2.bf16.msra.mxu0 %v16626_v0  ;;  %v16704_v0 = vld [vmem:[%s17233_s22 + $0x2ce0] ss:$8 sps:$4 sm:$0xff]  }
 0x5fa   : > { %12042 = vmatpush2.bf16.msra.mxu1 %v16629_v1  ;;  %12000 = vmatprep.subr.bf16.mxu0 %v16634_v54  ;;  %v16707_v1 = vld [vmem:[%s17233_s22 + $0x2de0] ss:$8 sps:$4 sm:$0xff]   ;;  %v16712_v54 = vld [vmem:[%s17233_s22 + $0x2cd4] ss:$8 sps:$4 sm:$0xff]  }
 0x5fb   : > { %12043 = vmatprep.subr.bf16.mxu1 %v16637_v53  ;;  %v16715_v53 = vld [vmem:[%s17233_s22 + $0x2dd4] ss:$8 sps:$4 sm:$0xff]  }
 0x5fd   : > { %12001 = vmatpush2.bf16.msra.mxu0 %v16632_v55  ;;  %v16710_v55 = vld [vmem:[%s17233_s22 + $0x2cd0] ss:$8 sps:$4 sm:$0xff]  }
 0x5fe   : > { %12044 = vmatpush2.bf16.msra.mxu1 %v16635_v6  ;;  %12002 = vmatprep.subr.bf16.mxu0 %v16640_v12  ;;  %v16713_v6 = vld [vmem:[%s17233_s22 + $0x2dd0] ss:$8 sps:$4 sm:$0xff]   ;;  %v16718_v12 = vld [vmem:[%s17233_s22 + $0x2cc4] ss:$8 sps:$4 sm:$0xff]  }
 0x5ff   : > { %12045 = vmatprep.subr.bf16.mxu1 %v16643_v57  ;;  %v16721_v57 = vld [vmem:[%s17233_s22 + $0x2dc4] ss:$8 sps:$4 sm:$0xff]  }
 0x601   : > { %12003 = vmatpush2.bf16.msra.mxu0 %v16638_v62  ;;  %v16716_v62 = vld [vmem:[%s17233_s22 + $0x2cc0] ss:$8 sps:$4 sm:$0xff]  }
 0x602   : > { %12046 = vmatpush2.bf16.msra.mxu1 %v16641_v24  ;;  %12004 = vmatprep.subr.bf16.mxu0 %v16646_v44  ;;  %v16719_v24 = vld [vmem:[%s17233_s22 + $0x2dc0] ss:$8 sps:$4 sm:$0xff]   ;;  %v16724_v44 = vld [vmem:[%s17233_s22 + $0x2cb4] ss:$8 sps:$4 sm:$0xff]  }
 0x603   : > { %12047 = vmatprep.subr.bf16.mxu1 %v16649_v47  ;;  %v16727_v47 = vld [vmem:[%s17233_s22 + $0x2db4] ss:$8 sps:$4 sm:$0xff]  }
 0x605   : > { %12005 = vmatpush2.bf16.msra.mxu0 %v16644_v30  ;;  %v16722_v30 = vld [vmem:[%s17233_s22 + $0x2cb0] ss:$8 sps:$4 sm:$0xff]  }
 0x606   : > { %12048 = vmatpush2.bf16.msra.mxu1 %v16647_v31  ;;  %12060 = vmatprep.subr.bf16.mxu0 %v16652_v60  ;;  %v16725_v31 = vld [vmem:[%s17233_s22 + $0x2db0] ss:$8 sps:$4 sm:$0xff]   ;;  %v16730_v60 = vld [vmem:[%s17233_s22 + $0x2ca4] ss:$8 sps:$4 sm:$0xff]  }
 0x607   : > { %12103 = vmatprep.subr.bf16.mxu1 %v16655_v7  ;;  %v16733_v7 = vld [vmem:[%s17233_s22 + $0x2da4] ss:$8 sps:$4 sm:$0xff]  }
 0x608   : > { %12007 = vmatmul.mubr.bf16.vlgmr.msra.gmra.mxu0 %v12773_v38  ;;  %v16728_v38 = vld [vmem:[%s17233_s22 + $0x2ca0] ss:$8 sps:$4 sm:$0xff]  }
 0x609   : > { %12050 = vmatmul.mubr.bf16.vlgmr.msra.gmra.mxu1 %v12775_v20  ;;  %12061 = vmatpush1.bf16.msra.mxu0 %v16650_v34  ;;  %v16731_v20 = vld [vmem:[%s17233_s22 + $0x2da0] ss:$8 sps:$4 sm:$0xff]   ;;  %v16736_v34 = vld [vmem:[%s17233_s22 + $0x2c94] ss:$8 sps:$4 sm:$0xff]  }
 0x60a   : > { %12104 = vmatpush1.bf16.msra.mxu1 %v16653_v41  ;;  %12062 = vmatprep.subr.bf16.mxu0 %v16658_v9  ;;  %v16739_v41 = vld [vmem:[%s17233_s22 + $0x2d94] ss:$8 sps:$4 sm:$0xff]   ;;  %v16734_v9 = vld [vmem:[%s17233_s22 + $0x2c90] ss:$8 sps:$4 sm:$0xff]  }
 0x60b   : > { %12105 = vmatprep.subr.bf16.mxu1 %v16661_v43  ;;  %12092 = vmatprep.mubr.bf16.mxu0 %v12778_v32  ;;  %v16737_v43 = vld [vmem:[%s17233_s22 + $0x2d90] ss:$8 sps:$4 sm:$0xff]   ;;  %v16742_v32 = vld [vmem:[%s17233_s22 + $0x2c84] ss:$8 sps:$4 sm:$0xff]  }
 0x60c   : > { %12135 = vmatprep.mubr.bf16.mxu1 %v12780_v13  ;;  %v16745_v13 = vld [vmem:[%s17233_s22 + $0x2d84] ss:$8 sps:$4 sm:$0xff]  }
 0x60d   : > { %12063 = vmatpush1.bf16.msra.mxu0 %v16656_v14  ;;  %v16740_v14 = vld [vmem:[%s17233_s22 + $0x2c80] ss:$8 sps:$4 sm:$0xff]  }
 0x60e   : > { %12106 = vmatpush1.bf16.msra.mxu1 %v16659_v15  ;;  %12064 = vmatprep.subr.bf16.mxu0 %v16664_v18  ;;  %v16743_v15 = vld [vmem:[%s17233_s22 + $0x2d80] ss:$8 sps:$4 sm:$0xff]   ;;  %v16748_v18 = vld [vmem:[%s17233_s22 + $0x2e74] ss:$8 sps:$4 sm:$0xff]  }
 0x60f   : > { %12107 = vmatprep.subr.bf16.mxu1 %v16667_v17  ;;  %v16751_v17 = vld [vmem:[%s17233_s22 + $0x2f74] ss:$8 sps:$4 sm:$0xff]  }
 0x611   : > { %12065 = vmatpush1.bf16.msra.mxu0 %v16662_v16  ;;  %v19448_v16 = vld [vmem:[%s19885_s0 + $0x170] sm:$0xff] }
 0x612   : > { %12108 = vmatpush1.bf16.msra.mxu1 %v16665_v19  ;;  %12066 = vmatprep.subr.bf16.mxu0 %v16670_v4  ;;  %v12777_v19 = vcombine.low %v19356_v42, %v19365_v21  ;;  %v12779_v4 = vcombine.low %v19370_v58, %v19375_v59  ;;  %v16746_v42 = vld [vmem:[%s17233_s22 + $0x2e70] ss:$8 sps:$4 sm:$0xff]   ;;  %v16754_v58 = vld [vmem:[%s17233_s22 + $0x2e64] ss:$8 sps:$4 sm:$0xff]  }
 0x613   : > { %12109 = vmatprep.subr.bf16.mxu1 %v16673_v26  ;;  %v19457_v26 = vld [vmem:[%s19885_s0 + $0x2f0] sm:$0xff]  ;;  %v16757_v59 = vld [vmem:[%s17233_s22 + $0x2f64] ss:$8 sps:$4 sm:$0xff]  }
 0x614   : > { %v16749_v21 = vld [vmem:[%s17233_s22 + $0x2f70] ss:$8 sps:$4 sm:$0xff]  }
 0x615   : > { %12067 = vmatpush1.bf16.msra.mxu0 %v16668_v39  ;;  %v19462_v39 = vld [vmem:[%s19885_s0 + $0x178] sm:$0xff] }
 0x616   : > { %12110 = vmatpush1.bf16.msra.mxu1 %v16671_v5  ;;  %12068 = vmatprep.subr.bf16.mxu0 %v16676_v33  ;;  %v19467_v5 = vld [vmem:[%s19885_s0 + $0x2f8] sm:$0xff]  ;;  %v12782_v33 = vcombine.high %v19448_v16, %v19457_v26 }
 0x617   : > { %12111 = vmatprep.subr.bf16.mxu1 %v16679_v29  ;;  %v12784_v29 = vcombine.high %v19462_v39, %v19467_v5 }
 0x619   : > { %12069 = vmatpush1.bf16.msra.mxu0 %v16674_v36  ;;  %v16752_v36 = vld [vmem:[%s17233_s22 + $0x2e60] ss:$8 sps:$4 sm:$0xff]  }
 0x61a   : > { %12112 = vmatpush1.bf16.msra.mxu1 %v16677_v46  ;;  %12070 = vmatprep.subr.bf16.mxu0 %v16682_v50  ;;  %v16755_v46 = vld [vmem:[%s17233_s22 + $0x2f60] ss:$8 sps:$4 sm:$0xff]   ;;  %v16760_v50 = vld [vmem:[%s17233_s22 + $0x2e54] ss:$8 sps:$4 sm:$0xff]  }
 0x61b   : > { %12113 = vmatprep.subr.bf16.mxu1 %v16685_v37  ;;  %v16763_v37 = vld [vmem:[%s17233_s22 + $0x2f54] ss:$8 sps:$4 sm:$0xff]  }
 0x61d   : > { %12071 = vmatpush1.bf16.msra.mxu0 %v16680_v27  ;;  %v16758_v27 = vld [vmem:[%s17233_s22 + $0x2e50] ss:$8 sps:$4 sm:$0xff]  }
 0x61e   : > { %12114 = vmatpush1.bf16.msra.mxu1 %v16683_v3  ;;  %12072 = vmatprep.subr.bf16.mxu0 %v16688_v52  ;;  %v16761_v3 = vld [vmem:[%s17233_s22 + $0x2f50] ss:$8 sps:$4 sm:$0xff]   ;;  %v16766_v52 = vld [vmem:[%s17233_s22 + $0x2e44] ss:$8 sps:$4 sm:$0xff]  }
 0x61f   : > { %12115 = vmatprep.subr.bf16.mxu1 %v16691_v28  ;;  %v16769_v28 = vld [vmem:[%s17233_s22 + $0x2f44] ss:$8 sps:$4 sm:$0xff]  }
 0x621   : > { %12073 = vmatpush1.bf16.msra.mxu0 %v16686_v22  ;;  %v16764_v22 = vld [vmem:[%s17233_s22 + $0x2e40] ss:$8 sps:$4 sm:$0xff]  }
 0x622   : > { %12116 = vmatpush1.bf16.msra.mxu1 %v16689_v23  ;;  %12074 = vmatprep.subr.bf16.mxu0 %v16694_v2  ;;  %v16767_v23 = vld [vmem:[%s17233_s22 + $0x2f40] ss:$8 sps:$4 sm:$0xff]   ;;  %v16772_v2 = vld [vmem:[%s17233_s22 + $0x2e34] ss:$8 sps:$4 sm:$0xff]  }
 0x623   : > { %12117 = vmatprep.subr.bf16.mxu1 %v16697_v10  ;;  %v16775_v10 = vld [vmem:[%s17233_s22 + $0x2f34] ss:$8 sps:$4 sm:$0xff]  }
 0x625   : > { %12075 = vmatpush1.bf16.msra.mxu0 %v16692_v8  ;;  %v16770_v8 = vld [vmem:[%s17233_s22 + $0x2e30] ss:$8 sps:$4 sm:$0xff]  }
 0x626   : > { %12118 = vmatpush1.bf16.msra.mxu1 %v16695_v56  ;;  %12076 = vmatprep.subr.bf16.mxu0 %v16700_v35  ;;  %v16773_v56 = vld [vmem:[%s17233_s22 + $0x2f30] ss:$8 sps:$4 sm:$0xff]   ;;  %v16778_v35 = vld [vmem:[%s17233_s22 + $0x2e24] ss:$8 sps:$4 sm:$0xff]  }
 0x627   : > { %12119 = vmatprep.subr.bf16.mxu1 %v16703_v11  ;;  %v16781_v11 = vld [vmem:[%s17233_s22 + $0x2f24] ss:$8 sps:$4 sm:$0xff]  }
 0x629   : > { %12077 = vmatpush2.bf16.msra.mxu0 %v16698_v49  ;;  %v16776_v49 = vld [vmem:[%s17233_s22 + $0x2e20] ss:$8 sps:$4 sm:$0xff]  }
 0x62a   : > { %12120 = vmatpush2.bf16.msra.mxu1 %v16701_v51  ;;  %12078 = vmatprep.subr.bf16.mxu0 %v16706_v25  ;;  %v16779_v51 = vld [vmem:[%s17233_s22 + $0x2f20] ss:$8 sps:$4 sm:$0xff]   ;;  %v16784_v25 = vld [vmem:[%s17233_s22 + $0x2e14] ss:$8 sps:$4 sm:$0xff]  }
 0x62b   : > { %12121 = vmatprep.subr.bf16.mxu1 %v16709_v61  ;;  %v16787_v61 = vld [vmem:[%s17233_s22 + $0x2f14] ss:$8 sps:$4 sm:$0xff]  }
 0x62d   : > { %12079 = vmatpush2.bf16.msra.mxu0 %v16704_v0  ;;  %v16782_v0 = vld [vmem:[%s17233_s22 + $0x2e10] ss:$8 sps:$4 sm:$0xff]  }
 0x62e   : > { %12122 = vmatpush2.bf16.msra.mxu1 %v16707_v1  ;;  %12080 = vmatprep.subr.bf16.mxu0 %v16712_v54  ;;  %v16785_v1 = vld [vmem:[%s17233_s22 + $0x2f10] ss:$8 sps:$4 sm:$0xff]   ;;  %v16790_v54 = vld [vmem:[%s17233_s22 + $0x2e04] ss:$8 sps:$4 sm:$0xff]  }
 0x62f   : > { %12123 = vmatprep.subr.bf16.mxu1 %v16715_v53  ;;  %v16793_v53 = vld [vmem:[%s17233_s22 + $0x2f04] ss:$8 sps:$4 sm:$0xff]  }
 0x631   : > { %12081 = vmatpush2.bf16.msra.mxu0 %v16710_v55  ;;  %v16788_v55 = vld [vmem:[%s17233_s22 + $0x2e00] ss:$8 sps:$4 sm:$0xff]  }
 0x632   : > { %12124 = vmatpush2.bf16.msra.mxu1 %v16713_v6  ;;  %12082 = vmatprep.subr.bf16.mxu0 %v16718_v12  ;;  %v16791_v6 = vld [vmem:[%s17233_s22 + $0x2f00] ss:$8 sps:$4 sm:$0xff]   ;;  %v16796_v12 = vld [vmem:[%s17233_s22 + $0x2ef4] ss:$8 sps:$4 sm:$0xff]  }
 0x633   : > { %12125 = vmatprep.subr.bf16.mxu1 %v16721_v57  ;;  %v16799_v57 = vld [vmem:[%s17233_s22 + $0x2ff4] ss:$8 sps:$4 sm:$0xff]  }
 0x635   : > { %12083 = vmatpush2.bf16.msra.mxu0 %v16716_v62  ;;  %v16794_v62 = vld [vmem:[%s17233_s22 + $0x2ef0] ss:$8 sps:$4 sm:$0xff]  }
 0x636   : > { %12126 = vmatpush2.bf16.msra.mxu1 %v16719_v24  ;;  %12084 = vmatprep.subr.bf16.mxu0 %v16724_v44  ;;  %v16797_v24 = vld [vmem:[%s17233_s22 + $0x2ff0] ss:$8 sps:$4 sm:$0xff]   ;;  %v16802_v44 = vld [vmem:[%s17233_s22 + $0x2ee4] ss:$8 sps:$4 sm:$0xff]  }
 0x637   : > { %12127 = vmatprep.subr.bf16.mxu1 %v16727_v47  ;;  %v16805_v47 = vld [vmem:[%s17233_s22 + $0x2fe4] ss:$8 sps:$4 sm:$0xff]  }
 0x639   : > { %12085 = vmatpush2.bf16.msra.mxu0 %v16722_v30  ;;  %v16800_v30 = vld [vmem:[%s17233_s22 + $0x2ee0] ss:$8 sps:$4 sm:$0xff]  }
 0x63a   : > { %12128 = vmatpush2.bf16.msra.mxu1 %v16725_v31  ;;  %12086 = vmatprep.subr.bf16.mxu0 %v16730_v60  ;;  %v16803_v31 = vld [vmem:[%s17233_s22 + $0x2fe0] ss:$8 sps:$4 sm:$0xff]   ;;  %v16808_v60 = vld [vmem:[%s17233_s22 + $0x2ed4] ss:$8 sps:$4 sm:$0xff]  }
 0x63b   : > { %12129 = vmatprep.subr.bf16.mxu1 %v16733_v7  ;;  %v16811_v7 = vld [vmem:[%s17233_s22 + $0x2fd4] ss:$8 sps:$4 sm:$0xff]  }
 0x63d   : > { %12087 = vmatpush2.bf16.msra.mxu0 %v16728_v38  ;;  %v16806_v38 = vld [vmem:[%s17233_s22 + $0x2ed0] ss:$8 sps:$4 sm:$0xff]  }
 0x63e   : > { %12130 = vmatpush2.bf16.msra.mxu1 %v16731_v20  ;;  %12088 = vmatprep.subr.bf16.mxu0 %v16736_v34  ;;  %v16809_v20 = vld [vmem:[%s17233_s22 + $0x2fd0] ss:$8 sps:$4 sm:$0xff]   ;;  %v16814_v34 = vld [vmem:[%s17233_s22 + $0x2ec4] ss:$8 sps:$4 sm:$0xff]  }
 0x63f   : > { %12131 = vmatprep.subr.bf16.mxu1 %v16739_v41  ;;  %v16817_v41 = vld [vmem:[%s17233_s22 + $0x2fc4] ss:$8 sps:$4 sm:$0xff]  }
 0x641   : > { %12089 = vmatpush2.bf16.msra.mxu0 %v16734_v9  ;;  %v16812_v9 = vld [vmem:[%s17233_s22 + $0x2ec0] ss:$8 sps:$4 sm:$0xff]  }
 0x642   : > { %12132 = vmatpush2.bf16.msra.mxu1 %v16737_v43  ;;  %12090 = vmatprep.subr.bf16.mxu0 %v16742_v32  ;;  %v16815_v43 = vld [vmem:[%s17233_s22 + $0x2fc0] ss:$8 sps:$4 sm:$0xff]   ;;  %v16820_v32 = vld [vmem:[%s17233_s22 + $0x2eb4] ss:$8 sps:$4 sm:$0xff]  }
 0x643   : > { %12133 = vmatprep.subr.bf16.mxu1 %v16745_v13  ;;  %v16823_v13 = vld [vmem:[%s17233_s22 + $0x2fb4] ss:$8 sps:$4 sm:$0xff]  }
 0x645   : > { %12091 = vmatpush2.bf16.msra.mxu0 %v16740_v14  ;;  %v16818_v14 = vld [vmem:[%s17233_s22 + $0x2eb0] ss:$8 sps:$4 sm:$0xff]  }
 0x646   : > { %12134 = vmatpush2.bf16.msra.mxu1 %v16743_v15  ;;  %12146 = vmatprep.subr.bf16.mxu0 %v16748_v18  ;;  %v16821_v15 = vld [vmem:[%s17233_s22 + $0x2fb0] ss:$8 sps:$4 sm:$0xff]   ;;  %v19523_v18 = vpop.f32.mrf.mxu0 }
 0x647   : > { %12189 = vmatprep.subr.bf16.mxu1 %v16751_v17  ;;  %v19525_v17 = vpop.f32.mrf.mxu1 }
 0x648   : > { %12093 = vmatmul.mubr.bf16.vlgmr.msra.gmra.mxu0 %v12777_v19  ;;  %v16826_v19 = vld [vmem:[%s17233_s22 + $0x2ea4] ss:$8 sps:$4 sm:$0xff]  }
 0x649   : > { %12136 = vmatmul.mubr.bf16.vlgmr.msra.gmra.mxu1 %v12779_v4  ;;  %12147 = vmatpush1.bf16.msra.mxu0 %v16746_v42  ;;  %v16829_v4 = vld [vmem:[%s17233_s22 + $0x2fa4] ss:$8 sps:$4 sm:$0xff]   ;;  %v16824_v42 = vld [vmem:[%s17233_s22 + $0x2ea0] ss:$8 sps:$4 sm:$0xff]  }
 0x64a   : > { %12190 = vmatpush1.bf16.msra.mxu1 %v16749_v21  ;;  %12148 = vmatprep.subr.bf16.mxu0 %v16754_v58  ;;  %v16827_v21 = vld [vmem:[%s17233_s22 + $0x2fa0] ss:$8 sps:$4 sm:$0xff]   ;;  %v19531_v58 = vpop.f32.mrf.mxu0 }
 0x64b   : > { %12191 = vmatprep.subr.bf16.mxu1 %v16757_v59  ;;  %12178 = vmatprep.mubr.bf16.mxu0 %v12782_v33  ;;  %v19533_v59 = vpop.f32.mrf.mxu1  ;;  %v16832_v33 = vld [vmem:[%s17233_s22 + $0x2e94] ss:$8 sps:$4 sm:$0xff]  }
 0x64c   : > { %12221 = vmatprep.mubr.bf16.mxu1 %v12784_v29  ;;  %v16835_v29 = vld [vmem:[%s17233_s22 + $0x2f94] ss:$8 sps:$4 sm:$0xff]  }
 0x64d   : > { %12149 = vmatpush1.bf16.msra.mxu0 %v16752_v36  ;;  %v16830_v36 = vld [vmem:[%s17233_s22 + $0x2e90] ss:$8 sps:$4 sm:$0xff]  }
 0x64e   : > { %12192 = vmatpush1.bf16.msra.mxu1 %v16755_v46  ;;  %12150 = vmatprep.subr.bf16.mxu0 %v16760_v50  ;;  %v16833_v46 = vld [vmem:[%s17233_s22 + $0x2f90] ss:$8 sps:$4 sm:$0xff]   ;;  %v19539_v50 = vpop.f32.mrf.mxu0 }
 0x64f   : > { %12193 = vmatprep.subr.bf16.mxu1 %v16763_v37  ;;  %v19541_v37 = vpop.f32.mrf.mxu1 }
 0x651   : > { %12151 = vmatpush1.bf16.msra.mxu0 %v16758_v27  ;;  %v16838_v27 = vld [vmem:[%s17233_s22 + $0x2e84] ss:$8 sps:$4 sm:$0xff]  }
 0x652   : > { %12194 = vmatpush1.bf16.msra.mxu1 %v16761_v3  ;;  %12152 = vmatprep.subr.bf16.mxu0 %v16766_v52  ;;  %v16841_v3 = vld [vmem:[%s17233_s22 + $0x2f84] ss:$8 sps:$4 sm:$0xff]   ;;  %v16836_v52 = vld [vmem:[%s17233_s22 + $0x2e80] ss:$8 sps:$4 sm:$0xff]  }
 0x653   : > { %12195 = vmatprep.subr.bf16.mxu1 %v16769_v28  ;;  %v16839_v28 = vld [vmem:[%s17233_s22 + $0x2f80] ss:$8 sps:$4 sm:$0xff]   ;;  %s12688_s22 = sshll.u32 %s17091_s28, 8 }
 0x654   : > { %s12236_s4 = sshra.s32 %s12688_s22, 7 }
 0x655   : > { %12153 = vmatpush1.bf16.msra.mxu0 %v16764_v22  ;;  %v19547_v22 = vpop.f32.mrf.mxu0  ;;  %s14321_s8 = sshll.u32 %s12236_s4, 3 }
 0x656   : > { %12196 = vmatpush1.bf16.msra.mxu1 %v16767_v23  ;;  %12154 = vmatprep.subr.bf16.mxu0 %v16772_v2  ;;  %v19549_v23 = vpop.f32.mrf.mxu1  ;;  %s12239_s12 = scalar_lea.vmem [#allocation2], %s14321_s8 }
 0x657   : > { %12197 = vmatprep.subr.bf16.mxu1 %v16775_v10  ;;  %v19551_v2 = vpop.f32.mrf.mxu0 }
 0x658   : > { %v19553_v10 = vpop.f32.mrf.mxu1 }
 0x659   : > { %12155 = vmatpush1.bf16.msra.mxu0 %v16770_v8  ;;  %v12781_v8 = vcombine.low %v19448_v16, %v19457_v26 }
 0x65a   : > { %12198 = vmatpush1.bf16.msra.mxu1 %v16773_v56  ;;  %12156 = vmatprep.subr.bf16.mxu0 %v16778_v35  ;;  %v12783_v56 = vcombine.low %v19462_v39, %v19467_v5  ;;  %v19559_v35 = vpop.f32.mrf.mxu0 }
 0x65b   : > { %12199 = vmatprep.subr.bf16.mxu1 %v16781_v11  ;;  %v19561_v11 = vpop.f32.mrf.mxu1 }
 0x65d   : > { %12157 = vmatpush1.bf16.msra.mxu0 %v16776_v49  ;;  %v19563_v49 = vpop.f32.mrf.mxu0 }
 0x65e   : > { %12200 = vmatpush1.bf16.msra.mxu1 %v16779_v51  ;;  %12158 = vmatprep.subr.bf16.mxu0 %v16784_v25  ;;  %v19565_v51 = vpop.f32.mrf.mxu1 }
 0x65f   : > { %12201 = vmatprep.subr.bf16.mxu1 %v16787_v61  ;;  %v19567_v25 = vpop.f32.mrf.mxu0 }
 0x660   : > { %v19569_v61 = vpop.f32.mrf.mxu1 }
 0x661   : > { %12159 = vmatpush1.bf16.msra.mxu0 %v16782_v0  ;;  %v19571_v16 = vpop.f32.mrf.mxu0 }
 0x662   : > { %12202 = vmatpush1.bf16.msra.mxu1 %v16785_v1  ;;  %12160 = vmatprep.subr.bf16.mxu0 %v16790_v54  ;;  %v19573_v26 = vpop.f32.mrf.mxu1 }
 0x663   : > { %12203 = vmatprep.subr.bf16.mxu1 %v16793_v53  ;;  %v19575_v39 = vpop.f32.mrf.mxu0 }
 0x664   : > { %v19577_v5 = vpop.f32.mrf.mxu1 }
 0x665   : > { %12161 = vmatpush1.bf16.msra.mxu0 %v16788_v55  ;;  %v19579_v0 = vpop.f32.mrf.mxu0 }
 0x666   : > { %12204 = vmatpush1.bf16.msra.mxu1 %v16791_v6  ;;  %12162 = vmatprep.subr.bf16.mxu0 %v16796_v12  ;;  %v19581_v1 = vpop.f32.mrf.mxu1 }
 0x667   : > { %12205 = vmatprep.subr.bf16.mxu1 %v16799_v57  ;;  %v19583_v54 = vpop.f32.mrf.mxu0 }
 0x668   : > { %v19585_v53 = vpop.f32.mrf.mxu1 }
 0x669   : > { %12163 = vmatpush2.bf16.msra.mxu0 %v16794_v62  ;;  %v19587_v55 = vpop.f32.mrf.mxu0 }
 0x66a   : > { %12206 = vmatpush2.bf16.msra.mxu1 %v16797_v24  ;;  %12164 = vmatprep.subr.bf16.mxu0 %v16802_v44  ;;  %v19589_v6 = vpop.f32.mrf.mxu1 }
 0x66b   : > { %12207 = vmatprep.subr.bf16.mxu1 %v16805_v47  ;;  %v19591_v12 = vpop.f32.mrf.mxu0 }
 0x66c   : > { %v19593_v57 = vpop.f32.mrf.mxu1 }
 0x66d   : > { %12165 = vmatpush2.bf16.msra.mxu0 %v16800_v30  ;;  %v19595_v62 = vpop.f32.mrf.mxu0 }
 0x66e   : > { %12208 = vmatpush2.bf16.msra.mxu1 %v16803_v31  ;;  %12166 = vmatprep.subr.bf16.mxu0 %v16808_v60  ;;  %v19597_v24 = vpop.f32.mrf.mxu1 }
 0x66f   : > { %12209 = vmatprep.subr.bf16.mxu1 %v16811_v7  ;;  %v19599_v44 = vpop.f32.mrf.mxu0 }
 0x670   : > { %v19601_v47 = vpop.f32.mrf.mxu1 }
 0x671   : > { %12167 = vmatpush2.bf16.msra.mxu0 %v16806_v38  ;;  %v19603_v30 = vpop.f32.mrf.mxu0 }
 0x672   : > { %12210 = vmatpush2.bf16.msra.mxu1 %v16809_v20  ;;  %12168 = vmatprep.subr.bf16.mxu0 %v16814_v34  ;;  %v19605_v31 = vpop.f32.mrf.mxu1 }
 0x673   : > { %12211 = vmatprep.subr.bf16.mxu1 %v16817_v41  ;;  %v19607_v60 = vpop.f32.mrf.mxu0 }
 0x674   : > { %v19609_v7 = vpop.f32.mrf.mxu1 }
 0x675   : > { %12169 = vmatpush2.bf16.msra.mxu0 %v16812_v9  ;;  %v19611_v38 = vpop.f32.mrf.mxu0 }
 0x676   : > { %12212 = vmatpush2.bf16.msra.mxu1 %v16815_v43  ;;  %12170 = vmatprep.subr.bf16.mxu0 %v16820_v32  ;;  %v19613_v20 = vpop.f32.mrf.mxu1 }
 0x677   : > { %12213 = vmatprep.subr.bf16.mxu1 %v16823_v13  ;;  %v19615_v34 = vpop.f32.mrf.mxu0 }
 0x678   : > { %v19617_v41 = vpop.f32.mrf.mxu1 }
 0x679   : > { %12171 = vmatpush2.bf16.msra.mxu0 %v16818_v14  ;;  %v19619_v9 = vpop.f32.mrf.mxu0 }
 0x67a   : > { %12214 = vmatpush2.bf16.msra.mxu1 %v16821_v15  ;;  %12172 = vmatprep.subr.bf16.mxu0 %v16826_v19  ;;  %v19621_v43 = vpop.f32.mrf.mxu1 }
 0x67b   : > { %12215 = vmatprep.subr.bf16.mxu1 %v16829_v4  ;;  %v19623_v32 = vpop.f32.mrf.mxu0 }
 0x67c   : > { %v19625_v13 = vpop.f32.mrf.mxu1 }
 0x67d   : > { %12173 = vmatpush2.bf16.msra.mxu0 %v16824_v42  ;;  %v19627_v14 = vpop.f32.mrf.mxu0 }
 0x67e   : > { %12216 = vmatpush2.bf16.msra.mxu1 %v16827_v21  ;;  %12174 = vmatprep.subr.bf16.mxu0 %v16832_v33  ;;  %v19629_v15 = vpop.f32.mrf.mxu1 }
 0x67f   : > { %12217 = vmatprep.subr.bf16.mxu1 %v16835_v29  ;;  %v19631_v19 = vpop.f32.mrf.mxu0 }
 0x680   : > { %v19633_v4 = vpop.f32.mrf.mxu1 }
 0x681   : > { %12175 = vmatpush2.bf16.msra.mxu0 %v16830_v36  ;;  %19915 = vst [vmem:[#allocation15_spill] sm:$0xff] %v19633_v4  ;;  %v19635_v42 = vpop.f32.mrf.mxu0 }
 0x682   : > { %12218 = vmatpush2.bf16.msra.mxu1 %v16833_v46  ;;  %12176 = vmatprep.subr.bf16.mxu0 %v16838_v27  ;;  %v19637_v21 = vpop.f32.mrf.mxu1 }
 0x683   : > { %12219 = vmatprep.subr.bf16.mxu1 %v16841_v3  ;;  %19916 = vst [vmem:[#allocation16_spill] sm:$0xff] %v19637_v21  ;;  %v19639_v33 = vpop.f32.mrf.mxu0 }
 0x684   : > { %v19641_v29 = vpop.f32.mrf.mxu1 }
 0x685   : > { %12177 = vmatpush2.bf16.msra.mxu0 %v16836_v52  ;;  %19917 = vst [vmem:[#allocation17_spill] sm:$0xff] %v19641_v29  ;;  %v19643_v36 = vpop.f32.mrf.mxu0 }
 0x686   : > { %12220 = vmatpush2.bf16.msra.mxu1 %v16839_v28  ;;  %19918 = vst [vmem:[#allocation18_spill] sm:$0xff] %v19643_v36  ;;  %v19645_v46 = vpop.f32.mrf.mxu1 }
 0x687   : > { %19919 = vst [vmem:[#allocation19_spill] sm:$0xff] %v19645_v46  ;;  %v19647_v27 = vpop.f32.mrf.mxu0 }
 0x688   : > { %12179 = vmatmul.mubr.bf16.vlgmr.msra.gmra.mxu0 %v12781_v8  ;;  %19920 = vst [vmem:[#allocation20_spill] sm:$0xff] %v19647_v27  ;;  %v19649_v3 = vpop.f32.mrf.mxu1 }
 0x689   : > { %12222 = vmatmul.mubr.bf16.vlgmr.msra.gmra.mxu1 %v12783_v56  ;;  %19921 = vst [vmem:[#allocation21_spill] sm:$0xff] %v19649_v3  ;;  %v19651_v52 = vpop.f32.mrf.mxu0 }
 0x68a   : > { %19922 = vst [vmem:[#allocation22_spill] sm:$0xff] %v19651_v52  ;;  %v19653_v28 = vpop.f32.mrf.mxu1 }
 0x68b   : > { %19923 = vst [vmem:[#allocation23_spill] sm:$0xff] %v19653_v28  ;;  %v19655_v8 = vpop.f32.mrf.mxu0 }
 0x68c   : > { %19924 = vst [vmem:[#allocation24_spill] sm:$0xff] %v19655_v8  ;;  %v19657_v56 = vpop.f32.mrf.mxu1 }
 0x68d   : > { %19925 = vst [vmem:[#allocation25_spill] sm:$0xff] %v19657_v56  ;;  %v19659_v21 = vpop.f32.mrf.mxu0  ;;  %v10891_v56 = vadd.f32 %v19523_v18, %v18366_v63  ;;  %v10897_v63 = vadd.f32 %v19547_v22, %v18379_v48 }
 0x68e   : > { %v19661_v4 = vpop.f32.mrf.mxu1 }
 0x68f   : > { %19926 = vst [vmem:[#allocation26_spill] sm:$0xff] %v19661_v4  ;;  %v19663_v29 = vpop.f32.mrf.mxu0  ;;  %v10893_v4 = vadd.f32 %v19531_v58, %v18371_v45 }
 0x690   : > { %19927 = vst [vmem:[#allocation27_spill] sm:$0xff] %v19663_v29  ;;  %v19665_v36 = vpop.f32.mrf.mxu1 }
 0x691   : > { %19928 = vst [vmem:[#allocation28_spill] sm:$0xff] %v19665_v36  ;;  %v19667_v46 = vpop.f32.mrf.mxu0 }
 0x692   : > { %v19669_v27 = vpop.f32.mrf.mxu1 }
 0x693   : > { %19929 = vst [vmem:[#allocation29_spill] sm:$0xff] %v19669_v27  ;;  %v19671_v3 = vpop.f32.mrf.mxu0  ;;  %v10934_v27 = vadd.f32 %v19525_v17, %v10891_v56 }
 0x694   : > { %19930 = vst [vmem:[#allocation30_spill] sm:$0xff] %v19671_v3  ;;  %v19673_v52 = vpop.f32.mrf.mxu1  ;;  %v10895_v3 = vadd.f32 %v19539_v50, %v18376_v40  ;;  %v10940_v40 = vadd.f32 %v19549_v23, %v10897_v63 }
 0x695   : > { %19931 = vst [vmem:[#allocation31_spill] sm:$0xff] %v19673_v52  ;;  %v19675_v28 = vpop.f32.mrf.mxu0  ;;  %v10977_v45 = vadd.f32 %v19551_v2, %v10934_v27 }
 0x696   : > { %19932 = vst [vmem:[#allocation32_spill] sm:$0xff] %v19675_v28  ;;  %v19677_v8 = vpop.f32.mrf.mxu1  ;;  %v10938_v18 = vadd.f32 %v19541_v37, %v10895_v3  ;;  %v10983_v48 = vadd.f32 %v19567_v25, %v10940_v40 }
 0x697   : > { %19933 = vst [vmem:[#allocation33_spill] sm:$0xff] %v19677_v8  ;;  %v19683_v29 = vpop.f32.mrf.mxu0  ;;  %v10936_v8 = vadd.f32 %v19533_v59, %v10893_v4  ;;  %v11020_v50 = vadd.f32 %v19553_v10, %v10977_v45 }
 0x698   : > { %v19685_v36 = vpop.f32.mrf.mxu1  ;;  %v10981_v56 = vadd.f32 %v19563_v49, %v10938_v18  ;;  %v11026_v23 = vadd.f32 %v19569_v61, %v10983_v48 }
 0x699   : > { %19934 = vst [vmem:[#allocation34_spill] sm:$0xff] %v19685_v36  ;;  %v19690_v52 = vpop.f32.mrf.mxu0  ;;  %v10979_v58 = vadd.f32 %v19559_v35, %v10936_v8  ;;  %v11063_v22 = vadd.f32 %v19571_v16, %v11020_v50 }
 0x69a   : > { %v19692_v28 = vpop.f32.mrf.mxu1  ;;  %v11024_v35 = vadd.f32 %v19565_v51, %v10981_v56  ;;  %v11069_v16 = vadd.f32 %v19583_v54, %v11026_v23 }
 0x69b   : > { %v19700_v36 = vpop.f32.mrf.mxu0  ;;  %v11022_v59 = vadd.f32 %v19561_v11, %v10979_v58  ;;  %v11106_v10 = vadd.f32 %v19573_v26, %v11063_v22 }
 0x69c   : > { %v19702_v17 = vpop.f32.mrf.mxu1  ;;  %v11067_v49 = vadd.f32 %v19579_v0, %v11024_v35 }
 0x69d   : > { %v19710_v2 = vpop.f32.mrf.mxu0  ;;  %v11065_v4 = vadd.f32 %v19575_v39, %v11022_v59  ;;  %v11149_v3 = vadd.f32 %v19587_v55, %v11106_v10  ;;  %v11112_v39 = vadd.f32 %v19585_v53, %v11069_v16 }
 0x69e   : > { %v19712_v37 = vpop.f32.mrf.mxu1  ;;  %v11110_v61 = vadd.f32 %v19581_v1, %v11067_v49 }
 0x69f   : > { %v19719_v27 = vpop.f32.mrf.mxu0  ;;  %v11108_v25 = vadd.f32 %v19577_v5, %v11065_v4  ;;  %v11192_v0 = vadd.f32 %v19589_v6, %v11149_v3  ;;  %v11155_v55 = vadd.f32 %v19599_v44, %v11112_v39  ;;  %v19935_v4 = vld [vmem:[#allocation15_spill] sm:$0xff] }
 0x6a0   : > { %v19721_v11 = vpop.f32.mrf.mxu1  ;;  %v11153_v63 = vadd.f32 %v19595_v62, %v11110_v61 }
 0x6a1   : > { %v19726_v8 = vpop.f32.mrf.mxu0  ;;  %v11151_v26 = vadd.f32 %v19591_v12, %v11108_v25  ;;  %v11235_v18 = vadd.f32 %v19603_v30, %v11192_v0  ;;  %v11198_v6 = vadd.f32 %v19601_v47, %v11155_v55  ;;  %v19942_v0 = vld [vmem:[#allocation24_spill] sm:$0xff] }
 0x6a2   : > { %v19728_v51 = vpop.f32.mrf.mxu1  ;;  %v11196_v1 = vadd.f32 %v19597_v24, %v11153_v63 }
 0x6a3   : > { %v19735_v45 = vpop.f32.mrf.mxu0  ;;  %v11194_v54 = vadd.f32 %v19593_v57, %v11151_v26  ;;  %v11278_v62 = vadd.f32 %v19605_v31, %v11235_v18  ;;  %v11241_v44 = vadd.f32 %v19615_v34, %v11198_v6  ;;  %v19941_v26 = vld [vmem:[#allocation19_spill] sm:$0xff] }
 0x6a4   : > { %v19737_v5 = vpop.f32.mrf.mxu1  ;;  %v11239_v40 = vadd.f32 %v19611_v38, %v11196_v1  ;;  %v19944_v18 = vld [vmem:[#allocation23_spill] sm:$0xff] }
 0x6a5   : > { %v11237_v12 = vadd.f32 %v19607_v60, %v11194_v54  ;;  %v19744_v58 = vpop.f32.mrf.mxu0  ;;  %v11321_v30 = vadd.f32 %v19619_v9, %v11278_v62  ;;  %v11284_v31 = vadd.f32 %v19617_v41, %v11241_v44  ;;  %v19936_v41 = vld [vmem:[#allocation16_spill] sm:$0xff]  ;;  %v19943_v54 = vld [vmem:[#allocation21_spill] sm:$0xff]  ;;  %v19946_v44 = vld [vmem:[#allocation27_spill] sm:$0xff] }
 0x6a6   : > { %v19746_v53 = vpop.f32.mrf.mxu1  ;;  %v11282_v60 = vadd.f32 %v19613_v20, %v11239_v40  ;;  %v19945_v40 = vld [vmem:[#allocation25_spill] sm:$0xff] }
 0x6a7   : > { %v11280_v57 = vadd.f32 %v19609_v7, %v11237_v12  ;;  %v19754_v50 = vpop.f32.mrf.mxu0  ;;  %v11364_v7 = vadd.f32 %v19621_v43, %v11321_v30  ;;  %v11327_v9 = vadd.f32 %v19631_v19, %v11284_v31  ;;  %v19937_v43 = vld [vmem:[#allocation18_spill] sm:$0xff]  ;;  %v19939_v19 = vld [vmem:[#allocation20_spill] sm:$0xff] }
 0x6a8   : > { %v19756_v24 = vpop.f32.mrf.mxu1  ;;  %v11325_v38 = vadd.f32 %v19627_v14, %v11282_v60 }
 0x6a9   : > { %v11323_v56 = vadd.f32 %v19623_v32, %v11280_v57  ;;  %v19760_v59 = vpop.f32.mrf.mxu0  ;;  %v11407_v48 = vadd.f32 %v19635_v42, %v11364_v7  ;;  %v11370_v23 = vadd.f32 %v19935_v4, %v11327_v9  ;;  %v19940_v42 = vld [vmem:[#allocation22_spill] sm:$0xff] }
 0x6aa   : > { %v19762_v47 = vpop.f32.mrf.mxu1  ;;  %v11368_v32 = vadd.f32 %v19629_v15, %v11325_v38  ;;  %v19948_v7 = vld [vmem:[#allocation30_spill] sm:$0xff] }
 0x6ab   : > { %v11366_v34 = vadd.f32 %v19625_v13, %v11323_v56  ;;  %v11838_v22 = vpop.f32.mrf.mxu0  ;;  %v11450_v10 = vadd.f32 %v19936_v41, %v11407_v48  ;;  %v19938_v13 = vld [vmem:[#allocation17_spill] sm:$0xff]  ;;  %v11413_v3 = vadd.f32 %v19939_v19, %v11370_v23  ;;  %v19947_v56 = vld [vmem:[#allocation26_spill] sm:$0xff]  ;;  %v19949_v48 = vld [vmem:[#allocation28_spill] sm:$0xff] }
 0x6ac   : > { %v19770_v20 = vpop.f32.mrf.mxu1  ;;  %v11411_v49 = vadd.f32 %v19937_v43, %v11368_v32  ;;  %v19951_v23 = vld [vmem:[#allocation32_spill] sm:$0xff]  ;;  %v19952_v41 = vld [vmem:[#allocation31_spill] sm:$0xff] }
 0x6ad   : > { %v11409_v35 = vadd.f32 %v19639_v33, %v11366_v34  ;;  %v11840_v14 = vpop.f32.mrf.mxu0  ;;  %v11493_v61 = vadd.f32 %v19940_v42, %v11450_v10  ;;  %v11456_v55 = vadd.f32 %v19943_v54, %v11413_v3  ;;  %v19954_v42 = vld [vmem:[#allocation34_spill] sm:$0xff] }
 0x6ae   : > { %v11883_v25 = vpop.f32.mrf.mxu1  ;;  %v11454_v39 = vadd.f32 %v19941_v26, %v11411_v49 }
 0x6af   : > { %v11452_v16 = vadd.f32 %v19938_v13, %v11409_v35  ;;  %v11842_v63 = vpop.f32.mrf.mxu0  ;;  %v11536_v1 = vadd.f32 %v19944_v18, %v11493_v61  ;;  %v11499_v30 = vadd.f32 %v19946_v44, %v11456_v55  ;;  %v19950_v35 = vld [vmem:[#allocation29_spill] sm:$0xff] }
 0x6b0   : > { %v11885_v33 = vpop.f32.mrf.mxu1  ;;  %v11497_v12 = vadd.f32 %v19659_v21, %v11454_v39 }
 0x6b1   : > { %v11495_v15 = vadd.f32 %v19942_v0, %v11452_v16  ;;  %v11922_v6 = vpop.f32.mrf.mxu0  ;;  %v11579_v60 = vadd.f32 %v19667_v46, %v11536_v1  ;;  %v11542_v32 = vadd.f32 %v19949_v48, %v11499_v30  ;;  %v19953_v16 = vld [vmem:[#allocation33_spill] sm:$0xff] }
 0x6b2   : > { %v11965_v62 = vpop.f32.mrf.mxu1  ;;  %v11540_v31 = vadd.f32 %v19947_v56, %v11497_v12 }
 0x6b3   : > { %v11538_v57 = vadd.f32 %v19945_v40, %v11495_v15  ;;  %v11924_v34 = vpop.f32.mrf.mxu0  ;;  %v11622_v4 = vadd.f32 %v19950_v35, %v11579_v60  ;;  %v11585_v43 = vadd.f32 %v19683_v29, %v11542_v32 }
 0x6b4   : > { %v11967_v9 = vpop.f32.mrf.mxu1  ;;  %v11583_v21 = vadd.f32 %v19951_v23, %v11540_v31 }
 0x6b5   : > { %v11581_v38 = vadd.f32 %v19948_v7, %v11538_v57  ;;  %v11665_v49 = vadd.f32 %v19690_v52, %v11622_v4  ;;  %v11926_v13 = vpop.f32.mrf.mxu0  ;;  %v11628_v61 = vadd.f32 %v19954_v42, %v11585_v43 }
 0x6b6   : > { %v11969_v46 = vpop.f32.mrf.mxu1  ;;  %v11626_v19 = vadd.f32 %v19953_v16, %v11583_v21 }
 0x6b7   : > { %v11624_v10 = vadd.f32 %v19952_v41, %v11581_v38  ;;  %v11708_v26 = vadd.f32 %v19692_v28, %v11665_v49  ;;  %v11928_v0 = vpop.f32.mrf.mxu0  ;;  %v11671_v29 = vadd.f32 %v19719_v27, %v11628_v61 }
 0x6b8   : > { %v11669_v39 = vadd.f32 %v19710_v2, %v11626_v19  ;;  %v11971_v15 = vpop.f32.mrf.mxu1 }
 0x6b9   : > { %v11667_v3 = vadd.f32 %v19700_v36, %v11624_v10  ;;  %v11751_v52 = vadd.f32 %v19726_v8, %v11708_v26  ;;  %v11714_v12 = vadd.f32 %v19721_v11, %v11671_v29 }
 0x6ba   : > { %v11712_v1 = vadd.f32 %v19712_v37, %v11669_v39 }
 0x6bb   : > { %v11710_v54 = vadd.f32 %v19702_v17, %v11667_v3  ;;  %v11794_v28 = vadd.f32 %v19728_v51, %v11751_v52  ;;  %v11757_v27 = vadd.f32 %v19754_v50, %v11714_v12 }
 0x6bc   : > { %v11755_v2 = vadd.f32 %v19744_v58, %v11712_v1 }
 0x6bd   : > { %v11753_v36 = vadd.f32 %v19735_v45, %v11710_v54  ;;  %v11837_v8 = vadd.f32 %v19760_v59, %v11794_v28  ;;  %v11800_v45 = vadd.f32 %v19756_v24, %v11757_v27 }
 0x6be   : > { %v11798_v44 = vadd.f32 %v19746_v53, %v11755_v2 }
 0x6bf   : > { %v11796_v17 = vadd.f32 %v19737_v5, %v11753_v36  ;;  %v11880_v11 = vadd.f32 %v19762_v47, %v11837_v8  ;;  %v11843_v56 = vadd.f32 %v11842_v63, %v11800_v45 }
 0x6c0   : > { %v11841_v51 = vadd.f32 %v11840_v14, %v11798_v44 }
 0x6c1   : > { %v11839_v30 = vadd.f32 %v11838_v22, %v11796_v17  ;;  %v11923_v31 = vadd.f32 %v11922_v6, %v11880_v11  ;;  %v11886_v32 = vadd.f32 %v11885_v33, %v11843_v56 }
 0x6c2   : > { %v11884_v38 = vadd.f32 %v11883_v25, %v11841_v51 }
 0x6c3   : > { %v11882_v58 = vadd.f32 %v19770_v20, %v11839_v30  ;;  %v11966_v53 = vadd.f32 %v11965_v62, %v11923_v31  ;;  %v11929_v4 = vadd.f32 %v11928_v0, %v11886_v32 }
 0x6c4   : > { %v11927_v22 = vadd.f32 %v11926_v13, %v11884_v38 }
 0x6c5   : > { %v11925_v50 = vadd.f32 %v11924_v34, %v11882_v58  ;;  %v11972_v20 = vadd.f32 %v11971_v15, %v11929_v4 }
 0x6c6   : > { %v11970_v14 = vadd.f32 %v11969_v46, %v11927_v22 }
 0x6c7   : > { %v11968_v35 = vadd.f32 %v11967_v9, %v11925_v50 }
 0x6c8   : > { %v12008_v55 = vpop.f32.mrf.mxu0 }
 0x6c9   : > { %v12051_v18 = vpop.f32.mrf.mxu1  ;;  %v12009_v24 = vadd.f32 %v12008_v55, %v11966_v53 }
 0x6ca   : > { %v12010_v40 = vpop.f32.mrf.mxu0 }
 0x6cb   : > { %v12053_v57 = vpop.f32.mrf.mxu1  ;;  %v12011_v21 = vadd.f32 %v12010_v40, %v11968_v35  ;;  %v12052_v63 = vadd.f32 %v12051_v18, %v12009_v24 }
 0x6cc   : > { %v12012_v37 = vpop.f32.mrf.mxu0 }
 0x6cd   : > { %v12055_v60 = vpop.f32.mrf.mxu1  ;;  %v12013_v6 = vadd.f32 %v12012_v37, %v11970_v14  ;;  %v12054_v25 = vadd.f32 %v12053_v57, %v12011_v21 }
 0x6ce   : > { %v12014_v7 = vpop.f32.mrf.mxu0 }
 0x6cf   : > { %v12057_v5 = vpop.f32.mrf.mxu1  ;;  %v12015_v34 = vadd.f32 %v12014_v7, %v11972_v20  ;;  %v12056_v33 = vadd.f32 %v12055_v60, %v12013_v6 }
 0x6d1   : > { %v12058_v9 = vadd.f32 %v12057_v5, %v12015_v34 }
 0x708   : > { %v12094_v48 = vpop.f32.mrf.mxu0 }
 0x709   : > { %v12137_v59 = vpop.f32.mrf.mxu1  ;;  %v12095_v43 = vadd.f32 %v12094_v48, %v12052_v63 }
 0x70a   : > { %v12096_v23 = vpop.f32.mrf.mxu0 }
 0x70b   : > { %v12139_v47 = vpop.f32.mrf.mxu1  ;;  %v12097_v62 = vadd.f32 %v12096_v23, %v12054_v25  ;;  %v12138_v16 = vadd.f32 %v12137_v59, %v12095_v43 }
 0x70c   : > { %v12098_v41 = vpop.f32.mrf.mxu0 }
 0x70d   : > { %v12141_v10 = vpop.f32.mrf.mxu1  ;;  %v12099_v19 = vadd.f32 %v12098_v41, %v12056_v33  ;;  %v12140_v42 = vadd.f32 %v12139_v47, %v12097_v62 }
 0x70e   : > { %v12100_v49 = vpop.f32.mrf.mxu0 }
 0x70f   : > { %v12143_v13 = vpop.f32.mrf.mxu1  ;;  %v12101_v61 = vadd.f32 %v12100_v49, %v12058_v9  ;;  %v12142_v15 = vadd.f32 %v12141_v10, %v12099_v19 }
 0x711   : > { %v12144_v18 = vadd.f32 %v12143_v13, %v12101_v61 }
 0x748   : > { %v12180_v3 = vpop.f32.mrf.mxu0 }
 0x749   : > { %v12223_v46 = vpop.f32.mrf.mxu1  ;;  %v12181_v26 = vadd.f32 %v12180_v3, %v12138_v16 }
 0x74a   : > { %v12182_v39 = vpop.f32.mrf.mxu0 }
 0x74b   : > { %v12225_v0 = vpop.f32.mrf.mxu1  ;;  %v12224_v54 = vadd.f32 %v12223_v46, %v12181_v26  ;;  %v12183_v29 = vadd.f32 %v12182_v39, %v12140_v42 }
 0x74c   : > { %v12184_v52 = vpop.f32.mrf.mxu0 }
 0x74d   : > { %v12227_v55 = vpop.f32.mrf.mxu1  ;;  %v12232_v1 = vmax.f32 %v12224_v54, 0.0  ;;  %v12226_v36 = vadd.f32 %v12225_v0, %v12183_v29  ;;  %v12185_v12 = vadd.f32 %v12184_v52, %v12142_v15 }
 0x74e   : > { %v12186_v28 = vpop.f32.mrf.mxu0 }
 0x74f   : > { %12240 = vst [vmem:[%s12239_s12] sm:$0xff] %v12232_v1  ;;  %v12233_v2 = vmax.f32 %v12226_v36, 0.0  ;;  %v12228_v40 = vadd.f32 %v12227_v55, %v12185_v12  ;;  %v12187_v57 = vadd.f32 %v12186_v28, %v12144_v18  ;;  %v12229_v17 = vpop.f32.mrf.mxu1 }
 0x751   : > { %12241 = vst [vmem:[%s12239_s12 + $0x8] sm:$0xff] %v12233_v2  ;;  %v12234_v27 = vmax.f32 %v12228_v40, 0.0  ;;  %v12230_v8 = vadd.f32 %v12229_v17, %v12187_v57  ;;  %12247 = sbr.rel (%p14322_p12) target bundleno = 2318 (0x90e), region = 72 }
 0x753   : > { %12242 = vst [vmem:[%s12239_s12 + $0x20] sm:$0xff] %v12234_v27  ;;  %v12235_v44 = vmax.f32 %v12230_v8, 0.0 }
 0x755   : > { %12243 = vst [vmem:[%s12239_s12 + $0x28] sm:$0xff] %v12235_v44 }
 0x756   : > { %v12287_v30 = vld [vmem:[#allocation7 + $0xf8] sm:$0xff]  ;;  %v12286_v11 = vld [vmem:[#allocation7 + $0xf0] sm:$0xff]  ;;  %v12285_v31 = vld [vmem:[#allocation7 + $0xe8] sm:$0xff]  ;;  %vm12577_vm0 = vcmask 23552  }
 0x757   : > { %v12319_v37 = vld [vmem:[#allocation7 + $0x1f8] sm:$0xff]  ;;  %14329 = vmatprep.subr.mxu0 %v12287_v30  ;;  %v12318_v51 = vld [vmem:[#allocation7 + $0x1f0] sm:$0xff]  ;;  %v12317_v7 = vld [vmem:[#allocation7 + $0x1e8] sm:$0xff] }
 0x758   : > { %v12271_v60 = vld [vmem:[#allocation7 + $0x78] sm:$0xff]  ;;  %14367 = vmatprep.subr.mxu1 %v12319_v37  ;;  %v12270_v58 = vld [vmem:[#allocation7 + $0x70] sm:$0xff]  ;;  %v12269_v5 = vld [vmem:[#allocation7 + $0x68] sm:$0xff] }
 0x759   : > { %v12303_v45 = vld [vmem:[#allocation7 + $0x178] sm:$0xff]  ;;  %14330 = vmatpush3.msra.mxu0 %v12271_v60  ;;  %v12302_v56 = vld [vmem:[#allocation7 + $0x170] sm:$0xff]  ;;  %v12301_v38 = vld [vmem:[#allocation7 + $0x168] sm:$0xff] }
 0x75a   : > { %14368 = vmatpush3.msra.mxu1 %v12303_v45  ;;  %14331 = vmatprep.subr.mxu0 %v12286_v11  ;;  %v12284_v50 = vld [vmem:[#allocation7 + $0xe0] sm:$0xff]  ;;  %v12283_v53 = vld [vmem:[#allocation7 + $0xd8] sm:$0xff]  ;;  %v12282_v24 = vld [vmem:[#allocation7 + $0xd0] sm:$0xff] }
 0x75b   : > { %14369 = vmatprep.subr.mxu1 %v12318_v51  ;;  %14332 = vmatpush3.msra.mxu0 %v12270_v58  ;;  %v12316_v48 = vld [vmem:[#allocation7 + $0x1e0] sm:$0xff]  ;;  %v12315_v22 = vld [vmem:[#allocation7 + $0x1d8] sm:$0xff]  ;;  %v12314_v23 = vld [vmem:[#allocation7 + $0x1d0] sm:$0xff] }
 0x75c   : > { %14370 = vmatpush3.msra.mxu1 %v12302_v56  ;;  %14333 = vmatprep.subr.mxu0 %v12285_v31  ;;  %v12268_v59 = vld [vmem:[#allocation7 + $0x60] sm:$0xff]  ;;  %v12267_v35 = vld [vmem:[#allocation7 + $0x58] sm:$0xff]  ;;  %v12266_v47 = vld [vmem:[#allocation7 + $0x50] sm:$0xff] }
 0x75d   : > { %14371 = vmatprep.subr.mxu1 %v12317_v7  ;;  %v12300_v32 = vld [vmem:[#allocation7 + $0x160] sm:$0xff]  ;;  %14334 = vmatpush3.msra.mxu0 %v12269_v5  ;;  %v12299_v4 = vld [vmem:[#allocation7 + $0x158] sm:$0xff]  ;;  %v12298_v14 = vld [vmem:[#allocation7 + $0x150] sm:$0xff] }
 0x75e   : > { %14372 = vmatpush3.msra.mxu1 %v12301_v38  ;;  %14335 = vmatprep.subr.mxu0 %v12284_v50  ;;  %v12281_v21 = vld [vmem:[#allocation7 + $0xc8] sm:$0xff]  ;;  %v12280_v41 = vld [vmem:[#allocation7 + $0xc0] sm:$0xff]  ;;  %v12279_v43 = vld [vmem:[#allocation7 + $0xb8] sm:$0xff] }
 0x75f   : > { %14373 = vmatprep.subr.mxu1 %v12316_v48  ;;  %14336 = vmatpush3.msra.mxu0 %v12268_v59  ;;  %v12313_v20 = vld [vmem:[#allocation7 + $0x1c8] sm:$0xff]  ;;  %v12312_v10 = vld [vmem:[#allocation7 + $0x1c0] sm:$0xff]  ;;  %v12311_v33 = vld [vmem:[#allocation7 + $0x1b8] sm:$0xff] }
 0x760   : > { %14374 = vmatpush3.msra.mxu1 %v12300_v32  ;;  %14337 = vmatprep.subr.mxu0 %v12283_v53  ;;  %v12265_v63 = vld [vmem:[#allocation7 + $0x48] sm:$0xff]  ;;  %v12264_v25 = vld [vmem:[#allocation7 + $0x40] sm:$0xff]  ;;  %v12263_v62 = vld [vmem:[#allocation7 + $0x38] sm:$0xff] }
 0x761   : > { %14375 = vmatprep.subr.mxu1 %v12315_v22  ;;  %14338 = vmatpush3.msra.mxu0 %v12267_v35  ;;  %v12297_v6 = vld [vmem:[#allocation7 + $0x148] sm:$0xff]  ;;  %v12296_v34 = vld [vmem:[#allocation7 + $0x140] sm:$0xff]  ;;  %v12295_v49 = vld [vmem:[#allocation7 + $0x138] sm:$0xff] }
 0x762   : > { %14376 = vmatpush3.msra.mxu1 %v12299_v4  ;;  %14339 = vmatprep.subr.mxu0 %v12282_v24  ;;  %v12278_v13 = vld [vmem:[#allocation7 + $0xb0] sm:$0xff]  ;;  %v12277_v3 = vld [vmem:[#allocation7 + $0xa8] sm:$0xff]  ;;  %v12276_v26 = vld [vmem:[#allocation7 + $0xa0] sm:$0xff] }
 0x763   : > { %14377 = vmatprep.subr.mxu1 %v12314_v23  ;;  %14340 = vmatpush3.msra.mxu0 %v12266_v47  ;;  %v12310_v9 = vld [vmem:[#allocation7 + $0x1b0] sm:$0xff]  ;;  %v12309_v46 = vld [vmem:[#allocation7 + $0x1a8] sm:$0xff]  ;;  %v12308_v39 = vld [vmem:[#allocation7 + $0x1a0] sm:$0xff] }
 0x764   : > { %14378 = vmatpush3.msra.mxu1 %v12298_v14  ;;  %14341 = vmatprep.subr.mxu0 %v12281_v21  ;;  %v12262_v16 = vld [vmem:[#allocation7 + $0x30] sm:$0xff]  ;;  %v12261_v42 = vld [vmem:[#allocation7 + $0x28] sm:$0xff]  ;;  %v12260_v0 = vld [vmem:[#allocation7 + $0x20] sm:$0xff] }
 0x765   : > { %14379 = vmatprep.subr.mxu1 %v12313_v20  ;;  %14342 = vmatpush3.msra.mxu0 %v12265_v63  ;;  %v12294_v19 = vld [vmem:[#allocation7 + $0x130] sm:$0xff]  ;;  %v12293_v61 = vld [vmem:[#allocation7 + $0x128] sm:$0xff]  ;;  %v12292_v15 = vld [vmem:[#allocation7 + $0x120] sm:$0xff] }
 0x766   : > { %14380 = vmatpush3.msra.mxu1 %v12297_v6  ;;  %14343 = vmatprep.subr.mxu0 %v12280_v41  ;;  %v12275_v54 = vld [vmem:[#allocation7 + $0x98] sm:$0xff]  ;;  %v12274_v18 = vld [vmem:[#allocation7 + $0x90] sm:$0xff]  ;;  %v12273_v28 = vld [vmem:[#allocation7 + $0x88] sm:$0xff] }
 0x767   : > { %14381 = vmatprep.subr.mxu1 %v12312_v10  ;;  %14344 = vmatpush3.msra.mxu0 %v12264_v25  ;;  %v12307_v29 = vld [vmem:[#allocation7 + $0x198] sm:$0xff]  ;;  %v12306_v1 = vld [vmem:[#allocation7 + $0x190] sm:$0xff]  ;;  %v12305_v2 = vld [vmem:[#allocation7 + $0x188] sm:$0xff] }
 0x768   : > { %14382 = vmatpush3.msra.mxu1 %v12296_v34  ;;  %14345 = vmatprep.subr.mxu0 %v12279_v43  ;;  %v12259_v52 = vld [vmem:[#allocation7 + $0x18] sm:$0xff]  ;;  %v12258_v36 = vld [vmem:[#allocation7 + $0x10] sm:$0xff]  ;;  %v12257_v40 = vld [vmem:[#allocation7 + $0x8] sm:$0xff] }
 0x769   : > { %14383 = vmatprep.subr.mxu1 %v12311_v33  ;;  %14346 = vmatpush3.msra.mxu0 %v12263_v62  ;;  %v12291_v55 = vld [vmem:[#allocation7 + $0x118] sm:$0xff]  ;;  %v12290_v12 = vld [vmem:[#allocation7 + $0x110] sm:$0xff]  ;;  %v12289_v57 = vld [vmem:[#allocation7 + $0x108] sm:$0xff] }
 0x76a   : > { %14384 = vmatpush3.msra.mxu1 %v12295_v49  ;;  %14347 = vmatprep.subr.mxu0 %v12278_v13  ;;  %v12272_v17 = vld [vmem:[#allocation7 + $0x80] sm:$0xff]  ;;  %v12251_v37 = vld [vmem:[#allocation2 + $0x18] sm:$0xff]  ;;  %v12250_v45 = vld [vmem:[#allocation2 + $0x10] sm:$0xff] }
 0x76b   : > { %14385 = vmatprep.subr.mxu1 %v12310_v9  ;;  %14348 = vmatpush3.msra.mxu0 %v12262_v16  ;;  %v12304_v27 = vld [vmem:[#allocation7 + $0x180] sm:$0xff]  ;;  %v12255_v51 = vld [vmem:[#allocation2 + $0x38] sm:$0xff]  ;;  %v12254_v31 = vld [vmem:[#allocation2 + $0x30] sm:$0xff] }
 0x76c   : > { %14386 = vmatpush3.msra.mxu1 %v12294_v19  ;;  %14349 = vmatprep.subr.mxu0 %v12277_v3  ;;  %v12256_v8 = vld [vmem:[#allocation7] sm:$0xff]  ;;  %v12494_v58 = vld [vmem:[%s19890_s5 + $0x78] sm:$0xff]  ;;  %v12493_v7 = vld [vmem:[%s19890_s5 + $0x70] sm:$0xff] }
 0x76d   : > { %14387 = vmatprep.subr.mxu1 %v12309_v46  ;;  %14350 = vmatpush3.msra.mxu0 %v12261_v42  ;;  %v12249_v44 = vld [vmem:[#allocation2 + $0x8] sm:$0xff]  ;;  %v12248_v60 = vld [vmem:[#allocation2] sm:$0xff]  ;;  %v12490_v50 = vld [vmem:[%s19890_s5 + $0x58] sm:$0xff] }
 0x76e   : > { %14388 = vmatpush3.msra.mxu1 %v12293_v61  ;;  %14351 = vmatprep.subr.mxu0 %v12276_v26  ;;  %v12288_v30 = vld [vmem:[#allocation7 + $0x100] sm:$0xff]  ;;  %v12489_v48 = vld [vmem:[%s19890_s5 + $0x50] sm:$0xff]  ;;  %v12486_v53 = vld [vmem:[%s19890_s5 + $0x38] sm:$0xff] }
 0x76f   : > { %14389 = vmatprep.subr.mxu1 %v12308_v39  ;;  %14352 = vmatpush3.msra.mxu0 %v12260_v0  ;;  %v12253_v11 = vld [vmem:[#allocation2 + $0x28] sm:$0xff]  ;;  %v12252_v56 = vld [vmem:[#allocation2 + $0x20] sm:$0xff]  ;;  %v12485_v22 = vld [vmem:[%s19890_s5 + $0x30] sm:$0xff] }
 0x770   : > { %14390 = vmatpush3.msra.mxu1 %v12292_v15  ;;  %14353 = vmatprep.subr.mxu0 %v12275_v54  ;;  %v12492_v5 = vld [vmem:[%s19890_s5 + $0x68] sm:$0xff]  ;;  %v12491_v38 = vld [vmem:[%s19890_s5 + $0x60] sm:$0xff]  ;;  %v12482_v24 = vld [vmem:[%s19890_s5 + $0x18] sm:$0xff] }
 0x771   : > { %14391 = vmatprep.subr.mxu1 %v12307_v29  ;;  %14354 = vmatpush3.msra.mxu0 %v12259_v52  ;;  %v12488_v59 = vld [vmem:[%s19890_s5 + $0x48] sm:$0xff]  ;;  %v12487_v32 = vld [vmem:[%s19890_s5 + $0x40] sm:$0xff]  ;;  %v12481_v23 = vld [vmem:[%s19890_s5 + $0x10] sm:$0xff] }
 0x772   : > { %14392 = vmatpush3.msra.mxu1 %v12291_v55  ;;  %14355 = vmatprep.subr.mxu0 %v12274_v18  ;;  %v12484_v35 = vld [vmem:[%s19890_s5 + $0x28] sm:$0xff]  ;;  %v12483_v4 = vld [vmem:[%s19890_s5 + $0x20] sm:$0xff] }
 0x773   : > { %14393 = vmatprep.subr.mxu1 %v12306_v1  ;;  %14356 = vmatpush3.msra.mxu0 %v12258_v36  ;;  %v12480_v47 = vld [vmem:[%s19890_s5 + $0x8] sm:$0xff]  ;;  %v12479_v14 = vld [vmem:[%s19890_s5] sm:$0xff] }
 0x774   : > { %14394 = vmatpush3.msra.mxu1 %v12290_v12  ;;  %14357 = vmatprep.subr.mxu0 %v12273_v28  ;;  %v14323_v63 = vld [vmem:[#allocation8] ss:$0 sm:$0xff]  ;;  %v14324_v61 = vld [vmem:[#allocation10] ss:$0 sm:$0xff] }
 0x775   : > { %14395 = vmatprep.subr.mxu1 %v12305_v2  ;;  %14358 = vmatpush3.msra.mxu0 %v12257_v40 }
 0x776   : > { %14396 = vmatpush3.msra.mxu1 %v12289_v57  ;;  %14359 = vmatprep.subr.mxu0 %v12272_v17 }
 0x777   : > { %14397 = vmatprep.subr.mxu1 %v12304_v27  ;;  %14360 = vmatpush3.msra.mxu0 %v12256_v8 }
 0x778   : > { %12391 = vmatprep.mubr.f32.mxu0 %v12249_v44  ;;  %14398 = vmatpush3.msra.mxu1 %v12288_v30 }
 0x779   : > { %12466 = vmatprep.mubr.f32.mxu1 %v12251_v37  ;;  %12392 = vmatmul.mubr.f32.vlgmr.msra.gmra.mxu0 %v12248_v60 }
 0x77a   : > { %12467 = vmatmul.mubr.f32.vlgmr.msra.gmra.mxu1 %v12250_v45  ;;  %12396 = vmatprep.mubr.f32.mxu0 %v12253_v11 }
 0x77b   : > { %12471 = vmatprep.mubr.f32.mxu1 %v12255_v51  ;;  %14423 = vmatprep.subr.mxu0 %v12494_v58 }
 0x77c   : > { %14424 = vmatpush3.msra.mxu0 %v12494_v58 }
 0x77d   : > { %12397 = vmatmul.mubr.f32.gmra.mxu0 %v12252_v56  ;;  %14425 = vmatprep.subr.mxu0 %v12493_v7 }
 0x77e   : > { %12472 = vmatmul.mubr.f32.gmra.mxu1 %v12254_v31  ;;  %14426 = vmatpush3.msra.mxu0 %v12493_v7 }
 0x77f   : > { %14427 = vmatprep.subr.mxu0 %v12492_v5 }
 0x780   : > { %14428 = vmatpush3.msra.mxu0 %v12492_v5 }
 0x781   : > { %14429 = vmatprep.subr.mxu0 %v12491_v38 }
 0x782   : > { %14430 = vmatpush3.msra.mxu0 %v12491_v38 }
 0x783   : > { %14431 = vmatprep.subr.mxu0 %v12490_v50 }
 0x784   : > { %14432 = vmatpush3.msra.mxu0 %v12490_v50 }
 0x785   : > { %14433 = vmatprep.subr.mxu0 %v12489_v48 }
 0x786   : > { %14434 = vmatpush3.msra.mxu0 %v12489_v48 }
 0x787   : > { %14435 = vmatprep.subr.mxu0 %v12488_v59 }
 0x788   : > { %14436 = vmatpush3.msra.mxu0 %v12488_v59 }
 0x789   : > { %14437 = vmatprep.subr.mxu0 %v12487_v32 }
 0x78a   : > { %14438 = vmatpush3.msra.mxu0 %v12487_v32 }
 0x78b   : > { %14439 = vmatprep.subr.mxu0 %v12486_v53 }
 0x78c   : > { %14440 = vmatpush3.msra.mxu0 %v12486_v53 }
 0x78d   : > { %14441 = vmatprep.subr.mxu0 %v12485_v22 }
 0x78e   : > { %14442 = vmatpush3.msra.mxu0 %v12485_v22 }
 0x78f   : > { %14443 = vmatprep.subr.mxu0 %v12484_v35 }
 0x790   : > { %14444 = vmatpush3.msra.mxu0 %v12484_v35 }
 0x791   : > { %14445 = vmatprep.subr.mxu0 %v12483_v4 }
 0x792   : > { %14446 = vmatpush3.msra.mxu0 %v12483_v4 }
 0x793   : > { %14447 = vmatprep.subr.mxu0 %v12482_v24 }
 0x794   : > { %14448 = vmatpush3.msra.mxu0 %v12482_v24 }
 0x795   : > { %14449 = vmatprep.subr.mxu0 %v12481_v23 }
 0x796   : > { %14450 = vmatpush3.msra.mxu0 %v12481_v23 }
 0x797   : > { %14451 = vmatprep.subr.mxu0 %v12480_v47 }
 0x798   : > { %14452 = vmatpush3.msra.mxu0 %v12480_v47 }
 0x799   : > { %14453 = vmatprep.subr.mxu0 %v12479_v14 }
 0x79a   : > { %14454 = vmatpush3.msra.mxu0 %v12479_v14 }
 0x839   : > { %v14361_v21 = vpop.f32.mrf.mxu0 }
 0x83a   : > { %v14399_v20 = vpop.f32.mrf.mxu1 }
 0x83b   : > { %v14362_v6 = vpop.f32.mrf.mxu0 }
 0x83c   : > { %v14400_v41 = vpop.f32.mrf.mxu1  ;;  %v14363_v10 = vadd.f32 %v14362_v6, %v14361_v21 }
 0x83d   : > { %v14364_v25 = vpop.f32.mrf.mxu0  ;;  %v14401_v33 = vadd.f32 %v14400_v41, %v14399_v20 }
 0x83e   : > { %v14402_v34 = vpop.f32.mrf.mxu1  ;;  %v12394_v43 = vadd.f32 %v14363_v10, %v14323_v63 }
 0x83f   : > { %v14365_v62 = vpop.f32.mrf.mxu0 }
 0x840   : > { %v14403_v49 = vpop.f32.mrf.mxu1  ;;  %v12469_v13 = vadd.f32 %v14401_v33, %v12394_v43  ;;  %v14366_v9 = vadd.f32 %v14365_v62, %v14364_v25 }
 0x841   : > { %v14404_v3 = vadd.f32 %v14403_v49, %v14402_v34 }
 0x842   : > { %v12477_v16 = vmax.f32 %v12469_v13, 0.0  ;;  %v12399_v19 = vadd.f32 %v14366_v9, %v14323_v63 }
 0x844   : > { %v12474_v46 = vadd.f32 %v14404_v3, %v12399_v19  ;;  %14455 = vmatprep.mubr.f32.mxu0 %v12477_v16 }
 0x846   : > { %v12478_v42 = vmax.f32 %v12474_v46, 0.0 }
 0x848   : > { %14456 = vmatmul.mubr.f32.vlgmr.msra.gmra.mxu0 %v12478_v42 }
 0x908   : > { %v14457_v26 = vpop.f32.mrf.mxu0 }
 0x909   : > { %v12574_v39 = vadd.f32 %v14457_v26, %v14324_v61 }
 0x90a   : > { %v12568_v0 = vpop.f32.mrf.mxu0 }
 0x90b   : > { %12579 = vst.msk [vmem:[%s19892_s7 + $0x8] sm:$0xff] %vm12577_vm0, %v12574_v39  ;;  %v12569_v15 = vadd.f32 %v14324_v61, %v12568_v0 }
 0x90d   : > { %12578 = vst.msk [vmem:[%s19892_s7] sm:$0xff] %vm12577_vm0, %v12569_v15 }
 0x90e PF: > { %p21_p1 = scmp.ge.s32.totalorder %s17094_s29, 4   ;;  %s19955_s24 = smov %s17014_s25 }
 0x90f   : > { %s19956_s25 = smov %s17018_s26  ;;  %s19957_s26 = smov %s17104_s9 }
 0x910   : > { %s19958_s27 = smov %s17094_s29  ;;  %23 = sbr.rel (!%p21_p1) target bundleno = 10 (0xa), region = 114 }
 0x915   :  { %12591 = vsyncpa [#allocation4], 1 }
 0x916   :  { %12593 = vsyncpa [#allocation4 + $0x1], 1 }
 0x917   :  { %12594 = vsyncpa [#allocation6], 1 }
 0x918   :  { %12596 = vsyncpa [#allocation6 + $0x1], 1 }
 0x919   :  { %12597 = vsyncpa [#allocation9], 1 }

</bundles_post_ra>
